<compile_context>
chip_gen: v5e
topology: v5e:2x2
jax: 0.10.0
libtpu: 0.0.40
codegen_flags: <defaults>
</compile_context>

<pallas_src>
import jax
import jax.numpy as jnp
from jax import lax
from jax.experimental import pallas as pl
from jax.experimental.pallas import tpu as pltpu


_BN_EPS = 1e-5

# (Cin, Cout) of the 8 conv layers, and whether a 2x2 maxpool precedes them.
_LAYER_CHANNELS = ((1, 64), (64, 64),
                   (64, 64), (64, 64),
                   (64, 128), (128, 128),
                   (128, 128), (128, 128))
_POOL_BEFORE = (False, False, True, False, True, False, True, False)


def _conv_bn_relu_kernel(p_ref, w_ref, b_ref, o_ref):
    """Fused GEMM + bias + ReLU for one tile of output pixels.

    p_ref: (tm, 9*Cin)   im2col patches for tm output pixels
    w_ref: (9*Cin, Cout) conv weights with BN scale folded in
    b_ref: (1, Cout)     folded bias (conv bias + BN mean/beta)
    o_ref: (tm, Cout)
    """
    acc = jnp.dot(p_ref[...], w_ref[...], preferred_element_type=jnp.float32)
    acc = acc + b_ref[...]
    o_ref[...] = jnp.maximum(acc, 0.0).astype(o_ref.dtype)


def _conv3x3_bn_relu(x_nhwc, w_flat, bias, *, tm=512):
    """conv3x3(pad=1) + folded eval-BN + ReLU as a tiled Pallas GEMM."""
    B, H, W, Cin = x_nhwc.shape
    K, Cout = w_flat.shape                    # K == 9 * Cin

    # im2col in the wrapper: 9 shifted views concatenated on the channel axis
    # (ordering dy-major, dx, then channel -- matches HWIO weight flattening).
    xp = jnp.pad(x_nhwc, ((0, 0), (1, 1), (1, 1), (0, 0)))
    taps = [xp[:, dy:dy + H, dx:dx + W, :]
            for dy in range(3) for dx in range(3)]
    patches = jnp.concatenate(taps, axis=-1).reshape(B * H * W, K)

    M = B * H * W
    tm = min(tm, M)
    grid = (pl.cdiv(M, tm),)

    out = pl.pallas_call(
        _conv_bn_relu_kernel,
        out_shape=jax.ShapeDtypeStruct((M, Cout), jnp.float32),
        grid_spec=pltpu.PrefetchScalarGridSpec(
            num_scalar_prefetch=0,
            grid=grid,
            in_specs=[
                pl.BlockSpec((tm, K), lambda i: (i, 0)),
                pl.BlockSpec((K, Cout), lambda i: (0, 0)),
                pl.BlockSpec((1, Cout), lambda i: (0, 0)),
            ],
            out_specs=pl.BlockSpec((tm, Cout), lambda i: (i, 0)),
        ),
        compiler_params=pltpu.CompilerParams(
            dimension_semantics=("parallel",)),
    )(patches, w_flat, bias.reshape(1, Cout))

    return out.reshape(B, H, W, Cout)


def _maxpool2_nhwc(x):
    B, H, W, C = x.shape
    return jnp.max(x.reshape(B, H // 2, 2, W // 2, 2, C), axis=(2, 4))


def _fold_bn(p):
    """Fold eval-mode BatchNorm (and the conv bias) into conv weights/bias."""
    scale = p["gamma"] / jnp.sqrt(p["var"] + _BN_EPS)      # (Cout,)
    w = p["w"] * scale                                     # HWIO, scale on O
    kh, kw, ci, co = w.shape
    w_flat = w.reshape(kh * kw * ci, co)
    bias = (p["b"] - p["mean"]) * scale + p["beta"]
    return w_flat, bias


@jax.jit
def _unetback_features(x_nchw, params):
    x = jnp.transpose(x_nchw, (0, 2, 3, 1))                # NCHW -> NHWC
    for p, pool in zip(params, _POOL_BEFORE):
        if pool:
            x = _maxpool2_nhwc(x)
        w_flat, bias = _fold_bn(p)
        x = _conv3x3_bn_relu(x, w_flat, bias)
    return jnp.transpose(x, (0, 3, 1, 2))                  # NHWC -> NCHW


def unetback_forward(x_nchw, params):
    """Matches unetback.forward: returns (x4, x_hw)."""
    x_hw = x_nchw.shape[2:]
    return _unetback_features(x_nchw, params), x_hw


def unetback_reference(x_nchw, params):
    """Pure-JAX/XLA reference (eval-mode BN, no folding)."""
    x = x_nchw
    for p, pool in zip(params, _POOL_BEFORE):
        if pool:
            x = lax.reduce_window(x, -jnp.inf, lax.max,
                                  (1, 1, 2, 2), (1, 1, 2, 2), "VALID")
        w_oihw = jnp.transpose(p["w"], (3, 2, 0, 1))       # HWIO -> OIHW
        y = lax.conv_general_dilated(
            x, w_oihw, window_strides=(1, 1), padding=((1, 1), (1, 1)),
            dimension_numbers=("NCHW", "OIHW", "NCHW"),
            precision=lax.Precision.HIGHEST)
        y = y + p["b"][None, :, None, None]
        y = (y - p["mean"][None, :, None, None]) / jnp.sqrt(
            p["var"][None, :, None, None] + _BN_EPS)
        y = y * p["gamma"][None, :, None, None] + p["beta"][None, :, None, None]
        x = jnp.maximum(y, 0.0)
    return x


if __name__ == "__main__":
    B, H, W = 2, 16, 16

    key = jax.random.PRNGKey(0)
    params = []
    for (ci, co) in _LAYER_CHANNELS:
        key, *ks = jax.random.split(key, 7)
        params.append(dict(
            w=jax.random.normal(ks[0], (3, 3, ci, co), jnp.float32) * 0.05,
            b=jax.random.normal(ks[1], (co,), jnp.float32) * 0.05,
            gamma=1.0 + 0.1 * jax.random.normal(ks[2], (co,), jnp.float32),
            beta=0.1 * jax.random.normal(ks[3], (co,), jnp.float32),
            mean=0.1 * jax.random.normal(ks[4], (co,), jnp.float32),
            var=1.0 + 0.1 * jax.nn.softplus(
                jax.random.normal(ks[5], (co,), jnp.float32)),
        ))
    x = jax.random.normal(key, (B, 1, H, W), jnp.float32)

    x4, x_hw = unetback_forward(x, params)
    x4 = jax.block_until_ready(x4)

    assert x4.shape == (B, 128, H // 8, W // 8), x4.shape
    assert tuple(x_hw) == (H, W), x_hw

    ref = unetback_reference(x, params)
    err = float(jnp.max(jnp.abs(x4 - ref)))
    assert jnp.allclose(x4, ref, rtol=1e-3, atol=5e-4), f"max abs err = {err}"

    print("KERNEL_OK")
</pallas_src>

<mosaic_0001>
module attributes {stable_mosaic.version = 11 : i64} {
  func.func @_conv_bn_relu_kernel(%arg0: i32, %arg1: memref<512x9xf32, #tpu.memory_space<vmem>>, %arg2: memref<9x64xf32, #tpu.memory_space<vmem>>, %arg3: memref<1x64xf32, #tpu.memory_space<vmem>>, %arg4: memref<512x64xf32, #tpu.memory_space<vmem>>) attributes {dimension_semantics = [#tpu.dimension_semantics<parallel>], iteration_bounds = array<i64: 1>, scalar_prefetch = 0 : i64, scratch_operands = 0 : i64, tpu.core_type = #tpu.core_type<tc>, window_params = [{transform_indices = @transform_0, window_bounds = array<i64: 512, 9>}, {pipeline_mode = #tpu.pipeline_mode<synchronous>, transform_indices = @transform_1, window_bounds = array<i64: 9, 64>}, {pipeline_mode = #tpu.pipeline_mode<synchronous>, transform_indices = @transform_2, window_bounds = array<i64: 1, 64>}, {transform_indices = @transform_3, window_bounds = array<i64: 512, 64>}]} {
    %c0 = arith.constant 0 : index
    %c0_0 = arith.constant 0 : index
    %0 = vector.load %arg1[%c0, %c0_0] : memref<512x9xf32, #tpu.memory_space<vmem>>, vector<512x9xf32>
    %c0_1 = arith.constant 0 : index
    %c0_2 = arith.constant 0 : index
    %1 = vector.load %arg2[%c0_1, %c0_2] : memref<9x64xf32, #tpu.memory_space<vmem>>, vector<9x64xf32>
    %cst = arith.constant dense<0.000000e+00> : vector<512x64xf32>
    %2 = tpu.matmul %0, %1, %cst {dimension_numbers = #tpu.dot_dimension_numbers<[1], [0], [0], [1], [0, 0, 1, 1], [], []>} : vector<512x9xf32>, vector<9x64xf32>, vector<512x64xf32> -> vector<512x64xf32>
    %c0_3 = arith.constant 0 : index
    %c0_4 = arith.constant 0 : index
    %3 = vector.load %arg3[%c0_3, %c0_4] : memref<1x64xf32, #tpu.memory_space<vmem>>, vector<1x64xf32>
    %4 = vector.broadcast %3 : vector<1x64xf32> to vector<512x64xf32>
    %5 = arith.addf %2, %4 : vector<512x64xf32>
    %cst_5 = arith.constant 0.000000e+00 : f32
    %6 = vector.broadcast %cst_5 : f32 to vector<512x64xf32>
    %7 = arith.maximumf %5, %6 : vector<512x64xf32>
    %c0_6 = arith.constant 0 : index
    %c0_7 = arith.constant 0 : index
    %8 = vector.load %arg4[%c0_6, %c0_7] : memref<512x64xf32, #tpu.memory_space<vmem>>, vector<512x64xf32>
    tpu.vector_store %arg4[%c0_6, %c0_7], %7 {strides = array<i32>} : memref<512x64xf32, #tpu.memory_space<vmem>>, vector<512x64xf32>,
    return
  }
  func.func @transform_0(%arg0: i32) -> (i32, i32) {
    %c0_i32 = arith.constant 0 : i32
    %c0_i32_0 = arith.constant 0 : i32
    return %arg0, %c0_i32 : i32, i32
  }
  func.func @transform_1(%arg0: i32) -> (i32, i32) {
    %c0_i32 = arith.constant 0 : i32
    %c0_i32_0 = arith.constant 0 : i32
    %c0_i32_1 = arith.constant 0 : i32
    return %c0_i32, %c0_i32_0 : i32, i32
  }
  func.func @transform_2(%arg0: i32) -> (i32, i32) {
    %c0_i32 = arith.constant 0 : i32
    %c0_i32_0 = arith.constant 0 : i32
    %c0_i32_1 = arith.constant 0 : i32
    return %c0_i32, %c0_i32_0 : i32, i32
  }
  func.func @transform_3(%arg0: i32) -> (i32, i32) {
    %c0_i32 = arith.constant 0 : i32
    %c0_i32_0 = arith.constant 0 : i32
    return %arg0, %c0_i32 : i32, i32
  }
}

module attributes {stable_mosaic.version = 11 : i64} {
  func.func @_conv_bn_relu_kernel(%arg0: i32, %arg1: memref<512x576xf32, #tpu.memory_space<vmem>>, %arg2: memref<576x64xf32, #tpu.memory_space<vmem>>, %arg3: memref<1x64xf32, #tpu.memory_space<vmem>>, %arg4: memref<512x64xf32, #tpu.memory_space<vmem>>) attributes {dimension_semantics = [#tpu.dimension_semantics<parallel>], iteration_bounds = array<i64: 1>, scalar_prefetch = 0 : i64, scratch_operands = 0 : i64, tpu.core_type = #tpu.core_type<tc>, window_params = [{transform_indices = @transform_0, window_bounds = array<i64: 512, 576>}, {pipeline_mode = #tpu.pipeline_mode<synchronous>, transform_indices = @transform_1, window_bounds = array<i64: 576, 64>}, {pipeline_mode = #tpu.pipeline_mode<synchronous>, transform_indices = @transform_2, window_bounds = array<i64: 1, 64>}, {transform_indices = @transform_3, window_bounds = array<i64: 512, 64>}]} {
    %c0 = arith.constant 0 : index
    %c0_0 = arith.constant 0 : index
    %0 = vector.load %arg1[%c0, %c0_0] : memref<512x576xf32, #tpu.memory_space<vmem>>, vector<512x576xf32>
    %c0_1 = arith.constant 0 : index
    %c0_2 = arith.constant 0 : index
    %1 = vector.load %arg2[%c0_1, %c0_2] : memref<576x64xf32, #tpu.memory_space<vmem>>, vector<576x64xf32>
    %cst = arith.constant dense<0.000000e+00> : vector<512x64xf32>
    %2 = tpu.matmul %0, %1, %cst {dimension_numbers = #tpu.dot_dimension_numbers<[1], [0], [0], [1], [0, 0, 1, 1], [], []>} : vector<512x576xf32>, vector<576x64xf32>, vector<512x64xf32> -> vector<512x64xf32>
    %c0_3 = arith.constant 0 : index
    %c0_4 = arith.constant 0 : index
    %3 = vector.load %arg3[%c0_3, %c0_4] : memref<1x64xf32, #tpu.memory_space<vmem>>, vector<1x64xf32>
    %4 = vector.broadcast %3 : vector<1x64xf32> to vector<512x64xf32>
    %5 = arith.addf %2, %4 : vector<512x64xf32>
    %cst_5 = arith.constant 0.000000e+00 : f32
    %6 = vector.broadcast %cst_5 : f32 to vector<512x64xf32>
    %7 = arith.maximumf %5, %6 : vector<512x64xf32>
    %c0_6 = arith.constant 0 : index
    %c0_7 = arith.constant 0 : index
    %8 = vector.load %arg4[%c0_6, %c0_7] : memref<512x64xf32, #tpu.memory_space<vmem>>, vector<512x64xf32>
    tpu.vector_store %arg4[%c0_6, %c0_7], %7 {strides = array<i32>} : memref<512x64xf32, #tpu.memory_space<vmem>>, vector<512x64xf32>,
    return
  }
  func.func @transform_0(%arg0: i32) -> (i32, i32) {
    %c0_i32 = arith.constant 0 : i32
    %c0_i32_0 = arith.constant 0 : i32
    return %arg0, %c0_i32 : i32, i32
  }
  func.func @transform_1(%arg0: i32) -> (i32, i32) {
    %c0_i32 = arith.constant 0 : i32
    %c0_i32_0 = arith.constant 0 : i32
    %c0_i32_1 = arith.constant 0 : i32
    return %c0_i32, %c0_i32_0 : i32, i32
  }
  func.func @transform_2(%arg0: i32) -> (i32, i32) {
    %c0_i32 = arith.constant 0 : i32
    %c0_i32_0 = arith.constant 0 : i32
    %c0_i32_1 = arith.constant 0 : i32
    return %c0_i32, %c0_i32_0 : i32, i32
  }
  func.func @transform_3(%arg0: i32) -> (i32, i32) {
    %c0_i32 = arith.constant 0 : i32
    %c0_i32_0 = arith.constant 0 : i32
    return %arg0, %c0_i32 : i32, i32
  }
}

module attributes {stable_mosaic.version = 11 : i64} {
  func.func @_conv_bn_relu_kernel(%arg0: i32, %arg1: memref<128x576xf32, #tpu.memory_space<vmem>>, %arg2: memref<576x64xf32, #tpu.memory_space<vmem>>, %arg3: memref<1x64xf32, #tpu.memory_space<vmem>>, %arg4: memref<128x64xf32, #tpu.memory_space<vmem>>) attributes {dimension_semantics = [#tpu.dimension_semantics<parallel>], iteration_bounds = array<i64: 1>, scalar_prefetch = 0 : i64, scratch_operands = 0 : i64, tpu.core_type = #tpu.core_type<tc>, window_params = [{transform_indices = @transform_0, window_bounds = array<i64: 128, 576>}, {pipeline_mode = #tpu.pipeline_mode<synchronous>, transform_indices = @transform_1, window_bounds = array<i64: 576, 64>}, {pipeline_mode = #tpu.pipeline_mode<synchronous>, transform_indices = @transform_2, window_bounds = array<i64: 1, 64>}, {transform_indices = @transform_3, window_bounds = array<i64: 128, 64>}]} {
    %c0 = arith.constant 0 : index
    %c0_0 = arith.constant 0 : index
    %0 = vector.load %arg1[%c0, %c0_0] : memref<128x576xf32, #tpu.memory_space<vmem>>, vector<128x576xf32>
    %c0_1 = arith.constant 0 : index
    %c0_2 = arith.constant 0 : index
    %1 = vector.load %arg2[%c0_1, %c0_2] : memref<576x64xf32, #tpu.memory_space<vmem>>, vector<576x64xf32>
    %cst = arith.constant dense<0.000000e+00> : vector<128x64xf32>
    %2 = tpu.matmul %0, %1, %cst {dimension_numbers = #tpu.dot_dimension_numbers<[1], [0], [0], [1], [0, 0, 1, 1], [], []>} : vector<128x576xf32>, vector<576x64xf32>, vector<128x64xf32> -> vector<128x64xf32>
    %c0_3 = arith.constant 0 : index
    %c0_4 = arith.constant 0 : index
    %3 = vector.load %arg3[%c0_3, %c0_4] : memref<1x64xf32, #tpu.memory_space<vmem>>, vector<1x64xf32>
    %4 = vector.broadcast %3 : vector<1x64xf32> to vector<128x64xf32>
    %5 = arith.addf %2, %4 : vector<128x64xf32>
    %cst_5 = arith.constant 0.000000e+00 : f32
    %6 = vector.broadcast %cst_5 : f32 to vector<128x64xf32>
    %7 = arith.maximumf %5, %6 : vector<128x64xf32>
    %c0_6 = arith.constant 0 : index
    %c0_7 = arith.constant 0 : index
    %8 = vector.load %arg4[%c0_6, %c0_7] : memref<128x64xf32, #tpu.memory_space<vmem>>, vector<128x64xf32>
    tpu.vector_store %arg4[%c0_6, %c0_7], %7 {strides = array<i32>} : memref<128x64xf32, #tpu.memory_space<vmem>>, vector<128x64xf32>,
    return
  }
  func.func @transform_0(%arg0: i32) -> (i32, i32) {
    %c0_i32 = arith.constant 0 : i32
    %c0_i32_0 = arith.constant 0 : i32
    return %arg0, %c0_i32 : i32, i32
  }
  func.func @transform_1(%arg0: i32) -> (i32, i32) {
    %c0_i32 = arith.constant 0 : i32
    %c0_i32_0 = arith.constant 0 : i32
    %c0_i32_1 = arith.constant 0 : i32
    return %c0_i32, %c0_i32_0 : i32, i32
  }
  func.func @transform_2(%arg0: i32) -> (i32, i32) {
    %c0_i32 = arith.constant 0 : i32
    %c0_i32_0 = arith.constant 0 : i32
    %c0_i32_1 = arith.constant 0 : i32
    return %c0_i32, %c0_i32_0 : i32, i32
  }
  func.func @transform_3(%arg0: i32) -> (i32, i32) {
    %c0_i32 = arith.constant 0 : i32
    %c0_i32_0 = arith.constant 0 : i32
    return %arg0, %c0_i32 : i32, i32
  }
}

module attributes {stable_mosaic.version = 11 : i64} {
  func.func @_conv_bn_relu_kernel(%arg0: i32, %arg1: memref<32x576xf32, #tpu.memory_space<vmem>>, %arg2: memref<576x128xf32, #tpu.memory_space<vmem>>, %arg3: memref<1x128xf32, #tpu.memory_space<vmem>>, %arg4: memref<32x128xf32, #tpu.memory_space<vmem>>) attributes {dimension_semantics = [#tpu.dimension_semantics<parallel>], iteration_bounds = array<i64: 1>, scalar_prefetch = 0 : i64, scratch_operands = 0 : i64, tpu.core_type = #tpu.core_type<tc>, window_params = [{transform_indices = @transform_0, window_bounds = array<i64: 32, 576>}, {pipeline_mode = #tpu.pipeline_mode<synchronous>, transform_indices = @transform_1, window_bounds = array<i64: 576, 128>}, {pipeline_mode = #tpu.pipeline_mode<synchronous>, transform_indices = @transform_2, window_bounds = array<i64: 1, 128>}, {transform_indices = @transform_3, window_bounds = array<i64: 32, 128>}]} {
    %c0 = arith.constant 0 : index
    %c0_0 = arith.constant 0 : index
    %0 = vector.load %arg1[%c0, %c0_0] : memref<32x576xf32, #tpu.memory_space<vmem>>, vector<32x576xf32>
    %c0_1 = arith.constant 0 : index
    %c0_2 = arith.constant 0 : index
    %1 = vector.load %arg2[%c0_1, %c0_2] : memref<576x128xf32, #tpu.memory_space<vmem>>, vector<576x128xf32>
    %cst = arith.constant dense<0.000000e+00> : vector<32x128xf32>
    %2 = tpu.matmul %0, %1, %cst {dimension_numbers = #tpu.dot_dimension_numbers<[1], [0], [0], [1], [0, 0, 1, 1], [], []>} : vector<32x576xf32>, vector<576x128xf32>, vector<32x128xf32> -> vector<32x128xf32>
    %c0_3 = arith.constant 0 : index
    %c0_4 = arith.constant 0 : index
    %3 = vector.load %arg3[%c0_3, %c0_4] : memref<1x128xf32, #tpu.memory_space<vmem>>, vector<1x128xf32>
    %4 = vector.broadcast %3 : vector<1x128xf32> to vector<32x128xf32>
    %5 = arith.addf %2, %4 : vector<32x128xf32>
    %cst_5 = arith.constant 0.000000e+00 : f32
    %6 = vector.broadcast %cst_5 : f32 to vector<32x128xf32>
    %7 = arith.maximumf %5, %6 : vector<32x128xf32>
    %c0_6 = arith.constant 0 : index
    %c0_7 = arith.constant 0 : index
    %8 = vector.load %arg4[%c0_6, %c0_7] : memref<32x128xf32, #tpu.memory_space<vmem>>, vector<32x128xf32>
    tpu.vector_store %arg4[%c0_6, %c0_7], %7 {strides = array<i32>} : memref<32x128xf32, #tpu.memory_space<vmem>>, vector<32x128xf32>,
    return
  }
  func.func @transform_0(%arg0: i32) -> (i32, i32) {
    %c0_i32 = arith.constant 0 : i32
    %c0_i32_0 = arith.constant 0 : i32
    return %arg0, %c0_i32 : i32, i32
  }
  func.func @transform_1(%arg0: i32) -> (i32, i32) {
    %c0_i32 = arith.constant 0 : i32
    %c0_i32_0 = arith.constant 0 : i32
    %c0_i32_1 = arith.constant 0 : i32
    return %c0_i32, %c0_i32_0 : i32, i32
  }
  func.func @transform_2(%arg0: i32) -> (i32, i32) {
    %c0_i32 = arith.constant 0 : i32
    %c0_i32_0 = arith.constant 0 : i32
    %c0_i32_1 = arith.constant 0 : i32
    return %c0_i32, %c0_i32_0 : i32, i32
  }
  func.func @transform_3(%arg0: i32) -> (i32, i32) {
    %c0_i32 = arith.constant 0 : i32
    %c0_i32_0 = arith.constant 0 : i32
    return %arg0, %c0_i32 : i32, i32
  }
}

module attributes {stable_mosaic.version = 11 : i64} {
  func.func @_conv_bn_relu_kernel(%arg0: i32, %arg1: memref<32x1152xf32, #tpu.memory_space<vmem>>, %arg2: memref<1152x128xf32, #tpu.memory_space<vmem>>, %arg3: memref<1x128xf32, #tpu.memory_space<vmem>>, %arg4: memref<32x128xf32, #tpu.memory_space<vmem>>) attributes {dimension_semantics = [#tpu.dimension_semantics<parallel>], iteration_bounds = array<i64: 1>, scalar_prefetch = 0 : i64, scratch_operands = 0 : i64, tpu.core_type = #tpu.core_type<tc>, window_params = [{transform_indices = @transform_0, window_bounds = array<i64: 32, 1152>}, {pipeline_mode = #tpu.pipeline_mode<synchronous>, transform_indices = @transform_1, window_bounds = array<i64: 1152, 128>}, {pipeline_mode = #tpu.pipeline_mode<synchronous>, transform_indices = @transform_2, window_bounds = array<i64: 1, 128>}, {transform_indices = @transform_3, window_bounds = array<i64: 32, 128>}]} {
    %c0 = arith.constant 0 : index
    %c0_0 = arith.constant 0 : index
    %0 = vector.load %arg1[%c0, %c0_0] : memref<32x1152xf32, #tpu.memory_space<vmem>>, vector<32x1152xf32>
    %c0_1 = arith.constant 0 : index
    %c0_2 = arith.constant 0 : index
    %1 = vector.load %arg2[%c0_1, %c0_2] : memref<1152x128xf32, #tpu.memory_space<vmem>>, vector<1152x128xf32>
    %cst = arith.constant dense<0.000000e+00> : vector<32x128xf32>
    %2 = tpu.matmul %0, %1, %cst {dimension_numbers = #tpu.dot_dimension_numbers<[1], [0], [0], [1], [0, 0, 1, 1], [], []>} : vector<32x1152xf32>, vector<1152x128xf32>, vector<32x128xf32> -> vector<32x128xf32>
    %c0_3 = arith.constant 0 : index
    %c0_4 = arith.constant 0 : index
    %3 = vector.load %arg3[%c0_3, %c0_4] : memref<1x128xf32, #tpu.memory_space<vmem>>, vector<1x128xf32>
    %4 = vector.broadcast %3 : vector<1x128xf32> to vector<32x128xf32>
    %5 = arith.addf %2, %4 : vector<32x128xf32>
    %cst_5 = arith.constant 0.000000e+00 : f32
    %6 = vector.broadcast %cst_5 : f32 to vector<32x128xf32>
    %7 = arith.maximumf %5, %6 : vector<32x128xf32>
    %c0_6 = arith.constant 0 : index
    %c0_7 = arith.constant 0 : index
    %8 = vector.load %arg4[%c0_6, %c0_7] : memref<32x128xf32, #tpu.memory_space<vmem>>, vector<32x128xf32>
    tpu.vector_store %arg4[%c0_6, %c0_7], %7 {strides = array<i32>} : memref<32x128xf32, #tpu.memory_space<vmem>>, vector<32x128xf32>,
    return
  }
  func.func @transform_0(%arg0: i32) -> (i32, i32) {
    %c0_i32 = arith.constant 0 : i32
    %c0_i32_0 = arith.constant 0 : i32
    return %arg0, %c0_i32 : i32, i32
  }
  func.func @transform_1(%arg0: i32) -> (i32, i32) {
    %c0_i32 = arith.constant 0 : i32
    %c0_i32_0 = arith.constant 0 : i32
    %c0_i32_1 = arith.constant 0 : i32
    return %c0_i32, %c0_i32_0 : i32, i32
  }
  func.func @transform_2(%arg0: i32) -> (i32, i32) {
    %c0_i32 = arith.constant 0 : i32
    %c0_i32_0 = arith.constant 0 : i32
    %c0_i32_1 = arith.constant 0 : i32
    return %c0_i32, %c0_i32_0 : i32, i32
  }
  func.func @transform_3(%arg0: i32) -> (i32, i32) {
    %c0_i32 = arith.constant 0 : i32
    %c0_i32_0 = arith.constant 0 : i32
    return %arg0, %c0_i32 : i32, i32
  }
}

module attributes {stable_mosaic.version = 11 : i64} {
  func.func @_conv_bn_relu_kernel(%arg0: i32, %arg1: memref<8x1152xf32, #tpu.memory_space<vmem>>, %arg2: memref<1152x128xf32, #tpu.memory_space<vmem>>, %arg3: memref<1x128xf32, #tpu.memory_space<vmem>>, %arg4: memref<8x128xf32, #tpu.memory_space<vmem>>) attributes {dimension_semantics = [#tpu.dimension_semantics<parallel>], iteration_bounds = array<i64: 1>, scalar_prefetch = 0 : i64, scratch_operands = 0 : i64, tpu.core_type = #tpu.core_type<tc>, window_params = [{transform_indices = @transform_0, window_bounds = array<i64: 8, 1152>}, {pipeline_mode = #tpu.pipeline_mode<synchronous>, transform_indices = @transform_1, window_bounds = array<i64: 1152, 128>}, {pipeline_mode = #tpu.pipeline_mode<synchronous>, transform_indices = @transform_2, window_bounds = array<i64: 1, 128>}, {transform_indices = @transform_3, window_bounds = array<i64: 8, 128>}]} {
    %c0 = arith.constant 0 : index
    %c0_0 = arith.constant 0 : index
    %0 = vector.load %arg1[%c0, %c0_0] : memref<8x1152xf32, #tpu.memory_space<vmem>>, vector<8x1152xf32>
    %c0_1 = arith.constant 0 : index
    %c0_2 = arith.constant 0 : index
    %1 = vector.load %arg2[%c0_1, %c0_2] : memref<1152x128xf32, #tpu.memory_space<vmem>>, vector<1152x128xf32>
    %cst = arith.constant dense<0.000000e+00> : vector<8x128xf32>
    %2 = tpu.matmul %0, %1, %cst {dimension_numbers = #tpu.dot_dimension_numbers<[1], [0], [0], [1], [0, 0, 1, 1], [], []>} : vector<8x1152xf32>, vector<1152x128xf32>, vector<8x128xf32> -> vector<8x128xf32>
    %c0_3 = arith.constant 0 : index
    %c0_4 = arith.constant 0 : index
    %3 = vector.load %arg3[%c0_3, %c0_4] : memref<1x128xf32, #tpu.memory_space<vmem>>, vector<1x128xf32>
    %4 = vector.broadcast %3 : vector<1x128xf32> to vector<8x128xf32>
    %5 = arith.addf %2, %4 : vector<8x128xf32>
    %cst_5 = arith.constant 0.000000e+00 : f32
    %6 = vector.broadcast %cst_5 : f32 to vector<8x128xf32>
    %7 = arith.maximumf %5, %6 : vector<8x128xf32>
    %c0_6 = arith.constant 0 : index
    %c0_7 = arith.constant 0 : index
    %8 = vector.load %arg4[%c0_6, %c0_7] : memref<8x128xf32, #tpu.memory_space<vmem>>, vector<8x128xf32>
    tpu.vector_store %arg4[%c0_6, %c0_7], %7 {strides = array<i32>} : memref<8x128xf32, #tpu.memory_space<vmem>>, vector<8x128xf32>,
    return
  }
  func.func @transform_0(%arg0: i32) -> (i32, i32) {
    %c0_i32 = arith.constant 0 : i32
    %c0_i32_0 = arith.constant 0 : i32
    return %arg0, %c0_i32 : i32, i32
  }
  func.func @transform_1(%arg0: i32) -> (i32, i32) {
    %c0_i32 = arith.constant 0 : i32
    %c0_i32_0 = arith.constant 0 : i32
    %c0_i32_1 = arith.constant 0 : i32
    return %c0_i32, %c0_i32_0 : i32, i32
  }
  func.func @transform_2(%arg0: i32) -> (i32, i32) {
    %c0_i32 = arith.constant 0 : i32
    %c0_i32_0 = arith.constant 0 : i32
    %c0_i32_1 = arith.constant 0 : i32
    return %c0_i32, %c0_i32_0 : i32, i32
  }
  func.func @transform_3(%arg0: i32) -> (i32, i32) {
    %c0_i32 = arith.constant 0 : i32
    %c0_i32_0 = arith.constant 0 : i32
    return %arg0, %c0_i32 : i32, i32
  }
}

module attributes {stable_mosaic.version = 11 : i64} {
  func.func @_conv_bn_relu_kernel(%arg0: i32, %arg1: memref<8x1152xf32, #tpu.memory_space<vmem>>, %arg2: memref<1152x128xf32, #tpu.memory_space<vmem>>, %arg3: memref<1x128xf32, #tpu.memory_space<vmem>>, %arg4: memref<8x128xf32, #tpu.memory_space<vmem>>) attributes {dimension_semantics = [#tpu.dimension_semantics<parallel>], iteration_bounds = array<i64: 1>, scalar_prefetch = 0 : i64, scratch_operands = 0 : i64, tpu.core_type = #tpu.core_type<tc>, window_params = [{transform_indices = @transform_0, window_bounds = array<i64: 8, 1152>}, {pipeline_mode = #tpu.pipeline_mode<synchronous>, transform_indices = @transform_1, window_bounds = array<i64: 1152, 128>}, {pipeline_mode = #tpu.pipeline_mode<synchronous>, transform_indices = @transform_2, window_bounds = array<i64: 1, 128>}, {transform_indices = @transform_3, window_bounds = array<i64: 8, 128>}]} {
    %c0 = arith.constant 0 : index
    %c0_0 = arith.constant 0 : index
    %0 = vector.load %arg1[%c0, %c0_0] : memref<8x1152xf32, #tpu.memory_space<vmem>>, vector<8x1152xf32>
    %c0_1 = arith.constant 0 : index
    %c0_2 = arith.constant 0 : index
    %1 = vector.load %arg2[%c0_1, %c0_2] : memref<1152x128xf32, #tpu.memory_space<vmem>>, vector<1152x128xf32>
    %cst = arith.constant dense<0.000000e+00> : vector<8x128xf32>
    %2 = tpu.matmul %0, %1, %cst {dimension_numbers = #tpu.dot_dimension_numbers<[1], [0], [0], [1], [0, 0, 1, 1], [], []>} : vector<8x1152xf32>, vector<1152x128xf32>, vector<8x128xf32> -> vector<8x128xf32>
    %c0_3 = arith.constant 0 : index
    %c0_4 = arith.constant 0 : index
    %3 = vector.load %arg3[%c0_3, %c0_4] : memref<1x128xf32, #tpu.memory_space<vmem>>, vector<1x128xf32>
    %4 = vector.broadcast %3 : vector<1x128xf32> to vector<8x128xf32>
    %5 = arith.addf %2, %4 : vector<8x128xf32>
    %cst_5 = arith.constant 0.000000e+00 : f32
    %6 = vector.broadcast %cst_5 : f32 to vector<8x128xf32>
    %7 = arith.maximumf %5, %6 : vector<8x128xf32>
    %c0_6 = arith.constant 0 : index
    %c0_7 = arith.constant 0 : index
    %8 = vector.load %arg4[%c0_6, %c0_7] : memref<8x128xf32, #tpu.memory_space<vmem>>, vector<8x128xf32>
    tpu.vector_store %arg4[%c0_6, %c0_7], %7 {strides = array<i32>} : memref<8x128xf32, #tpu.memory_space<vmem>>, vector<8x128xf32>,
    return
  }
  func.func @transform_0(%arg0: i32) -> (i32, i32) {
    %c0_i32 = arith.constant 0 : i32
    %c0_i32_0 = arith.constant 0 : i32
    return %arg0, %c0_i32 : i32, i32
  }
  func.func @transform_1(%arg0: i32) -> (i32, i32) {
    %c0_i32 = arith.constant 0 : i32
    %c0_i32_0 = arith.constant 0 : i32
    %c0_i32_1 = arith.constant 0 : i32
    return %c0_i32, %c0_i32_0 : i32, i32
  }
  func.func @transform_2(%arg0: i32) -> (i32, i32) {
    %c0_i32 = arith.constant 0 : i32
    %c0_i32_0 = arith.constant 0 : i32
    %c0_i32_1 = arith.constant 0 : i32
    return %c0_i32, %c0_i32_0 : i32, i32
  }
  func.func @transform_3(%arg0: i32) -> (i32, i32) {
    %c0_i32 = arith.constant 0 : i32
    %c0_i32_0 = arith.constant 0 : i32
    return %arg0, %c0_i32 : i32, i32
  }
}

</mosaic_0001>

<bundles_post_ra>
// kernel: _unetback_features.8
= control target key start
LH: loop header
LB: loop body
LE: loop exit
PB: predicated region body
PF: predicated region fallthrough
CT: control target
= control target key end

     0   :  { %vm277_vm0 = vcmask 1040384   ;;  %vm84_vm1 = vcmask 72704   ;;  %vm554_vm2 = vcmask 523264   ;;  %s1302_s1 = inlined_call_operand.vmem [shape: f32[9,64], index: 1, kind: input, shape index: {}]   ;;  %s1303_s0 = inlined_call_operand.vmem [shape: f32[512,9], index: 0, kind: input, shape index: {}]   ;;  %s1304_s2 = inlined_call_operand.vmem [shape: f32[1,64], index: 2, kind: input, shape index: {}]   ;;  %s1305_s3 = inlined_call_operand.vmem [shape: f32[512,64], index: 3, kind: output, shape index: {}]  }
   0x1   :  { %v79_v0 = vld [vmem:[%s1302_s1 + $0x8] sm:$0x1]  ;;  %v78_v1 = vld [vmem:[%s1302_s1] sm:$0xff]  ;;  %v48_v10 = vld [vmem:[%s1303_s0 + $0x110] sm:$0xff] }
   0x2   :  { %689 = vmatpush.msk.msra.mxu2 %vm277_vm0, %v79_v0  ;;  %690 = vmatpush.msk.msra.mxu3 %vm277_vm0, %v79_v0  ;;  %v46_v2 = vld [vmem:[%s1303_s0 + $0x100] sm:$0xff]  ;;  %v47_v6 = vld [vmem:[%s1303_s0 + $0x108] sm:$0xff]  ;;  %v64_v11 = vld [vmem:[%s1303_s0 + $0x190] sm:$0xff] }
   0x3   :  { %v62_v3 = vld [vmem:[%s1303_s0 + $0x180] sm:$0xff]  ;;  %623 = vmatpush.msk.msra.mxu0 %vm277_vm0, %v79_v0  ;;  %688 = vmatpush.msk.msra.mxu1 %vm277_vm0, %v79_v0  ;;  %v63_v7 = vld [vmem:[%s1303_s0 + $0x188] sm:$0xff]  ;;  %v16_v12 = vld [vmem:[%s1303_s0 + $0x10] sm:$0xff] }
   0x4   :  { %692 = vmatpush.msra.mxu2 %v78_v1  ;;  %693 = vmatpush.msra.mxu3 %v78_v1  ;;  %v14_v4 = vld [vmem:[%s1303_s0] sm:$0xff]  ;;  %v15_v8 = vld [vmem:[%s1303_s0 + $0x8] sm:$0xff]  ;;  %v32_v13 = vld [vmem:[%s1303_s0 + $0x90] sm:$0xff] }
   0x5   :  { %v30_v5 = vld [vmem:[%s1303_s0 + $0x80] sm:$0xff]  ;;  %656 = vmatmul.msk.f32.vlgmr.msra.gmra.mxu2 %vm84_vm1, %v46_v2  ;;  %672 = vmatmul.msk.f32.vlgmr.msra.gmra.mxu3 %vm84_vm1, %v62_v3  ;;  %v31_v9 = vld [vmem:[%s1303_s0 + $0x88] sm:$0xff]  ;;  %v49_v14 = vld [vmem:[%s1303_s0 + $0x118] sm:$0xff] }
   0x6   :  { %296 = vmatpush.msra.mxu0 %v78_v1  ;;  %691 = vmatpush.msra.mxu1 %v78_v1  ;;  %v65_v15 = vld [vmem:[%s1303_s0 + $0x198] sm:$0xff]  ;;  %v50_v18 = vld [vmem:[%s1303_s0 + $0x120] sm:$0xff]  ;;  %v51_v22 = vld [vmem:[%s1303_s0 + $0x128] sm:$0xff] }
   0x7   :  { %624 = vmatmul.msk.f32.vlgmr.msra.gmra.mxu0 %vm84_vm1, %v14_v4  ;;  %640 = vmatmul.msk.f32.vlgmr.msra.gmra.mxu1 %vm84_vm1, %v30_v5  ;;  %v17_v16 = vld [vmem:[%s1303_s0 + $0x18] sm:$0xff]  ;;  %v66_v19 = vld [vmem:[%s1303_s0 + $0x1a0] sm:$0xff]  ;;  %v67_v23 = vld [vmem:[%s1303_s0 + $0x1a8] sm:$0xff] }
   0x8   :  { %v33_v17 = vld [vmem:[%s1303_s0 + $0x98] sm:$0xff]  ;;  %v18_v20 = vld [vmem:[%s1303_s0 + $0x20] sm:$0xff]  ;;  %v19_v24 = vld [vmem:[%s1303_s0 + $0x28] sm:$0xff] }
   0x9   :  { %v34_v21 = vld [vmem:[%s1303_s0 + $0xa0] sm:$0xff]  ;;  %v35_v25 = vld [vmem:[%s1303_s0 + $0xa8] sm:$0xff]  ;;  %v52_v26 = vld [vmem:[%s1303_s0 + $0x130] sm:$0xff] }
   0xa   :  { %v68_v27 = vld [vmem:[%s1303_s0 + $0x1b0] sm:$0xff]  ;;  %v53_v30 = vld [vmem:[%s1303_s0 + $0x138] sm:$0xff]  ;;  %v54_v34 = vld [vmem:[%s1303_s0 + $0x140] sm:$0xff] }
   0xb   :  { %v20_v28 = vld [vmem:[%s1303_s0 + $0x30] sm:$0xff]  ;;  %v69_v31 = vld [vmem:[%s1303_s0 + $0x1b8] sm:$0xff]  ;;  %v70_v35 = vld [vmem:[%s1303_s0 + $0x1c0] sm:$0xff] }
   0xc   :  { %v36_v29 = vld [vmem:[%s1303_s0 + $0xb0] sm:$0xff]  ;;  %v21_v32 = vld [vmem:[%s1303_s0 + $0x38] sm:$0xff]  ;;  %v22_v36 = vld [vmem:[%s1303_s0 + $0x40] sm:$0xff] }
   0xd   :  { %657 = vmatmul.msk.f32.gmra.mxu2 %vm84_vm1, %v47_v6  ;;  %673 = vmatmul.msk.f32.gmra.mxu3 %vm84_vm1, %v63_v7  ;;  %v37_v33 = vld [vmem:[%s1303_s0 + $0xb8] sm:$0xff]  ;;  %v38_v37 = vld [vmem:[%s1303_s0 + $0xc0] sm:$0xff]  ;;  %v55_v38 = vld [vmem:[%s1303_s0 + $0x148] sm:$0xff] }
   0xe   :  { %v71_v39 = vld [vmem:[%s1303_s0 + $0x1c8] sm:$0xff]  ;;  %v56_v42 = vld [vmem:[%s1303_s0 + $0x150] sm:$0xff]  ;;  %v57_v46 = vld [vmem:[%s1303_s0 + $0x158] sm:$0xff] }
   0xf   :  { %625 = vmatmul.msk.f32.gmra.mxu0 %vm84_vm1, %v15_v8  ;;  %641 = vmatmul.msk.f32.gmra.mxu1 %vm84_vm1, %v31_v9  ;;  %v23_v40 = vld [vmem:[%s1303_s0 + $0x48] sm:$0xff]  ;;  %v72_v43 = vld [vmem:[%s1303_s0 + $0x1d0] sm:$0xff]  ;;  %v73_v47 = vld [vmem:[%s1303_s0 + $0x1d8] sm:$0xff] }
  0x10   :  { %v39_v41 = vld [vmem:[%s1303_s0 + $0xc8] sm:$0xff]  ;;  %v24_v44 = vld [vmem:[%s1303_s0 + $0x50] sm:$0xff]  ;;  %v25_v48 = vld [vmem:[%s1303_s0 + $0x58] sm:$0xff] }
  0x11   :  { %v40_v45 = vld [vmem:[%s1303_s0 + $0xd0] sm:$0xff]  ;;  %v41_v49 = vld [vmem:[%s1303_s0 + $0xd8] sm:$0xff]  ;;  %v58_v50 = vld [vmem:[%s1303_s0 + $0x160] sm:$0xff] }
  0x12   :  { %v74_v51 = vld [vmem:[%s1303_s0 + $0x1e0] sm:$0xff]  ;;  %v59_v54 = vld [vmem:[%s1303_s0 + $0x168] sm:$0xff]  ;;  %v60_v58 = vld [vmem:[%s1303_s0 + $0x170] sm:$0xff] }
  0x13   :  { %v26_v52 = vld [vmem:[%s1303_s0 + $0x60] sm:$0xff]  ;;  %v75_v55 = vld [vmem:[%s1303_s0 + $0x1e8] sm:$0xff]  ;;  %v76_v59 = vld [vmem:[%s1303_s0 + $0x1f0] sm:$0xff] }
  0x14   :  { %v42_v53 = vld [vmem:[%s1303_s0 + $0xe0] sm:$0xff]  ;;  %v27_v56 = vld [vmem:[%s1303_s0 + $0x68] sm:$0xff]  ;;  %v28_v60 = vld [vmem:[%s1303_s0 + $0x70] sm:$0xff] }
  0x15   :  { %658 = vmatmul.msk.f32.gmra.mxu2 %vm84_vm1, %v48_v10  ;;  %674 = vmatmul.msk.f32.gmra.mxu3 %vm84_vm1, %v64_v11  ;;  %v43_v57 = vld [vmem:[%s1303_s0 + $0xe8] sm:$0xff]  ;;  %v44_v61 = vld [vmem:[%s1303_s0 + $0xf0] sm:$0xff]  ;;  %v61_v62 = vld [vmem:[%s1303_s0 + $0x178] sm:$0xff] }
  0x16   :  { %v77_v63 = vld [vmem:[%s1303_s0 + $0x1f8] sm:$0xff]  ;;  %v980_v2 = vld [vmem:[%s1304_s2] ss:$0 sm:$0xff] }
  0x17   :  { %626 = vmatmul.msk.f32.gmra.mxu0 %vm84_vm1, %v16_v12  ;;  %642 = vmatmul.msk.f32.gmra.mxu1 %vm84_vm1, %v32_v13  ;;  %v29_v0 = vld [vmem:[%s1303_s0 + $0x78] sm:$0xff] }
  0x18   :  { %v45_v1 = vld [vmem:[%s1303_s0 + $0xf8] sm:$0xff] }
  0x1d   :  { %659 = vmatmul.msk.f32.gmra.mxu2 %vm84_vm1, %v49_v14  ;;  %675 = vmatmul.msk.f32.gmra.mxu3 %vm84_vm1, %v65_v15 }
  0x1f   :  { %627 = vmatmul.msk.f32.gmra.mxu0 %vm84_vm1, %v17_v16  ;;  %643 = vmatmul.msk.f32.gmra.mxu1 %vm84_vm1, %v33_v17 }
  0x25   :  { %660 = vmatmul.msk.f32.gmra.mxu2 %vm84_vm1, %v50_v18  ;;  %676 = vmatmul.msk.f32.gmra.mxu3 %vm84_vm1, %v66_v19 }
  0x27   :  { %628 = vmatmul.msk.f32.gmra.mxu0 %vm84_vm1, %v18_v20  ;;  %644 = vmatmul.msk.f32.gmra.mxu1 %vm84_vm1, %v34_v21 }
  0x2d   :  { %661 = vmatmul.msk.f32.gmra.mxu2 %vm84_vm1, %v51_v22  ;;  %677 = vmatmul.msk.f32.gmra.mxu3 %vm84_vm1, %v67_v23 }
  0x2f   :  { %629 = vmatmul.msk.f32.gmra.mxu0 %vm84_vm1, %v19_v24  ;;  %645 = vmatmul.msk.f32.gmra.mxu1 %vm84_vm1, %v35_v25 }
  0x35   :  { %662 = vmatmul.msk.f32.gmra.mxu2 %vm84_vm1, %v52_v26  ;;  %678 = vmatmul.msk.f32.gmra.mxu3 %vm84_vm1, %v68_v27 }
  0x37   :  { %630 = vmatmul.msk.f32.gmra.mxu0 %vm84_vm1, %v20_v28  ;;  %646 = vmatmul.msk.f32.gmra.mxu1 %vm84_vm1, %v36_v29 }
  0x3d   :  { %663 = vmatmul.msk.f32.gmra.mxu2 %vm84_vm1, %v53_v30  ;;  %679 = vmatmul.msk.f32.gmra.mxu3 %vm84_vm1, %v69_v31 }
  0x3f   :  { %631 = vmatmul.msk.f32.gmra.mxu0 %vm84_vm1, %v21_v32  ;;  %647 = vmatmul.msk.f32.gmra.mxu1 %vm84_vm1, %v37_v33 }
  0x45   :  { %664 = vmatmul.msk.f32.gmra.mxu2 %vm84_vm1, %v54_v34  ;;  %680 = vmatmul.msk.f32.gmra.mxu3 %vm84_vm1, %v70_v35 }
  0x47   :  { %632 = vmatmul.msk.f32.gmra.mxu0 %vm84_vm1, %v22_v36  ;;  %648 = vmatmul.msk.f32.gmra.mxu1 %vm84_vm1, %v38_v37 }
  0x4d   :  { %665 = vmatmul.msk.f32.gmra.mxu2 %vm84_vm1, %v55_v38  ;;  %681 = vmatmul.msk.f32.gmra.mxu3 %vm84_vm1, %v71_v39 }
  0x4f   :  { %633 = vmatmul.msk.f32.gmra.mxu0 %vm84_vm1, %v23_v40  ;;  %649 = vmatmul.msk.f32.gmra.mxu1 %vm84_vm1, %v39_v41 }
  0x55   :  { %666 = vmatmul.msk.f32.gmra.mxu2 %vm84_vm1, %v56_v42  ;;  %682 = vmatmul.msk.f32.gmra.mxu3 %vm84_vm1, %v72_v43 }
  0x57   :  { %634 = vmatmul.msk.f32.gmra.mxu0 %vm84_vm1, %v24_v44  ;;  %650 = vmatmul.msk.f32.gmra.mxu1 %vm84_vm1, %v40_v45 }
  0x5d   :  { %667 = vmatmul.msk.f32.gmra.mxu2 %vm84_vm1, %v57_v46  ;;  %683 = vmatmul.msk.f32.gmra.mxu3 %vm84_vm1, %v73_v47 }
  0x5f   :  { %635 = vmatmul.msk.f32.gmra.mxu0 %vm84_vm1, %v25_v48  ;;  %651 = vmatmul.msk.f32.gmra.mxu1 %vm84_vm1, %v41_v49 }
  0x65   :  { %668 = vmatmul.msk.f32.gmra.mxu2 %vm84_vm1, %v58_v50  ;;  %684 = vmatmul.msk.f32.gmra.mxu3 %vm84_vm1, %v74_v51 }
  0x67   :  { %636 = vmatmul.msk.f32.gmra.mxu0 %vm84_vm1, %v26_v52  ;;  %652 = vmatmul.msk.f32.gmra.mxu1 %vm84_vm1, %v42_v53 }
  0x6d   :  { %669 = vmatmul.msk.f32.gmra.mxu2 %vm84_vm1, %v59_v54  ;;  %685 = vmatmul.msk.f32.gmra.mxu3 %vm84_vm1, %v75_v55 }
  0x6f   :  { %637 = vmatmul.msk.f32.gmra.mxu0 %vm84_vm1, %v27_v56  ;;  %653 = vmatmul.msk.f32.gmra.mxu1 %vm84_vm1, %v43_v57 }
  0x75   :  { %670 = vmatmul.msk.f32.gmra.mxu2 %vm84_vm1, %v60_v58  ;;  %686 = vmatmul.msk.f32.gmra.mxu3 %vm84_vm1, %v76_v59 }
  0x77   :  { %638 = vmatmul.msk.f32.gmra.mxu0 %vm84_vm1, %v28_v60  ;;  %654 = vmatmul.msk.f32.gmra.mxu1 %vm84_vm1, %v44_v61 }
  0x7d   :  { %671 = vmatmul.msk.f32.gmra.mxu2 %vm84_vm1, %v61_v62  ;;  %687 = vmatmul.msk.f32.gmra.mxu3 %vm84_vm1, %v77_v63 }
  0x7f   :  { %639 = vmatmul.msk.f32.gmra.mxu0 %vm84_vm1, %v29_v0  ;;  %655 = vmatmul.msk.f32.gmra.mxu1 %vm84_vm1, %v45_v1 }
  0x84   :  { %v298_v3 = vpop.f32.mrf.mxu0  ;;  %v346_v4 = vpop.f32.mrf.mxu1 }
  0x85   :  { %v299_v5 = vadd.f32 %v980_v2, %v298_v3  ;;  %v347_v6 = vadd.f32 %v980_v2, %v346_v4 }
  0x87   :  { %v490_v7 = vmax.f32 %v299_v5, 0.0  ;;  %v506_v8 = vmax.f32 %v347_v6, 0.0 }
  0x88   :  { %v394_v9 = vpop.f32.mrf.mxu2  ;;  %v442_v10 = vpop.f32.mrf.mxu3 }
  0x89   :  { %555 = vst.msk [vmem:[%s1305_s3] sm:$0xff] %vm554_vm2, %v490_v7  ;;  %v395_v11 = vadd.f32 %v980_v2, %v394_v9  ;;  %v443_v12 = vadd.f32 %v980_v2, %v442_v10 }
  0x8a   :  { %571 = vst.msk [vmem:[%s1305_s3 + $0x80] sm:$0xff] %vm554_vm2, %v506_v8 }
  0x8b   :  { %v522_v13 = vmax.f32 %v395_v11, 0.0  ;;  %v538_v14 = vmax.f32 %v443_v12, 0.0 }
  0x8c   :  { %v301_v15 = vpop.f32.mrf.mxu0  ;;  %v349_v16 = vpop.f32.mrf.mxu1 }
  0x8d   :  { %587 = vst.msk [vmem:[%s1305_s3 + $0x100] sm:$0xff] %vm554_vm2, %v522_v13  ;;  %v302_v17 = vadd.f32 %v980_v2, %v301_v15  ;;  %v350_v18 = vadd.f32 %v980_v2, %v349_v16 }
  0x8e   :  { %603 = vst.msk [vmem:[%s1305_s3 + $0x180] sm:$0xff] %vm554_vm2, %v538_v14 }
  0x8f   :  { %v491_v19 = vmax.f32 %v302_v17, 0.0  ;;  %v507_v20 = vmax.f32 %v350_v18, 0.0 }
  0x90   :  { %v397_v21 = vpop.f32.mrf.mxu2  ;;  %v445_v22 = vpop.f32.mrf.mxu3 }
  0x91   :  { %556 = vst.msk [vmem:[%s1305_s3 + $0x8] sm:$0xff] %vm554_vm2, %v491_v19  ;;  %v398_v23 = vadd.f32 %v980_v2, %v397_v21  ;;  %v446_v24 = vadd.f32 %v980_v2, %v445_v22 }
  0x92   :  { %572 = vst.msk [vmem:[%s1305_s3 + $0x88] sm:$0xff] %vm554_vm2, %v507_v20 }
  0x93   :  { %v523_v25 = vmax.f32 %v398_v23, 0.0  ;;  %v539_v26 = vmax.f32 %v446_v24, 0.0 }
  0x94   :  { %v304_v27 = vpop.f32.mrf.mxu0  ;;  %v352_v28 = vpop.f32.mrf.mxu1 }
  0x95   :  { %588 = vst.msk [vmem:[%s1305_s3 + $0x108] sm:$0xff] %vm554_vm2, %v523_v25  ;;  %v305_v29 = vadd.f32 %v980_v2, %v304_v27  ;;  %v353_v30 = vadd.f32 %v980_v2, %v352_v28 }
  0x96   :  { %604 = vst.msk [vmem:[%s1305_s3 + $0x188] sm:$0xff] %vm554_vm2, %v539_v26 }
  0x97   :  { %v492_v31 = vmax.f32 %v305_v29, 0.0  ;;  %v508_v32 = vmax.f32 %v353_v30, 0.0 }
  0x98   :  { %v400_v33 = vpop.f32.mrf.mxu2  ;;  %v448_v34 = vpop.f32.mrf.mxu3 }
  0x99   :  { %557 = vst.msk [vmem:[%s1305_s3 + $0x10] sm:$0xff] %vm554_vm2, %v492_v31  ;;  %v401_v35 = vadd.f32 %v980_v2, %v400_v33  ;;  %v449_v36 = vadd.f32 %v980_v2, %v448_v34 }
  0x9a   :  { %573 = vst.msk [vmem:[%s1305_s3 + $0x90] sm:$0xff] %vm554_vm2, %v508_v32 }
  0x9b   :  { %v524_v37 = vmax.f32 %v401_v35, 0.0  ;;  %v540_v38 = vmax.f32 %v449_v36, 0.0 }
  0x9c   :  { %v307_v39 = vpop.f32.mrf.mxu0  ;;  %v355_v40 = vpop.f32.mrf.mxu1 }
  0x9d   :  { %589 = vst.msk [vmem:[%s1305_s3 + $0x110] sm:$0xff] %vm554_vm2, %v524_v37  ;;  %v308_v41 = vadd.f32 %v980_v2, %v307_v39  ;;  %v356_v42 = vadd.f32 %v980_v2, %v355_v40 }
  0x9e   :  { %605 = vst.msk [vmem:[%s1305_s3 + $0x190] sm:$0xff] %vm554_vm2, %v540_v38 }
  0x9f   :  { %v493_v43 = vmax.f32 %v308_v41, 0.0  ;;  %v509_v44 = vmax.f32 %v356_v42, 0.0 }
  0xa0   :  { %v403_v45 = vpop.f32.mrf.mxu2  ;;  %v451_v46 = vpop.f32.mrf.mxu3 }
  0xa1   :  { %558 = vst.msk [vmem:[%s1305_s3 + $0x18] sm:$0xff] %vm554_vm2, %v493_v43  ;;  %v404_v47 = vadd.f32 %v980_v2, %v403_v45  ;;  %v452_v48 = vadd.f32 %v980_v2, %v451_v46 }
  0xa2   :  { %574 = vst.msk [vmem:[%s1305_s3 + $0x98] sm:$0xff] %vm554_vm2, %v509_v44 }
  0xa3   :  { %v525_v49 = vmax.f32 %v404_v47, 0.0  ;;  %v541_v50 = vmax.f32 %v452_v48, 0.0 }
  0xa4   :  { %v310_v51 = vpop.f32.mrf.mxu0  ;;  %v358_v52 = vpop.f32.mrf.mxu1 }
  0xa5   :  { %590 = vst.msk [vmem:[%s1305_s3 + $0x118] sm:$0xff] %vm554_vm2, %v525_v49  ;;  %v311_v53 = vadd.f32 %v980_v2, %v310_v51  ;;  %v359_v54 = vadd.f32 %v980_v2, %v358_v52 }
  0xa6   :  { %606 = vst.msk [vmem:[%s1305_s3 + $0x198] sm:$0xff] %vm554_vm2, %v541_v50 }
  0xa7   :  { %v494_v55 = vmax.f32 %v311_v53, 0.0  ;;  %v510_v56 = vmax.f32 %v359_v54, 0.0 }
  0xa8   :  { %v406_v57 = vpop.f32.mrf.mxu2  ;;  %v454_v58 = vpop.f32.mrf.mxu3 }
  0xa9   :  { %559 = vst.msk [vmem:[%s1305_s3 + $0x20] sm:$0xff] %vm554_vm2, %v494_v55  ;;  %v407_v59 = vadd.f32 %v980_v2, %v406_v57  ;;  %v455_v60 = vadd.f32 %v980_v2, %v454_v58 }
  0xaa   :  { %575 = vst.msk [vmem:[%s1305_s3 + $0xa0] sm:$0xff] %vm554_vm2, %v510_v56 }
  0xab   :  { %v526_v61 = vmax.f32 %v407_v59, 0.0  ;;  %v542_v62 = vmax.f32 %v455_v60, 0.0 }
  0xac   :  { %v313_v63 = vpop.f32.mrf.mxu0  ;;  %v361_v0 = vpop.f32.mrf.mxu1 }
  0xad   :  { %591 = vst.msk [vmem:[%s1305_s3 + $0x120] sm:$0xff] %vm554_vm2, %v526_v61  ;;  %v314_v1 = vadd.f32 %v980_v2, %v313_v63  ;;  %v362_v3 = vadd.f32 %v980_v2, %v361_v0 }
  0xae   :  { %607 = vst.msk [vmem:[%s1305_s3 + $0x1a0] sm:$0xff] %vm554_vm2, %v542_v62 }
  0xaf   :  { %v495_v4 = vmax.f32 %v314_v1, 0.0  ;;  %v511_v5 = vmax.f32 %v362_v3, 0.0 }
  0xb0   :  { %v409_v6 = vpop.f32.mrf.mxu2  ;;  %v457_v7 = vpop.f32.mrf.mxu3 }
  0xb1   :  { %560 = vst.msk [vmem:[%s1305_s3 + $0x28] sm:$0xff] %vm554_vm2, %v495_v4  ;;  %v410_v8 = vadd.f32 %v980_v2, %v409_v6  ;;  %v458_v9 = vadd.f32 %v980_v2, %v457_v7 }
  0xb2   :  { %576 = vst.msk [vmem:[%s1305_s3 + $0xa8] sm:$0xff] %vm554_vm2, %v511_v5 }
  0xb3   :  { %v527_v10 = vmax.f32 %v410_v8, 0.0  ;;  %v543_v11 = vmax.f32 %v458_v9, 0.0 }
  0xb4   :  { %v316_v12 = vpop.f32.mrf.mxu0  ;;  %v364_v13 = vpop.f32.mrf.mxu1 }
  0xb5   :  { %592 = vst.msk [vmem:[%s1305_s3 + $0x128] sm:$0xff] %vm554_vm2, %v527_v10  ;;  %v317_v14 = vadd.f32 %v980_v2, %v316_v12  ;;  %v365_v15 = vadd.f32 %v980_v2, %v364_v13 }
  0xb6   :  { %608 = vst.msk [vmem:[%s1305_s3 + $0x1a8] sm:$0xff] %vm554_vm2, %v543_v11 }
  0xb7   :  { %v496_v16 = vmax.f32 %v317_v14, 0.0  ;;  %v512_v17 = vmax.f32 %v365_v15, 0.0 }
  0xb8   :  { %v412_v18 = vpop.f32.mrf.mxu2  ;;  %v460_v19 = vpop.f32.mrf.mxu3 }
  0xb9   :  { %561 = vst.msk [vmem:[%s1305_s3 + $0x30] sm:$0xff] %vm554_vm2, %v496_v16  ;;  %v413_v20 = vadd.f32 %v980_v2, %v412_v18  ;;  %v461_v21 = vadd.f32 %v980_v2, %v460_v19 }
  0xba   :  { %577 = vst.msk [vmem:[%s1305_s3 + $0xb0] sm:$0xff] %vm554_vm2, %v512_v17 }
  0xbb   :  { %v528_v22 = vmax.f32 %v413_v20, 0.0  ;;  %v544_v23 = vmax.f32 %v461_v21, 0.0 }
  0xbc   :  { %v319_v24 = vpop.f32.mrf.mxu0  ;;  %v367_v25 = vpop.f32.mrf.mxu1 }
  0xbd   :  { %593 = vst.msk [vmem:[%s1305_s3 + $0x130] sm:$0xff] %vm554_vm2, %v528_v22  ;;  %v320_v26 = vadd.f32 %v980_v2, %v319_v24  ;;  %v368_v27 = vadd.f32 %v980_v2, %v367_v25 }
  0xbe   :  { %609 = vst.msk [vmem:[%s1305_s3 + $0x1b0] sm:$0xff] %vm554_vm2, %v544_v23 }
  0xbf   :  { %v497_v28 = vmax.f32 %v320_v26, 0.0  ;;  %v513_v29 = vmax.f32 %v368_v27, 0.0 }
  0xc0   :  { %v415_v30 = vpop.f32.mrf.mxu2  ;;  %v463_v31 = vpop.f32.mrf.mxu3 }
  0xc1   :  { %562 = vst.msk [vmem:[%s1305_s3 + $0x38] sm:$0xff] %vm554_vm2, %v497_v28  ;;  %v416_v32 = vadd.f32 %v980_v2, %v415_v30  ;;  %v464_v33 = vadd.f32 %v980_v2, %v463_v31 }
  0xc2   :  { %578 = vst.msk [vmem:[%s1305_s3 + $0xb8] sm:$0xff] %vm554_vm2, %v513_v29 }
  0xc3   :  { %v529_v34 = vmax.f32 %v416_v32, 0.0  ;;  %v545_v35 = vmax.f32 %v464_v33, 0.0 }
  0xc4   :  { %v322_v36 = vpop.f32.mrf.mxu0  ;;  %v370_v37 = vpop.f32.mrf.mxu1 }
  0xc5   :  { %594 = vst.msk [vmem:[%s1305_s3 + $0x138] sm:$0xff] %vm554_vm2, %v529_v34  ;;  %v323_v38 = vadd.f32 %v980_v2, %v322_v36  ;;  %v371_v39 = vadd.f32 %v980_v2, %v370_v37 }
  0xc6   :  { %610 = vst.msk [vmem:[%s1305_s3 + $0x1b8] sm:$0xff] %vm554_vm2, %v545_v35 }
  0xc7   :  { %v498_v40 = vmax.f32 %v323_v38, 0.0  ;;  %v514_v41 = vmax.f32 %v371_v39, 0.0 }
  0xc8   :  { %v418_v42 = vpop.f32.mrf.mxu2  ;;  %v466_v43 = vpop.f32.mrf.mxu3 }
  0xc9   :  { %563 = vst.msk [vmem:[%s1305_s3 + $0x40] sm:$0xff] %vm554_vm2, %v498_v40  ;;  %v419_v44 = vadd.f32 %v980_v2, %v418_v42  ;;  %v467_v45 = vadd.f32 %v980_v2, %v466_v43 }
  0xca   :  { %579 = vst.msk [vmem:[%s1305_s3 + $0xc0] sm:$0xff] %vm554_vm2, %v514_v41 }
  0xcb   :  { %v530_v46 = vmax.f32 %v419_v44, 0.0  ;;  %v546_v47 = vmax.f32 %v467_v45, 0.0 }
  0xcc   :  { %v325_v48 = vpop.f32.mrf.mxu0  ;;  %v373_v49 = vpop.f32.mrf.mxu1 }
  0xcd   :  { %595 = vst.msk [vmem:[%s1305_s3 + $0x140] sm:$0xff] %vm554_vm2, %v530_v46  ;;  %v326_v50 = vadd.f32 %v980_v2, %v325_v48  ;;  %v374_v51 = vadd.f32 %v980_v2, %v373_v49 }
  0xce   :  { %611 = vst.msk [vmem:[%s1305_s3 + $0x1c0] sm:$0xff] %vm554_vm2, %v546_v47 }
  0xcf   :  { %v499_v52 = vmax.f32 %v326_v50, 0.0  ;;  %v515_v53 = vmax.f32 %v374_v51, 0.0 }
  0xd0   :  { %v421_v54 = vpop.f32.mrf.mxu2  ;;  %v469_v55 = vpop.f32.mrf.mxu3 }
  0xd1   :  { %564 = vst.msk [vmem:[%s1305_s3 + $0x48] sm:$0xff] %vm554_vm2, %v499_v52  ;;  %v422_v56 = vadd.f32 %v980_v2, %v421_v54  ;;  %v470_v57 = vadd.f32 %v980_v2, %v469_v55 }
  0xd2   :  { %580 = vst.msk [vmem:[%s1305_s3 + $0xc8] sm:$0xff] %vm554_vm2, %v515_v53 }
  0xd3   :  { %v531_v58 = vmax.f32 %v422_v56, 0.0  ;;  %v547_v59 = vmax.f32 %v470_v57, 0.0 }
  0xd4   :  { %v328_v60 = vpop.f32.mrf.mxu0  ;;  %v376_v61 = vpop.f32.mrf.mxu1 }
  0xd5   :  { %596 = vst.msk [vmem:[%s1305_s3 + $0x148] sm:$0xff] %vm554_vm2, %v531_v58  ;;  %v329_v62 = vadd.f32 %v980_v2, %v328_v60  ;;  %v377_v63 = vadd.f32 %v980_v2, %v376_v61 }
  0xd6   :  { %612 = vst.msk [vmem:[%s1305_s3 + $0x1c8] sm:$0xff] %vm554_vm2, %v547_v59 }
  0xd7   :  { %v500_v0 = vmax.f32 %v329_v62, 0.0  ;;  %v516_v1 = vmax.f32 %v377_v63, 0.0 }
  0xd8   :  { %v424_v3 = vpop.f32.mrf.mxu2  ;;  %v472_v4 = vpop.f32.mrf.mxu3 }
  0xd9   :  { %565 = vst.msk [vmem:[%s1305_s3 + $0x50] sm:$0xff] %vm554_vm2, %v500_v0  ;;  %v425_v5 = vadd.f32 %v980_v2, %v424_v3  ;;  %v473_v6 = vadd.f32 %v980_v2, %v472_v4 }
  0xda   :  { %581 = vst.msk [vmem:[%s1305_s3 + $0xd0] sm:$0xff] %vm554_vm2, %v516_v1 }
  0xdb   :  { %v532_v7 = vmax.f32 %v425_v5, 0.0  ;;  %v548_v8 = vmax.f32 %v473_v6, 0.0 }
  0xdc   :  { %v331_v9 = vpop.f32.mrf.mxu0  ;;  %v379_v10 = vpop.f32.mrf.mxu1 }
  0xdd   :  { %597 = vst.msk [vmem:[%s1305_s3 + $0x150] sm:$0xff] %vm554_vm2, %v532_v7  ;;  %v332_v11 = vadd.f32 %v980_v2, %v331_v9  ;;  %v380_v12 = vadd.f32 %v980_v2, %v379_v10 }
  0xde   :  { %613 = vst.msk [vmem:[%s1305_s3 + $0x1d0] sm:$0xff] %vm554_vm2, %v548_v8 }
  0xdf   :  { %v501_v13 = vmax.f32 %v332_v11, 0.0  ;;  %v517_v14 = vmax.f32 %v380_v12, 0.0 }
  0xe0   :  { %v427_v15 = vpop.f32.mrf.mxu2  ;;  %v475_v16 = vpop.f32.mrf.mxu3 }
  0xe1   :  { %566 = vst.msk [vmem:[%s1305_s3 + $0x58] sm:$0xff] %vm554_vm2, %v501_v13  ;;  %v428_v17 = vadd.f32 %v980_v2, %v427_v15  ;;  %v476_v18 = vadd.f32 %v980_v2, %v475_v16 }
  0xe2   :  { %582 = vst.msk [vmem:[%s1305_s3 + $0xd8] sm:$0xff] %vm554_vm2, %v517_v14 }
  0xe3   :  { %v533_v19 = vmax.f32 %v428_v17, 0.0  ;;  %v549_v20 = vmax.f32 %v476_v18, 0.0 }
  0xe4   :  { %v334_v21 = vpop.f32.mrf.mxu0  ;;  %v382_v22 = vpop.f32.mrf.mxu1 }
  0xe5   :  { %598 = vst.msk [vmem:[%s1305_s3 + $0x158] sm:$0xff] %vm554_vm2, %v533_v19  ;;  %v335_v23 = vadd.f32 %v980_v2, %v334_v21  ;;  %v383_v24 = vadd.f32 %v980_v2, %v382_v22 }
  0xe6   :  { %614 = vst.msk [vmem:[%s1305_s3 + $0x1d8] sm:$0xff] %vm554_vm2, %v549_v20 }
  0xe7   :  { %v502_v25 = vmax.f32 %v335_v23, 0.0  ;;  %v518_v26 = vmax.f32 %v383_v24, 0.0 }
  0xe8   :  { %v430_v27 = vpop.f32.mrf.mxu2  ;;  %v478_v28 = vpop.f32.mrf.mxu3 }
  0xe9   :  { %567 = vst.msk [vmem:[%s1305_s3 + $0x60] sm:$0xff] %vm554_vm2, %v502_v25  ;;  %v431_v29 = vadd.f32 %v980_v2, %v430_v27  ;;  %v479_v30 = vadd.f32 %v980_v2, %v478_v28 }
  0xea   :  { %583 = vst.msk [vmem:[%s1305_s3 + $0xe0] sm:$0xff] %vm554_vm2, %v518_v26 }
  0xeb   :  { %v534_v31 = vmax.f32 %v431_v29, 0.0  ;;  %v550_v32 = vmax.f32 %v479_v30, 0.0 }
  0xec   :  { %v337_v33 = vpop.f32.mrf.mxu0  ;;  %v385_v34 = vpop.f32.mrf.mxu1 }
  0xed   :  { %599 = vst.msk [vmem:[%s1305_s3 + $0x160] sm:$0xff] %vm554_vm2, %v534_v31  ;;  %v338_v35 = vadd.f32 %v980_v2, %v337_v33  ;;  %v386_v36 = vadd.f32 %v980_v2, %v385_v34 }
  0xee   :  { %615 = vst.msk [vmem:[%s1305_s3 + $0x1e0] sm:$0xff] %vm554_vm2, %v550_v32 }
  0xef   :  { %v503_v37 = vmax.f32 %v338_v35, 0.0  ;;  %v519_v38 = vmax.f32 %v386_v36, 0.0 }
  0xf0   :  { %v433_v39 = vpop.f32.mrf.mxu2  ;;  %v481_v40 = vpop.f32.mrf.mxu3 }
  0xf1   :  { %568 = vst.msk [vmem:[%s1305_s3 + $0x68] sm:$0xff] %vm554_vm2, %v503_v37  ;;  %v434_v41 = vadd.f32 %v980_v2, %v433_v39  ;;  %v482_v42 = vadd.f32 %v980_v2, %v481_v40 }
  0xf2   :  { %584 = vst.msk [vmem:[%s1305_s3 + $0xe8] sm:$0xff] %vm554_vm2, %v519_v38 }
  0xf3   :  { %v535_v43 = vmax.f32 %v434_v41, 0.0  ;;  %v551_v44 = vmax.f32 %v482_v42, 0.0 }
  0xf4   :  { %v340_v45 = vpop.f32.mrf.mxu0  ;;  %v388_v46 = vpop.f32.mrf.mxu1 }
  0xf5   :  { %600 = vst.msk [vmem:[%s1305_s3 + $0x168] sm:$0xff] %vm554_vm2, %v535_v43  ;;  %v341_v47 = vadd.f32 %v980_v2, %v340_v45  ;;  %v389_v48 = vadd.f32 %v980_v2, %v388_v46 }
  0xf6   :  { %616 = vst.msk [vmem:[%s1305_s3 + $0x1e8] sm:$0xff] %vm554_vm2, %v551_v44 }
  0xf7   :  { %v504_v49 = vmax.f32 %v341_v47, 0.0  ;;  %v520_v50 = vmax.f32 %v389_v48, 0.0 }
  0xf8   :  { %v436_v51 = vpop.f32.mrf.mxu2  ;;  %v484_v52 = vpop.f32.mrf.mxu3 }
  0xf9   :  { %569 = vst.msk [vmem:[%s1305_s3 + $0x70] sm:$0xff] %vm554_vm2, %v504_v49  ;;  %v437_v53 = vadd.f32 %v980_v2, %v436_v51  ;;  %v485_v54 = vadd.f32 %v980_v2, %v484_v52 }
  0xfa   :  { %585 = vst.msk [vmem:[%s1305_s3 + $0xf0] sm:$0xff] %vm554_vm2, %v520_v50 }
  0xfb   :  { %v536_v55 = vmax.f32 %v437_v53, 0.0  ;;  %v552_v56 = vmax.f32 %v485_v54, 0.0 }
  0xfc   :  { %v343_v57 = vpop.f32.mrf.mxu0  ;;  %v391_v58 = vpop.f32.mrf.mxu1 }
  0xfd   :  { %601 = vst.msk [vmem:[%s1305_s3 + $0x170] sm:$0xff] %vm554_vm2, %v536_v55  ;;  %v344_v59 = vadd.f32 %v980_v2, %v343_v57  ;;  %v392_v60 = vadd.f32 %v980_v2, %v391_v58 }
  0xfe   :  { %617 = vst.msk [vmem:[%s1305_s3 + $0x1f0] sm:$0xff] %vm554_vm2, %v552_v56 }
  0xff   :  { %v505_v61 = vmax.f32 %v344_v59, 0.0  ;;  %v521_v62 = vmax.f32 %v392_v60, 0.0 }
 0x100   :  { %v439_v63 = vpop.f32.mrf.mxu2  ;;  %v487_v0 = vpop.f32.mrf.mxu3 }
 0x101   :  { %570 = vst.msk [vmem:[%s1305_s3 + $0x78] sm:$0xff] %vm554_vm2, %v505_v61  ;;  %v440_v1 = vadd.f32 %v980_v2, %v439_v63  ;;  %v488_v3 = vadd.f32 %v980_v2, %v487_v0 }
 0x102   :  { %586 = vst.msk [vmem:[%s1305_s3 + $0xf8] sm:$0xff] %vm554_vm2, %v521_v62 }
 0x103   :  { %v537_v4 = vmax.f32 %v440_v1, 0.0  ;;  %v553_v5 = vmax.f32 %v488_v3, 0.0 }
 0x105   :  { %602 = vst.msk [vmem:[%s1305_s3 + $0x178] sm:$0xff] %vm554_vm2, %v537_v4 }
 0x106   :  { %618 = vst.msk [vmem:[%s1305_s3 + $0x1f8] sm:$0xff] %vm554_vm2, %v553_v5 }

// kernel: _unetback_features.9
= control target key start
LH: loop header
LB: loop body
LE: loop exit
PB: predicated region body
PF: predicated region fallthrough
CT: control target
= control target key end

     0   :  { %vm410_vm0 = vcmask 523264   ;;  %s3675_s1 = inlined_call_operand.vmem [shape: f32[576,64], index: 1, kind: input, shape index: {}]   ;;  %s3676_s0 = inlined_call_operand.vmem [shape: f32[512,576], index: 0, kind: input, shape index: {}]   ;;  %s3677_s2 = inlined_call_operand.vmem [shape: f32[1,64], index: 2, kind: input, shape index: {}]   ;;  %s3678_s3 = inlined_call_operand.vmem [shape: f32[512,64], index: 3, kind: output, shape index: {}]  }
   0x1   :  { %v349_v0 = vld [vmem:[%s3675_s1 + $0x78] sm:$0xff]  ;;  %v348_v1 = vld [vmem:[%s3675_s1 + $0x70] sm:$0xff]  ;;  %v347_v2 = vld [vmem:[%s3675_s1 + $0x68] sm:$0xff] }
   0x2   :  { %1844 = vmatpush.msra.mxu1 %v349_v0  ;;  %1845 = vmatpush.msra.mxu2 %v349_v0  ;;  %v346_v3 = vld [vmem:[%s3675_s1 + $0x60] sm:$0xff]  ;;  %v345_v4 = vld [vmem:[%s3675_s1 + $0x58] sm:$0xff]  ;;  %v344_v5 = vld [vmem:[%s3675_s1 + $0x50] sm:$0xff] }
   0x3   :  { %1846 = vmatpush.msra.mxu3 %v349_v0  ;;  %603 = vmatpush.msra.mxu0 %v349_v0  ;;  %v343_v6 = vld [vmem:[%s3675_s1 + $0x48] sm:$0xff]  ;;  %v342_v7 = vld [vmem:[%s3675_s1 + $0x40] sm:$0xff]  ;;  %v341_v8 = vld [vmem:[%s3675_s1 + $0x38] sm:$0xff] }
   0x4   :  { %1847 = vmatpush.msra.mxu1 %v348_v1  ;;  %1848 = vmatpush.msra.mxu2 %v348_v1  ;;  %v340_v9 = vld [vmem:[%s3675_s1 + $0x30] sm:$0xff]  ;;  %v339_v10 = vld [vmem:[%s3675_s1 + $0x28] sm:$0xff]  ;;  %v338_v11 = vld [vmem:[%s3675_s1 + $0x20] sm:$0xff] }
   0x5   :  { %1849 = vmatpush.msra.mxu3 %v348_v1  ;;  %604 = vmatpush.msra.mxu0 %v348_v1  ;;  %v337_v12 = vld [vmem:[%s3675_s1 + $0x18] sm:$0xff]  ;;  %v336_v13 = vld [vmem:[%s3675_s1 + $0x10] sm:$0xff]  ;;  %v335_v14 = vld [vmem:[%s3675_s1 + $0x8] sm:$0xff] }
   0x6   :  { %1850 = vmatpush.msra.mxu1 %v347_v2  ;;  %1851 = vmatpush.msra.mxu2 %v347_v2  ;;  %v334_v15 = vld [vmem:[%s3675_s1] sm:$0xff]  ;;  %v381_v18 = vld [vmem:[%s3675_s1 + $0x178] sm:$0xff]  ;;  %v380_v22 = vld [vmem:[%s3675_s1 + $0x170] sm:$0xff] }
   0x7   :  { %1852 = vmatpush.msra.mxu3 %v347_v2  ;;  %605 = vmatpush.msra.mxu0 %v347_v2  ;;  %v94_v16 = vld [vmem:[%s3676_s0 + $0x280] sm:$0xff]  ;;  %v365_v20 = vld [vmem:[%s3675_s1 + $0xf8] sm:$0xff]  ;;  %v364_v23 = vld [vmem:[%s3675_s1 + $0xf0] sm:$0xff] }
   0x8   :  { %1853 = vmatpush.msra.mxu1 %v346_v3  ;;  %1854 = vmatpush.msra.mxu2 %v346_v3  ;;  %v174_v17 = vld [vmem:[%s3676_s0 + $0x500] sm:$0xff]  ;;  %v397_v21 = vld [vmem:[%s3675_s1 + $0x1f8] sm:$0xff]  ;;  %v396_v25 = vld [vmem:[%s3675_s1 + $0x1f0] sm:$0xff] }
   0x9   :  { %1855 = vmatpush.msra.mxu3 %v346_v3  ;;  %606 = vmatpush.msra.mxu0 %v346_v3  ;;  %v254_v19 = vld [vmem:[%s3676_s0 + $0x780] sm:$0xff]  ;;  %v405_v26 = vld [vmem:[%s3675_s1 + $0x238] sm:$0xff]  ;;  %v379_v27 = vld [vmem:[%s3675_s1 + $0x168] sm:$0xff] }
   0xa   :  { %1856 = vmatpush.msra.mxu1 %v345_v4  ;;  %1857 = vmatpush.msra.mxu2 %v345_v4  ;;  %v14_v24 = vld [vmem:[%s3676_s0] sm:$0xff]  ;;  %v395_v28 = vld [vmem:[%s3675_s1 + $0x1e8] sm:$0xff]  ;;  %v404_v35 = vld [vmem:[%s3675_s1 + $0x230] sm:$0xff] }
   0xb   :  { %1858 = vmatpush.msra.mxu3 %v345_v4  ;;  %607 = vmatpush.msra.mxu0 %v345_v4  ;;  %v363_v29 = vld [vmem:[%s3675_s1 + $0xe8] sm:$0xff]  ;;  %v378_v32 = vld [vmem:[%s3675_s1 + $0x160] sm:$0xff]  ;;  %v377_v37 = vld [vmem:[%s3675_s1 + $0x158] sm:$0xff] }
   0xc   :  { %1859 = vmatpush.msra.mxu1 %v344_v5  ;;  %1860 = vmatpush.msra.mxu2 %v344_v5  ;;  %v99_v30 = vld [vmem:[%s3676_s0 + $0x2a8] sm:$0xff]  ;;  %v394_v33 = vld [vmem:[%s3675_s1 + $0x1e0] sm:$0xff]  ;;  %v393_v38 = vld [vmem:[%s3675_s1 + $0x1d8] sm:$0xff] }
   0xd   :  { %1861 = vmatpush.msra.mxu3 %v344_v5  ;;  %608 = vmatpush.msra.mxu0 %v344_v5  ;;  %v179_v31 = vld [vmem:[%s3676_s0 + $0x528] sm:$0xff]  ;;  %v362_v36 = vld [vmem:[%s3675_s1 + $0xe0] sm:$0xff]  ;;  %v361_v40 = vld [vmem:[%s3675_s1 + $0xd8] sm:$0xff] }
   0xe   :  { %1862 = vmatpush.msra.mxu1 %v343_v6  ;;  %1863 = vmatpush.msra.mxu2 %v343_v6  ;;  %v259_v34 = vld [vmem:[%s3676_s0 + $0x7a8] sm:$0xff]  ;;  %v376_v42 = vld [vmem:[%s3675_s1 + $0x150] sm:$0xff]  ;;  %v109_v52 = vld [vmem:[%s3676_s0 + $0x2f8] sm:$0xff] }
   0xf   :  { %1864 = vmatpush.msra.mxu3 %v343_v6  ;;  %609 = vmatpush.msra.mxu0 %v343_v6  ;;  %v19_v39 = vld [vmem:[%s3676_s0 + $0x28] sm:$0xff]  ;;  %v392_v43 = vld [vmem:[%s3675_s1 + $0x1d0] sm:$0xff]  ;;  %v189_v53 = vld [vmem:[%s3676_s0 + $0x578] sm:$0xff] }
  0x10   :  { %1865 = vmatpush.msra.mxu1 %v342_v7  ;;  %1866 = vmatpush.msra.mxu2 %v342_v7  ;;  %v403_v41 = vld [vmem:[%s3675_s1 + $0x228] sm:$0xff]  ;;  %v360_v44 = vld [vmem:[%s3675_s1 + $0xd0] sm:$0xff]  ;;  %v269_v54 = vld [vmem:[%s3676_s0 + $0x7f8] sm:$0xff] }
  0x11   :  { %1867 = vmatpush.msra.mxu3 %v342_v7  ;;  %610 = vmatpush.msra.mxu0 %v342_v7  ;;  %v104_v45 = vld [vmem:[%s3676_s0 + $0x2d0] sm:$0xff]  ;;  %v375_v48 = vld [vmem:[%s3675_s1 + $0x148] sm:$0xff]  ;;  %v374_v55 = vld [vmem:[%s3675_s1 + $0x140] sm:$0xff] }
  0x12   :  { %1868 = vmatpush.msra.mxu1 %v341_v8  ;;  %1869 = vmatpush.msra.mxu2 %v341_v8  ;;  %v184_v46 = vld [vmem:[%s3676_s0 + $0x550] sm:$0xff]  ;;  %v391_v50 = vld [vmem:[%s3675_s1 + $0x1c8] sm:$0xff]  ;;  %v29_v56 = vld [vmem:[%s3676_s0 + $0x78] sm:$0xff] }
  0x13   :  { %1870 = vmatpush.msra.mxu3 %v341_v8  ;;  %611 = vmatpush.msra.mxu0 %v341_v8  ;;  %v264_v47 = vld [vmem:[%s3676_s0 + $0x7d0] sm:$0xff]  ;;  %v359_v51 = vld [vmem:[%s3675_s1 + $0xc8] sm:$0xff]  ;;  %v390_v57 = vld [vmem:[%s3675_s1 + $0x1c0] sm:$0xff] }
  0x14   :  { %1871 = vmatpush.msra.mxu1 %v340_v9  ;;  %1872 = vmatpush.msra.mxu2 %v340_v9  ;;  %v24_v49 = vld [vmem:[%s3676_s0 + $0x50] sm:$0xff]  ;;  %v402_v58 = vld [vmem:[%s3675_s1 + $0x220] sm:$0xff]  ;;  %v373_v63 = vld [vmem:[%s3675_s1 + $0x138] sm:$0xff] }
  0x15   :  { %1873 = vmatpush.msra.mxu3 %v340_v9  ;;  %612 = vmatpush.msra.mxu0 %v340_v9  ;;  %v358_v59 = vld [vmem:[%s3675_s1 + $0xc0] sm:$0xff]  ;;  %v389_v1 = vld [vmem:[%s3675_s1 + $0x1b8] sm:$0xff]  ;;  %v119_v3 = vld [vmem:[%s3676_s0 + $0x348] sm:$0xff] }
  0x16   :  { %1874 = vmatpush.msra.mxu1 %v339_v10  ;;  %1875 = vmatpush.msra.mxu2 %v339_v10  ;;  %v114_v60 = vld [vmem:[%s3676_s0 + $0x320] sm:$0xff]  ;;  %v357_v2 = vld [vmem:[%s3675_s1 + $0xb8] sm:$0xff]  ;;  %v199_v4 = vld [vmem:[%s3676_s0 + $0x5c8] sm:$0xff] }
  0x17   :  { %1876 = vmatpush.msra.mxu3 %v339_v10  ;;  %613 = vmatpush.msra.mxu0 %v339_v10  ;;  %v194_v61 = vld [vmem:[%s3676_s0 + $0x5a0] sm:$0xff]  ;;  %v279_v5 = vld [vmem:[%s3676_s0 + $0x848] sm:$0xff]  ;;  %v372_v6 = vld [vmem:[%s3675_s1 + $0x130] sm:$0xff] }
  0x18   :  { %1877 = vmatpush.msra.mxu1 %v338_v11  ;;  %1878 = vmatpush.msra.mxu2 %v338_v11  ;;  %v274_v62 = vld [vmem:[%s3676_s0 + $0x820] sm:$0xff]  ;;  %v39_v7 = vld [vmem:[%s3676_s0 + $0xc8] sm:$0xff]  ;;  %v388_v8 = vld [vmem:[%s3675_s1 + $0x1b0] sm:$0xff] }
  0x19   :  { %1879 = vmatpush.msra.mxu3 %v338_v11  ;;  %614 = vmatpush.msra.mxu0 %v338_v11  ;;  %v34_v0 = vld [vmem:[%s3676_s0 + $0xa0] sm:$0xff]  ;;  %v401_v9 = vld [vmem:[%s3675_s1 + $0x218] sm:$0xff]  ;;  %v356_v10 = vld [vmem:[%s3675_s1 + $0xb0] sm:$0xff] }
  0x1a   :  { %1880 = vmatpush.msra.mxu1 %v337_v12  ;;  %1881 = vmatpush.msra.mxu2 %v337_v12  ;;  %v124_v11 = vld [vmem:[%s3676_s0 + $0x370] sm:$0xff] }
  0x1b   :  { %1882 = vmatpush.msra.mxu3 %v337_v12  ;;  %615 = vmatpush.msra.mxu0 %v337_v12  ;;  %v204_v12 = vld [vmem:[%s3676_s0 + $0x5f0] sm:$0xff] }
  0x1c   :  { %1883 = vmatpush.msra.mxu1 %v336_v13  ;;  %1884 = vmatpush.msra.mxu2 %v336_v13 }
  0x1d   :  { %1885 = vmatpush.msra.mxu3 %v336_v13  ;;  %616 = vmatpush.msra.mxu0 %v336_v13  ;;  %v284_v13 = vld [vmem:[%s3676_s0 + $0x870] sm:$0xff] }
  0x1e   :  { %1886 = vmatpush.msra.mxu1 %v335_v14  ;;  %1887 = vmatpush.msra.mxu2 %v335_v14 }
  0x1f   :  { %1888 = vmatpush.msra.mxu3 %v335_v14  ;;  %617 = vmatpush.msra.mxu0 %v335_v14  ;;  %v371_v14 = vld [vmem:[%s3675_s1 + $0x128] sm:$0xff] }
  0x20   :  { %1889 = vmatpush.msra.mxu1 %v334_v15  ;;  %1890 = vmatpush.msra.mxu2 %v334_v15 }
  0x21   :  { %667 = vmatmul.f32.vlgmr.msra.gmra.mxu1 %v94_v16  ;;  %715 = vmatmul.f32.vlgmr.msra.gmra.mxu2 %v174_v17  ;;  %v387_v16 = vld [vmem:[%s3675_s1 + $0x1a8] sm:$0xff] }
  0x22   :  { %1021 = vmatpush.msrb.mxu2 %v381_v18  ;;  %1891 = vmatpush.msra.mxu3 %v334_v15  ;;  %v355_v17 = vld [vmem:[%s3675_s1 + $0xa8] sm:$0xff]  ;;  %v129_v18 = vld [vmem:[%s3676_s0 + $0x398] sm:$0xff] }
  0x23   :  { %763 = vmatmul.f32.vlgmr.msra.gmra.mxu3 %v254_v19  ;;  %812 = vmatpush.msrb.mxu1 %v365_v20  ;;  %v209_v19 = vld [vmem:[%s3676_s0 + $0x618] sm:$0xff] }
  0x24   :  { %1230 = vmatpush.msrb.mxu3 %v397_v21  ;;  %1022 = vmatpush.msrb.mxu2 %v380_v22  ;;  %v289_v20 = vld [vmem:[%s3676_s0 + $0x898] sm:$0xff]  ;;  %v370_v21 = vld [vmem:[%s3675_s1 + $0x120] sm:$0xff] }
  0x25   :  { %618 = vmatpush.msra.mxu0 %v334_v15  ;;  %813 = vmatpush.msrb.mxu1 %v364_v23  ;;  %v44_v15 = vld [vmem:[%s3676_s0 + $0xf0] sm:$0xff]  ;;  %v49_v22 = vld [vmem:[%s3676_s0 + $0x118] sm:$0xff]  ;;  %v386_v23 = vld [vmem:[%s3675_s1 + $0x1a0] sm:$0xff] }
  0x26   :  { %619 = vmatmul.f32.vlgmr.msra.gmra.mxu0 %v14_v24  ;;  %1231 = vmatpush.msrb.mxu3 %v396_v25  ;;  %v400_v24 = vld [vmem:[%s3675_s1 + $0x210] sm:$0xff]  ;;  %v354_v25 = vld [vmem:[%s3675_s1 + $0xa0] sm:$0xff] }
  0x27   :  { %1447 = vmatpush.msrb.mxu0 %v405_v26  ;;  %1023 = vmatpush.msrb.mxu2 %v379_v27  ;;  %v134_v26 = vld [vmem:[%s3676_s0 + $0x3c0] sm:$0xff] }
  0x28   :  { %1232 = vmatpush.msrb.mxu3 %v395_v28  ;;  %814 = vmatpush.msrb.mxu1 %v363_v29  ;;  %v214_v27 = vld [vmem:[%s3676_s0 + $0x640] sm:$0xff]  ;;  %v369_v29 = vld [vmem:[%s3675_s1 + $0x118] sm:$0xff] }
  0x29   :  { %670 = vmatmul.f32.gmra.mxu1 %v99_v30  ;;  %718 = vmatmul.f32.gmra.mxu2 %v179_v31  ;;  %v294_v28 = vld [vmem:[%s3676_s0 + $0x8c0] sm:$0xff]  ;;  %v385_v31 = vld [vmem:[%s3675_s1 + $0x198] sm:$0xff] }
  0x2a   :  { %1024 = vmatpush.msrb.mxu2 %v378_v32  ;;  %1233 = vmatpush.msrb.mxu3 %v394_v33  ;;  %v54_v30 = vld [vmem:[%s3676_s0 + $0x140] sm:$0xff]  ;;  %v353_v32 = vld [vmem:[%s3675_s1 + $0x98] sm:$0xff]  ;;  %v139_v33 = vld [vmem:[%s3676_s0 + $0x3e8] sm:$0xff] }
  0x2b   :  { %766 = vmatmul.f32.gmra.mxu3 %v259_v34  ;;  %1448 = vmatpush.msrb.mxu0 %v404_v35  ;;  %v219_v34 = vld [vmem:[%s3676_s0 + $0x668] sm:$0xff] }
  0x2c   :  { %815 = vmatpush.msrb.mxu1 %v362_v36  ;;  %1025 = vmatpush.msrb.mxu2 %v377_v37  ;;  %v299_v35 = vld [vmem:[%s3676_s0 + $0x8e8] sm:$0xff]  ;;  %v368_v36 = vld [vmem:[%s3675_s1 + $0x110] sm:$0xff] }
  0x2d   :  { %1234 = vmatpush.msrb.mxu3 %v393_v38  ;;  %1449 = vmatpush.msrb.mxu0 %v403_v41  ;;  %v59_v37 = vld [vmem:[%s3676_s0 + $0x168] sm:$0xff]  ;;  %v384_v38 = vld [vmem:[%s3675_s1 + $0x190] sm:$0xff] }
  0x2e   :  { %622 = vmatmul.f32.gmra.mxu0 %v19_v39  ;;  %816 = vmatpush.msrb.mxu1 %v361_v40  ;;  %v399_v39 = vld [vmem:[%s3675_s1 + $0x208] sm:$0xff]  ;;  %v352_v40 = vld [vmem:[%s3675_s1 + $0x90] sm:$0xff] }
  0x2f   :  { %1026 = vmatpush.msrb.mxu2 %v376_v42  ;;  %1235 = vmatpush.msrb.mxu3 %v392_v43  ;;  %v144_v41 = vld [vmem:[%s3676_s0 + $0x410] sm:$0xff] }
  0x30   :  { %817 = vmatpush.msrb.mxu1 %v360_v44  ;;  %1450 = vmatpush.msrb.mxu0 %v402_v58  ;;  %v224_v42 = vld [vmem:[%s3676_s0 + $0x690] sm:$0xff]  ;;  %v367_v44 = vld [vmem:[%s3675_s1 + $0x108] sm:$0xff]  ;;  %v314_v58 = vld [vmem:[%s3676_s0 + $0x960] sm:$0xff] }
  0x31   :  { %673 = vmatmul.f32.gmra.mxu1 %v104_v45  ;;  %721 = vmatmul.f32.gmra.mxu2 %v184_v46  ;;  %v304_v43 = vld [vmem:[%s3676_s0 + $0x910] sm:$0xff]  ;;  %v383_v46 = vld [vmem:[%s3675_s1 + $0x188] sm:$0xff] }
  0x32   :  { %1027 = vmatpush.msrb.mxu2 %v375_v48  ;;  %1236 = vmatpush.msrb.mxu3 %v391_v50  ;;  %v64_v45 = vld [vmem:[%s3676_s0 + $0x190] sm:$0xff]  ;;  %v149_v48 = vld [vmem:[%s3676_s0 + $0x438] sm:$0xff] }
  0x33   :  { %769 = vmatmul.f32.gmra.mxu3 %v264_v47  ;;  %818 = vmatpush.msrb.mxu1 %v359_v51  ;;  %v351_v47 = vld [vmem:[%s3675_s1 + $0x88] sm:$0xff]  ;;  %v309_v50 = vld [vmem:[%s3676_s0 + $0x938] sm:$0xff]  ;;  %v366_v51 = vld [vmem:[%s3675_s1 + $0x100] sm:$0xff] }
  0x34   :  { %1028 = vmatpush.msrb.mxu2 %v374_v55  ;;  %1237 = vmatpush.msrb.mxu3 %v390_v57  ;;  %v350_v55 = vld [vmem:[%s3675_s1 + $0x80] sm:$0xff] }
  0x35   :  { %819 = vmatpush.msrb.mxu1 %v358_v59  ;;  %1451 = vmatpush.msrb.mxu0 %v401_v9  ;;  %v234_v57 = vld [vmem:[%s3676_s0 + $0x6e0] sm:$0xff]  ;;  %v15_v9 = vld [vmem:[%s3676_s0 + $0x8] sm:$0xff] }
  0x36   :  { %625 = vmatmul.f32.gmra.mxu0 %v24_v49  ;;  %1029 = vmatpush.msrb.mxu2 %v373_v63  ;;  %v229_v49 = vld [vmem:[%s3676_s0 + $0x6b8] sm:$0xff]  ;;  %v74_v59 = vld [vmem:[%s3676_s0 + $0x1e0] sm:$0xff]  ;;  %v79_v63 = vld [vmem:[%s3676_s0 + $0x208] sm:$0xff] }
  0x37   :  { %1238 = vmatpush.msrb.mxu3 %v389_v1  ;;  %820 = vmatpush.msrb.mxu1 %v357_v2  ;;  %v244_v1 = vld [vmem:[%s3676_s0 + $0x730] sm:$0xff] }
  0x38   :  { %1030 = vmatpush.msrb.mxu2 %v372_v6  ;;  %1452 = vmatpush.msrb.mxu0 %v400_v24  ;;  %v324_v2 = vld [vmem:[%s3676_s0 + $0x9b0] sm:$0xff]  ;;  %v329_v6 = vld [vmem:[%s3676_s0 + $0x9d8] sm:$0xff] }
  0x39   :  { %676 = vmatmul.f32.gmra.mxu1 %v109_v52  ;;  %724 = vmatmul.f32.gmra.mxu2 %v189_v53  ;;  %v69_v52 = vld [vmem:[%s3676_s0 + $0x1b8] sm:$0xff]  ;;  %v382_v53 = vld [vmem:[%s3675_s1 + $0x180] sm:$0xff] }
  0x3a   :  { %1239 = vmatpush.msrb.mxu3 %v388_v8  ;;  %821 = vmatpush.msrb.mxu1 %v356_v10  ;;  %v16_v10 = vld [vmem:[%s3676_s0 + $0x10] sm:$0xff] }
  0x3b   :  { %772 = vmatmul.f32.gmra.mxu3 %v269_v54  ;;  %1031 = vmatpush.msrb.mxu2 %v371_v14  ;;  %v398_v54 = vld [vmem:[%s3675_s1 + $0x200] sm:$0xff] }
  0x3c   :  { %1240 = vmatpush.msrb.mxu3 %v387_v16  ;;  %822 = vmatpush.msrb.mxu1 %v355_v17  ;;  %v20_v17 = vld [vmem:[%s3676_s0 + $0x30] sm:$0xff] }
  0x3d   :  { %1032 = vmatpush.msrb.mxu2 %v370_v21  ;;  %1453 = vmatpush.msrb.mxu0 %v399_v39  ;;  %v23_v21 = vld [vmem:[%s3676_s0 + $0x48] sm:$0xff] }
  0x3e   :  { %628 = vmatmul.f32.gmra.mxu0 %v29_v56  ;;  %1241 = vmatpush.msrb.mxu3 %v386_v23  ;;  %v154_v56 = vld [vmem:[%s3676_s0 + $0x460] sm:$0xff] }
  0x3f   :  { %823 = vmatpush.msrb.mxu1 %v354_v25  ;;  %1033 = vmatpush.msrb.mxu2 %v369_v29  ;;  %v25_v25 = vld [vmem:[%s3676_s0 + $0x58] sm:$0xff]  ;;  %v28_v29 = vld [vmem:[%s3676_s0 + $0x70] sm:$0xff] }
  0x40   :  { %1242 = vmatpush.msrb.mxu3 %v385_v31  ;;  %1454 = vmatpush.msrb.mxu0 %v398_v54 }
  0x41   :  { %679 = vmatmul.f32.gmra.mxu1 %v114_v60  ;;  %727 = vmatmul.f32.gmra.mxu2 %v194_v61  ;;  %v159_v60 = vld [vmem:[%s3676_s0 + $0x488] sm:$0xff] }
  0x42   :  { %824 = vmatpush.msrb.mxu1 %v353_v32  ;;  %1034 = vmatpush.msrb.mxu2 %v368_v36  ;;  %v239_v61 = vld [vmem:[%s3676_s0 + $0x708] sm:$0xff] }
  0x43   :  { %775 = vmatmul.f32.gmra.mxu3 %v274_v62  ;;  %v319_v62 = vld [vmem:[%s3676_s0 + $0x988] sm:$0xff] }
  0x44   :  { %1243 = vmatpush.msrb.mxu3 %v384_v38  ;;  %825 = vmatpush.msrb.mxu1 %v352_v40 }
  0x45   :  { %1035 = vmatpush.msrb.mxu2 %v367_v44 }
  0x46   :  { %631 = vmatmul.f32.gmra.mxu0 %v34_v0  ;;  %1244 = vmatpush.msrb.mxu3 %v383_v46  ;;  %v164_v0 = vld [vmem:[%s3676_s0 + $0x4b0] sm:$0xff] }
  0x47   :  { %826 = vmatpush.msrb.mxu1 %v351_v47  ;;  %1036 = vmatpush.msrb.mxu2 %v366_v51  ;;  %v42_v51 = vld [vmem:[%s3676_s0 + $0xe0] sm:$0xff] }
  0x48   :  { %1245 = vmatpush.msrb.mxu3 %v382_v53  ;;  %v43_v53 = vld [vmem:[%s3676_s0 + $0xe8] sm:$0xff] }
  0x49   :  { %682 = vmatmul.f32.gmra.mxu1 %v119_v3  ;;  %730 = vmatmul.f32.gmra.mxu2 %v199_v4  ;;  %v84_v3 = vld [vmem:[%s3676_s0 + $0x230] sm:$0xff]  ;;  %v169_v4 = vld [vmem:[%s3676_s0 + $0x4d8] sm:$0xff] }
  0x4a   :  { %827 = vmatpush.msrb.mxu1 %v350_v55 }
  0x4b   :  { %778 = vmatmul.f32.gmra.mxu3 %v279_v5  ;;  %v249_v5 = vld [vmem:[%s3676_s0 + $0x758] sm:$0xff] }
  0x4e   :  { %634 = vmatmul.f32.gmra.mxu0 %v39_v7  ;;  %v89_v7 = vld [vmem:[%s3676_s0 + $0x258] sm:$0xff] }
  0x51   :  { %685 = vmatmul.f32.gmra.mxu1 %v124_v11  ;;  %733 = vmatmul.f32.gmra.mxu2 %v204_v12  ;;  %v17_v11 = vld [vmem:[%s3676_s0 + $0x18] sm:$0xff] }
  0x53   :  { %781 = vmatmul.f32.gmra.mxu3 %v284_v13  ;;  %v18_v13 = vld [vmem:[%s3676_s0 + $0x20] sm:$0xff] }
  0x56   :  { %637 = vmatmul.f32.gmra.mxu0 %v44_v15 }
  0x59   :  { %688 = vmatmul.f32.gmra.mxu1 %v129_v18  ;;  %736 = vmatmul.f32.gmra.mxu2 %v209_v19  ;;  %v21_v18 = vld [vmem:[%s3676_s0 + $0x38] sm:$0xff]  ;;  %v22_v19 = vld [vmem:[%s3676_s0 + $0x40] sm:$0xff] }
  0x5b   :  { %784 = vmatmul.f32.gmra.mxu3 %v289_v20 }
  0x5e   :  { %640 = vmatmul.f32.gmra.mxu0 %v49_v22 }
  0x61   :  { %691 = vmatmul.f32.gmra.mxu1 %v134_v26  ;;  %739 = vmatmul.f32.gmra.mxu2 %v214_v27  ;;  %v26_v26 = vld [vmem:[%s3676_s0 + $0x60] sm:$0xff]  ;;  %v27_v27 = vld [vmem:[%s3676_s0 + $0x68] sm:$0xff] }
  0x63   :  { %787 = vmatmul.f32.gmra.mxu3 %v294_v28 }
  0x66   :  { %643 = vmatmul.f32.gmra.mxu0 %v54_v30 }
  0x69   :  { %694 = vmatmul.f32.gmra.mxu1 %v139_v33  ;;  %742 = vmatmul.f32.gmra.mxu2 %v219_v34  ;;  %v30_v33 = vld [vmem:[%s3676_s0 + $0x80] sm:$0xff]  ;;  %v31_v34 = vld [vmem:[%s3676_s0 + $0x88] sm:$0xff] }
  0x6b   :  { %790 = vmatmul.f32.gmra.mxu3 %v299_v35  ;;  %v32_v35 = vld [vmem:[%s3676_s0 + $0x90] sm:$0xff] }
  0x6e   :  { %646 = vmatmul.f32.gmra.mxu0 %v59_v37  ;;  %v33_v37 = vld [vmem:[%s3676_s0 + $0x98] sm:$0xff] }
  0x71   :  { %697 = vmatmul.f32.gmra.mxu1 %v144_v41  ;;  %745 = vmatmul.f32.gmra.mxu2 %v224_v42  ;;  %v35_v41 = vld [vmem:[%s3676_s0 + $0xa8] sm:$0xff]  ;;  %v36_v42 = vld [vmem:[%s3676_s0 + $0xb0] sm:$0xff] }
  0x73   :  { %793 = vmatmul.f32.gmra.mxu3 %v304_v43  ;;  %v37_v43 = vld [vmem:[%s3676_s0 + $0xb8] sm:$0xff] }
  0x76   :  { %649 = vmatmul.f32.gmra.mxu0 %v64_v45  ;;  %v38_v45 = vld [vmem:[%s3676_s0 + $0xc0] sm:$0xff] }
  0x79   :  { %700 = vmatmul.f32.gmra.mxu1 %v149_v48  ;;  %748 = vmatmul.f32.gmra.mxu2 %v229_v49  ;;  %v40_v49 = vld [vmem:[%s3676_s0 + $0xd0] sm:$0xff] }
  0x7b   :  { %796 = vmatmul.f32.gmra.mxu3 %v309_v50  ;;  %v41_v50 = vld [vmem:[%s3676_s0 + $0xd8] sm:$0xff] }
  0x7e   :  { %652 = vmatmul.f32.gmra.mxu0 %v69_v52 }
  0x81   :  { %703 = vmatmul.f32.gmra.mxu1 %v154_v56  ;;  %751 = vmatmul.f32.gmra.mxu2 %v234_v57  ;;  %v45_v57 = vld [vmem:[%s3676_s0 + $0xf8] sm:$0xff] }
  0x83   :  { %799 = vmatmul.f32.gmra.mxu3 %v314_v58  ;;  %v46_v58 = vld [vmem:[%s3676_s0 + $0x100] sm:$0xff] }
  0x86   :  { %655 = vmatmul.f32.gmra.mxu0 %v74_v59  ;;  %v47_v59 = vld [vmem:[%s3676_s0 + $0x108] sm:$0xff] }
  0x89   :  { %706 = vmatmul.f32.gmra.mxu1 %v159_v60  ;;  %754 = vmatmul.f32.gmra.mxu2 %v239_v61  ;;  %v48_v61 = vld [vmem:[%s3676_s0 + $0x110] sm:$0xff] }
  0x8b   :  { %802 = vmatmul.f32.gmra.mxu3 %v319_v62 }
  0x8e   :  { %658 = vmatmul.f32.gmra.mxu0 %v79_v63 }
  0x91   :  { %709 = vmatmul.f32.gmra.mxu1 %v164_v0  ;;  %757 = vmatmul.f32.gmra.mxu2 %v244_v1  ;;  %v50_v1 = vld [vmem:[%s3676_s0 + $0x120] sm:$0xff] }
  0x93   :  { %805 = vmatmul.f32.gmra.mxu3 %v324_v2  ;;  %v51_v2 = vld [vmem:[%s3676_s0 + $0x128] sm:$0xff] }
  0x96   :  { %661 = vmatmul.f32.gmra.mxu0 %v84_v3  ;;  %v52_v3 = vld [vmem:[%s3676_s0 + $0x130] sm:$0xff] }
  0x99   :  { %712 = vmatmul.f32.gmra.mxu1 %v169_v4  ;;  %760 = vmatmul.f32.gmra.mxu2 %v249_v5  ;;  %v53_v5 = vld [vmem:[%s3676_s0 + $0x138] sm:$0xff] }
  0x9b   :  { %808 = vmatmul.f32.gmra.mxu3 %v329_v6 }
  0x9e   :  { %v2323_v8 = vpop.f32.mrf.mxu1  ;;  %664 = vmatmul.f32.gmra.mxu0 %v89_v7 }
  0xa1   :  { %828 = vmatmul.f32.vlgmr.msrb.gmra.mxu1 %v15_v9  ;;  %1037 = vmatmul.f32.vlgmr.msrb.gmra.mxu2 %v16_v10  ;;  %v55_v10 = vld [vmem:[%s3676_s0 + $0x148] sm:$0xff] }
  0xa3   :  { %1246 = vmatmul.f32.vlgmr.msrb.gmra.mxu3 %v17_v11  ;;  %v2334_v12 = vpop.f32.mrf.mxu0  ;;  %v56_v11 = vld [vmem:[%s3676_s0 + $0x150] sm:$0xff] }
  0xa4   :  { %v2339_v14 = vpop.f32.mrf.mxu2 }
  0xa6   :  { %v2341_v15 = vpop.f32.mrf.mxu1  ;;  %v2343_v16 = vpop.f32.mrf.mxu3  ;;  %1780 = vmatmul.msk.f32.vlgmr.msrb.gmra.mxu0 %vm410_vm0, %v18_v13  ;;  %v57_v13 = vld [vmem:[%s3676_s0 + $0x158] sm:$0xff] }
  0xa9   :  { %831 = vmatmul.f32.gmra.mxu1 %v20_v17  ;;  %1040 = vmatmul.f32.gmra.mxu2 %v21_v18  ;;  %v58_v18 = vld [vmem:[%s3676_s0 + $0x160] sm:$0xff] }
  0xab   :  { %1249 = vmatmul.f32.gmra.mxu3 %v22_v19  ;;  %v2355_v20 = vpop.f32.mrf.mxu0 }
  0xac   :  { %v2360_v22 = vpop.f32.mrf.mxu2 }
  0xae   :  { %v2362_v23 = vpop.f32.mrf.mxu1  ;;  %v2364_v24 = vpop.f32.mrf.mxu3  ;;  %1781 = vmatmul.msk.f32.gmra.mxu0 %vm410_vm0, %v23_v21 }
  0xaf   :  { %3679 = vst [vmem:[#allocation2_spill] sm:$0xff] %v2364_v24  ;;  %v103_v24 = vld [vmem:[%s3676_s0 + $0x2c8] sm:$0xff] }
  0xb1   :  { %834 = vmatmul.f32.gmra.mxu1 %v25_v25  ;;  %1043 = vmatmul.f32.gmra.mxu2 %v26_v26  ;;  %v60_v26 = vld [vmem:[%s3676_s0 + $0x170] sm:$0xff] }
  0xb3   :  { %1252 = vmatmul.f32.gmra.mxu3 %v27_v27  ;;  %v2376_v28 = vpop.f32.mrf.mxu0  ;;  %v61_v27 = vld [vmem:[%s3676_s0 + $0x178] sm:$0xff] }
  0xb4   :  { %v2381_v30 = vpop.f32.mrf.mxu2 }
  0xb6   :  { %v2383_v31 = vpop.f32.mrf.mxu1  ;;  %v2385_v32 = vpop.f32.mrf.mxu3  ;;  %1782 = vmatmul.msk.f32.gmra.mxu0 %vm410_vm0, %v28_v29  ;;  %v62_v29 = vld [vmem:[%s3676_s0 + $0x180] sm:$0xff] }
  0xb7   :  { %3680 = vst [vmem:[#allocation3_spill] sm:$0xff] %v2385_v32  ;;  %v100_v32 = vld [vmem:[%s3676_s0 + $0x2b0] sm:$0xff] }
  0xb9   :  { %837 = vmatmul.f32.gmra.mxu1 %v30_v33  ;;  %1046 = vmatmul.f32.gmra.mxu2 %v31_v34  ;;  %v63_v34 = vld [vmem:[%s3676_s0 + $0x188] sm:$0xff] }
  0xbb   :  { %1255 = vmatmul.f32.gmra.mxu3 %v32_v35  ;;  %v2397_v36 = vpop.f32.mrf.mxu0 }
  0xbc   :  { %v2402_v38 = vpop.f32.mrf.mxu2 }
  0xbe   :  { %v2404_v39 = vpop.f32.mrf.mxu1  ;;  %v2406_v40 = vpop.f32.mrf.mxu3  ;;  %1783 = vmatmul.msk.f32.gmra.mxu0 %vm410_vm0, %v33_v37 }
  0xbf   :  { %3681 = vst [vmem:[#allocation4_spill] sm:$0xff] %v2406_v40 }
  0xc1   :  { %840 = vmatmul.f32.gmra.mxu1 %v35_v41  ;;  %1049 = vmatmul.f32.gmra.mxu2 %v36_v42  ;;  %v65_v42 = vld [vmem:[%s3676_s0 + $0x198] sm:$0xff] }
  0xc3   :  { %1258 = vmatmul.f32.gmra.mxu3 %v37_v43  ;;  %v2418_v44 = vpop.f32.mrf.mxu0  ;;  %v66_v43 = vld [vmem:[%s3676_s0 + $0x1a0] sm:$0xff] }
  0xc4   :  { %v2423_v46 = vpop.f32.mrf.mxu2 }
  0xc6   :  { %v2425_v47 = vpop.f32.mrf.mxu1  ;;  %v2427_v48 = vpop.f32.mrf.mxu3  ;;  %1784 = vmatmul.msk.f32.gmra.mxu0 %vm410_vm0, %v38_v45  ;;  %v67_v45 = vld [vmem:[%s3676_s0 + $0x1a8] sm:$0xff] }
  0xc7   :  { %3682 = vst [vmem:[#allocation5_spill] sm:$0xff] %v2427_v48 }
  0xc9   :  { %843 = vmatmul.f32.gmra.mxu1 %v40_v49  ;;  %1052 = vmatmul.f32.gmra.mxu2 %v41_v50  ;;  %v68_v50 = vld [vmem:[%s3676_s0 + $0x1b0] sm:$0xff] }
  0xcb   :  { %1261 = vmatmul.f32.gmra.mxu3 %v42_v51  ;;  %v2439_v52 = vpop.f32.mrf.mxu0 }
  0xcc   :  { %v2444_v54 = vpop.f32.mrf.mxu2 }
  0xce   :  { %v2446_v55 = vpop.f32.mrf.mxu1  ;;  %v2448_v56 = vpop.f32.mrf.mxu3  ;;  %1785 = vmatmul.msk.f32.gmra.mxu0 %vm410_vm0, %v43_v53 }
  0xcf   :  { %3683 = vst [vmem:[#allocation6_spill] sm:$0xff] %v2448_v56 }
  0xd1   :  { %846 = vmatmul.f32.gmra.mxu1 %v45_v57  ;;  %1055 = vmatmul.f32.gmra.mxu2 %v46_v58  ;;  %v70_v58 = vld [vmem:[%s3676_s0 + $0x1c0] sm:$0xff] }
  0xd3   :  { %1264 = vmatmul.f32.gmra.mxu3 %v47_v59  ;;  %v2460_v60 = vpop.f32.mrf.mxu0  ;;  %v71_v59 = vld [vmem:[%s3676_s0 + $0x1c8] sm:$0xff] }
  0xd4   :  { %v2465_v62 = vpop.f32.mrf.mxu2 }
  0xd6   :  { %v2467_v63 = vpop.f32.mrf.mxu1  ;;  %v2469_v0 = vpop.f32.mrf.mxu3  ;;  %1786 = vmatmul.msk.f32.gmra.mxu0 %vm410_vm0, %v48_v61  ;;  %v72_v61 = vld [vmem:[%s3676_s0 + $0x1d0] sm:$0xff] }
  0xd7   :  { %3684 = vst [vmem:[#allocation7_spill] sm:$0xff] %v2469_v0 }
  0xd9   :  { %849 = vmatmul.f32.gmra.mxu1 %v50_v1  ;;  %1058 = vmatmul.f32.gmra.mxu2 %v51_v2  ;;  %v73_v2 = vld [vmem:[%s3676_s0 + $0x1d8] sm:$0xff] }
  0xdb   :  { %1267 = vmatmul.f32.gmra.mxu3 %v52_v3  ;;  %v2481_v4 = vpop.f32.mrf.mxu0 }
  0xdc   :  { %v2486_v6 = vpop.f32.mrf.mxu2 }
  0xde   :  { %v2488_v7 = vpop.f32.mrf.mxu1  ;;  %v2490_v9 = vpop.f32.mrf.mxu3  ;;  %1787 = vmatmul.msk.f32.gmra.mxu0 %vm410_vm0, %v53_v5 }
  0xdf   :  { %3685 = vst [vmem:[#allocation8_spill] sm:$0xff] %v2490_v9 }
  0xe1   :  { %852 = vmatmul.f32.gmra.mxu1 %v55_v10  ;;  %1061 = vmatmul.f32.gmra.mxu2 %v56_v11  ;;  %v75_v11 = vld [vmem:[%s3676_s0 + $0x1e8] sm:$0xff] }
  0xe3   :  { %1270 = vmatmul.f32.gmra.mxu3 %v57_v13  ;;  %v2502_v17 = vpop.f32.mrf.mxu0  ;;  %v76_v13 = vld [vmem:[%s3676_s0 + $0x1f0] sm:$0xff] }
  0xe4   :  { %v2507_v19 = vpop.f32.mrf.mxu2 }
  0xe6   :  { %v2509_v21 = vpop.f32.mrf.mxu1  ;;  %v2511_v25 = vpop.f32.mrf.mxu3  ;;  %1788 = vmatmul.msk.f32.gmra.mxu0 %vm410_vm0, %v58_v18  ;;  %v77_v18 = vld [vmem:[%s3676_s0 + $0x1f8] sm:$0xff] }
  0xe7   :  { %3686 = vst [vmem:[#allocation9_spill] sm:$0xff] %v2511_v25 }
  0xe9   :  { %855 = vmatmul.f32.gmra.mxu1 %v60_v26  ;;  %1064 = vmatmul.f32.gmra.mxu2 %v61_v27  ;;  %v78_v27 = vld [vmem:[%s3676_s0 + $0x200] sm:$0xff] }
  0xeb   :  { %1273 = vmatmul.f32.gmra.mxu3 %v62_v29  ;;  %v2523_v33 = vpop.f32.mrf.mxu0 }
  0xec   :  { %v2528_v35 = vpop.f32.mrf.mxu2 }
  0xee   :  { %v2530_v37 = vpop.f32.mrf.mxu1  ;;  %v2532_v41 = vpop.f32.mrf.mxu3  ;;  %1789 = vmatmul.msk.f32.gmra.mxu0 %vm410_vm0, %v63_v34 }
  0xef   :  { %3687 = vst [vmem:[#allocation10_spill] sm:$0xff] %v2532_v41 }
  0xf1   :  { %858 = vmatmul.f32.gmra.mxu1 %v65_v42  ;;  %1067 = vmatmul.f32.gmra.mxu2 %v66_v43  ;;  %v80_v43 = vld [vmem:[%s3676_s0 + $0x210] sm:$0xff] }
  0xf3   :  { %1276 = vmatmul.f32.gmra.mxu3 %v67_v45  ;;  %v2544_v49 = vpop.f32.mrf.mxu0  ;;  %v81_v45 = vld [vmem:[%s3676_s0 + $0x218] sm:$0xff] }
  0xf4   :  { %v2549_v51 = vpop.f32.mrf.mxu2 }
  0xf6   :  { %v2551_v53 = vpop.f32.mrf.mxu1  ;;  %v2553_v57 = vpop.f32.mrf.mxu3  ;;  %1790 = vmatmul.msk.f32.gmra.mxu0 %vm410_vm0, %v68_v50  ;;  %v82_v50 = vld [vmem:[%s3676_s0 + $0x220] sm:$0xff] }
  0xf7   :  { %3688 = vst [vmem:[#allocation11_spill] sm:$0xff] %v2553_v57 }
  0xf9   :  { %861 = vmatmul.f32.gmra.mxu1 %v70_v58  ;;  %1070 = vmatmul.f32.gmra.mxu2 %v71_v59  ;;  %v83_v59 = vld [vmem:[%s3676_s0 + $0x228] sm:$0xff] }
  0xfb   :  { %1279 = vmatmul.f32.gmra.mxu3 %v72_v61  ;;  %v2565_v1 = vpop.f32.mrf.mxu0 }
  0xfc   :  { %v2570_v3 = vpop.f32.mrf.mxu2 }
  0xfe   :  { %v2572_v5 = vpop.f32.mrf.mxu1  ;;  %v2574_v10 = vpop.f32.mrf.mxu3  ;;  %1791 = vmatmul.msk.f32.gmra.mxu0 %vm410_vm0, %v73_v2 }
  0xff   :  { %3689 = vst [vmem:[#allocation12_spill] sm:$0xff] %v2574_v10 }
 0x101   :  { %864 = vmatmul.f32.gmra.mxu1 %v75_v11  ;;  %1073 = vmatmul.f32.gmra.mxu2 %v76_v13  ;;  %v85_v13 = vld [vmem:[%s3676_s0 + $0x238] sm:$0xff] }
 0x103   :  { %1282 = vmatmul.f32.gmra.mxu3 %v77_v18  ;;  %v2586_v26 = vpop.f32.mrf.mxu0  ;;  %v86_v18 = vld [vmem:[%s3676_s0 + $0x240] sm:$0xff] }
 0x104   :  { %v2591_v29 = vpop.f32.mrf.mxu2 }
 0x106   :  { %v2593_v34 = vpop.f32.mrf.mxu1  ;;  %v2595_v42 = vpop.f32.mrf.mxu3  ;;  %1792 = vmatmul.msk.f32.gmra.mxu0 %vm410_vm0, %v78_v27  ;;  %v87_v27 = vld [vmem:[%s3676_s0 + $0x248] sm:$0xff] }
 0x107   :  { %3690 = vst [vmem:[#allocation13_spill] sm:$0xff] %v2595_v42 }
 0x109   :  { %867 = vmatmul.f32.gmra.mxu1 %v80_v43  ;;  %1076 = vmatmul.f32.gmra.mxu2 %v81_v45  ;;  %v88_v45 = vld [vmem:[%s3676_s0 + $0x250] sm:$0xff] }
 0x10b   :  { %1285 = vmatmul.f32.gmra.mxu3 %v82_v50  ;;  %v2607_v58 = vpop.f32.mrf.mxu0 }
 0x10c   :  { %v2612_v61 = vpop.f32.mrf.mxu2 }
 0x10e   :  { %v2614_v2 = vpop.f32.mrf.mxu1  ;;  %v2616_v11 = vpop.f32.mrf.mxu3  ;;  %1793 = vmatmul.msk.f32.gmra.mxu0 %vm410_vm0, %v83_v59  ;;  %v90_v59 = vld [vmem:[%s3676_s0 + $0x260] sm:$0xff] }
 0x10f   :  { %3691 = vst [vmem:[#allocation14_spill] sm:$0xff] %v2616_v11 }
 0x111   :  { %870 = vmatmul.f32.gmra.mxu1 %v85_v13  ;;  %1079 = vmatmul.f32.gmra.mxu2 %v86_v18  ;;  %v91_v13 = vld [vmem:[%s3676_s0 + $0x268] sm:$0xff]  ;;  %v92_v18 = vld [vmem:[%s3676_s0 + $0x270] sm:$0xff] }
 0x113   :  { %1288 = vmatmul.f32.gmra.mxu3 %v87_v27  ;;  %v2628_v43 = vpop.f32.mrf.mxu0 }
 0x114   :  { %v2633_v50 = vpop.f32.mrf.mxu2 }
 0x116   :  { %v2635_v11 = vpop.f32.mrf.mxu1  ;;  %v2637_v42 = vpop.f32.mrf.mxu3  ;;  %1794 = vmatmul.msk.f32.gmra.mxu0 %vm410_vm0, %v88_v45  ;;  %v95_v45 = vld [vmem:[%s3676_s0 + $0x288] sm:$0xff] }
 0x117   :  { %3692 = vst [vmem:[#allocation15_spill] sm:$0xff] %v2637_v42  ;;  %v93_v42 = vld [vmem:[%s3676_s0 + $0x278] sm:$0xff] }
 0x119   :  { %873 = vmatmul.f32.gmra.mxu1 %v90_v59  ;;  %1082 = vmatmul.f32.gmra.mxu2 %v91_v13  ;;  %v96_v59 = vld [vmem:[%s3676_s0 + $0x290] sm:$0xff]  ;;  %v2668_v13 = vld [vmem:[%s3677_s2] ss:$0 sm:$0xff] }
 0x11b   :  { %1291 = vmatmul.f32.gmra.mxu3 %v92_v18  ;;  %v2649_v27 = vpop.f32.mrf.mxu0  ;;  %v97_v18 = vld [vmem:[%s3676_s0 + $0x298] sm:$0xff] }
 0x11c   :  { %v2654_v10 = vpop.f32.mrf.mxu2 }
 0x11e   :  { %v2656_v57 = vpop.f32.mrf.mxu3  ;;  %v829_v41 = vpop.f32.mrf.mxu1  ;;  %1795 = vmatmul.msk.f32.gmra.mxu0 %vm410_vm0, %v93_v42  ;;  %v98_v42 = vld [vmem:[%s3676_s0 + $0x2a0] sm:$0xff] }
 0x11f   :  { %3693 = vst [vmem:[#allocation16_spill] sm:$0xff] %v2656_v57  ;;  %v621_v57 = vadd.f32 %v2668_v13, %v2334_v12  ;;  %v101_v12 = vld [vmem:[%s3676_s0 + $0x2b8] sm:$0xff] }
 0x121   :  { %876 = vmatmul.f32.gmra.mxu1 %v95_v45  ;;  %1085 = vmatmul.f32.gmra.mxu2 %v96_v59  ;;  %v830_v25 = vadd.f32 %v829_v41, %v621_v57  ;;  %v102_v57 = vld [vmem:[%s3676_s0 + $0x2c0] sm:$0xff] }
 0x123   :  { %1294 = vmatmul.f32.gmra.mxu3 %v97_v18  ;;  %v1456_v9 = vpop.f32.mrf.mxu0 }
 0x124   :  { %v1038_v0 = vpop.f32.mrf.mxu2 }
 0x125   :  { %v1039_v56 = vadd.f32 %v1038_v0, %v830_v25  ;;  %v624_v0 = vadd.f32 %v2668_v13, %v2355_v20 }
 0x126   :  { %v832_v48 = vpop.f32.mrf.mxu1  ;;  %v1247_v40 = vpop.f32.mrf.mxu3  ;;  %1796 = vmatmul.msk.f32.gmra.mxu0 %vm410_vm0, %v98_v42 }
 0x127   :  { %v1248_v41 = vadd.f32 %v1247_v40, %v1039_v56  ;;  %v833_v45 = vadd.f32 %v832_v48, %v624_v0  ;;  %v106_v48 = vld [vmem:[%s3676_s0 + $0x2e0] sm:$0xff] }
 0x129   :  { %v1457_v25 = vadd.f32 %v1456_v9, %v1248_v41  ;;  %879 = vmatmul.f32.gmra.mxu1 %v100_v32  ;;  %1088 = vmatmul.f32.gmra.mxu2 %v101_v12  ;;  %v105_v32 = vld [vmem:[%s3676_s0 + $0x2d8] sm:$0xff]  ;;  %v107_v12 = vld [vmem:[%s3676_s0 + $0x2e8] sm:$0xff]  ;;  %v627_v41 = vadd.f32 %v2668_v13, %v2376_v28 }
 0x12b   :  { %v1648_v59 = vmax.f32 %v1457_v25, 0.0  ;;  %1297 = vmatmul.f32.gmra.mxu3 %v102_v57  ;;  %v1459_v18 = vpop.f32.mrf.mxu0 }
 0x12c   :  { %v1041_v42 = vpop.f32.mrf.mxu2 }
 0x12d   :  { %1712 = vst.msk [vmem:[%s3678_s3] sm:$0xff] %vm410_vm0, %v1648_v59  ;;  %v1042_v40 = vadd.f32 %v1041_v42, %v833_v45  ;;  %v108_v59 = vld [vmem:[%s3676_s0 + $0x2f0] sm:$0xff] }
 0x12e   :  { %v835_v56 = vpop.f32.mrf.mxu1  ;;  %v1250_v20 = vpop.f32.mrf.mxu3  ;;  %1797 = vmatmul.msk.f32.gmra.mxu0 %vm410_vm0, %v103_v24 }
 0x12f   :  { %v1251_v9 = vadd.f32 %v1250_v20, %v1042_v40  ;;  %v836_v0 = vadd.f32 %v835_v56, %v627_v41  ;;  %v111_v56 = vld [vmem:[%s3676_s0 + $0x308] sm:$0xff] }
 0x131   :  { %v1460_v57 = vadd.f32 %v1459_v18, %v1251_v9  ;;  %882 = vmatmul.f32.gmra.mxu1 %v105_v32  ;;  %1091 = vmatmul.f32.gmra.mxu2 %v106_v48  ;;  %v110_v18 = vld [vmem:[%s3676_s0 + $0x300] sm:$0xff]  ;;  %v112_v32 = vld [vmem:[%s3676_s0 + $0x310] sm:$0xff]  ;;  %v630_v48 = vadd.f32 %v2668_v13, %v2397_v36 }
 0x133   :  { %v1649_v25 = vmax.f32 %v1460_v57, 0.0  ;;  %1300 = vmatmul.f32.gmra.mxu3 %v107_v12  ;;  %v1462_v45 = vpop.f32.mrf.mxu0 }
 0x134   :  { %v1044_v24 = vpop.f32.mrf.mxu2 }
 0x135   :  { %1713 = vst.msk [vmem:[%s3678_s3 + $0x8] sm:$0xff] %vm410_vm0, %v1649_v25  ;;  %v1045_v42 = vadd.f32 %v1044_v24, %v836_v0  ;;  %v113_v0 = vld [vmem:[%s3676_s0 + $0x318] sm:$0xff] }
 0x136   :  { %v838_v40 = vpop.f32.mrf.mxu1  ;;  %v1253_v28 = vpop.f32.mrf.mxu3  ;;  %1798 = vmatmul.msk.f32.gmra.mxu0 %vm410_vm0, %v108_v59 }
 0x137   :  { %v1254_v20 = vadd.f32 %v1253_v28, %v1045_v42  ;;  %v839_v12 = vadd.f32 %v838_v40, %v630_v48  ;;  %v116_v42 = vld [vmem:[%s3676_s0 + $0x330] sm:$0xff]  ;;  %v117_v28 = vld [vmem:[%s3676_s0 + $0x338] sm:$0xff] }
 0x139   :  { %v1463_v9 = vadd.f32 %v1462_v45, %v1254_v20  ;;  %885 = vmatmul.f32.gmra.mxu1 %v110_v18  ;;  %1094 = vmatmul.f32.gmra.mxu2 %v111_v56  ;;  %v115_v45 = vld [vmem:[%s3676_s0 + $0x328] sm:$0xff]  ;;  %v633_v18 = vadd.f32 %v2668_v13, %v2418_v44 }
 0x13b   :  { %v1650_v41 = vmax.f32 %v1463_v9, 0.0  ;;  %1303 = vmatmul.f32.gmra.mxu3 %v112_v32  ;;  %v1465_v57 = vpop.f32.mrf.mxu0  ;;  %v118_v9 = vld [vmem:[%s3676_s0 + $0x340] sm:$0xff] }
 0x13c   :  { %v1047_v25 = vpop.f32.mrf.mxu2 }
 0x13d   :  { %1714 = vst.msk [vmem:[%s3678_s3 + $0x10] sm:$0xff] %vm410_vm0, %v1650_v41  ;;  %v1048_v59 = vadd.f32 %v1047_v25, %v839_v12  ;;  %v121_v25 = vld [vmem:[%s3676_s0 + $0x358] sm:$0xff] }
 0x13e   :  { %v841_v24 = vpop.f32.mrf.mxu1  ;;  %v1256_v36 = vpop.f32.mrf.mxu3  ;;  %1799 = vmatmul.msk.f32.gmra.mxu0 %vm410_vm0, %v113_v0 }
 0x13f   :  { %v1257_v40 = vadd.f32 %v1256_v36, %v1048_v59  ;;  %v842_v20 = vadd.f32 %v841_v24, %v633_v18  ;;  %v122_v24 = vld [vmem:[%s3676_s0 + $0x360] sm:$0xff]  ;;  %v636_v36 = vadd.f32 %v2668_v13, %v2439_v52  ;;  %v123_v18 = vld [vmem:[%s3676_s0 + $0x368] sm:$0xff] }
 0x141   :  { %v1466_v56 = vadd.f32 %v1465_v57, %v1257_v40  ;;  %888 = vmatmul.f32.gmra.mxu1 %v115_v45  ;;  %1097 = vmatmul.f32.gmra.mxu2 %v116_v42  ;;  %v120_v57 = vld [vmem:[%s3676_s0 + $0x350] sm:$0xff] }
 0x143   :  { %v1651_v32 = vmax.f32 %v1466_v56, 0.0  ;;  %1306 = vmatmul.f32.gmra.mxu3 %v117_v28  ;;  %v1468_v48 = vpop.f32.mrf.mxu0 }
 0x144   :  { %v1050_v12 = vpop.f32.mrf.mxu2 }
 0x145   :  { %1715 = vst.msk [vmem:[%s3678_s3 + $0x18] sm:$0xff] %vm410_vm0, %v1651_v32  ;;  %v1051_v41 = vadd.f32 %v1050_v12, %v842_v20 }
 0x146   :  { %v844_v0 = vpop.f32.mrf.mxu1  ;;  %v1259_v44 = vpop.f32.mrf.mxu3  ;;  %1800 = vmatmul.msk.f32.gmra.mxu0 %vm410_vm0, %v118_v9  ;;  %v126_v9 = vld [vmem:[%s3676_s0 + $0x380] sm:$0xff] }
 0x147   :  { %v1260_v59 = vadd.f32 %v1259_v44, %v1051_v41  ;;  %v845_v42 = vadd.f32 %v844_v0, %v636_v36  ;;  %v127_v41 = vld [vmem:[%s3676_s0 + $0x388] sm:$0xff]  ;;  %v639_v0 = vadd.f32 %v2668_v13, %v2460_v60 }
 0x149   :  { %v1469_v45 = vadd.f32 %v1468_v48, %v1260_v59  ;;  %891 = vmatmul.f32.gmra.mxu1 %v120_v57  ;;  %1100 = vmatmul.f32.gmra.mxu2 %v121_v25  ;;  %v125_v48 = vld [vmem:[%s3676_s0 + $0x378] sm:$0xff] }
 0x14b   :  { %v1652_v40 = vmax.f32 %v1469_v45, 0.0  ;;  %1309 = vmatmul.f32.gmra.mxu3 %v122_v24  ;;  %v1471_v28 = vpop.f32.mrf.mxu0  ;;  %v128_v24 = vld [vmem:[%s3676_s0 + $0x390] sm:$0xff] }
 0x14c   :  { %v1053_v56 = vpop.f32.mrf.mxu2 }
 0x14d   :  { %1716 = vst.msk [vmem:[%s3678_s3 + $0x20] sm:$0xff] %vm410_vm0, %v1652_v40  ;;  %v1054_v20 = vadd.f32 %v1053_v56, %v845_v42  ;;  %v130_v40 = vld [vmem:[%s3676_s0 + $0x3a0] sm:$0xff]  ;;  %v132_v56 = vld [vmem:[%s3676_s0 + $0x3b0] sm:$0xff] }
 0x14e   :  { %v847_v32 = vpop.f32.mrf.mxu1  ;;  %v1262_v52 = vpop.f32.mrf.mxu3  ;;  %1801 = vmatmul.msk.f32.gmra.mxu0 %vm410_vm0, %v123_v18 }
 0x14f   :  { %v1263_v12 = vadd.f32 %v1262_v52, %v1054_v20  ;;  %v848_v57 = vadd.f32 %v847_v32, %v639_v0  ;;  %v642_v20 = vadd.f32 %v2668_v13, %v2481_v4 }
 0x151   :  { %v1472_v44 = vadd.f32 %v1471_v28, %v1263_v12  ;;  %894 = vmatmul.f32.gmra.mxu1 %v125_v48  ;;  %1103 = vmatmul.f32.gmra.mxu2 %v126_v9  ;;  %v131_v28 = vld [vmem:[%s3676_s0 + $0x3a8] sm:$0xff]  ;;  %v133_v12 = vld [vmem:[%s3676_s0 + $0x3b8] sm:$0xff] }
 0x153   :  { %v1653_v25 = vmax.f32 %v1472_v44, 0.0  ;;  %1312 = vmatmul.f32.gmra.mxu3 %v127_v41  ;;  %v1474_v59 = vpop.f32.mrf.mxu0 }
 0x154   :  { %v1056_v36 = vpop.f32.mrf.mxu2 }
 0x155   :  { %1717 = vst.msk [vmem:[%s3678_s3 + $0x28] sm:$0xff] %vm410_vm0, %v1653_v25  ;;  %v1057_v45 = vadd.f32 %v1056_v36, %v848_v57  ;;  %v135_v57 = vld [vmem:[%s3676_s0 + $0x3c8] sm:$0xff]  ;;  %v136_v25 = vld [vmem:[%s3676_s0 + $0x3d0] sm:$0xff]  ;;  %v645_v36 = vadd.f32 %v2668_v13, %v2502_v17 }
 0x156   :  { %v850_v42 = vpop.f32.mrf.mxu1  ;;  %v1265_v60 = vpop.f32.mrf.mxu3  ;;  %1802 = vmatmul.msk.f32.gmra.mxu0 %vm410_vm0, %v128_v24  ;;  %v137_v24 = vld [vmem:[%s3676_s0 + $0x3d8] sm:$0xff] }
 0x157   :  { %v1266_v18 = vadd.f32 %v1265_v60, %v1057_v45  ;;  %v851_v52 = vadd.f32 %v850_v42, %v642_v20 }
 0x159   :  { %v1475_v32 = vadd.f32 %v1474_v59, %v1266_v18  ;;  %897 = vmatmul.f32.gmra.mxu1 %v130_v40  ;;  %1106 = vmatmul.f32.gmra.mxu2 %v131_v28  ;;  %v138_v28 = vld [vmem:[%s3676_s0 + $0x3e0] sm:$0xff] }
 0x15b   :  { %v1654_v48 = vmax.f32 %v1475_v32, 0.0  ;;  %1315 = vmatmul.f32.gmra.mxu3 %v132_v56  ;;  %v1477_v9 = vpop.f32.mrf.mxu0  ;;  %v140_v32 = vld [vmem:[%s3676_s0 + $0x3f0] sm:$0xff] }
 0x15c   :  { %v1059_v41 = vpop.f32.mrf.mxu2 }
 0x15d   :  { %1718 = vst.msk [vmem:[%s3678_s3 + $0x30] sm:$0xff] %vm410_vm0, %v1654_v48  ;;  %v1060_v0 = vadd.f32 %v1059_v41, %v851_v52  ;;  %v141_v52 = vld [vmem:[%s3676_s0 + $0x3f8] sm:$0xff] }
 0x15e   :  { %v853_v44 = vpop.f32.mrf.mxu1  ;;  %v1268_v4 = vpop.f32.mrf.mxu3  ;;  %1803 = vmatmul.msk.f32.gmra.mxu0 %vm410_vm0, %v133_v12  ;;  %v648_v12 = vadd.f32 %v2668_v13, %v2523_v33 }
 0x15f   :  { %v1269_v59 = vadd.f32 %v1268_v4, %v1060_v0  ;;  %v854_v42 = vadd.f32 %v853_v44, %v645_v36  ;;  %v145_v36 = vld [vmem:[%s3676_s0 + $0x418] sm:$0xff] }
 0x161   :  { %v1478_v45 = vadd.f32 %v1477_v9, %v1269_v59  ;;  %900 = vmatmul.f32.gmra.mxu1 %v135_v57  ;;  %1109 = vmatmul.f32.gmra.mxu2 %v136_v25  ;;  %v142_v9 = vld [vmem:[%s3676_s0 + $0x400] sm:$0xff]  ;;  %v143_v57 = vld [vmem:[%s3676_s0 + $0x408] sm:$0xff] }
 0x163   :  { %v1655_v60 = vmax.f32 %v1478_v45, 0.0  ;;  %1318 = vmatmul.f32.gmra.mxu3 %v137_v24  ;;  %v1480_v40 = vpop.f32.mrf.mxu0  ;;  %v146_v45 = vld [vmem:[%s3676_s0 + $0x420] sm:$0xff] }
 0x164   :  { %v1062_v18 = vpop.f32.mrf.mxu2 }
 0x165   :  { %1719 = vst.msk [vmem:[%s3678_s3 + $0x38] sm:$0xff] %vm410_vm0, %v1655_v60  ;;  %v1063_v56 = vadd.f32 %v1062_v18, %v854_v42  ;;  %v147_v60 = vld [vmem:[%s3676_s0 + $0x428] sm:$0xff] }
 0x166   :  { %v856_v20 = vpop.f32.mrf.mxu1  ;;  %v1271_v17 = vpop.f32.mrf.mxu3  ;;  %1804 = vmatmul.msk.f32.gmra.mxu0 %vm410_vm0, %v138_v28 }
 0x167   :  { %v1272_v48 = vadd.f32 %v1271_v17, %v1063_v56  ;;  %v857_v0 = vadd.f32 %v856_v20, %v648_v12  ;;  %v148_v17 = vld [vmem:[%s3676_s0 + $0x430] sm:$0xff]  ;;  %v151_v12 = vld [vmem:[%s3676_s0 + $0x448] sm:$0xff] }
 0x169   :  { %v1481_v41 = vadd.f32 %v1480_v40, %v1272_v48  ;;  %903 = vmatmul.f32.gmra.mxu1 %v140_v32  ;;  %1112 = vmatmul.f32.gmra.mxu2 %v141_v52  ;;  %v651_v40 = vadd.f32 %v2668_v13, %v2544_v49 }
 0x16b   :  { %v1656_v44 = vmax.f32 %v1481_v41, 0.0  ;;  %1321 = vmatmul.f32.gmra.mxu3 %v142_v9  ;;  %v1483_v4 = vpop.f32.mrf.mxu0  ;;  %v150_v9 = vld [vmem:[%s3676_s0 + $0x440] sm:$0xff] }
 0x16c   :  { %v1065_v25 = vpop.f32.mrf.mxu2 }
 0x16d   :  { %1720 = vst.msk [vmem:[%s3678_s3 + $0x40] sm:$0xff] %vm410_vm0, %v1656_v44  ;;  %v1066_v59 = vadd.f32 %v1065_v25, %v857_v0  ;;  %v152_v0 = vld [vmem:[%s3676_s0 + $0x450] sm:$0xff]  ;;  %v654_v44 = vadd.f32 %v2668_v13, %v2565_v1 }
 0x16e   :  { %v859_v24 = vpop.f32.mrf.mxu1  ;;  %v1274_v33 = vpop.f32.mrf.mxu3  ;;  %1805 = vmatmul.msk.f32.gmra.mxu0 %vm410_vm0, %v143_v57 }
 0x16f   :  { %v1275_v42 = vadd.f32 %v1274_v33, %v1066_v59  ;;  %v860_v18 = vadd.f32 %v859_v24, %v651_v40  ;;  %v153_v24 = vld [vmem:[%s3676_s0 + $0x458] sm:$0xff] }
 0x171   :  { %v1484_v28 = vadd.f32 %v1483_v4, %v1275_v42  ;;  %906 = vmatmul.f32.gmra.mxu1 %v145_v36  ;;  %1115 = vmatmul.f32.gmra.mxu2 %v146_v45  ;;  %v155_v42 = vld [vmem:[%s3676_s0 + $0x468] sm:$0xff] }
 0x173   :  { %v1657_v56 = vmax.f32 %v1484_v28, 0.0  ;;  %1324 = vmatmul.f32.gmra.mxu3 %v147_v60  ;;  %v1486_v20 = vpop.f32.mrf.mxu0  ;;  %v156_v60 = vld [vmem:[%s3676_s0 + $0x470] sm:$0xff]  ;;  %v157_v28 = vld [vmem:[%s3676_s0 + $0x478] sm:$0xff] }
 0x174   :  { %v1068_v32 = vpop.f32.mrf.mxu2 }
 0x175   :  { %1721 = vst.msk [vmem:[%s3678_s3 + $0x48] sm:$0xff] %vm410_vm0, %v1657_v56  ;;  %v1069_v52 = vadd.f32 %v1068_v32, %v860_v18  ;;  %v657_v18 = vadd.f32 %v2668_v13, %v2586_v26 }
 0x176   :  { %v862_v48 = vpop.f32.mrf.mxu1  ;;  %v1277_v49 = vpop.f32.mrf.mxu3  ;;  %1806 = vmatmul.msk.f32.gmra.mxu0 %vm410_vm0, %v148_v17 }
 0x177   :  { %v1278_v41 = vadd.f32 %v1277_v49, %v1069_v52  ;;  %v863_v57 = vadd.f32 %v862_v48, %v654_v44  ;;  %v158_v52 = vld [vmem:[%s3676_s0 + $0x480] sm:$0xff] }
 0x178   :  { %v162_v44 = vld [vmem:[%s3676_s0 + $0x4a0] sm:$0xff] }
 0x179   :  { %v1487_v4 = vadd.f32 %v1486_v20, %v1278_v41  ;;  %909 = vmatmul.f32.gmra.mxu1 %v150_v9  ;;  %1118 = vmatmul.f32.gmra.mxu2 %v151_v12  ;;  %v160_v12 = vld [vmem:[%s3676_s0 + $0x490] sm:$0xff]  ;;  %v161_v41 = vld [vmem:[%s3676_s0 + $0x498] sm:$0xff] }
 0x17b   :  { %v1658_v25 = vmax.f32 %v1487_v4, 0.0  ;;  %1327 = vmatmul.f32.gmra.mxu3 %v152_v0  ;;  %v1489_v59 = vpop.f32.mrf.mxu0  ;;  %v660_v4 = vadd.f32 %v2668_v13, %v2607_v58 }
 0x17c   :  { %v1071_v33 = vpop.f32.mrf.mxu2 }
 0x17d   :  { %1722 = vst.msk [vmem:[%s3678_s3 + $0x50] sm:$0xff] %vm410_vm0, %v1658_v25  ;;  %v1072_v36 = vadd.f32 %v1071_v33, %v863_v57  ;;  %v163_v33 = vld [vmem:[%s3676_s0 + $0x4a8] sm:$0xff] }
 0x17e   :  { %v865_v45 = vpop.f32.mrf.mxu1  ;;  %v1280_v1 = vpop.f32.mrf.mxu3  ;;  %1807 = vmatmul.msk.f32.gmra.mxu0 %vm410_vm0, %v153_v24 }
 0x17f   :  { %v1281_v40 = vadd.f32 %v1280_v1, %v1072_v36  ;;  %v866_v20 = vadd.f32 %v865_v45, %v657_v18  ;;  %v663_v18 = vadd.f32 %v2668_v13, %v2628_v43 }
 0x181   :  { %v1490_v56 = vadd.f32 %v1489_v59, %v1281_v40  ;;  %912 = vmatmul.f32.gmra.mxu1 %v155_v42  ;;  %1121 = vmatmul.f32.gmra.mxu2 %v156_v60  ;;  %v165_v42 = vld [vmem:[%s3676_s0 + $0x4b8] sm:$0xff]  ;;  %v166_v60 = vld [vmem:[%s3676_s0 + $0x4c0] sm:$0xff] }
 0x183   :  { %v1659_v17 = vmax.f32 %v1490_v56, 0.0  ;;  %1330 = vmatmul.f32.gmra.mxu3 %v157_v28  ;;  %v1492_v32 = vpop.f32.mrf.mxu0  ;;  %v167_v28 = vld [vmem:[%s3676_s0 + $0x4c8] sm:$0xff] }
 0x184   :  { %v1074_v48 = vpop.f32.mrf.mxu2 }
 0x185   :  { %1723 = vst.msk [vmem:[%s3678_s3 + $0x58] sm:$0xff] %vm410_vm0, %v1659_v17  ;;  %v1075_v49 = vadd.f32 %v1074_v48, %v866_v20 }
 0x186   :  { %v868_v9 = vpop.f32.mrf.mxu1  ;;  %v1283_v26 = vpop.f32.mrf.mxu3  ;;  %1808 = vmatmul.msk.f32.gmra.mxu0 %vm410_vm0, %v158_v52  ;;  %v168_v52 = vld [vmem:[%s3676_s0 + $0x4d0] sm:$0xff] }
 0x187   :  { %v1284_v0 = vadd.f32 %v1283_v26, %v1075_v49  ;;  %v869_v25 = vadd.f32 %v868_v9, %v660_v4  ;;  %v170_v26 = vld [vmem:[%s3676_s0 + $0x4e0] sm:$0xff] }
 0x189   :  { %v1493_v57 = vadd.f32 %v1492_v32, %v1284_v0  ;;  %915 = vmatmul.f32.gmra.mxu1 %v160_v12  ;;  %1124 = vmatmul.f32.gmra.mxu2 %v161_v41  ;;  %v171_v12 = vld [vmem:[%s3676_s0 + $0x4e8] sm:$0xff]  ;;  %v172_v0 = vld [vmem:[%s3676_s0 + $0x4f0] sm:$0xff] }
 0x18b   :  { %v1660_v59 = vmax.f32 %v1493_v57, 0.0  ;;  %1333 = vmatmul.f32.gmra.mxu3 %v162_v44  ;;  %v1495_v24 = vpop.f32.mrf.mxu0  ;;  %v666_v44 = vadd.f32 %v2668_v13, %v2649_v27 }
 0x18c   :  { %v1077_v36 = vpop.f32.mrf.mxu2 }
 0x18d   :  { %1724 = vst.msk [vmem:[%s3678_s3 + $0x60] sm:$0xff] %vm410_vm0, %v1660_v59  ;;  %v1078_v45 = vadd.f32 %v1077_v36, %v869_v25 }
 0x18e   :  { %v871_v1 = vpop.f32.mrf.mxu1  ;;  %v1286_v58 = vpop.f32.mrf.mxu3  ;;  %1809 = vmatmul.msk.f32.gmra.mxu0 %vm410_vm0, %v163_v33 }
 0x18f   :  { %v1287_v40 = vadd.f32 %v1286_v58, %v1078_v45  ;;  %v872_v20 = vadd.f32 %v871_v1, %v663_v18  ;;  %v175_v1 = vld [vmem:[%s3676_s0 + $0x508] sm:$0xff]  ;;  %v176_v58 = vld [vmem:[%s3676_s0 + $0x510] sm:$0xff] }
 0x191   :  { %v1496_v56 = vadd.f32 %v1495_v24, %v1287_v40  ;;  %918 = vmatmul.f32.gmra.mxu1 %v165_v42  ;;  %1127 = vmatmul.f32.gmra.mxu2 %v166_v60  ;;  %v173_v24 = vld [vmem:[%s3676_s0 + $0x4f8] sm:$0xff]  ;;  %v669_v40 = vadd.f32 %v2668_v13, %v2323_v8 }
 0x192   :  { %v177_v60 = vld [vmem:[%s3676_s0 + $0x518] sm:$0xff] }
 0x193   :  { %v1661_v17 = vmax.f32 %v1496_v56, 0.0  ;;  %1336 = vmatmul.f32.gmra.mxu3 %v167_v28  ;;  %v1498_v32 = vpop.f32.mrf.mxu0 }
 0x194   :  { %v1080_v48 = vpop.f32.mrf.mxu2 }
 0x195   :  { %1725 = vst.msk [vmem:[%s3678_s3 + $0x68] sm:$0xff] %vm410_vm0, %v1661_v17  ;;  %v1081_v49 = vadd.f32 %v1080_v48, %v872_v20  ;;  %v178_v17 = vld [vmem:[%s3676_s0 + $0x520] sm:$0xff] }
 0x196   :  { %v874_v9 = vpop.f32.mrf.mxu1  ;;  %v1289_v43 = vpop.f32.mrf.mxu3  ;;  %1810 = vmatmul.msk.f32.gmra.mxu0 %vm410_vm0, %v168_v52 }
 0x197   :  { %v1290_v41 = vadd.f32 %v1289_v43, %v1081_v49  ;;  %v875_v57 = vadd.f32 %v874_v9, %v666_v44  ;;  %v180_v49 = vld [vmem:[%s3676_s0 + $0x530] sm:$0xff]  ;;  %v181_v9 = vld [vmem:[%s3676_s0 + $0x538] sm:$0xff] }
 0x199   :  { %v1499_v4 = vadd.f32 %v1498_v32, %v1290_v41  ;;  %921 = vmatmul.f32.gmra.mxu1 %v170_v26  ;;  %1130 = vmatmul.f32.gmra.mxu2 %v171_v12  ;;  %v182_v26 = vld [vmem:[%s3676_s0 + $0x540] sm:$0xff]  ;;  %v672_v12 = vadd.f32 %v2668_v13, %v2341_v15 }
 0x19b   :  { %v1662_v25 = vmax.f32 %v1499_v4, 0.0  ;;  %1339 = vmatmul.f32.gmra.mxu3 %v172_v0  ;;  %v1501_v59 = vpop.f32.mrf.mxu0 }
 0x19c   :  { %v1083_v33 = vpop.f32.mrf.mxu2 }
 0x19d   :  { %1726 = vst.msk [vmem:[%s3678_s3 + $0x70] sm:$0xff] %vm410_vm0, %v1662_v25  ;;  %v1084_v36 = vadd.f32 %v1083_v33, %v875_v57  ;;  %v183_v57 = vld [vmem:[%s3676_s0 + $0x548] sm:$0xff]  ;;  %v185_v33 = vld [vmem:[%s3676_s0 + $0x558] sm:$0xff] }
 0x19e   :  { %v877_v45 = vpop.f32.mrf.mxu1  ;;  %v1292_v27 = vpop.f32.mrf.mxu3  ;;  %1811 = vmatmul.msk.f32.gmra.mxu0 %vm410_vm0, %v173_v24 }
 0x19f   :  { %v1293_v42 = vadd.f32 %v1292_v27, %v1084_v36  ;;  %v878_v18 = vadd.f32 %v877_v45, %v669_v40  ;;  %v186_v36 = vld [vmem:[%s3676_s0 + $0x560] sm:$0xff]  ;;  %v187_v27 = vld [vmem:[%s3676_s0 + $0x568] sm:$0xff] }
 0x1a1   :  { %v1502_v28 = vadd.f32 %v1501_v59, %v1293_v42  ;;  %924 = vmatmul.f32.gmra.mxu1 %v175_v1  ;;  %1133 = vmatmul.f32.gmra.mxu2 %v176_v58  ;;  %v675_v1 = vadd.f32 %v2668_v13, %v2362_v23 }
 0x1a3   :  { %v1663_v56 = vmax.f32 %v1502_v28, 0.0  ;;  %1342 = vmatmul.f32.gmra.mxu3 %v177_v60  ;;  %v1504_v20 = vpop.f32.mrf.mxu0  ;;  %v188_v28 = vld [vmem:[%s3676_s0 + $0x570] sm:$0xff] }
 0x1a4   :  { %v1086_v32 = vpop.f32.mrf.mxu2 }
 0x1a5   :  { %1727 = vst.msk [vmem:[%s3678_s3 + $0x78] sm:$0xff] %vm410_vm0, %v1663_v56  ;;  %v1087_v52 = vadd.f32 %v1086_v32, %v878_v18  ;;  %v191_v32 = vld [vmem:[%s3676_s0 + $0x588] sm:$0xff] }
 0x1a6   :  { %v880_v48 = vpop.f32.mrf.mxu1  ;;  %v1295_v8 = vpop.f32.mrf.mxu3  ;;  %1812 = vmatmul.msk.f32.gmra.mxu0 %vm410_vm0, %v178_v17  ;;  %v190_v17 = vld [vmem:[%s3676_s0 + $0x580] sm:$0xff] }
 0x1a7   :  { %v1296_v43 = vadd.f32 %v1295_v8, %v1087_v52  ;;  %v881_v0 = vadd.f32 %v880_v48, %v672_v12  ;;  %v192_v48 = vld [vmem:[%s3676_s0 + $0x590] sm:$0xff]  ;;  %v678_v8 = vadd.f32 %v2668_v13, %v2383_v31  ;;  %v193_v12 = vld [vmem:[%s3676_s0 + $0x598] sm:$0xff] }
 0x1a9   :  { %v1505_v41 = vadd.f32 %v1504_v20, %v1296_v43  ;;  %927 = vmatmul.f32.gmra.mxu1 %v180_v49  ;;  %1136 = vmatmul.f32.gmra.mxu2 %v181_v9 }
 0x1ab   :  { %v1664_v44 = vmax.f32 %v1505_v41, 0.0  ;;  %1345 = vmatmul.f32.gmra.mxu3 %v182_v26  ;;  %v1507_v4 = vpop.f32.mrf.mxu0 }
 0x1ac   :  { %v1089_v25 = vpop.f32.mrf.mxu2 }
 0x1ad   :  { %1728 = vst.msk [vmem:[%s3678_s3 + $0x80] sm:$0xff] %vm410_vm0, %v1664_v44  ;;  %v1090_v59 = vadd.f32 %v1089_v25, %v881_v0 }
 0x1ae   :  { %v883_v24 = vpop.f32.mrf.mxu1  ;;  %v1298_v15 = vpop.f32.mrf.mxu3  ;;  %1813 = vmatmul.msk.f32.gmra.mxu0 %vm410_vm0, %v183_v57  ;;  %v196_v57 = vld [vmem:[%s3676_s0 + $0x5b0] sm:$0xff] }
 0x1af   :  { %v1299_v45 = vadd.f32 %v1298_v15, %v1090_v59  ;;  %v884_v42 = vadd.f32 %v883_v24, %v675_v1  ;;  %v197_v59 = vld [vmem:[%s3676_s0 + $0x5b8] sm:$0xff]  ;;  %v681_v24 = vadd.f32 %v2668_v13, %v2404_v39 }
 0x1b1   :  { %v1508_v58 = vadd.f32 %v1507_v4, %v1299_v45  ;;  %930 = vmatmul.f32.gmra.mxu1 %v185_v33  ;;  %1139 = vmatmul.f32.gmra.mxu2 %v186_v36  ;;  %v195_v4 = vld [vmem:[%s3676_s0 + $0x5a8] sm:$0xff] }
 0x1b3   :  { %v1665_v60 = vmax.f32 %v1508_v58, 0.0  ;;  %1348 = vmatmul.f32.gmra.mxu3 %v187_v27  ;;  %v1510_v40 = vpop.f32.mrf.mxu0  ;;  %v198_v27 = vld [vmem:[%s3676_s0 + $0x5c0] sm:$0xff] }
 0x1b4   :  { %v1092_v18 = vpop.f32.mrf.mxu2 }
 0x1b5   :  { %1729 = vst.msk [vmem:[%s3678_s3 + $0x88] sm:$0xff] %vm410_vm0, %v1665_v60  ;;  %v1093_v56 = vadd.f32 %v1092_v18, %v884_v42  ;;  %v200_v60 = vld [vmem:[%s3676_s0 + $0x5d0] sm:$0xff]  ;;  %v202_v18 = vld [vmem:[%s3676_s0 + $0x5e0] sm:$0xff] }
 0x1b6   :  { %v886_v20 = vpop.f32.mrf.mxu1  ;;  %v1301_v23 = vpop.f32.mrf.mxu3  ;;  %1814 = vmatmul.msk.f32.gmra.mxu0 %vm410_vm0, %v188_v28 }
 0x1b7   :  { %v1302_v52 = vadd.f32 %v1301_v23, %v1093_v56  ;;  %v887_v9 = vadd.f32 %v886_v20, %v678_v8  ;;  %v684_v56 = vadd.f32 %v2668_v13, %v2425_v47 }
 0x1b9   :  { %v1511_v49 = vadd.f32 %v1510_v40, %v1302_v52  ;;  %933 = vmatmul.f32.gmra.mxu1 %v190_v17  ;;  %1142 = vmatmul.f32.gmra.mxu2 %v191_v32  ;;  %v201_v40 = vld [vmem:[%s3676_s0 + $0x5d8] sm:$0xff]  ;;  %v203_v52 = vld [vmem:[%s3676_s0 + $0x5e8] sm:$0xff] }
 0x1bb   :  { %v1666_v43 = vmax.f32 %v1511_v49, 0.0  ;;  %1351 = vmatmul.f32.gmra.mxu3 %v192_v48  ;;  %v1513_v26 = vpop.f32.mrf.mxu0 }
 0x1bc   :  { %v1095_v41 = vpop.f32.mrf.mxu2 }
 0x1bd   :  { %1730 = vst.msk [vmem:[%s3678_s3 + $0x90] sm:$0xff] %vm410_vm0, %v1666_v43  ;;  %v1096_v0 = vadd.f32 %v1095_v41, %v887_v9  ;;  %v205_v9 = vld [vmem:[%s3676_s0 + $0x5f8] sm:$0xff]  ;;  %v206_v43 = vld [vmem:[%s3676_s0 + $0x600] sm:$0xff]  ;;  %v687_v41 = vadd.f32 %v2668_v13, %v2446_v55 }
 0x1be   :  { %v889_v44 = vpop.f32.mrf.mxu1  ;;  %v1304_v31 = vpop.f32.mrf.mxu3  ;;  %1815 = vmatmul.msk.f32.gmra.mxu0 %vm410_vm0, %v193_v12  ;;  %v207_v12 = vld [vmem:[%s3676_s0 + $0x608] sm:$0xff] }
 0x1bf   :  { %v1305_v25 = vadd.f32 %v1304_v31, %v1096_v0  ;;  %v890_v33 = vadd.f32 %v889_v44, %v681_v24 }
 0x1c1   :  { %v1514_v15 = vadd.f32 %v1513_v26, %v1305_v25  ;;  %936 = vmatmul.f32.gmra.mxu1 %v195_v4  ;;  %1145 = vmatmul.f32.gmra.mxu2 %v196_v57  ;;  %v208_v57 = vld [vmem:[%s3676_s0 + $0x610] sm:$0xff] }
 0x1c3   :  { %v1667_v36 = vmax.f32 %v1514_v15, 0.0  ;;  %1354 = vmatmul.f32.gmra.mxu3 %v197_v59  ;;  %v1516_v45 = vpop.f32.mrf.mxu0  ;;  %v210_v15 = vld [vmem:[%s3676_s0 + $0x620] sm:$0xff] }
 0x1c4   :  { %v1098_v1 = vpop.f32.mrf.mxu2 }
 0x1c5   :  { %1731 = vst.msk [vmem:[%s3678_s3 + $0x98] sm:$0xff] %vm410_vm0, %v1667_v36  ;;  %v1099_v58 = vadd.f32 %v1098_v1, %v890_v33  ;;  %v211_v33 = vld [vmem:[%s3676_s0 + $0x628] sm:$0xff] }
 0x1c6   :  { %v892_v42 = vpop.f32.mrf.mxu1  ;;  %v1307_v39 = vpop.f32.mrf.mxu3  ;;  %1816 = vmatmul.msk.f32.gmra.mxu0 %vm410_vm0, %v198_v27  ;;  %v690_v27 = vadd.f32 %v2668_v13, %v2467_v63 }
 0x1c7   :  { %v1308_v28 = vadd.f32 %v1307_v39, %v1099_v58  ;;  %v893_v23 = vadd.f32 %v892_v42, %v684_v56  ;;  %v215_v56 = vld [vmem:[%s3676_s0 + $0x648] sm:$0xff] }
 0x1c9   :  { %v1517_v20 = vadd.f32 %v1516_v45, %v1308_v28  ;;  %939 = vmatmul.f32.gmra.mxu1 %v200_v60  ;;  %1148 = vmatmul.f32.gmra.mxu2 %v201_v40  ;;  %v212_v45 = vld [vmem:[%s3676_s0 + $0x630] sm:$0xff]  ;;  %v213_v60 = vld [vmem:[%s3676_s0 + $0x638] sm:$0xff] }
 0x1cb   :  { %v1668_v17 = vmax.f32 %v1517_v20, 0.0  ;;  %1357 = vmatmul.f32.gmra.mxu3 %v202_v18  ;;  %v1519_v32 = vpop.f32.mrf.mxu0  ;;  %v216_v20 = vld [vmem:[%s3676_s0 + $0x650] sm:$0xff] }
 0x1cc   :  { %v1101_v48 = vpop.f32.mrf.mxu2 }
 0x1cd   :  { %1732 = vst.msk [vmem:[%s3678_s3 + $0xa0] sm:$0xff] %vm410_vm0, %v1668_v17  ;;  %v1102_v8 = vadd.f32 %v1101_v48, %v893_v23  ;;  %v217_v17 = vld [vmem:[%s3676_s0 + $0x658] sm:$0xff] }
 0x1ce   :  { %v895_v49 = vpop.f32.mrf.mxu1  ;;  %v1310_v47 = vpop.f32.mrf.mxu3  ;;  %1817 = vmatmul.msk.f32.gmra.mxu0 %vm410_vm0, %v203_v52 }
 0x1cf   :  { %v1311_v26 = vadd.f32 %v1310_v47, %v1102_v8  ;;  %v896_v44 = vadd.f32 %v895_v49, %v687_v41  ;;  %v218_v47 = vld [vmem:[%s3676_s0 + $0x660] sm:$0xff]  ;;  %v221_v41 = vld [vmem:[%s3676_s0 + $0x678] sm:$0xff] }
 0x1d1   :  { %v1520_v0 = vadd.f32 %v1519_v32, %v1311_v26  ;;  %942 = vmatmul.f32.gmra.mxu1 %v205_v9  ;;  %1151 = vmatmul.f32.gmra.mxu2 %v206_v43  ;;  %v693_v32 = vadd.f32 %v2668_v13, %v2488_v7 }
 0x1d3   :  { %v1669_v31 = vmax.f32 %v1520_v0, 0.0  ;;  %1360 = vmatmul.f32.gmra.mxu3 %v207_v12  ;;  %v1522_v4 = vpop.f32.mrf.mxu0  ;;  %v220_v12 = vld [vmem:[%s3676_s0 + $0x670] sm:$0xff] }
 0x1d4   :  { %v1104_v25 = vpop.f32.mrf.mxu2 }
 0x1d5   :  { %1733 = vst.msk [vmem:[%s3678_s3 + $0xa8] sm:$0xff] %vm410_vm0, %v1669_v31  ;;  %v1105_v59 = vadd.f32 %v1104_v25, %v896_v44  ;;  %v222_v44 = vld [vmem:[%s3676_s0 + $0x680] sm:$0xff]  ;;  %v696_v31 = vadd.f32 %v2668_v13, %v2509_v21 }
 0x1d6   :  { %v898_v24 = vpop.f32.mrf.mxu1  ;;  %v1313_v55 = vpop.f32.mrf.mxu3  ;;  %1818 = vmatmul.msk.f32.gmra.mxu0 %vm410_vm0, %v208_v57 }
 0x1d7   :  { %v1314_v36 = vadd.f32 %v1313_v55, %v1105_v59  ;;  %v899_v58 = vadd.f32 %v898_v24, %v690_v27  ;;  %v223_v24 = vld [vmem:[%s3676_s0 + $0x688] sm:$0xff] }
 0x1d9   :  { %v1523_v1 = vadd.f32 %v1522_v4, %v1314_v36  ;;  %945 = vmatmul.f32.gmra.mxu1 %v210_v15  ;;  %1154 = vmatmul.f32.gmra.mxu2 %v211_v33  ;;  %v225_v36 = vld [vmem:[%s3676_s0 + $0x698] sm:$0xff] }
 0x1db   :  { %v1670_v42 = vmax.f32 %v1523_v1, 0.0  ;;  %1363 = vmatmul.f32.gmra.mxu3 %v212_v45  ;;  %v1525_v39 = vpop.f32.mrf.mxu0  ;;  %v226_v45 = vld [vmem:[%s3676_s0 + $0x6a0] sm:$0xff]  ;;  %v227_v1 = vld [vmem:[%s3676_s0 + $0x6a8] sm:$0xff] }
 0x1dc   :  { %v1107_v40 = vpop.f32.mrf.mxu2 }
 0x1dd   :  { %1734 = vst.msk [vmem:[%s3678_s3 + $0xb0] sm:$0xff] %vm410_vm0, %v1670_v42  ;;  %v1108_v28 = vadd.f32 %v1107_v40, %v899_v58  ;;  %v699_v58 = vadd.f32 %v2668_v13, %v2530_v37  ;;  %v230_v13 = vld [vmem:[%s3676_s0 + $0x6c0] sm:$0xff] }
 0x1de   :  { %v901_v18 = vpop.f32.mrf.mxu1  ;;  %v1316_v63 = vpop.f32.mrf.mxu3  ;;  %1819 = vmatmul.msk.f32.gmra.mxu0 %vm410_vm0, %v213_v60 }
 0x1df   :  { %v1317_v23 = vadd.f32 %v1316_v63, %v1108_v28  ;;  %v902_v48 = vadd.f32 %v901_v18, %v693_v32  ;;  %v228_v28 = vld [vmem:[%s3676_s0 + $0x6b0] sm:$0xff]  ;;  %v3185_v32 = vld [vmem:[%s3677_s2] ss:$0 sm:$0xff] }
 0x1e1   :  { %v1526_v52 = vadd.f32 %v1525_v39, %v1317_v23  ;;  %948 = vmatmul.f32.gmra.mxu1 %v215_v56  ;;  %1157 = vmatmul.f32.gmra.mxu2 %v216_v20  ;;  %v231_v20 = vld [vmem:[%s3676_s0 + $0x6c8] sm:$0xff] }
 0x1e3   :  { %v1671_v8 = vmax.f32 %v1526_v52, 0.0  ;;  %1366 = vmatmul.f32.gmra.mxu3 %v217_v17  ;;  %v1528_v49 = vpop.f32.mrf.mxu0  ;;  %v232_v17 = vld [vmem:[%s3676_s0 + $0x6d0] sm:$0xff]  ;;  %v702_v52 = vadd.f32 %v3185_v32, %v2551_v53 }
 0x1e4   :  { %v1110_v9 = vpop.f32.mrf.mxu2 }
 0x1e5   :  { %1735 = vst.msk [vmem:[%s3678_s3 + $0xb8] sm:$0xff] %vm410_vm0, %v1671_v8  ;;  %v1111_v43 = vadd.f32 %v1110_v9, %v902_v48  ;;  %v233_v9 = vld [vmem:[%s3676_s0 + $0x6d8] sm:$0xff] }
 0x1e6   :  { %v904_v26 = vpop.f32.mrf.mxu1  ;;  %v1319_v7 = vpop.f32.mrf.mxu3  ;;  %1820 = vmatmul.msk.f32.gmra.mxu0 %vm410_vm0, %v218_v47 }
 0x1e7   :  { %v1320_v0 = vadd.f32 %v1319_v7, %v1111_v43  ;;  %v905_v57 = vadd.f32 %v904_v26, %v696_v31  ;;  %v705_v31 = vadd.f32 %v3185_v32, %v2572_v5 }
 0x1e9   :  { %v1529_v4 = vadd.f32 %v1528_v49, %v1320_v0  ;;  %951 = vmatmul.f32.gmra.mxu1 %v220_v12  ;;  %1160 = vmatmul.f32.gmra.mxu2 %v221_v41  ;;  %v235_v12 = vld [vmem:[%s3676_s0 + $0x6e8] sm:$0xff]  ;;  %v236_v41 = vld [vmem:[%s3676_s0 + $0x6f0] sm:$0xff] }
 0x1eb   :  { %v1672_v25 = vmax.f32 %v1529_v4, 0.0  ;;  %1369 = vmatmul.f32.gmra.mxu3 %v222_v44  ;;  %v1531_v59 = vpop.f32.mrf.mxu0  ;;  %v237_v44 = vld [vmem:[%s3676_s0 + $0x6f8] sm:$0xff] }
 0x1ec   :  { %v1113_v55 = vpop.f32.mrf.mxu2 }
 0x1ed   :  { %1736 = vst.msk [vmem:[%s3678_s3 + $0xc0] sm:$0xff] %vm410_vm0, %v1672_v25  ;;  %v1114_v15 = vadd.f32 %v1113_v55, %v905_v57 }
 0x1ee   :  { %v907_v33 = vpop.f32.mrf.mxu1  ;;  %v1322_v21 = vpop.f32.mrf.mxu3  ;;  %1821 = vmatmul.msk.f32.gmra.mxu0 %vm410_vm0, %v223_v24  ;;  %v238_v24 = vld [vmem:[%s3676_s0 + $0x700] sm:$0xff] }
 0x1ef   :  { %v1323_v27 = vadd.f32 %v1322_v21, %v1114_v15  ;;  %v908_v39 = vadd.f32 %v907_v33, %v699_v58  ;;  %v240_v21 = vld [vmem:[%s3676_s0 + $0x710] sm:$0xff] }
 0x1f1   :  { %v1532_v42 = vadd.f32 %v1531_v59, %v1323_v27  ;;  %954 = vmatmul.f32.gmra.mxu1 %v225_v36  ;;  %1163 = vmatmul.f32.gmra.mxu2 %v226_v45  ;;  %v241_v36 = vld [vmem:[%s3676_s0 + $0x718] sm:$0xff]  ;;  %v242_v27 = vld [vmem:[%s3676_s0 + $0x720] sm:$0xff] }
 0x1f3   :  { %v1673_v60 = vmax.f32 %v1532_v42, 0.0  ;;  %1372 = vmatmul.f32.gmra.mxu3 %v227_v1  ;;  %v1534_v40 = vpop.f32.mrf.mxu0  ;;  %v708_v1 = vadd.f32 %v3185_v32, %v2593_v34 }
 0x1f4   :  { %v1116_v18 = vpop.f32.mrf.mxu2 }
 0x1f5   :  { %1737 = vst.msk [vmem:[%s3678_s3 + $0xc8] sm:$0xff] %vm410_vm0, %v1673_v60  ;;  %v1117_v63 = vadd.f32 %v1116_v18, %v908_v39 }
 0x1f6   :  { %v910_v56 = vpop.f32.mrf.mxu1  ;;  %v1325_v37 = vpop.f32.mrf.mxu3  ;;  %1822 = vmatmul.msk.f32.gmra.mxu0 %vm410_vm0, %v228_v28 }
 0x1f7   :  { %v1326_v23 = vadd.f32 %v1325_v37, %v1117_v63  ;;  %v911_v8 = vadd.f32 %v910_v56, %v702_v52  ;;  %v245_v56 = vld [vmem:[%s3676_s0 + $0x738] sm:$0xff]  ;;  %v246_v37 = vld [vmem:[%s3676_s0 + $0x740] sm:$0xff] }
 0x1f9   :  { %v1535_v48 = vadd.f32 %v1534_v40, %v1326_v23  ;;  %957 = vmatmul.f32.gmra.mxu1 %v230_v13  ;;  %1166 = vmatmul.f32.gmra.mxu2 %v231_v20  ;;  %v243_v40 = vld [vmem:[%s3676_s0 + $0x728] sm:$0xff]  ;;  %v711_v23 = vadd.f32 %v3185_v32, %v2614_v2 }
 0x1fa   :  { %v247_v20 = vld [vmem:[%s3676_s0 + $0x748] sm:$0xff] }
 0x1fb   :  { %v1674_v49 = vmax.f32 %v1535_v48, 0.0  ;;  %1375 = vmatmul.f32.gmra.mxu3 %v232_v17  ;;  %v1537_v47 = vpop.f32.mrf.mxu0 }
 0x1fc   :  { %v1119_v43 = vpop.f32.mrf.mxu2 }
 0x1fd   :  { %1738 = vst.msk [vmem:[%s3678_s3 + $0xd0] sm:$0xff] %vm410_vm0, %v1674_v49  ;;  %v1120_v26 = vadd.f32 %v1119_v43, %v911_v8  ;;  %v248_v49 = vld [vmem:[%s3676_s0 + $0x750] sm:$0xff] }
 0x1fe   :  { %v913_v7 = vpop.f32.mrf.mxu1  ;;  %v1328_v53 = vpop.f32.mrf.mxu3  ;;  %1823 = vmatmul.msk.f32.gmra.mxu0 %vm410_vm0, %v233_v9 }
 0x1ff   :  { %v1329_v0 = vadd.f32 %v1328_v53, %v1120_v26  ;;  %v914_v57 = vadd.f32 %v913_v7, %v705_v31  ;;  %v250_v26 = vld [vmem:[%s3676_s0 + $0x760] sm:$0xff]  ;;  %v251_v7 = vld [vmem:[%s3676_s0 + $0x768] sm:$0xff] }
 0x201   :  { %v1538_v4 = vadd.f32 %v1537_v47, %v1329_v0  ;;  %960 = vmatmul.f32.gmra.mxu1 %v235_v12  ;;  %1169 = vmatmul.f32.gmra.mxu2 %v236_v41  ;;  %v252_v12 = vld [vmem:[%s3676_s0 + $0x770] sm:$0xff]  ;;  %v714_v41 = vadd.f32 %v3185_v32, %v2635_v11 }
 0x203   :  { %v1675_v25 = vmax.f32 %v1538_v4, 0.0  ;;  %1378 = vmatmul.f32.gmra.mxu3 %v237_v44  ;;  %v1540_v59 = vpop.f32.mrf.mxu0 }
 0x204   :  { %v1122_v55 = vpop.f32.mrf.mxu2 }
 0x205   :  { %1739 = vst.msk [vmem:[%s3678_s3 + $0xd8] sm:$0xff] %vm410_vm0, %v1675_v25  ;;  %v1123_v15 = vadd.f32 %v1122_v55, %v914_v57  ;;  %v253_v57 = vld [vmem:[%s3676_s0 + $0x778] sm:$0xff]  ;;  %v255_v55 = vld [vmem:[%s3676_s0 + $0x788] sm:$0xff] }
 0x206   :  { %v916_v33 = vpop.f32.mrf.mxu1  ;;  %v1331_v5 = vpop.f32.mrf.mxu3  ;;  %1824 = vmatmul.msk.f32.gmra.mxu0 %vm410_vm0, %v238_v24 }
 0x207   :  { %v1332_v45 = vadd.f32 %v1331_v5, %v1123_v15  ;;  %v917_v42 = vadd.f32 %v916_v33, %v708_v1  ;;  %v256_v15 = vld [vmem:[%s3676_s0 + $0x790] sm:$0xff]  ;;  %v257_v5 = vld [vmem:[%s3676_s0 + $0x798] sm:$0xff] }
 0x209   :  { %v1541_v58 = vadd.f32 %v1540_v59, %v1332_v45  ;;  %963 = vmatmul.f32.gmra.mxu1 %v240_v21  ;;  %1172 = vmatmul.f32.gmra.mxu2 %v241_v36  ;;  %v717_v21 = vadd.f32 %v3185_v32, %v2339_v14 }
 0x20b   :  { %v1676_v39 = vmax.f32 %v1541_v58, 0.0  ;;  %1381 = vmatmul.f32.gmra.mxu3 %v242_v27  ;;  %v1543_v60 = vpop.f32.mrf.mxu0  ;;  %v258_v58 = vld [vmem:[%s3676_s0 + $0x7a0] sm:$0xff] }
 0x20c   :  { %v1125_v28 = vpop.f32.mrf.mxu2 }
 0x20d   :  { %1740 = vst.msk [vmem:[%s3678_s3 + $0xe0] sm:$0xff] %vm410_vm0, %v1676_v39  ;;  %v1126_v18 = vadd.f32 %v1125_v28, %v917_v42  ;;  %v261_v28 = vld [vmem:[%s3676_s0 + $0x7b8] sm:$0xff] }
 0x20e   :  { %v919_v63 = vpop.f32.mrf.mxu1  ;;  %v1334_v34 = vpop.f32.mrf.mxu3  ;;  %1825 = vmatmul.msk.f32.gmra.mxu0 %vm410_vm0, %v243_v40  ;;  %v260_v40 = vld [vmem:[%s3676_s0 + $0x7b0] sm:$0xff] }
 0x20f   :  { %v1335_v13 = vadd.f32 %v1334_v34, %v1126_v18  ;;  %v920_v52 = vadd.f32 %v919_v63, %v711_v23  ;;  %v262_v63 = vld [vmem:[%s3676_s0 + $0x7c0] sm:$0xff]  ;;  %v720_v34 = vadd.f32 %v3185_v32, %v2360_v22  ;;  %v263_v23 = vld [vmem:[%s3676_s0 + $0x7c8] sm:$0xff] }
 0x211   :  { %v1544_v17 = vadd.f32 %v1543_v60, %v1335_v13  ;;  %966 = vmatmul.f32.gmra.mxu1 %v245_v56  ;;  %1175 = vmatmul.f32.gmra.mxu2 %v246_v37 }
 0x213   :  { %v1677_v48 = vmax.f32 %v1544_v17, 0.0  ;;  %1384 = vmatmul.f32.gmra.mxu3 %v247_v20  ;;  %v1546_v8 = vpop.f32.mrf.mxu0 }
 0x214   :  { %v1128_v47 = vpop.f32.mrf.mxu2 }
 0x215   :  { %1741 = vst.msk [vmem:[%s3678_s3 + $0xe8] sm:$0xff] %vm410_vm0, %v1677_v48  ;;  %v1129_v9 = vadd.f32 %v1128_v47, %v920_v52 }
 0x216   :  { %v922_v43 = vpop.f32.mrf.mxu1  ;;  %v1337_v2 = vpop.f32.mrf.mxu3  ;;  %1826 = vmatmul.msk.f32.gmra.mxu0 %vm410_vm0, %v248_v49  ;;  %v266_v49 = vld [vmem:[%s3676_s0 + $0x7e0] sm:$0xff] }
 0x217   :  { %v1338_v53 = vadd.f32 %v1337_v2, %v1129_v9  ;;  %v923_v44 = vadd.f32 %v922_v43, %v714_v41  ;;  %v267_v9 = vld [vmem:[%s3676_s0 + $0x7e8] sm:$0xff]  ;;  %v723_v43 = vadd.f32 %v3185_v32, %v2381_v30 }
 0x219   :  { %v1547_v0 = vadd.f32 %v1546_v8, %v1338_v53  ;;  %969 = vmatmul.f32.gmra.mxu1 %v250_v26  ;;  %1178 = vmatmul.f32.gmra.mxu2 %v251_v7  ;;  %v265_v8 = vld [vmem:[%s3676_s0 + $0x7d8] sm:$0xff] }
 0x21b   :  { %v1678_v31 = vmax.f32 %v1547_v0, 0.0  ;;  %1387 = vmatmul.f32.gmra.mxu3 %v252_v12  ;;  %v1549_v4 = vpop.f32.mrf.mxu0  ;;  %v268_v12 = vld [vmem:[%s3676_s0 + $0x7f0] sm:$0xff] }
 0x21c   :  { %v1131_v25 = vpop.f32.mrf.mxu2 }
 0x21d   :  { %1742 = vst.msk [vmem:[%s3678_s3 + $0xf0] sm:$0xff] %vm410_vm0, %v1678_v31  ;;  %v1132_v59 = vadd.f32 %v1131_v25, %v923_v44  ;;  %v270_v31 = vld [vmem:[%s3676_s0 + $0x800] sm:$0xff]  ;;  %v272_v25 = vld [vmem:[%s3676_s0 + $0x810] sm:$0xff] }
 0x21e   :  { %v925_v24 = vpop.f32.mrf.mxu1  ;;  %v1340_v11 = vpop.f32.mrf.mxu3  ;;  %1827 = vmatmul.msk.f32.gmra.mxu0 %vm410_vm0, %v253_v57 }
 0x21f   :  { %v1341_v33 = vadd.f32 %v1340_v11, %v1132_v59  ;;  %v926_v45 = vadd.f32 %v925_v24, %v717_v21  ;;  %v726_v59 = vadd.f32 %v3185_v32, %v2402_v38 }
 0x221   :  { %v1550_v36 = vadd.f32 %v1549_v4, %v1341_v33  ;;  %972 = vmatmul.f32.gmra.mxu1 %v255_v55  ;;  %1181 = vmatmul.f32.gmra.mxu2 %v256_v15  ;;  %v271_v4 = vld [vmem:[%s3676_s0 + $0x808] sm:$0xff]  ;;  %v273_v33 = vld [vmem:[%s3676_s0 + $0x818] sm:$0xff] }
 0x223   :  { %v1679_v27 = vmax.f32 %v1550_v36, 0.0  ;;  %1390 = vmatmul.f32.gmra.mxu3 %v257_v5  ;;  %v1552_v1 = vpop.f32.mrf.mxu0 }
 0x224   :  { %v1134_v42 = vpop.f32.mrf.mxu2 }
 0x225   :  { %1743 = vst.msk [vmem:[%s3678_s3 + $0xf8] sm:$0xff] %vm410_vm0, %v1679_v27  ;;  %v1135_v39 = vadd.f32 %v1134_v42, %v926_v45  ;;  %v275_v45 = vld [vmem:[%s3676_s0 + $0x828] sm:$0xff]  ;;  %v276_v27 = vld [vmem:[%s3676_s0 + $0x830] sm:$0xff]  ;;  %v729_v42 = vadd.f32 %v3185_v32, %v2423_v46 }
 0x226   :  { %v928_v60 = vpop.f32.mrf.mxu1  ;;  %v1343_v14 = vpop.f32.mrf.mxu3  ;;  %1828 = vmatmul.msk.f32.gmra.mxu0 %vm410_vm0, %v258_v58  ;;  %v277_v58 = vld [vmem:[%s3676_s0 + $0x838] sm:$0xff] }
 0x227   :  { %v1344_v18 = vadd.f32 %v1343_v14, %v1135_v39  ;;  %v929_v37 = vadd.f32 %v928_v60, %v720_v34 }
 0x229   :  { %v1553_v56 = vadd.f32 %v1552_v1, %v1344_v18  ;;  %975 = vmatmul.f32.gmra.mxu1 %v260_v40  ;;  %1184 = vmatmul.f32.gmra.mxu2 %v261_v28  ;;  %v278_v28 = vld [vmem:[%s3676_s0 + $0x840] sm:$0xff] }
 0x22b   :  { %v1680_v13 = vmax.f32 %v1553_v56, 0.0  ;;  %1393 = vmatmul.f32.gmra.mxu3 %v262_v63  ;;  %v1555_v20 = vpop.f32.mrf.mxu0  ;;  %v280_v56 = vld [vmem:[%s3676_s0 + $0x850] sm:$0xff] }
 0x22c   :  { %v1137_v17 = vpop.f32.mrf.mxu2 }
 0x22d   :  { %1744 = vst.msk [vmem:[%s3678_s3 + $0x100] sm:$0xff] %vm410_vm0, %v1680_v13  ;;  %v1138_v52 = vadd.f32 %v1137_v17, %v929_v37  ;;  %v281_v37 = vld [vmem:[%s3676_s0 + $0x858] sm:$0xff] }
 0x22e   :  { %v931_v48 = vpop.f32.mrf.mxu1  ;;  %v1346_v22 = vpop.f32.mrf.mxu3  ;;  %1829 = vmatmul.msk.f32.gmra.mxu0 %vm410_vm0, %v263_v23  ;;  %v732_v23 = vadd.f32 %v3185_v32, %v2444_v54 }
 0x22f   :  { %v1347_v47 = vadd.f32 %v1346_v22, %v1138_v52  ;;  %v932_v26 = vadd.f32 %v931_v48, %v723_v43  ;;  %v285_v43 = vld [vmem:[%s3676_s0 + $0x878] sm:$0xff] }
 0x231   :  { %v1556_v2 = vadd.f32 %v1555_v20, %v1347_v47  ;;  %978 = vmatmul.f32.gmra.mxu1 %v265_v8  ;;  %1187 = vmatmul.f32.gmra.mxu2 %v266_v49  ;;  %v282_v20 = vld [vmem:[%s3676_s0 + $0x860] sm:$0xff]  ;;  %v283_v8 = vld [vmem:[%s3676_s0 + $0x868] sm:$0xff] }
 0x233   :  { %v1681_v7 = vmax.f32 %v1556_v2, 0.0  ;;  %1396 = vmatmul.f32.gmra.mxu3 %v267_v9  ;;  %v1558_v53 = vpop.f32.mrf.mxu0  ;;  %v286_v2 = vld [vmem:[%s3676_s0 + $0x880] sm:$0xff] }
 0x234   :  { %v1140_v41 = vpop.f32.mrf.mxu2 }
 0x235   :  { %1745 = vst.msk [vmem:[%s3678_s3 + $0x108] sm:$0xff] %vm410_vm0, %v1681_v7  ;;  %v1141_v0 = vadd.f32 %v1140_v41, %v932_v26  ;;  %v287_v7 = vld [vmem:[%s3676_s0 + $0x888] sm:$0xff] }
 0x236   :  { %v934_v44 = vpop.f32.mrf.mxu1  ;;  %v1349_v30 = vpop.f32.mrf.mxu3  ;;  %1830 = vmatmul.msk.f32.gmra.mxu0 %vm410_vm0, %v268_v12 }
 0x237   :  { %v1350_v57 = vadd.f32 %v1349_v30, %v1141_v0  ;;  %v935_v11 = vadd.f32 %v934_v44, %v726_v59  ;;  %v288_v30 = vld [vmem:[%s3676_s0 + $0x890] sm:$0xff]  ;;  %v291_v59 = vld [vmem:[%s3676_s0 + $0x8a8] sm:$0xff] }
 0x239   :  { %v1559_v24 = vadd.f32 %v1558_v53, %v1350_v57  ;;  %981 = vmatmul.f32.gmra.mxu1 %v270_v31  ;;  %1190 = vmatmul.f32.gmra.mxu2 %v271_v4  ;;  %v735_v53 = vadd.f32 %v3185_v32, %v2465_v62 }
 0x23b   :  { %v1682_v55 = vmax.f32 %v1559_v24, 0.0  ;;  %1399 = vmatmul.f32.gmra.mxu3 %v272_v25  ;;  %v1561_v15 = vpop.f32.mrf.mxu0  ;;  %v290_v25 = vld [vmem:[%s3676_s0 + $0x8a0] sm:$0xff] }
 0x23c   :  { %v1143_v5 = vpop.f32.mrf.mxu2 }
 0x23d   :  { %1746 = vst.msk [vmem:[%s3678_s3 + $0x110] sm:$0xff] %vm410_vm0, %v1682_v55  ;;  %v1144_v21 = vadd.f32 %v1143_v5, %v935_v11  ;;  %v292_v11 = vld [vmem:[%s3676_s0 + $0x8b0] sm:$0xff]  ;;  %v738_v55 = vadd.f32 %v3185_v32, %v2486_v6 }
 0x23e   :  { %v937_v36 = vpop.f32.mrf.mxu1  ;;  %v1352_v38 = vpop.f32.mrf.mxu3  ;;  %1831 = vmatmul.msk.f32.gmra.mxu0 %vm410_vm0, %v273_v33 }
 0x23f   :  { %v1353_v1 = vadd.f32 %v1352_v38, %v1144_v21  ;;  %v938_v60 = vadd.f32 %v937_v36, %v729_v42  ;;  %v293_v36 = vld [vmem:[%s3676_s0 + $0x8b8] sm:$0xff] }
 0x241   :  { %v1562_v39 = vadd.f32 %v1561_v15, %v1353_v1  ;;  %984 = vmatmul.f32.gmra.mxu1 %v275_v45  ;;  %1193 = vmatmul.f32.gmra.mxu2 %v276_v27  ;;  %v295_v1 = vld [vmem:[%s3676_s0 + $0x8c8] sm:$0xff] }
 0x243   :  { %v1683_v14 = vmax.f32 %v1562_v39, 0.0  ;;  %1402 = vmatmul.f32.gmra.mxu3 %v277_v58  ;;  %v1564_v40 = vpop.f32.mrf.mxu0  ;;  %v296_v58 = vld [vmem:[%s3676_s0 + $0x8d0] sm:$0xff]  ;;  %v297_v39 = vld [vmem:[%s3676_s0 + $0x8d8] sm:$0xff] }
 0x244   :  { %v1146_v18 = vpop.f32.mrf.mxu2 }
 0x245   :  { %1747 = vst.msk [vmem:[%s3678_s3 + $0x118] sm:$0xff] %vm410_vm0, %v1683_v14  ;;  %v1147_v63 = vadd.f32 %v1146_v18, %v938_v60  ;;  %v741_v60 = vadd.f32 %v3185_v32, %v2507_v19 }
 0x246   :  { %v940_v34 = vpop.f32.mrf.mxu1  ;;  %v1355_v46 = vpop.f32.mrf.mxu3  ;;  %1832 = vmatmul.msk.f32.gmra.mxu0 %vm410_vm0, %v278_v28 }
 0x247   :  { %v1356_v13 = vadd.f32 %v1355_v46, %v1147_v63  ;;  %v941_v52 = vadd.f32 %v940_v34, %v732_v23  ;;  %v298_v63 = vld [vmem:[%s3676_s0 + $0x8e0] sm:$0xff] }
 0x248   :  { %v302_v23 = vld [vmem:[%s3676_s0 + $0x900] sm:$0xff] }
 0x249   :  { %v1565_v17 = vadd.f32 %v1564_v40, %v1356_v13  ;;  %987 = vmatmul.f32.gmra.mxu1 %v280_v56  ;;  %1196 = vmatmul.f32.gmra.mxu2 %v281_v37  ;;  %v300_v37 = vld [vmem:[%s3676_s0 + $0x8f0] sm:$0xff]  ;;  %v301_v13 = vld [vmem:[%s3676_s0 + $0x8f8] sm:$0xff] }
 0x24b   :  { %v1684_v48 = vmax.f32 %v1565_v17, 0.0  ;;  %1405 = vmatmul.f32.gmra.mxu3 %v282_v20  ;;  %v1567_v22 = vpop.f32.mrf.mxu0  ;;  %v744_v17 = vadd.f32 %v3185_v32, %v2528_v35 }
 0x24c   :  { %v1149_v49 = vpop.f32.mrf.mxu2 }
 0x24d   :  { %1748 = vst.msk [vmem:[%s3678_s3 + $0x120] sm:$0xff] %vm410_vm0, %v1684_v48  ;;  %v1150_v47 = vadd.f32 %v1149_v49, %v941_v52  ;;  %v303_v49 = vld [vmem:[%s3676_s0 + $0x908] sm:$0xff] }
 0x24e   :  { %v943_v9 = vpop.f32.mrf.mxu1  ;;  %v1358_v54 = vpop.f32.mrf.mxu3  ;;  %1833 = vmatmul.msk.f32.gmra.mxu0 %vm410_vm0, %v283_v8 }
 0x24f   :  { %v1359_v26 = vadd.f32 %v1358_v54, %v1150_v47  ;;  %v944_v41 = vadd.f32 %v943_v9, %v735_v53  ;;  %v747_v53 = vadd.f32 %v3185_v32, %v2549_v51 }
 0x251   :  { %v1568_v12 = vadd.f32 %v1567_v22, %v1359_v26  ;;  %990 = vmatmul.f32.gmra.mxu1 %v285_v43  ;;  %1199 = vmatmul.f32.gmra.mxu2 %v286_v2  ;;  %v305_v43 = vld [vmem:[%s3676_s0 + $0x918] sm:$0xff]  ;;  %v306_v2 = vld [vmem:[%s3676_s0 + $0x920] sm:$0xff] }
 0x253   :  { %v1685_v0 = vmax.f32 %v1568_v12, 0.0  ;;  %1408 = vmatmul.f32.gmra.mxu3 %v287_v7  ;;  %v1570_v44 = vpop.f32.mrf.mxu0  ;;  %v307_v7 = vld [vmem:[%s3676_s0 + $0x928] sm:$0xff] }
 0x254   :  { %v1152_v31 = vpop.f32.mrf.mxu2 }
 0x255   :  { %1749 = vst.msk [vmem:[%s3678_s3 + $0x128] sm:$0xff] %vm410_vm0, %v1685_v0  ;;  %v1153_v4 = vadd.f32 %v1152_v31, %v944_v41 }
 0x256   :  { %v946_v57 = vpop.f32.mrf.mxu1  ;;  %v1361_v62 = vpop.f32.mrf.mxu3  ;;  %1834 = vmatmul.msk.f32.gmra.mxu0 %vm410_vm0, %v288_v30  ;;  %v308_v30 = vld [vmem:[%s3676_s0 + $0x930] sm:$0xff] }
 0x257   :  { %v1362_v24 = vadd.f32 %v1361_v62, %v1153_v4  ;;  %v947_v33 = vadd.f32 %v946_v57, %v738_v55  ;;  %v310_v62 = vld [vmem:[%s3676_s0 + $0x940] sm:$0xff] }
 0x259   :  { %v1571_v15 = vadd.f32 %v1570_v44, %v1362_v24  ;;  %993 = vmatmul.f32.gmra.mxu1 %v290_v25  ;;  %1202 = vmatmul.f32.gmra.mxu2 %v291_v59  ;;  %v311_v25 = vld [vmem:[%s3676_s0 + $0x948] sm:$0xff]  ;;  %v312_v24 = vld [vmem:[%s3676_s0 + $0x950] sm:$0xff] }
 0x25b   :  { %v1686_v5 = vmax.f32 %v1571_v15, 0.0  ;;  %1411 = vmatmul.f32.gmra.mxu3 %v292_v11  ;;  %v1573_v21 = vpop.f32.mrf.mxu0  ;;  %v750_v11 = vadd.f32 %v3185_v32, %v2570_v3 }
 0x25c   :  { %v1155_v38 = vpop.f32.mrf.mxu2 }
 0x25d   :  { %1750 = vst.msk [vmem:[%s3678_s3 + $0x130] sm:$0xff] %vm410_vm0, %v1686_v5  ;;  %v1156_v45 = vadd.f32 %v1155_v38, %v947_v33 }
 0x25e   :  { %v949_v27 = vpop.f32.mrf.mxu1  ;;  %v1364_v6 = vpop.f32.mrf.mxu3  ;;  %1835 = vmatmul.msk.f32.gmra.mxu0 %vm410_vm0, %v293_v36 }
 0x25f   :  { %v1365_v42 = vadd.f32 %v1364_v6, %v1156_v45  ;;  %v950_v40 = vadd.f32 %v949_v27, %v741_v60  ;;  %v315_v27 = vld [vmem:[%s3676_s0 + $0x968] sm:$0xff]  ;;  %v316_v6 = vld [vmem:[%s3676_s0 + $0x970] sm:$0xff] }
 0x261   :  { %v1574_v14 = vadd.f32 %v1573_v21, %v1365_v42  ;;  %996 = vmatmul.f32.gmra.mxu1 %v295_v1  ;;  %1205 = vmatmul.f32.gmra.mxu2 %v296_v58  ;;  %v313_v21 = vld [vmem:[%s3676_s0 + $0x958] sm:$0xff]  ;;  %v753_v42 = vadd.f32 %v3185_v32, %v2591_v29 }
 0x262   :  { %v317_v58 = vld [vmem:[%s3676_s0 + $0x978] sm:$0xff] }
 0x263   :  { %v1687_v28 = vmax.f32 %v1574_v14, 0.0  ;;  %1414 = vmatmul.f32.gmra.mxu3 %v297_v39  ;;  %v1576_v18 = vpop.f32.mrf.mxu0 }
 0x264   :  { %v1158_v34 = vpop.f32.mrf.mxu2 }
 0x265   :  { %1751 = vst.msk [vmem:[%s3678_s3 + $0x138] sm:$0xff] %vm410_vm0, %v1687_v28  ;;  %v1159_v46 = vadd.f32 %v1158_v34, %v950_v40  ;;  %v318_v28 = vld [vmem:[%s3676_s0 + $0x980] sm:$0xff] }
 0x266   :  { %v952_v56 = vpop.f32.mrf.mxu1  ;;  %v1367_v19 = vpop.f32.mrf.mxu3  ;;  %1836 = vmatmul.msk.f32.gmra.mxu0 %vm410_vm0, %v298_v63 }
 0x267   :  { %v1368_v20 = vadd.f32 %v1367_v19, %v1159_v46  ;;  %v953_v48 = vadd.f32 %v952_v56, %v744_v17  ;;  %v320_v46 = vld [vmem:[%s3676_s0 + $0x990] sm:$0xff]  ;;  %v321_v56 = vld [vmem:[%s3676_s0 + $0x998] sm:$0xff] }
 0x269   :  { %v1577_v52 = vadd.f32 %v1576_v18, %v1368_v20  ;;  %999 = vmatmul.f32.gmra.mxu1 %v300_v37  ;;  %1208 = vmatmul.f32.gmra.mxu2 %v301_v13  ;;  %v322_v37 = vld [vmem:[%s3676_s0 + $0x9a0] sm:$0xff]  ;;  %v756_v13 = vadd.f32 %v3185_v32, %v2612_v61 }
 0x26b   :  { %v1688_v22 = vmax.f32 %v1577_v52, 0.0  ;;  %1417 = vmatmul.f32.gmra.mxu3 %v302_v23  ;;  %v1579_v8 = vpop.f32.mrf.mxu0 }
 0x26c   :  { %v1161_v47 = vpop.f32.mrf.mxu2 }
 0x26d   :  { %1752 = vst.msk [vmem:[%s3678_s3 + $0x140] sm:$0xff] %vm410_vm0, %v1688_v22  ;;  %v1162_v9 = vadd.f32 %v1161_v47, %v953_v48  ;;  %v323_v48 = vld [vmem:[%s3676_s0 + $0x9a8] sm:$0xff]  ;;  %v325_v47 = vld [vmem:[%s3676_s0 + $0x9b8] sm:$0xff] }
 0x26e   :  { %v955_v54 = vpop.f32.mrf.mxu1  ;;  %v1370_v35 = vpop.f32.mrf.mxu3  ;;  %1837 = vmatmul.msk.f32.gmra.mxu0 %vm410_vm0, %v303_v49 }
 0x26f   :  { %v1371_v26 = vadd.f32 %v1370_v35, %v1162_v9  ;;  %v956_v41 = vadd.f32 %v955_v54, %v747_v53  ;;  %v326_v9 = vld [vmem:[%s3676_s0 + $0x9c0] sm:$0xff]  ;;  %v327_v35 = vld [vmem:[%s3676_s0 + $0x9c8] sm:$0xff] }
 0x271   :  { %v1580_v12 = vadd.f32 %v1579_v8, %v1371_v26  ;;  %1002 = vmatmul.f32.gmra.mxu1 %v305_v43  ;;  %1211 = vmatmul.f32.gmra.mxu2 %v306_v2  ;;  %v759_v43 = vadd.f32 %v3185_v32, %v2633_v50 }
 0x273   :  { %v1689_v0 = vmax.f32 %v1580_v12, 0.0  ;;  %1420 = vmatmul.f32.gmra.mxu3 %v307_v7  ;;  %v1582_v44 = vpop.f32.mrf.mxu0  ;;  %v328_v12 = vld [vmem:[%s3676_s0 + $0x9d0] sm:$0xff] }
 0x274   :  { %v1164_v31 = vpop.f32.mrf.mxu2 }
 0x275   :  { %1753 = vst.msk [vmem:[%s3678_s3 + $0x148] sm:$0xff] %vm410_vm0, %v1689_v0  ;;  %v1165_v4 = vadd.f32 %v1164_v31, %v956_v41  ;;  %v331_v31 = vld [vmem:[%s3676_s0 + $0x9e8] sm:$0xff] }
 0x276   :  { %v958_v57 = vpop.f32.mrf.mxu1  ;;  %v1373_v51 = vpop.f32.mrf.mxu3  ;;  %1838 = vmatmul.msk.f32.gmra.mxu0 %vm410_vm0, %v308_v30  ;;  %v330_v30 = vld [vmem:[%s3676_s0 + $0x9e0] sm:$0xff] }
 0x277   :  { %v1374_v59 = vadd.f32 %v1373_v51, %v1165_v4  ;;  %v959_v15 = vadd.f32 %v958_v57, %v750_v11  ;;  %v332_v57 = vld [vmem:[%s3676_s0 + $0x9f0] sm:$0xff]  ;;  %v762_v51 = vadd.f32 %v3185_v32, %v2654_v10  ;;  %v333_v11 = vld [vmem:[%s3676_s0 + $0x9f8] sm:$0xff] }
 0x279   :  { %v1583_v55 = vadd.f32 %v1582_v44, %v1374_v59  ;;  %1005 = vmatmul.f32.gmra.mxu1 %v310_v62  ;;  %1214 = vmatmul.f32.gmra.mxu2 %v311_v25 }
 0x27b   :  { %v1690_v33 = vmax.f32 %v1583_v55, 0.0  ;;  %1423 = vmatmul.f32.gmra.mxu3 %v312_v24  ;;  %v1585_v5 = vpop.f32.mrf.mxu0 }
 0x27c   :  { %v1167_v36 = vpop.f32.mrf.mxu2 }
 0x27d   :  { %1754 = vst.msk [vmem:[%s3678_s3 + $0x150] sm:$0xff] %vm410_vm0, %v1690_v33  ;;  %v1168_v38 = vadd.f32 %v1167_v36, %v959_v15 }
 0x27e   :  { %v961_v45 = vpop.f32.mrf.mxu1  ;;  %v1376_v3 = vpop.f32.mrf.mxu3  ;;  %1839 = vmatmul.msk.f32.gmra.mxu0 %vm410_vm0, %v313_v21  ;;  %v765_v21 = vadd.f32 %v3185_v32, %v2343_v16 }
 0x27f   :  { %v1377_v1 = vadd.f32 %v1376_v3, %v1168_v38  ;;  %v962_v60 = vadd.f32 %v961_v45, %v753_v42 }
 0x281   :  { %v1586_v39 = vadd.f32 %v1585_v5, %v1377_v1  ;;  %1008 = vmatmul.f32.gmra.mxu1 %v315_v27  ;;  %1217 = vmatmul.f32.gmra.mxu2 %v316_v6 }
 0x283   :  { %v1691_v14 = vmax.f32 %v1586_v39, 0.0  ;;  %1426 = vmatmul.f32.gmra.mxu3 %v317_v58  ;;  %v1588_v40 = vpop.f32.mrf.mxu0  ;;  %v3694_v39 = vld [vmem:[#allocation2_spill] sm:$0xff] }
 0x284   :  { %v1170_v18 = vpop.f32.mrf.mxu2 }
 0x285   :  { %1755 = vst.msk [vmem:[%s3678_s3 + $0x158] sm:$0xff] %vm410_vm0, %v1691_v14  ;;  %v1171_v63 = vadd.f32 %v1170_v18, %v962_v60  ;;  %v768_v60 = vadd.f32 %v3185_v32, %v3694_v39 }
 0x286   :  { %v964_v34 = vpop.f32.mrf.mxu1  ;;  %v1379_v29 = vpop.f32.mrf.mxu3  ;;  %1840 = vmatmul.msk.f32.gmra.mxu0 %vm410_vm0, %v318_v28 }
 0x287   :  { %v1380_v19 = vadd.f32 %v1379_v29, %v1171_v63  ;;  %v965_v23 = vadd.f32 %v964_v34, %v756_v13 }
 0x289   :  { %v1589_v20 = vadd.f32 %v1588_v40, %v1380_v19  ;;  %1011 = vmatmul.f32.gmra.mxu1 %v320_v46  ;;  %1220 = vmatmul.f32.gmra.mxu2 %v321_v56  ;;  %v3695_v56 = vld [vmem:[#allocation3_spill] sm:$0xff] }
 0x28a   :  { %v771_v19 = vadd.f32 %v3185_v32, %v3695_v56 }
 0x28b   :  { %v1692_v17 = vmax.f32 %v1589_v20, 0.0  ;;  %1429 = vmatmul.f32.gmra.mxu3 %v322_v37  ;;  %v1591_v52 = vpop.f32.mrf.mxu0 }
 0x28c   :  { %v1173_v22 = vpop.f32.mrf.mxu2 }
 0x28d   :  { %1756 = vst.msk [vmem:[%s3678_s3 + $0x160] sm:$0xff] %vm410_vm0, %v1692_v17  ;;  %v1174_v8 = vadd.f32 %v1173_v22, %v965_v23 }
 0x28e   :  { %v967_v49 = vpop.f32.mrf.mxu1  ;;  %v1382_v61 = vpop.f32.mrf.mxu3  ;;  %1841 = vmatmul.msk.f32.gmra.mxu0 %vm410_vm0, %v323_v48 }
 0x28f   :  { %v1383_v54 = vadd.f32 %v1382_v61, %v1174_v8  ;;  %v968_v26 = vadd.f32 %v967_v49, %v759_v43  ;;  %v3696_v49 = vld [vmem:[#allocation4_spill] sm:$0xff] }
 0x290   :  { %v774_v61 = vadd.f32 %v3185_v32, %v3696_v49 }
 0x291   :  { %v1592_v2 = vadd.f32 %v1591_v52, %v1383_v54  ;;  %1014 = vmatmul.f32.gmra.mxu1 %v325_v47  ;;  %1223 = vmatmul.f32.gmra.mxu2 %v326_v9 }
 0x293   :  { %v1693_v7 = vmax.f32 %v1592_v2, 0.0  ;;  %1432 = vmatmul.f32.gmra.mxu3 %v327_v35  ;;  %v1594_v53 = vpop.f32.mrf.mxu0 }
 0x294   :  { %v1176_v41 = vpop.f32.mrf.mxu2 }
 0x295   :  { %1757 = vst.msk [vmem:[%s3678_s3 + $0x168] sm:$0xff] %vm410_vm0, %v1693_v7  ;;  %v1177_v0 = vadd.f32 %v1176_v41, %v968_v26 }
 0x296   :  { %v970_v44 = vpop.f32.mrf.mxu1  ;;  %v1385_v50 = vpop.f32.mrf.mxu3  ;;  %1842 = vmatmul.msk.f32.gmra.mxu0 %vm410_vm0, %v328_v12  ;;  %v3697_v12 = vld [vmem:[#allocation5_spill] sm:$0xff] }
 0x297   :  { %v1386_v4 = vadd.f32 %v1385_v50, %v1177_v0  ;;  %v971_v25 = vadd.f32 %v970_v44, %v762_v51  ;;  %v777_v41 = vadd.f32 %v3185_v32, %v3697_v12 }
 0x299   :  { %v1595_v62 = vadd.f32 %v1594_v53, %v1386_v4  ;;  %1017 = vmatmul.f32.gmra.mxu1 %v330_v30  ;;  %1226 = vmatmul.f32.gmra.mxu2 %v331_v31 }
 0x29b   :  { %v1694_v59 = vmax.f32 %v1595_v62, 0.0  ;;  %1435 = vmatmul.f32.gmra.mxu3 %v332_v57  ;;  %v1597_v24 = vpop.f32.mrf.mxu0 }
 0x29c   :  { %v1179_v55 = vpop.f32.mrf.mxu2 }
 0x29d   :  { %1758 = vst.msk [vmem:[%s3678_s3 + $0x170] sm:$0xff] %vm410_vm0, %v1694_v59  ;;  %v1180_v15 = vadd.f32 %v1179_v55, %v971_v25  ;;  %v3698_v25 = vld [vmem:[#allocation6_spill] sm:$0xff] }
 0x29e   :  { %v973_v33 = vpop.f32.mrf.mxu1  ;;  %v1388_v10 = vpop.f32.mrf.mxu3  ;;  %1843 = vmatmul.msk.f32.gmra.mxu0 %vm410_vm0, %v333_v11  ;;  %v780_v59 = vadd.f32 %v3185_v32, %v3698_v25 }
 0x29f   :  { %v1389_v5 = vadd.f32 %v1388_v10, %v1180_v15  ;;  %v974_v38 = vadd.f32 %v973_v33, %v765_v21 }
 0x2a1   :  { %v1598_v36 = vadd.f32 %v1597_v24, %v1389_v5 }
 0x2a3   :  { %v1695_v45 = vmax.f32 %v1598_v36, 0.0  ;;  %v1600_v3 = vpop.f32.mrf.mxu0 }
 0x2a4   :  { %v1182_v27 = vpop.f32.mrf.mxu2 }
 0x2a5   :  { %1759 = vst.msk [vmem:[%s3678_s3 + $0x178] sm:$0xff] %vm410_vm0, %v1695_v45  ;;  %v1183_v6 = vadd.f32 %v1182_v27, %v974_v38  ;;  %v3699_v38 = vld [vmem:[#allocation7_spill] sm:$0xff] }
 0x2a6   :  { %v976_v1 = vpop.f32.mrf.mxu1  ;;  %v1391_v58 = vpop.f32.mrf.mxu3  ;;  %v783_v45 = vadd.f32 %v3185_v32, %v3699_v38 }
 0x2a7   :  { %v1392_v42 = vadd.f32 %v1391_v58, %v1183_v6  ;;  %v977_v40 = vadd.f32 %v976_v1, %v768_v60 }
 0x2a9   :  { %v1601_v14 = vadd.f32 %v1600_v3, %v1392_v42 }
 0x2ab   :  { %v1696_v16 = vmax.f32 %v1601_v14, 0.0  ;;  %v1603_v28 = vpop.f32.mrf.mxu0 }
 0x2ac   :  { %v1185_v18 = vpop.f32.mrf.mxu2 }
 0x2ad   :  { %1760 = vst.msk [vmem:[%s3678_s3 + $0x180] sm:$0xff] %vm410_vm0, %v1696_v16  ;;  %v1186_v63 = vadd.f32 %v1185_v18, %v977_v40  ;;  %v3700_v40 = vld [vmem:[#allocation8_spill] sm:$0xff] }
 0x2ae   :  { %v979_v34 = vpop.f32.mrf.mxu1  ;;  %v1394_v29 = vpop.f32.mrf.mxu3  ;;  %v786_v16 = vadd.f32 %v3185_v32, %v3700_v40 }
 0x2af   :  { %v1395_v46 = vadd.f32 %v1394_v29, %v1186_v63  ;;  %v980_v13 = vadd.f32 %v979_v34, %v771_v19 }
 0x2b1   :  { %v1604_v37 = vadd.f32 %v1603_v28, %v1395_v46 }
 0x2b3   :  { %v1697_v20 = vmax.f32 %v1604_v37, 0.0  ;;  %v1606_v23 = vpop.f32.mrf.mxu0 }
 0x2b4   :  { %v1188_v17 = vpop.f32.mrf.mxu2 }
 0x2b5   :  { %1761 = vst.msk [vmem:[%s3678_s3 + $0x188] sm:$0xff] %vm410_vm0, %v1697_v20  ;;  %v1189_v52 = vadd.f32 %v1188_v17, %v980_v13  ;;  %v3701_v13 = vld [vmem:[#allocation9_spill] sm:$0xff] }
 0x2b6   :  { %v982_v48 = vpop.f32.mrf.mxu1  ;;  %v1397_v22 = vpop.f32.mrf.mxu3  ;;  %v789_v20 = vadd.f32 %v3185_v32, %v3701_v13 }
 0x2b7   :  { %v1398_v8 = vadd.f32 %v1397_v22, %v1189_v52  ;;  %v983_v9 = vadd.f32 %v982_v48, %v774_v61 }
 0x2b9   :  { %v1607_v47 = vadd.f32 %v1606_v23, %v1398_v8 }
 0x2bb   :  { %v1698_v54 = vmax.f32 %v1607_v47, 0.0  ;;  %v1609_v35 = vpop.f32.mrf.mxu0 }
 0x2bc   :  { %v1191_v43 = vpop.f32.mrf.mxu2 }
 0x2bd   :  { %1762 = vst.msk [vmem:[%s3678_s3 + $0x190] sm:$0xff] %vm410_vm0, %v1698_v54  ;;  %v1192_v2 = vadd.f32 %v1191_v43, %v983_v9  ;;  %v3702_v9 = vld [vmem:[#allocation10_spill] sm:$0xff] }
 0x2be   :  { %v985_v26 = vpop.f32.mrf.mxu1  ;;  %v1400_v7 = vpop.f32.mrf.mxu3  ;;  %v792_v54 = vadd.f32 %v3185_v32, %v3702_v9 }
 0x2bf   :  { %v1401_v53 = vadd.f32 %v1400_v7, %v1192_v2  ;;  %v986_v44 = vadd.f32 %v985_v26, %v777_v41 }
 0x2c1   :  { %v1610_v0 = vadd.f32 %v1609_v35, %v1401_v53 }
 0x2c3   :  { %v1699_v50 = vmax.f32 %v1610_v0, 0.0  ;;  %v1612_v30 = vpop.f32.mrf.mxu0 }
 0x2c4   :  { %v1194_v31 = vpop.f32.mrf.mxu2 }
 0x2c5   :  { %1763 = vst.msk [vmem:[%s3678_s3 + $0x198] sm:$0xff] %vm410_vm0, %v1699_v50  ;;  %v1195_v4 = vadd.f32 %v1194_v31, %v986_v44  ;;  %v3703_v44 = vld [vmem:[#allocation11_spill] sm:$0xff] }
 0x2c6   :  { %v988_v57 = vpop.f32.mrf.mxu1  ;;  %v1403_v51 = vpop.f32.mrf.mxu3  ;;  %v795_v50 = vadd.f32 %v3185_v32, %v3703_v44 }
 0x2c7   :  { %v1404_v62 = vadd.f32 %v1403_v51, %v1195_v4  ;;  %v989_v11 = vadd.f32 %v988_v57, %v780_v59 }
 0x2c9   :  { %v1613_v24 = vadd.f32 %v1612_v30, %v1404_v62 }
 0x2cb   :  { %v1700_v55 = vmax.f32 %v1613_v24, 0.0  ;;  %v1615_v15 = vpop.f32.mrf.mxu0 }
 0x2cc   :  { %v1197_v33 = vpop.f32.mrf.mxu2 }
 0x2cd   :  { %1764 = vst.msk [vmem:[%s3678_s3 + $0x1a0] sm:$0xff] %vm410_vm0, %v1700_v55  ;;  %v1198_v10 = vadd.f32 %v1197_v33, %v989_v11  ;;  %v1894_v11 = vld [vmem:[%s3677_s2] ss:$0 sm:$0xff]  ;;  %v3704_v55 = vld [vmem:[#allocation12_spill] sm:$0xff] }
 0x2ce   :  { %v991_v5 = vpop.f32.mrf.mxu1  ;;  %v1406_v21 = vpop.f32.mrf.mxu3  ;;  %v798_v32 = vadd.f32 %v1894_v11, %v3704_v55 }
 0x2cf   :  { %v1407_v36 = vadd.f32 %v1406_v21, %v1198_v10  ;;  %v992_v27 = vadd.f32 %v991_v5, %v783_v45 }
 0x2d1   :  { %v1616_v3 = vadd.f32 %v1615_v15, %v1407_v36 }
 0x2d3   :  { %v1701_v6 = vmax.f32 %v1616_v3, 0.0  ;;  %v1618_v1 = vpop.f32.mrf.mxu0 }
 0x2d4   :  { %v1200_v58 = vpop.f32.mrf.mxu2 }
 0x2d5   :  { %1765 = vst.msk [vmem:[%s3678_s3 + $0x1a8] sm:$0xff] %vm410_vm0, %v1701_v6  ;;  %v1201_v42 = vadd.f32 %v1200_v58, %v992_v27  ;;  %v3705_v27 = vld [vmem:[#allocation13_spill] sm:$0xff] }
 0x2d6   :  { %v994_v39 = vpop.f32.mrf.mxu1  ;;  %v1409_v60 = vpop.f32.mrf.mxu3  ;;  %v801_v6 = vadd.f32 %v1894_v11, %v3705_v27 }
 0x2d7   :  { %v1410_v14 = vadd.f32 %v1409_v60, %v1201_v42  ;;  %v995_v18 = vadd.f32 %v994_v39, %v786_v16 }
 0x2d9   :  { %v1619_v28 = vadd.f32 %v1618_v1, %v1410_v14 }
 0x2db   :  { %v1702_v63 = vmax.f32 %v1619_v28, 0.0  ;;  %v1621_v34 = vpop.f32.mrf.mxu0 }
 0x2dc   :  { %v1203_v29 = vpop.f32.mrf.mxu2 }
 0x2dd   :  { %1766 = vst.msk [vmem:[%s3678_s3 + $0x1b0] sm:$0xff] %vm410_vm0, %v1702_v63  ;;  %v1204_v46 = vadd.f32 %v1203_v29, %v995_v18  ;;  %v3706_v18 = vld [vmem:[#allocation14_spill] sm:$0xff] }
 0x2de   :  { %v997_v56 = vpop.f32.mrf.mxu1  ;;  %v1412_v19 = vpop.f32.mrf.mxu3  ;;  %v804_v63 = vadd.f32 %v1894_v11, %v3706_v18 }
 0x2df   :  { %v1413_v37 = vadd.f32 %v1412_v19, %v1204_v46  ;;  %v998_v17 = vadd.f32 %v997_v56, %v789_v20 }
 0x2e1   :  { %v1622_v23 = vadd.f32 %v1621_v34, %v1413_v37 }
 0x2e3   :  { %v1703_v52 = vmax.f32 %v1622_v23, 0.0  ;;  %v1624_v48 = vpop.f32.mrf.mxu0 }
 0x2e4   :  { %v1206_v22 = vpop.f32.mrf.mxu2 }
 0x2e5   :  { %1767 = vst.msk [vmem:[%s3678_s3 + $0x1b8] sm:$0xff] %vm410_vm0, %v1703_v52  ;;  %v1207_v8 = vadd.f32 %v1206_v22, %v998_v17  ;;  %v3707_v17 = vld [vmem:[#allocation15_spill] sm:$0xff] }
 0x2e6   :  { %v1000_v49 = vpop.f32.mrf.mxu1  ;;  %v1415_v61 = vpop.f32.mrf.mxu3  ;;  %v807_v52 = vadd.f32 %v1894_v11, %v3707_v17 }
 0x2e7   :  { %v1416_v47 = vadd.f32 %v1415_v61, %v1207_v8  ;;  %v1001_v43 = vadd.f32 %v1000_v49, %v792_v54 }
 0x2e9   :  { %v1625_v35 = vadd.f32 %v1624_v48, %v1416_v47 }
 0x2eb   :  { %v1704_v2 = vmax.f32 %v1625_v35, 0.0  ;;  %v1627_v26 = vpop.f32.mrf.mxu0 }
 0x2ec   :  { %v1209_v7 = vpop.f32.mrf.mxu2 }
 0x2ed   :  { %1768 = vst.msk [vmem:[%s3678_s3 + $0x1c0] sm:$0xff] %vm410_vm0, %v1704_v2  ;;  %v1210_v53 = vadd.f32 %v1209_v7, %v1001_v43  ;;  %v3708_v43 = vld [vmem:[#allocation16_spill] sm:$0xff] }
 0x2ee   :  { %v1003_v12 = vpop.f32.mrf.mxu1  ;;  %v1418_v41 = vpop.f32.mrf.mxu3  ;;  %v810_v2 = vadd.f32 %v1894_v11, %v3708_v43 }
 0x2ef   :  { %v1419_v0 = vadd.f32 %v1418_v41, %v1210_v53  ;;  %v1004_v31 = vadd.f32 %v1003_v12, %v795_v50 }
 0x2f1   :  { %v1628_v30 = vadd.f32 %v1627_v26, %v1419_v0 }
 0x2f3   :  { %v1705_v4 = vmax.f32 %v1628_v30, 0.0  ;;  %v1630_v57 = vpop.f32.mrf.mxu0 }
 0x2f4   :  { %v1212_v51 = vpop.f32.mrf.mxu2 }
 0x2f5   :  { %1769 = vst.msk [vmem:[%s3678_s3 + $0x1c8] sm:$0xff] %vm410_vm0, %v1705_v4  ;;  %v1213_v62 = vadd.f32 %v1212_v51, %v1004_v31 }
 0x2f6   :  { %v1006_v25 = vpop.f32.mrf.mxu1  ;;  %v1421_v59 = vpop.f32.mrf.mxu3 }
 0x2f7   :  { %v1422_v24 = vadd.f32 %v1421_v59, %v1213_v62  ;;  %v1007_v33 = vadd.f32 %v1006_v25, %v798_v32 }
 0x2f9   :  { %v1631_v15 = vadd.f32 %v1630_v57, %v1422_v24 }
 0x2fb   :  { %v1706_v10 = vmax.f32 %v1631_v15, 0.0  ;;  %v1633_v5 = vpop.f32.mrf.mxu0 }
 0x2fc   :  { %v1215_v21 = vpop.f32.mrf.mxu2 }
 0x2fd   :  { %1770 = vst.msk [vmem:[%s3678_s3 + $0x1d0] sm:$0xff] %vm410_vm0, %v1706_v10  ;;  %v1216_v36 = vadd.f32 %v1215_v21, %v1007_v33 }
 0x2fe   :  { %v1009_v38 = vpop.f32.mrf.mxu1  ;;  %v1424_v45 = vpop.f32.mrf.mxu3 }
 0x2ff   :  { %v1425_v3 = vadd.f32 %v1424_v45, %v1216_v36  ;;  %v1010_v58 = vadd.f32 %v1009_v38, %v801_v6 }
 0x301   :  { %v1634_v1 = vadd.f32 %v1633_v5, %v1425_v3 }
 0x303   :  { %v1707_v42 = vmax.f32 %v1634_v1, 0.0  ;;  %v1636_v39 = vpop.f32.mrf.mxu0 }
 0x304   :  { %v1218_v60 = vpop.f32.mrf.mxu2 }
 0x305   :  { %1771 = vst.msk [vmem:[%s3678_s3 + $0x1d8] sm:$0xff] %vm410_vm0, %v1707_v42  ;;  %v1219_v14 = vadd.f32 %v1218_v60, %v1010_v58 }
 0x306   :  { %v1012_v40 = vpop.f32.mrf.mxu1  ;;  %v1427_v16 = vpop.f32.mrf.mxu3 }
 0x307   :  { %v1428_v28 = vadd.f32 %v1427_v16, %v1219_v14  ;;  %v1013_v29 = vadd.f32 %v1012_v40, %v804_v63 }
 0x309   :  { %v1637_v34 = vadd.f32 %v1636_v39, %v1428_v28 }
 0x30b   :  { %v1708_v46 = vmax.f32 %v1637_v34, 0.0  ;;  %v1639_v56 = vpop.f32.mrf.mxu0 }
 0x30c   :  { %v1221_v19 = vpop.f32.mrf.mxu2 }
 0x30d   :  { %1772 = vst.msk [vmem:[%s3678_s3 + $0x1e0] sm:$0xff] %vm410_vm0, %v1708_v46  ;;  %v1222_v37 = vadd.f32 %v1221_v19, %v1013_v29 }
 0x30e   :  { %v1015_v13 = vpop.f32.mrf.mxu1  ;;  %v1430_v20 = vpop.f32.mrf.mxu3 }
 0x30f   :  { %v1431_v23 = vadd.f32 %v1430_v20, %v1222_v37  ;;  %v1016_v22 = vadd.f32 %v1015_v13, %v807_v52 }
 0x311   :  { %v1640_v48 = vadd.f32 %v1639_v56, %v1431_v23 }
 0x313   :  { %v1709_v8 = vmax.f32 %v1640_v48, 0.0  ;;  %v1642_v61 = vpop.f32.mrf.mxu0 }
 0x314   :  { %v1224_v49 = vpop.f32.mrf.mxu2 }
 0x315   :  { %1773 = vst.msk [vmem:[%s3678_s3 + $0x1e8] sm:$0xff] %vm410_vm0, %v1709_v8  ;;  %v1225_v47 = vadd.f32 %v1224_v49, %v1016_v22 }
 0x316   :  { %v1433_v9 = vpop.f32.mrf.mxu3  ;;  %v1018_v35 = vpop.f32.mrf.mxu1 }
 0x317   :  { %v1434_v54 = vadd.f32 %v1433_v9, %v1225_v47  ;;  %v1019_v7 = vadd.f32 %v1018_v35, %v810_v2 }
 0x319   :  { %v1643_v26 = vadd.f32 %v1642_v61, %v1434_v54 }
 0x31b   :  { %v1710_v53 = vmax.f32 %v1643_v26, 0.0  ;;  %v1645_v44 = vpop.f32.mrf.mxu0 }
 0x31c   :  { %v1227_v12 = vpop.f32.mrf.mxu2 }
 0x31d   :  { %1774 = vst.msk [vmem:[%s3678_s3 + $0x1f0] sm:$0xff] %vm410_vm0, %v1710_v53  ;;  %v1228_v41 = vadd.f32 %v1227_v12, %v1019_v7 }
 0x31e   :  { %v1436_v0 = vpop.f32.mrf.mxu3 }
 0x31f   :  { %v1437_v50 = vadd.f32 %v1436_v0, %v1228_v41 }
 0x321   :  { %v1646_v30 = vadd.f32 %v1645_v44, %v1437_v50 }
 0x323   :  { %v1711_v31 = vmax.f32 %v1646_v30, 0.0 }
 0x325   :  { %1775 = vst.msk [vmem:[%s3678_s3 + $0x1f8] sm:$0xff] %vm410_vm0, %v1711_v31 }

// kernel: _unetback_features.10
= control target key start
LH: loop header
LB: loop body
LE: loop exit
PB: predicated region body
PF: predicated region fallthrough
CT: control target
= control target key end

     0   :  { %vm170_vm0 = vcmask 523264   ;;  %s1258_s1 = inlined_call_operand.vmem [shape: f32[576,64], index: 1, kind: input, shape index: {}]   ;;  %s1259_s0 = inlined_call_operand.vmem [shape: f32[128,576], index: 0, kind: input, shape index: {}]   ;;  %s1260_s2 = inlined_call_operand.vmem [shape: f32[1,64], index: 2, kind: input, shape index: {}]   ;;  %s1261_s3 = inlined_call_operand.vmem [shape: f32[128,64], index: 3, kind: output, shape index: {}]  }
   0x1   :  { %v109_v0 = vld [vmem:[%s1258_s1 + $0x78] sm:$0xff]  ;;  %v108_v1 = vld [vmem:[%s1258_s1 + $0x70] sm:$0xff]  ;;  %v107_v2 = vld [vmem:[%s1258_s1 + $0x68] sm:$0xff] }
   0x2   :  { %596 = vmatpush.msra.mxu1 %v109_v0  ;;  %597 = vmatpush.msra.mxu2 %v109_v0  ;;  %v106_v3 = vld [vmem:[%s1258_s1 + $0x60] sm:$0xff]  ;;  %v105_v4 = vld [vmem:[%s1258_s1 + $0x58] sm:$0xff]  ;;  %v104_v5 = vld [vmem:[%s1258_s1 + $0x50] sm:$0xff] }
   0x3   :  { %598 = vmatpush.msra.mxu3 %v109_v0  ;;  %219 = vmatpush.msra.mxu0 %v109_v0  ;;  %v103_v6 = vld [vmem:[%s1258_s1 + $0x48] sm:$0xff]  ;;  %v102_v7 = vld [vmem:[%s1258_s1 + $0x40] sm:$0xff]  ;;  %v101_v8 = vld [vmem:[%s1258_s1 + $0x38] sm:$0xff] }
   0x4   :  { %599 = vmatpush.msra.mxu1 %v108_v1  ;;  %600 = vmatpush.msra.mxu2 %v108_v1  ;;  %v100_v9 = vld [vmem:[%s1258_s1 + $0x30] sm:$0xff]  ;;  %v99_v10 = vld [vmem:[%s1258_s1 + $0x28] sm:$0xff]  ;;  %v98_v11 = vld [vmem:[%s1258_s1 + $0x20] sm:$0xff] }
   0x5   :  { %601 = vmatpush.msra.mxu3 %v108_v1  ;;  %220 = vmatpush.msra.mxu0 %v108_v1  ;;  %v97_v12 = vld [vmem:[%s1258_s1 + $0x18] sm:$0xff]  ;;  %v96_v13 = vld [vmem:[%s1258_s1 + $0x10] sm:$0xff]  ;;  %v95_v14 = vld [vmem:[%s1258_s1 + $0x8] sm:$0xff] }
   0x6   :  { %602 = vmatpush.msra.mxu1 %v107_v2  ;;  %603 = vmatpush.msra.mxu2 %v107_v2  ;;  %v94_v15 = vld [vmem:[%s1258_s1] sm:$0xff]  ;;  %v141_v18 = vld [vmem:[%s1258_s1 + $0x178] sm:$0xff]  ;;  %v140_v21 = vld [vmem:[%s1258_s1 + $0x170] sm:$0xff] }
   0x7   :  { %604 = vmatpush.msra.mxu3 %v107_v2  ;;  %221 = vmatpush.msra.mxu0 %v107_v2  ;;  %v34_v16 = vld [vmem:[%s1259_s0 + $0xa0] sm:$0xff]  ;;  %v125_v19 = vld [vmem:[%s1258_s1 + $0xf8] sm:$0xff]  ;;  %v124_v23 = vld [vmem:[%s1258_s1 + $0xf0] sm:$0xff] }
   0x8   :  { %605 = vmatpush.msra.mxu1 %v106_v3  ;;  %606 = vmatpush.msra.mxu2 %v106_v3  ;;  %v54_v17 = vld [vmem:[%s1259_s0 + $0x140] sm:$0xff]  ;;  %v157_v22 = vld [vmem:[%s1258_s1 + $0x1f8] sm:$0xff]  ;;  %v139_v24 = vld [vmem:[%s1258_s1 + $0x168] sm:$0xff] }
   0x9   :  { %607 = vmatpush.msra.mxu3 %v106_v3  ;;  %222 = vmatpush.msra.mxu0 %v106_v3  ;;  %v74_v20 = vld [vmem:[%s1259_s0 + $0x1e0] sm:$0xff]  ;;  %v156_v25 = vld [vmem:[%s1258_s1 + $0x1f0] sm:$0xff]  ;;  %v123_v26 = vld [vmem:[%s1258_s1 + $0xe8] sm:$0xff] }
   0xa   :  { %608 = vmatpush.msra.mxu1 %v105_v4  ;;  %609 = vmatpush.msra.mxu2 %v105_v4  ;;  %v14_v27 = vld [vmem:[%s1259_s0] sm:$0xff]  ;;  %v155_v29 = vld [vmem:[%s1258_s1 + $0x1e8] sm:$0xff]  ;;  %v137_v33 = vld [vmem:[%s1258_s1 + $0x158] sm:$0xff] }
   0xb   :  { %610 = vmatpush.msra.mxu3 %v105_v4  ;;  %223 = vmatpush.msra.mxu0 %v105_v4  ;;  %v138_v28 = vld [vmem:[%s1258_s1 + $0x160] sm:$0xff]  ;;  %v59_v31 = vld [vmem:[%s1259_s0 + $0x168] sm:$0xff]  ;;  %v121_v35 = vld [vmem:[%s1258_s1 + $0xd8] sm:$0xff] }
   0xc   :  { %611 = vmatpush.msra.mxu1 %v104_v5  ;;  %612 = vmatpush.msra.mxu2 %v104_v5  ;;  %v122_v30 = vld [vmem:[%s1258_s1 + $0xe0] sm:$0xff]  ;;  %v39_v32 = vld [vmem:[%s1259_s0 + $0xc8] sm:$0xff]  ;;  %v136_v37 = vld [vmem:[%s1258_s1 + $0x150] sm:$0xff] }
   0xd   :  { %613 = vmatpush.msra.mxu3 %v104_v5  ;;  %224 = vmatpush.msra.mxu0 %v104_v5  ;;  %v154_v34 = vld [vmem:[%s1258_s1 + $0x1e0] sm:$0xff]  ;;  %v79_v36 = vld [vmem:[%s1259_s0 + $0x208] sm:$0xff]  ;;  %v153_v38 = vld [vmem:[%s1258_s1 + $0x1d8] sm:$0xff] }
   0xe   :  { %614 = vmatpush.msra.mxu1 %v103_v6  ;;  %615 = vmatpush.msra.mxu2 %v103_v6  ;;  %v165_v39 = vld [vmem:[%s1258_s1 + $0x238] sm:$0xff]  ;;  %v120_v40 = vld [vmem:[%s1258_s1 + $0xd0] sm:$0xff]  ;;  %v135_v41 = vld [vmem:[%s1258_s1 + $0x148] sm:$0xff] }
   0xf   :  { %616 = vmatpush.msra.mxu3 %v103_v6  ;;  %225 = vmatpush.msra.mxu0 %v103_v6  ;;  %v152_v42 = vld [vmem:[%s1258_s1 + $0x1d0] sm:$0xff]  ;;  %v119_v44 = vld [vmem:[%s1258_s1 + $0xc8] sm:$0xff]  ;;  %v134_v45 = vld [vmem:[%s1258_s1 + $0x140] sm:$0xff] }
  0x10   :  { %617 = vmatpush.msra.mxu1 %v102_v7  ;;  %618 = vmatpush.msra.mxu2 %v102_v7  ;;  %v164_v43 = vld [vmem:[%s1258_s1 + $0x230] sm:$0xff]  ;;  %v151_v46 = vld [vmem:[%s1258_s1 + $0x1c8] sm:$0xff]  ;;  %v118_v48 = vld [vmem:[%s1258_s1 + $0xc0] sm:$0xff] }
  0x11   :  { %619 = vmatpush.msra.mxu3 %v102_v7  ;;  %226 = vmatpush.msra.mxu0 %v102_v7  ;;  %v64_v47 = vld [vmem:[%s1259_s0 + $0x190] sm:$0xff]  ;;  %v133_v49 = vld [vmem:[%s1258_s1 + $0x138] sm:$0xff]  ;;  %v150_v51 = vld [vmem:[%s1258_s1 + $0x1c0] sm:$0xff] }
  0x12   :  { %620 = vmatpush.msra.mxu1 %v101_v8  ;;  %621 = vmatpush.msra.mxu2 %v101_v8  ;;  %v44_v50 = vld [vmem:[%s1259_s0 + $0xf0] sm:$0xff]  ;;  %v117_v52 = vld [vmem:[%s1258_s1 + $0xb8] sm:$0xff]  ;;  %v19_v53 = vld [vmem:[%s1259_s0 + $0x28] sm:$0xff] }
  0x13   :  { %622 = vmatpush.msra.mxu3 %v101_v8  ;;  %227 = vmatpush.msra.mxu0 %v101_v8  ;;  %v84_v54 = vld [vmem:[%s1259_s0 + $0x230] sm:$0xff]  ;;  %v149_v56 = vld [vmem:[%s1258_s1 + $0x1b8] sm:$0xff]  ;;  %v163_v57 = vld [vmem:[%s1258_s1 + $0x228] sm:$0xff] }
  0x14   :  { %623 = vmatpush.msra.mxu1 %v100_v9  ;;  %624 = vmatpush.msra.mxu2 %v100_v9  ;;  %v132_v55 = vld [vmem:[%s1258_s1 + $0x130] sm:$0xff]  ;;  %v131_v59 = vld [vmem:[%s1258_s1 + $0x128] sm:$0xff]  ;;  %v162_v61 = vld [vmem:[%s1258_s1 + $0x220] sm:$0xff] }
  0x15   :  { %625 = vmatpush.msra.mxu3 %v100_v9  ;;  %228 = vmatpush.msra.mxu0 %v100_v9  ;;  %v116_v58 = vld [vmem:[%s1258_s1 + $0xb0] sm:$0xff]  ;;  %v115_v62 = vld [vmem:[%s1258_s1 + $0xa8] sm:$0xff]  ;;  %v130_v63 = vld [vmem:[%s1258_s1 + $0x120] sm:$0xff] }
  0x16   :  { %626 = vmatpush.msra.mxu1 %v99_v10  ;;  %627 = vmatpush.msra.mxu2 %v99_v10  ;;  %v148_v60 = vld [vmem:[%s1258_s1 + $0x1b0] sm:$0xff]  ;;  %v147_v0 = vld [vmem:[%s1258_s1 + $0x1a8] sm:$0xff]  ;;  %v69_v1 = vld [vmem:[%s1259_s0 + $0x1b8] sm:$0xff] }
  0x17   :  { %628 = vmatpush.msra.mxu3 %v99_v10  ;;  %229 = vmatpush.msra.mxu0 %v99_v10  ;;  %v114_v2 = vld [vmem:[%s1258_s1 + $0xa0] sm:$0xff]  ;;  %v129_v3 = vld [vmem:[%s1258_s1 + $0x118] sm:$0xff]  ;;  %v24_v7 = vld [vmem:[%s1259_s0 + $0x50] sm:$0xff] }
  0x18   :  { %629 = vmatpush.msra.mxu1 %v98_v11  ;;  %630 = vmatpush.msra.mxu2 %v98_v11  ;;  %v49_v4 = vld [vmem:[%s1259_s0 + $0x118] sm:$0xff]  ;;  %v146_v5 = vld [vmem:[%s1258_s1 + $0x1a0] sm:$0xff]  ;;  %v128_v9 = vld [vmem:[%s1258_s1 + $0x110] sm:$0xff] }
  0x19   :  { %631 = vmatpush.msra.mxu3 %v98_v11  ;;  %230 = vmatpush.msra.mxu0 %v98_v11  ;;  %v113_v6 = vld [vmem:[%s1258_s1 + $0x98] sm:$0xff] }
  0x1a   :  { %632 = vmatpush.msra.mxu1 %v97_v12  ;;  %633 = vmatpush.msra.mxu2 %v97_v12  ;;  %v89_v8 = vld [vmem:[%s1259_s0 + $0x258] sm:$0xff] }
  0x1b   :  { %634 = vmatpush.msra.mxu3 %v97_v12  ;;  %231 = vmatpush.msra.mxu0 %v97_v12  ;;  %v145_v10 = vld [vmem:[%s1258_s1 + $0x198] sm:$0xff]  ;;  %v112_v12 = vld [vmem:[%s1258_s1 + $0x90] sm:$0xff] }
  0x1c   :  { %635 = vmatpush.msra.mxu1 %v96_v13  ;;  %636 = vmatpush.msra.mxu2 %v96_v13  ;;  %v161_v11 = vld [vmem:[%s1258_s1 + $0x218] sm:$0xff] }
  0x1d   :  { %637 = vmatpush.msra.mxu3 %v96_v13  ;;  %232 = vmatpush.msra.mxu0 %v96_v13  ;;  %v127_v13 = vld [vmem:[%s1258_s1 + $0x108] sm:$0xff] }
  0x1e   :  { %638 = vmatpush.msra.mxu1 %v95_v14  ;;  %639 = vmatpush.msra.mxu2 %v95_v14 }
  0x1f   :  { %640 = vmatpush.msra.mxu3 %v95_v14  ;;  %233 = vmatpush.msra.mxu0 %v95_v14  ;;  %v144_v14 = vld [vmem:[%s1258_s1 + $0x190] sm:$0xff] }
  0x20   :  { %641 = vmatpush.msra.mxu1 %v94_v15  ;;  %642 = vmatpush.msra.mxu2 %v94_v15 }
  0x21   :  { %247 = vmatmul.f32.vlgmr.msra.gmra.mxu1 %v34_v16  ;;  %259 = vmatmul.f32.vlgmr.msra.gmra.mxu2 %v54_v17  ;;  %v111_v16 = vld [vmem:[%s1258_s1 + $0x88] sm:$0xff]  ;;  %v126_v17 = vld [vmem:[%s1258_s1 + $0x100] sm:$0xff] }
  0x22   :  { %349 = vmatpush.msrb.mxu2 %v141_v18  ;;  %643 = vmatpush.msra.mxu3 %v94_v15  ;;  %v143_v18 = vld [vmem:[%s1258_s1 + $0x188] sm:$0xff] }
  0x23   :  { %284 = vmatpush.msrb.mxu1 %v125_v19  ;;  %271 = vmatmul.f32.vlgmr.msra.gmra.mxu3 %v74_v20  ;;  %v16_v19 = vld [vmem:[%s1259_s0 + $0x10] sm:$0xff]  ;;  %v110_v20 = vld [vmem:[%s1258_s1 + $0x80] sm:$0xff] }
  0x24   :  { %350 = vmatpush.msrb.mxu2 %v140_v21  ;;  %414 = vmatpush.msrb.mxu3 %v157_v22  ;;  %v159_v21 = vld [vmem:[%s1258_s1 + $0x208] sm:$0xff] }
  0x25   :  { %285 = vmatpush.msrb.mxu1 %v124_v23  ;;  %234 = vmatpush.msra.mxu0 %v94_v15  ;;  %v160_v15 = vld [vmem:[%s1258_s1 + $0x210] sm:$0xff]  ;;  %v15_v22 = vld [vmem:[%s1259_s0 + $0x8] sm:$0xff]  ;;  %v142_v23 = vld [vmem:[%s1258_s1 + $0x180] sm:$0xff] }
  0x26   :  { %351 = vmatpush.msrb.mxu2 %v139_v24  ;;  %415 = vmatpush.msrb.mxu3 %v156_v25  ;;  %v29_v24 = vld [vmem:[%s1259_s0 + $0x78] sm:$0xff] }
  0x27   :  { %286 = vmatpush.msrb.mxu1 %v123_v26  ;;  %235 = vmatmul.f32.vlgmr.msra.gmra.mxu0 %v14_v27  ;;  %v17_v25 = vld [vmem:[%s1259_s0 + $0x18] sm:$0xff]  ;;  %v158_v26 = vld [vmem:[%s1258_s1 + $0x200] sm:$0xff] }
  0x28   :  { %352 = vmatpush.msrb.mxu2 %v138_v28  ;;  %416 = vmatpush.msrb.mxu3 %v155_v29  ;;  %v21_v27 = vld [vmem:[%s1259_s0 + $0x38] sm:$0xff]  ;;  %v20_v28 = vld [vmem:[%s1259_s0 + $0x30] sm:$0xff]  ;;  %v22_v29 = vld [vmem:[%s1259_s0 + $0x40] sm:$0xff] }
  0x29   :  { %287 = vmatpush.msrb.mxu1 %v122_v30  ;;  %262 = vmatmul.f32.gmra.mxu2 %v59_v31  ;;  %v18_v30 = vld [vmem:[%s1259_s0 + $0x20] sm:$0xff] }
  0x2a   :  { %250 = vmatmul.f32.gmra.mxu1 %v39_v32  ;;  %353 = vmatpush.msrb.mxu2 %v137_v33  ;;  %v26_v31 = vld [vmem:[%s1259_s0 + $0x60] sm:$0xff]  ;;  %v25_v32 = vld [vmem:[%s1259_s0 + $0x58] sm:$0xff]  ;;  %v27_v33 = vld [vmem:[%s1259_s0 + $0x68] sm:$0xff] }
  0x2b   :  { %417 = vmatpush.msrb.mxu3 %v154_v34  ;;  %288 = vmatpush.msrb.mxu1 %v121_v35  ;;  %v23_v34 = vld [vmem:[%s1259_s0 + $0x48] sm:$0xff] }
  0x2c   :  { %274 = vmatmul.f32.gmra.mxu3 %v79_v36  ;;  %354 = vmatpush.msrb.mxu2 %v136_v37  ;;  %v31_v35 = vld [vmem:[%s1259_s0 + $0x88] sm:$0xff]  ;;  %v30_v36 = vld [vmem:[%s1259_s0 + $0x80] sm:$0xff]  ;;  %v32_v37 = vld [vmem:[%s1259_s0 + $0x90] sm:$0xff] }
  0x2d   :  { %418 = vmatpush.msrb.mxu3 %v153_v38  ;;  %487 = vmatpush.msrb.mxu0 %v165_v39  ;;  %v28_v38 = vld [vmem:[%s1259_s0 + $0x70] sm:$0xff] }
  0x2e   :  { %289 = vmatpush.msrb.mxu1 %v120_v40  ;;  %355 = vmatpush.msrb.mxu2 %v135_v41  ;;  %v36_v39 = vld [vmem:[%s1259_s0 + $0xb0] sm:$0xff]  ;;  %v35_v40 = vld [vmem:[%s1259_s0 + $0xa8] sm:$0xff]  ;;  %v37_v41 = vld [vmem:[%s1259_s0 + $0xb8] sm:$0xff] }
  0x2f   :  { %419 = vmatpush.msrb.mxu3 %v152_v42  ;;  %488 = vmatpush.msrb.mxu0 %v164_v43  ;;  %v33_v42 = vld [vmem:[%s1259_s0 + $0x98] sm:$0xff] }
  0x30   :  { %290 = vmatpush.msrb.mxu1 %v119_v44  ;;  %356 = vmatpush.msrb.mxu2 %v134_v45  ;;  %v41_v43 = vld [vmem:[%s1259_s0 + $0xd8] sm:$0xff]  ;;  %v40_v44 = vld [vmem:[%s1259_s0 + $0xd0] sm:$0xff]  ;;  %v42_v45 = vld [vmem:[%s1259_s0 + $0xe0] sm:$0xff] }
  0x31   :  { %420 = vmatpush.msrb.mxu3 %v151_v46  ;;  %265 = vmatmul.f32.gmra.mxu2 %v64_v47  ;;  %v38_v46 = vld [vmem:[%s1259_s0 + $0xc0] sm:$0xff] }
  0x32   :  { %291 = vmatpush.msrb.mxu1 %v118_v48  ;;  %357 = vmatpush.msrb.mxu2 %v133_v49  ;;  %v46_v47 = vld [vmem:[%s1259_s0 + $0x100] sm:$0xff]  ;;  %v45_v48 = vld [vmem:[%s1259_s0 + $0xf8] sm:$0xff]  ;;  %v47_v49 = vld [vmem:[%s1259_s0 + $0x108] sm:$0xff] }
  0x33   :  { %253 = vmatmul.f32.gmra.mxu1 %v44_v50  ;;  %421 = vmatpush.msrb.mxu3 %v150_v51  ;;  %v43_v50 = vld [vmem:[%s1259_s0 + $0xe8] sm:$0xff] }
  0x34   :  { %292 = vmatpush.msrb.mxu1 %v117_v52  ;;  %238 = vmatmul.f32.gmra.mxu0 %v19_v53  ;;  %v51_v51 = vld [vmem:[%s1259_s0 + $0x128] sm:$0xff]  ;;  %v50_v52 = vld [vmem:[%s1259_s0 + $0x120] sm:$0xff]  ;;  %v52_v53 = vld [vmem:[%s1259_s0 + $0x130] sm:$0xff] }
  0x35   :  { %277 = vmatmul.f32.gmra.mxu3 %v84_v54  ;;  %358 = vmatpush.msrb.mxu2 %v132_v55  ;;  %v48_v54 = vld [vmem:[%s1259_s0 + $0x110] sm:$0xff] }
  0x36   :  { %422 = vmatpush.msrb.mxu3 %v149_v56  ;;  %489 = vmatpush.msrb.mxu0 %v163_v57  ;;  %v56_v55 = vld [vmem:[%s1259_s0 + $0x150] sm:$0xff]  ;;  %v55_v56 = vld [vmem:[%s1259_s0 + $0x148] sm:$0xff]  ;;  %v57_v57 = vld [vmem:[%s1259_s0 + $0x158] sm:$0xff] }
  0x37   :  { %293 = vmatpush.msrb.mxu1 %v116_v58  ;;  %359 = vmatpush.msrb.mxu2 %v131_v59  ;;  %v53_v58 = vld [vmem:[%s1259_s0 + $0x138] sm:$0xff] }
  0x38   :  { %423 = vmatpush.msrb.mxu3 %v148_v60  ;;  %490 = vmatpush.msrb.mxu0 %v162_v61  ;;  %v61_v59 = vld [vmem:[%s1259_s0 + $0x178] sm:$0xff]  ;;  %v60_v60 = vld [vmem:[%s1259_s0 + $0x170] sm:$0xff]  ;;  %v62_v61 = vld [vmem:[%s1259_s0 + $0x180] sm:$0xff] }
  0x39   :  { %294 = vmatpush.msrb.mxu1 %v115_v62  ;;  %360 = vmatpush.msrb.mxu2 %v130_v63  ;;  %v58_v62 = vld [vmem:[%s1259_s0 + $0x160] sm:$0xff] }
  0x3a   :  { %424 = vmatpush.msrb.mxu3 %v147_v0  ;;  %268 = vmatmul.f32.gmra.mxu2 %v69_v1  ;;  %v66_v63 = vld [vmem:[%s1259_s0 + $0x1a0] sm:$0xff]  ;;  %v65_v0 = vld [vmem:[%s1259_s0 + $0x198] sm:$0xff]  ;;  %v67_v1 = vld [vmem:[%s1259_s0 + $0x1a8] sm:$0xff] }
  0x3b   :  { %295 = vmatpush.msrb.mxu1 %v114_v2  ;;  %361 = vmatpush.msrb.mxu2 %v129_v3  ;;  %v63_v2 = vld [vmem:[%s1259_s0 + $0x188] sm:$0xff] }
  0x3c   :  { %256 = vmatmul.f32.gmra.mxu1 %v49_v4  ;;  %425 = vmatpush.msrb.mxu3 %v146_v5  ;;  %v71_v3 = vld [vmem:[%s1259_s0 + $0x1c8] sm:$0xff]  ;;  %v70_v4 = vld [vmem:[%s1259_s0 + $0x1c0] sm:$0xff]  ;;  %v72_v5 = vld [vmem:[%s1259_s0 + $0x1d0] sm:$0xff] }
  0x3d   :  { %296 = vmatpush.msrb.mxu1 %v113_v6  ;;  %241 = vmatmul.f32.gmra.mxu0 %v24_v7  ;;  %v68_v6 = vld [vmem:[%s1259_s0 + $0x1b0] sm:$0xff] }
  0x3e   :  { %280 = vmatmul.f32.gmra.mxu3 %v89_v8  ;;  %362 = vmatpush.msrb.mxu2 %v128_v9  ;;  %v76_v8 = vld [vmem:[%s1259_s0 + $0x1f0] sm:$0xff]  ;;  %v75_v9 = vld [vmem:[%s1259_s0 + $0x1e8] sm:$0xff] }
  0x3f   :  { %426 = vmatpush.msrb.mxu3 %v145_v10  ;;  %491 = vmatpush.msrb.mxu0 %v161_v11  ;;  %v1092_v10 = vld [vmem:[%s1260_s2] ss:$0 sm:$0xff]  ;;  %v77_v11 = vld [vmem:[%s1259_s0 + $0x1f8] sm:$0xff] }
  0x40   :  { %297 = vmatpush.msrb.mxu1 %v112_v12  ;;  %363 = vmatpush.msrb.mxu2 %v127_v13  ;;  %v73_v12 = vld [vmem:[%s1259_s0 + $0x1d8] sm:$0xff] }
  0x41   :  { %427 = vmatpush.msrb.mxu3 %v144_v14  ;;  %492 = vmatpush.msrb.mxu0 %v160_v15 }
  0x42   :  { %298 = vmatpush.msrb.mxu1 %v111_v16  ;;  %364 = vmatpush.msrb.mxu2 %v126_v17 }
  0x43   :  { %428 = vmatpush.msrb.mxu3 %v143_v18  ;;  %365 = vmatmul.f32.vlgmr.msrb.gmra.mxu2 %v16_v19  ;;  %v81_v19 = vld [vmem:[%s1259_s0 + $0x218] sm:$0xff] }
  0x44   :  { %299 = vmatpush.msrb.mxu1 %v110_v20  ;;  %493 = vmatpush.msrb.mxu0 %v159_v21  ;;  %v80_v20 = vld [vmem:[%s1259_s0 + $0x210] sm:$0xff]  ;;  %v82_v21 = vld [vmem:[%s1259_s0 + $0x220] sm:$0xff] }
  0x45   :  { %300 = vmatmul.f32.vlgmr.msrb.gmra.mxu1 %v15_v22  ;;  %429 = vmatpush.msrb.mxu3 %v142_v23  ;;  %v78_v22 = vld [vmem:[%s1259_s0 + $0x200] sm:$0xff] }
  0x46   :  { %244 = vmatmul.f32.gmra.mxu0 %v29_v24  ;;  %430 = vmatmul.f32.vlgmr.msrb.gmra.mxu3 %v17_v25 }
  0x47   :  { %494 = vmatpush.msrb.mxu0 %v158_v26 }
  0x4b   :  { %368 = vmatmul.f32.gmra.mxu2 %v21_v27 }
  0x4d   :  { %303 = vmatmul.f32.gmra.mxu1 %v20_v28  ;;  %v86_v28 = vld [vmem:[%s1259_s0 + $0x240] sm:$0xff] }
  0x4e   :  { %433 = vmatmul.f32.gmra.mxu3 %v22_v29  ;;  %580 = vmatmul.msk.f32.vlgmr.msrb.gmra.mxu0 %vm170_vm0, %v18_v30  ;;  %v85_v30 = vld [vmem:[%s1259_s0 + $0x238] sm:$0xff] }
  0x53   :  { %371 = vmatmul.f32.gmra.mxu2 %v26_v31  ;;  %v87_v31 = vld [vmem:[%s1259_s0 + $0x248] sm:$0xff] }
  0x55   :  { %306 = vmatmul.f32.gmra.mxu1 %v25_v32  ;;  %v83_v32 = vld [vmem:[%s1259_s0 + $0x228] sm:$0xff] }
  0x56   :  { %436 = vmatmul.f32.gmra.mxu3 %v27_v33  ;;  %581 = vmatmul.msk.f32.gmra.mxu0 %vm170_vm0, %v23_v34 }
  0x5b   :  { %374 = vmatmul.f32.gmra.mxu2 %v31_v35 }
  0x5d   :  { %309 = vmatmul.f32.gmra.mxu1 %v30_v36  ;;  %v91_v36 = vld [vmem:[%s1259_s0 + $0x268] sm:$0xff] }
  0x5e   :  { %439 = vmatmul.f32.gmra.mxu3 %v32_v37  ;;  %582 = vmatmul.msk.f32.gmra.mxu0 %vm170_vm0, %v28_v38 }
  0x63   :  { %377 = vmatmul.f32.gmra.mxu2 %v36_v39 }
  0x65   :  { %312 = vmatmul.f32.gmra.mxu1 %v35_v40  ;;  %v90_v40 = vld [vmem:[%s1259_s0 + $0x260] sm:$0xff] }
  0x66   :  { %442 = vmatmul.f32.gmra.mxu3 %v37_v41  ;;  %583 = vmatmul.msk.f32.gmra.mxu0 %vm170_vm0, %v33_v42  ;;  %v92_v41 = vld [vmem:[%s1259_s0 + $0x270] sm:$0xff] }
  0x67   :  { %v88_v42 = vld [vmem:[%s1259_s0 + $0x250] sm:$0xff] }
  0x6b   :  { %380 = vmatmul.f32.gmra.mxu2 %v41_v43 }
  0x6d   :  { %315 = vmatmul.f32.gmra.mxu1 %v40_v44 }
  0x6e   :  { %445 = vmatmul.f32.gmra.mxu3 %v42_v45  ;;  %584 = vmatmul.msk.f32.gmra.mxu0 %vm170_vm0, %v38_v46 }
  0x73   :  { %383 = vmatmul.f32.gmra.mxu2 %v46_v47 }
  0x75   :  { %318 = vmatmul.f32.gmra.mxu1 %v45_v48 }
  0x76   :  { %448 = vmatmul.f32.gmra.mxu3 %v47_v49  ;;  %585 = vmatmul.msk.f32.gmra.mxu0 %vm170_vm0, %v43_v50  ;;  %v93_v50 = vld [vmem:[%s1259_s0 + $0x278] sm:$0xff] }
  0x7b   :  { %386 = vmatmul.f32.gmra.mxu2 %v51_v51 }
  0x7d   :  { %321 = vmatmul.f32.gmra.mxu1 %v50_v52 }
  0x7e   :  { %451 = vmatmul.f32.gmra.mxu3 %v52_v53  ;;  %586 = vmatmul.msk.f32.gmra.mxu0 %vm170_vm0, %v48_v54 }
  0x83   :  { %389 = vmatmul.f32.gmra.mxu2 %v56_v55 }
  0x85   :  { %324 = vmatmul.f32.gmra.mxu1 %v55_v56 }
  0x86   :  { %454 = vmatmul.f32.gmra.mxu3 %v57_v57  ;;  %587 = vmatmul.msk.f32.gmra.mxu0 %vm170_vm0, %v53_v58 }
  0x8b   :  { %392 = vmatmul.f32.gmra.mxu2 %v61_v59 }
  0x8d   :  { %327 = vmatmul.f32.gmra.mxu1 %v60_v60 }
  0x8e   :  { %457 = vmatmul.f32.gmra.mxu3 %v62_v61  ;;  %588 = vmatmul.msk.f32.gmra.mxu0 %vm170_vm0, %v58_v62 }
  0x93   :  { %395 = vmatmul.f32.gmra.mxu2 %v66_v63 }
  0x95   :  { %330 = vmatmul.f32.gmra.mxu1 %v65_v0 }
  0x96   :  { %460 = vmatmul.f32.gmra.mxu3 %v67_v1  ;;  %589 = vmatmul.msk.f32.gmra.mxu0 %vm170_vm0, %v63_v2 }
  0x9b   :  { %398 = vmatmul.f32.gmra.mxu2 %v71_v3 }
  0x9d   :  { %333 = vmatmul.f32.gmra.mxu1 %v70_v4 }
  0x9e   :  { %463 = vmatmul.f32.gmra.mxu3 %v72_v5  ;;  %590 = vmatmul.msk.f32.gmra.mxu0 %vm170_vm0, %v68_v6  ;;  %v1081_v7 = vpop.f32.mrf.mxu1 }
  0xa3   :  { %401 = vmatmul.f32.gmra.mxu2 %v76_v8 }
  0xa4   :  { %v260_v13 = vpop.f32.mrf.mxu2  ;;  %v236_v18 = vpop.f32.mrf.mxu0 }
  0xa5   :  { %336 = vmatmul.f32.gmra.mxu1 %v75_v9  ;;  %v1101_v14 = vadd.f32 %v1092_v10, %v260_v13  ;;  %v237_v48 = vadd.f32 %v1092_v10, %v236_v18 }
  0xa6   :  { %466 = vmatmul.f32.gmra.mxu3 %v77_v11  ;;  %591 = vmatmul.msk.f32.gmra.mxu0 %vm170_vm0, %v73_v12  ;;  %v272_v15 = vpop.f32.mrf.mxu3 }
  0xa7   :  { %v1104_v16 = vpop.f32.mrf.mxu1  ;;  %v1107_v17 = vadd.f32 %v1092_v10, %v272_v15 }
  0xab   :  { %404 = vmatmul.f32.gmra.mxu2 %v81_v19 }
  0xac   :  { %v263_v23 = vpop.f32.mrf.mxu2 }
  0xad   :  { %339 = vmatmul.f32.gmra.mxu1 %v80_v20  ;;  %v1122_v24 = vadd.f32 %v1092_v10, %v263_v23 }
  0xae   :  { %469 = vmatmul.f32.gmra.mxu3 %v82_v21  ;;  %592 = vmatmul.msk.f32.gmra.mxu0 %vm170_vm0, %v78_v22 }
  0xaf   :  { %v275_v25 = vpop.f32.mrf.mxu3 }
  0xb0   :  { %v1125_v26 = vpop.f32.mrf.mxu1  ;;  %v1128_v27 = vadd.f32 %v1092_v10, %v275_v25 }
  0xb1   :  { %v239_v29 = vpop.f32.mrf.mxu0 }
  0xb2   :  { %v240_v57 = vadd.f32 %v1092_v10, %v239_v29 }
  0xb3   :  { %407 = vmatmul.f32.gmra.mxu2 %v86_v28 }
  0xb4   :  { %v266_v33 = vpop.f32.mrf.mxu2 }
  0xb5   :  { %342 = vmatmul.f32.gmra.mxu1 %v85_v30  ;;  %v1143_v34 = vadd.f32 %v1092_v10, %v266_v33 }
  0xb6   :  { %472 = vmatmul.f32.gmra.mxu3 %v87_v31  ;;  %593 = vmatmul.msk.f32.gmra.mxu0 %vm170_vm0, %v83_v32  ;;  %v249_v31 = vadd.f32 %v1092_v10, %v1081_v7 }
  0xb8   :  { %v278_v35 = vpop.f32.mrf.mxu3 }
  0xb9   :  { %v1149_v37 = vpop.f32.mrf.mxu1  ;;  %v1152_v38 = vadd.f32 %v1092_v10, %v278_v35 }
  0xba   :  { %v242_v39 = vpop.f32.mrf.mxu0 }
  0xbb   :  { %410 = vmatmul.f32.gmra.mxu2 %v91_v36  ;;  %v243_v3 = vadd.f32 %v1092_v10, %v242_v39 }
  0xbd   :  { %345 = vmatmul.f32.gmra.mxu1 %v90_v40  ;;  %v269_v43 = vpop.f32.mrf.mxu2 }
  0xbe   :  { %475 = vmatmul.f32.gmra.mxu3 %v92_v41  ;;  %594 = vmatmul.msk.f32.gmra.mxu0 %vm170_vm0, %v88_v42  ;;  %v1165_v44 = vadd.f32 %v1092_v10, %v269_v43 }
  0xc1   :  { %v281_v45 = vpop.f32.mrf.mxu3 }
  0xc2   :  { %v1168_v46 = vadd.f32 %v1092_v10, %v281_v45  ;;  %v301_v47 = vpop.f32.mrf.mxu1  ;;  %v252_v45 = vadd.f32 %v1092_v10, %v1104_v16 }
  0xc3   :  { %v245_v49 = vpop.f32.mrf.mxu0  ;;  %v302_v51 = vadd.f32 %v301_v47, %v237_v48 }
  0xc4   :  { %v246_v18 = vadd.f32 %v1092_v10, %v245_v49 }
  0xc6   :  { %595 = vmatmul.msk.f32.gmra.mxu0 %vm170_vm0, %v93_v50  ;;  %v366_v52 = vpop.f32.mrf.mxu2 }
  0xc7   :  { %v367_v53 = vadd.f32 %v366_v52, %v302_v51 }
  0xc9   :  { %v431_v54 = vpop.f32.mrf.mxu3 }
  0xca   :  { %v304_v55 = vpop.f32.mrf.mxu1  ;;  %v432_v56 = vadd.f32 %v431_v54, %v367_v53 }
  0xcb   :  { %v496_v58 = vpop.f32.mrf.mxu0  ;;  %v305_v60 = vadd.f32 %v304_v55, %v240_v57  ;;  %v255_v55 = vadd.f32 %v1092_v10, %v1125_v26 }
  0xcc   :  { %v497_v59 = vadd.f32 %v496_v58, %v432_v56 }
  0xce   :  { %v544_v61 = vmax.f32 %v497_v59, 0.0  ;;  %v369_v62 = vpop.f32.mrf.mxu2 }
  0xcf   :  { %v370_v63 = vadd.f32 %v369_v62, %v305_v60 }
  0xd0   :  { %560 = vst.msk [vmem:[%s1261_s3] sm:$0xff] %vm170_vm0, %v544_v61 }
  0xd1   :  { %v434_v0 = vpop.f32.mrf.mxu3 }
  0xd2   :  { %v307_v1 = vpop.f32.mrf.mxu1  ;;  %v435_v2 = vadd.f32 %v434_v0, %v370_v63  ;;  %v258_v0 = vadd.f32 %v1092_v10, %v1149_v37 }
  0xd3   :  { %v499_v4 = vpop.f32.mrf.mxu0  ;;  %v308_v6 = vadd.f32 %v307_v1, %v243_v3 }
  0xd4   :  { %v500_v5 = vadd.f32 %v499_v4, %v435_v2 }
  0xd6   :  { %v545_v8 = vmax.f32 %v500_v5, 0.0  ;;  %v372_v9 = vpop.f32.mrf.mxu2 }
  0xd7   :  { %v373_v11 = vadd.f32 %v372_v9, %v308_v6 }
  0xd8   :  { %561 = vst.msk [vmem:[%s1261_s3 + $0x8] sm:$0xff] %vm170_vm0, %v545_v8 }
  0xd9   :  { %v437_v12 = vpop.f32.mrf.mxu3 }
  0xda   :  { %v310_v13 = vpop.f32.mrf.mxu1  ;;  %v438_v15 = vadd.f32 %v437_v12, %v373_v11 }
  0xdb   :  { %v502_v19 = vpop.f32.mrf.mxu0  ;;  %v311_v21 = vadd.f32 %v310_v13, %v246_v18 }
  0xdc   :  { %v503_v20 = vadd.f32 %v502_v19, %v438_v15 }
  0xde   :  { %v546_v22 = vmax.f32 %v503_v20, 0.0  ;;  %v375_v23 = vpop.f32.mrf.mxu2 }
  0xdf   :  { %v376_v25 = vadd.f32 %v375_v23, %v311_v21 }
  0xe0   :  { %562 = vst.msk [vmem:[%s1261_s3 + $0x10] sm:$0xff] %vm170_vm0, %v546_v22 }
  0xe1   :  { %v440_v28 = vpop.f32.mrf.mxu3 }
  0xe2   :  { %v313_v29 = vpop.f32.mrf.mxu1  ;;  %v441_v30 = vadd.f32 %v440_v28, %v376_v25 }
  0xe3   :  { %v505_v32 = vpop.f32.mrf.mxu0  ;;  %v314_v35 = vadd.f32 %v313_v29, %v249_v31 }
  0xe4   :  { %v506_v33 = vadd.f32 %v505_v32, %v441_v30 }
  0xe6   :  { %v547_v36 = vmax.f32 %v506_v33, 0.0  ;;  %v378_v39 = vpop.f32.mrf.mxu2 }
  0xe7   :  { %v379_v40 = vadd.f32 %v378_v39, %v314_v35 }
  0xe8   :  { %563 = vst.msk [vmem:[%s1261_s3 + $0x18] sm:$0xff] %vm170_vm0, %v547_v36 }
  0xe9   :  { %v443_v41 = vpop.f32.mrf.mxu3 }
  0xea   :  { %v316_v42 = vpop.f32.mrf.mxu1  ;;  %v444_v43 = vadd.f32 %v443_v41, %v379_v40 }
  0xeb   :  { %v508_v47 = vpop.f32.mrf.mxu0  ;;  %v317_v7 = vadd.f32 %v316_v42, %v252_v45 }
  0xec   :  { %v509_v48 = vadd.f32 %v508_v47, %v444_v43 }
  0xee   :  { %v548_v49 = vmax.f32 %v509_v48, 0.0  ;;  %v381_v50 = vpop.f32.mrf.mxu2 }
  0xef   :  { %v382_v51 = vadd.f32 %v381_v50, %v317_v7 }
  0xf0   :  { %564 = vst.msk [vmem:[%s1261_s3 + $0x20] sm:$0xff] %vm170_vm0, %v548_v49 }
  0xf1   :  { %v446_v52 = vpop.f32.mrf.mxu3 }
  0xf2   :  { %v319_v53 = vpop.f32.mrf.mxu1  ;;  %v447_v54 = vadd.f32 %v446_v52, %v382_v51 }
  0xf3   :  { %v511_v56 = vpop.f32.mrf.mxu0  ;;  %v320_v16 = vadd.f32 %v319_v53, %v255_v55 }
  0xf4   :  { %v512_v57 = vadd.f32 %v511_v56, %v447_v54 }
  0xf6   :  { %v549_v58 = vmax.f32 %v512_v57, 0.0  ;;  %v384_v59 = vpop.f32.mrf.mxu2 }
  0xf7   :  { %v385_v60 = vadd.f32 %v384_v59, %v320_v16 }
  0xf8   :  { %565 = vst.msk [vmem:[%s1261_s3 + $0x28] sm:$0xff] %vm170_vm0, %v549_v58 }
  0xf9   :  { %v449_v61 = vpop.f32.mrf.mxu3 }
  0xfa   :  { %v322_v62 = vpop.f32.mrf.mxu1  ;;  %v450_v63 = vadd.f32 %v449_v61, %v385_v60 }
  0xfb   :  { %v514_v1 = vpop.f32.mrf.mxu0  ;;  %v323_v26 = vadd.f32 %v322_v62, %v258_v0 }
  0xfc   :  { %v515_v2 = vadd.f32 %v514_v1, %v450_v63 }
  0xfe   :  { %v550_v3 = vmax.f32 %v515_v2, 0.0  ;;  %v387_v4 = vpop.f32.mrf.mxu2 }
  0xff   :  { %v388_v5 = vadd.f32 %v387_v4, %v323_v26 }
 0x100   :  { %566 = vst.msk [vmem:[%s1261_s3 + $0x30] sm:$0xff] %vm170_vm0, %v550_v3 }
 0x101   :  { %v452_v6 = vpop.f32.mrf.mxu3 }
 0x102   :  { %v325_v8 = vpop.f32.mrf.mxu1  ;;  %v453_v9 = vadd.f32 %v452_v6, %v388_v5 }
 0x103   :  { %v517_v11 = vpop.f32.mrf.mxu0  ;;  %v326_v13 = vadd.f32 %v325_v8, %v1101_v14 }
 0x104   :  { %v518_v12 = vadd.f32 %v517_v11, %v453_v9 }
 0x106   :  { %v551_v15 = vmax.f32 %v518_v12, 0.0  ;;  %v390_v10 = vpop.f32.mrf.mxu2 }
 0x107   :  { %v391_v37 = vadd.f32 %v390_v10, %v326_v13 }
 0x108   :  { %567 = vst.msk [vmem:[%s1261_s3 + $0x38] sm:$0xff] %vm170_vm0, %v551_v15 }
 0x109   :  { %v455_v18 = vpop.f32.mrf.mxu3 }
 0x10a   :  { %v328_v19 = vpop.f32.mrf.mxu1  ;;  %v456_v20 = vadd.f32 %v455_v18, %v391_v37 }
 0x10b   :  { %v520_v21 = vpop.f32.mrf.mxu0  ;;  %v329_v23 = vadd.f32 %v328_v19, %v1122_v24 }
 0x10c   :  { %v521_v22 = vadd.f32 %v520_v21, %v456_v20 }
 0x10e   :  { %v552_v25 = vmax.f32 %v521_v22, 0.0  ;;  %v393_v28 = vpop.f32.mrf.mxu2 }
 0x10f   :  { %v394_v29 = vadd.f32 %v393_v28, %v329_v23 }
 0x110   :  { %568 = vst.msk [vmem:[%s1261_s3 + $0x40] sm:$0xff] %vm170_vm0, %v552_v25 }
 0x111   :  { %v458_v14 = vpop.f32.mrf.mxu3 }
 0x112   :  { %v331_v30 = vpop.f32.mrf.mxu1  ;;  %v459_v31 = vadd.f32 %v458_v14, %v394_v29 }
 0x113   :  { %v523_v32 = vpop.f32.mrf.mxu0  ;;  %v332_v35 = vadd.f32 %v331_v30, %v1143_v34 }
 0x114   :  { %v524_v33 = vadd.f32 %v523_v32, %v459_v31 }
 0x116   :  { %v553_v36 = vmax.f32 %v524_v33, 0.0  ;;  %v396_v39 = vpop.f32.mrf.mxu2 }
 0x117   :  { %v397_v40 = vadd.f32 %v396_v39, %v332_v35 }
 0x118   :  { %569 = vst.msk [vmem:[%s1261_s3 + $0x48] sm:$0xff] %vm170_vm0, %v553_v36 }
 0x119   :  { %v461_v24 = vpop.f32.mrf.mxu3 }
 0x11a   :  { %v334_v41 = vpop.f32.mrf.mxu1  ;;  %v462_v42 = vadd.f32 %v461_v24, %v397_v40 }
 0x11b   :  { %v526_v43 = vpop.f32.mrf.mxu0  ;;  %v335_v47 = vadd.f32 %v334_v41, %v1165_v44 }
 0x11c   :  { %v527_v45 = vadd.f32 %v526_v43, %v462_v42 }
 0x11e   :  { %v554_v48 = vmax.f32 %v527_v45, 0.0  ;;  %v399_v7 = vpop.f32.mrf.mxu2 }
 0x11f   :  { %v400_v49 = vadd.f32 %v399_v7, %v335_v47 }
 0x120   :  { %570 = vst.msk [vmem:[%s1261_s3 + $0x50] sm:$0xff] %vm170_vm0, %v554_v48 }
 0x121   :  { %v464_v34 = vpop.f32.mrf.mxu3 }
 0x122   :  { %v337_v50 = vpop.f32.mrf.mxu1  ;;  %v465_v51 = vadd.f32 %v464_v34, %v400_v49 }
 0x123   :  { %v529_v52 = vpop.f32.mrf.mxu0  ;;  %v338_v54 = vadd.f32 %v337_v50, %v1107_v17 }
 0x124   :  { %v530_v53 = vadd.f32 %v529_v52, %v465_v51 }
 0x126   :  { %v555_v55 = vmax.f32 %v530_v53, 0.0  ;;  %v402_v56 = vpop.f32.mrf.mxu2 }
 0x127   :  { %v403_v57 = vadd.f32 %v402_v56, %v338_v54 }
 0x128   :  { %571 = vst.msk [vmem:[%s1261_s3 + $0x58] sm:$0xff] %vm170_vm0, %v555_v55 }
 0x129   :  { %v467_v44 = vpop.f32.mrf.mxu3 }
 0x12a   :  { %v340_v16 = vpop.f32.mrf.mxu1  ;;  %v468_v58 = vadd.f32 %v467_v44, %v403_v57 }
 0x12b   :  { %v532_v59 = vpop.f32.mrf.mxu0  ;;  %v341_v61 = vadd.f32 %v340_v16, %v1128_v27 }
 0x12c   :  { %v533_v60 = vadd.f32 %v532_v59, %v468_v58 }
 0x12e   :  { %v556_v62 = vmax.f32 %v533_v60, 0.0  ;;  %v405_v63 = vpop.f32.mrf.mxu2 }
 0x12f   :  { %v406_v0 = vadd.f32 %v405_v63, %v341_v61 }
 0x130   :  { %572 = vst.msk [vmem:[%s1261_s3 + $0x60] sm:$0xff] %vm170_vm0, %v556_v62 }
 0x131   :  { %v470_v17 = vpop.f32.mrf.mxu3 }
 0x132   :  { %v343_v1 = vpop.f32.mrf.mxu1  ;;  %v471_v2 = vadd.f32 %v470_v17, %v406_v0 }
 0x133   :  { %v535_v26 = vpop.f32.mrf.mxu0  ;;  %v344_v4 = vadd.f32 %v343_v1, %v1152_v38 }
 0x134   :  { %v536_v3 = vadd.f32 %v535_v26, %v471_v2 }
 0x136   :  { %v557_v5 = vmax.f32 %v536_v3, 0.0  ;;  %v408_v6 = vpop.f32.mrf.mxu2 }
 0x137   :  { %v409_v8 = vadd.f32 %v408_v6, %v344_v4 }
 0x138   :  { %573 = vst.msk [vmem:[%s1261_s3 + $0x68] sm:$0xff] %vm170_vm0, %v557_v5 }
 0x139   :  { %v473_v27 = vpop.f32.mrf.mxu3 }
 0x13a   :  { %v346_v9 = vpop.f32.mrf.mxu1  ;;  %v474_v11 = vadd.f32 %v473_v27, %v409_v8 }
 0x13b   :  { %v538_v12 = vpop.f32.mrf.mxu0  ;;  %v347_v15 = vadd.f32 %v346_v9, %v1168_v46 }
 0x13c   :  { %v539_v13 = vadd.f32 %v538_v12, %v474_v11 }
 0x13e   :  { %v558_v10 = vmax.f32 %v539_v13, 0.0  ;;  %v411_v37 = vpop.f32.mrf.mxu2 }
 0x13f   :  { %v412_v18 = vadd.f32 %v411_v37, %v347_v15 }
 0x140   :  { %574 = vst.msk [vmem:[%s1261_s3 + $0x70] sm:$0xff] %vm170_vm0, %v558_v10 }
 0x141   :  { %v476_v38 = vpop.f32.mrf.mxu3 }
 0x142   :  { %v477_v19 = vadd.f32 %v476_v38, %v412_v18 }
 0x143   :  { %v541_v20 = vpop.f32.mrf.mxu0 }
 0x144   :  { %v542_v21 = vadd.f32 %v541_v20, %v477_v19 }
 0x146   :  { %v559_v22 = vmax.f32 %v542_v21, 0.0 }
 0x148   :  { %575 = vst.msk [vmem:[%s1261_s3 + $0x78] sm:$0xff] %vm170_vm0, %v559_v22 }

// kernel: _unetback_features.12
= control target key start
LH: loop header
LB: loop body
LE: loop exit
PB: predicated region body
PF: predicated region fallthrough
CT: control target
= control target key end

     0   :  { %vm110_vm0 = vcmask 523264   ;;  %s620_s1 = inlined_call_operand.vmem [shape: f32[576,128], index: 1, kind: input, shape index: {}]   ;;  %s621_s0 = inlined_call_operand.vmem [shape: f32[32,576], index: 0, kind: input, shape index: {}]   ;;  %s622_s2 = inlined_call_operand.vmem [shape: f32[1,128], index: 2, kind: input, shape index: {}]   ;;  %s623_s3 = inlined_call_operand.vmem [shape: f32[32,128], index: 3, kind: output, shape index: {}]  }
   0x1   :  { %v49_v0 = vld [vmem:[%s620_s1 + $0x78] sm:$0xff]  ;;  %v48_v4 = vld [vmem:[%s620_s1 + $0x70] sm:$0xff]  ;;  %v47_v8 = vld [vmem:[%s620_s1 + $0x68] sm:$0xff] }
   0x2   :  { %v65_v1 = vld [vmem:[%s620_s1 + $0xf8] sm:$0xff]  ;;  %123 = vmatpush.msra.mxu0 %v49_v0  ;;  %v64_v5 = vld [vmem:[%s620_s1 + $0xf0] sm:$0xff]  ;;  %v63_v9 = vld [vmem:[%s620_s1 + $0xe8] sm:$0xff] }
   0x3   :  { %v81_v2 = vld [vmem:[%s620_s1 + $0x178] sm:$0xff]  ;;  %152 = vmatpush.msra.mxu1 %v65_v1  ;;  %v80_v6 = vld [vmem:[%s620_s1 + $0x170] sm:$0xff]  ;;  %v79_v10 = vld [vmem:[%s620_s1 + $0x168] sm:$0xff] }
   0x4   :  { %v97_v3 = vld [vmem:[%s620_s1 + $0x1f8] sm:$0xff]  ;;  %181 = vmatpush.msra.mxu2 %v81_v2  ;;  %v96_v7 = vld [vmem:[%s620_s1 + $0x1f0] sm:$0xff]  ;;  %124 = vmatpush.msra.mxu0 %v48_v4  ;;  %v95_v11 = vld [vmem:[%s620_s1 + $0x1e8] sm:$0xff] }
   0x5   :  { %210 = vmatpush.msra.mxu3 %v97_v3  ;;  %153 = vmatpush.msra.mxu1 %v64_v5  ;;  %v46_v12 = vld [vmem:[%s620_s1 + $0x60] sm:$0xff]  ;;  %v45_v16 = vld [vmem:[%s620_s1 + $0x58] sm:$0xff]  ;;  %v44_v20 = vld [vmem:[%s620_s1 + $0x50] sm:$0xff] }
   0x6   :  { %182 = vmatpush.msra.mxu2 %v80_v6  ;;  %v62_v13 = vld [vmem:[%s620_s1 + $0xe0] sm:$0xff]  ;;  %125 = vmatpush.msra.mxu0 %v47_v8  ;;  %v61_v17 = vld [vmem:[%s620_s1 + $0xd8] sm:$0xff]  ;;  %v60_v21 = vld [vmem:[%s620_s1 + $0xd0] sm:$0xff] }
   0x7   :  { %211 = vmatpush.msra.mxu3 %v96_v7  ;;  %154 = vmatpush.msra.mxu1 %v63_v9  ;;  %v78_v14 = vld [vmem:[%s620_s1 + $0x160] sm:$0xff]  ;;  %v77_v18 = vld [vmem:[%s620_s1 + $0x158] sm:$0xff]  ;;  %v76_v22 = vld [vmem:[%s620_s1 + $0x150] sm:$0xff] }
   0x8   :  { %v94_v15 = vld [vmem:[%s620_s1 + $0x1e0] sm:$0xff]  ;;  %183 = vmatpush.msra.mxu2 %v79_v10  ;;  %126 = vmatpush.msra.mxu0 %v46_v12  ;;  %v93_v19 = vld [vmem:[%s620_s1 + $0x1d8] sm:$0xff]  ;;  %v92_v23 = vld [vmem:[%s620_s1 + $0x1d0] sm:$0xff] }
   0x9   :  { %212 = vmatpush.msra.mxu3 %v95_v11  ;;  %155 = vmatpush.msra.mxu1 %v62_v13  ;;  %v43_v24 = vld [vmem:[%s620_s1 + $0x48] sm:$0xff]  ;;  %v42_v28 = vld [vmem:[%s620_s1 + $0x40] sm:$0xff]  ;;  %v41_v32 = vld [vmem:[%s620_s1 + $0x38] sm:$0xff] }
   0xa   :  { %184 = vmatpush.msra.mxu2 %v78_v14  ;;  %127 = vmatpush.msra.mxu0 %v45_v16  ;;  %v59_v25 = vld [vmem:[%s620_s1 + $0xc8] sm:$0xff]  ;;  %v58_v29 = vld [vmem:[%s620_s1 + $0xc0] sm:$0xff]  ;;  %v57_v33 = vld [vmem:[%s620_s1 + $0xb8] sm:$0xff] }
   0xb   :  { %213 = vmatpush.msra.mxu3 %v94_v15  ;;  %156 = vmatpush.msra.mxu1 %v61_v17  ;;  %v75_v26 = vld [vmem:[%s620_s1 + $0x148] sm:$0xff]  ;;  %v74_v30 = vld [vmem:[%s620_s1 + $0x140] sm:$0xff]  ;;  %v73_v34 = vld [vmem:[%s620_s1 + $0x138] sm:$0xff] }
   0xc   :  { %185 = vmatpush.msra.mxu2 %v77_v18  ;;  %128 = vmatpush.msra.mxu0 %v44_v20  ;;  %v91_v27 = vld [vmem:[%s620_s1 + $0x1c8] sm:$0xff]  ;;  %v90_v31 = vld [vmem:[%s620_s1 + $0x1c0] sm:$0xff]  ;;  %v89_v35 = vld [vmem:[%s620_s1 + $0x1b8] sm:$0xff] }
   0xd   :  { %214 = vmatpush.msra.mxu3 %v93_v19  ;;  %157 = vmatpush.msra.mxu1 %v60_v21  ;;  %v40_v36 = vld [vmem:[%s620_s1 + $0x30] sm:$0xff]  ;;  %v39_v40 = vld [vmem:[%s620_s1 + $0x28] sm:$0xff]  ;;  %v38_v44 = vld [vmem:[%s620_s1 + $0x20] sm:$0xff] }
   0xe   :  { %186 = vmatpush.msra.mxu2 %v76_v22  ;;  %129 = vmatpush.msra.mxu0 %v43_v24  ;;  %v56_v37 = vld [vmem:[%s620_s1 + $0xb0] sm:$0xff]  ;;  %v55_v41 = vld [vmem:[%s620_s1 + $0xa8] sm:$0xff]  ;;  %v54_v45 = vld [vmem:[%s620_s1 + $0xa0] sm:$0xff] }
   0xf   :  { %215 = vmatpush.msra.mxu3 %v92_v23  ;;  %158 = vmatpush.msra.mxu1 %v59_v25  ;;  %v72_v38 = vld [vmem:[%s620_s1 + $0x130] sm:$0xff]  ;;  %v71_v42 = vld [vmem:[%s620_s1 + $0x128] sm:$0xff]  ;;  %v70_v46 = vld [vmem:[%s620_s1 + $0x120] sm:$0xff] }
  0x10   :  { %187 = vmatpush.msra.mxu2 %v75_v26  ;;  %130 = vmatpush.msra.mxu0 %v42_v28  ;;  %v88_v39 = vld [vmem:[%s620_s1 + $0x1b0] sm:$0xff]  ;;  %v87_v43 = vld [vmem:[%s620_s1 + $0x1a8] sm:$0xff]  ;;  %v86_v47 = vld [vmem:[%s620_s1 + $0x1a0] sm:$0xff] }
  0x11   :  { %216 = vmatpush.msra.mxu3 %v91_v27  ;;  %159 = vmatpush.msra.mxu1 %v58_v29  ;;  %v37_v48 = vld [vmem:[%s620_s1 + $0x18] sm:$0xff]  ;;  %v36_v52 = vld [vmem:[%s620_s1 + $0x10] sm:$0xff]  ;;  %v35_v56 = vld [vmem:[%s620_s1 + $0x8] sm:$0xff] }
  0x12   :  { %188 = vmatpush.msra.mxu2 %v74_v30  ;;  %131 = vmatpush.msra.mxu0 %v41_v32  ;;  %v53_v49 = vld [vmem:[%s620_s1 + $0x98] sm:$0xff]  ;;  %v52_v53 = vld [vmem:[%s620_s1 + $0x90] sm:$0xff]  ;;  %v51_v57 = vld [vmem:[%s620_s1 + $0x88] sm:$0xff] }
  0x13   :  { %217 = vmatpush.msra.mxu3 %v90_v31  ;;  %160 = vmatpush.msra.mxu1 %v57_v33  ;;  %v69_v50 = vld [vmem:[%s620_s1 + $0x118] sm:$0xff]  ;;  %v68_v54 = vld [vmem:[%s620_s1 + $0x110] sm:$0xff]  ;;  %v67_v58 = vld [vmem:[%s620_s1 + $0x108] sm:$0xff] }
  0x14   :  { %189 = vmatpush.msra.mxu2 %v73_v34  ;;  %132 = vmatpush.msra.mxu0 %v40_v36  ;;  %v85_v51 = vld [vmem:[%s620_s1 + $0x198] sm:$0xff]  ;;  %v84_v55 = vld [vmem:[%s620_s1 + $0x190] sm:$0xff]  ;;  %v83_v59 = vld [vmem:[%s620_s1 + $0x188] sm:$0xff] }
  0x15   :  { %218 = vmatpush.msra.mxu3 %v89_v35  ;;  %161 = vmatpush.msra.mxu1 %v56_v37  ;;  %v34_v60 = vld [vmem:[%s620_s1] sm:$0xff]  ;;  %v15_v1 = vld [vmem:[%s621_s0 + $0x8] sm:$0xff]  ;;  %v16_v2 = vld [vmem:[%s621_s0 + $0x10] sm:$0xff] }
  0x16   :  { %190 = vmatpush.msra.mxu2 %v72_v38  ;;  %133 = vmatpush.msra.mxu0 %v39_v40  ;;  %v50_v61 = vld [vmem:[%s620_s1 + $0x80] sm:$0xff]  ;;  %v17_v3 = vld [vmem:[%s621_s0 + $0x18] sm:$0xff]  ;;  %v104_v5 = vld [vmem:[%s620_s1 + $0x230] sm:$0xff] }
  0x17   :  { %219 = vmatpush.msra.mxu3 %v88_v39  ;;  %162 = vmatpush.msra.mxu1 %v55_v41  ;;  %v66_v62 = vld [vmem:[%s620_s1 + $0x100] sm:$0xff]  ;;  %v105_v4 = vld [vmem:[%s620_s1 + $0x238] sm:$0xff]  ;;  %v103_v6 = vld [vmem:[%s620_s1 + $0x228] sm:$0xff] }
  0x18   :  { %191 = vmatpush.msra.mxu2 %v71_v42  ;;  %134 = vmatpush.msra.mxu0 %v38_v44  ;;  %v82_v63 = vld [vmem:[%s620_s1 + $0x180] sm:$0xff]  ;;  %v19_v7 = vld [vmem:[%s621_s0 + $0x28] sm:$0xff]  ;;  %v20_v8 = vld [vmem:[%s621_s0 + $0x30] sm:$0xff] }
  0x19   :  { %220 = vmatpush.msra.mxu3 %v87_v43  ;;  %163 = vmatpush.msra.mxu1 %v54_v45  ;;  %v14_v0 = vld [vmem:[%s621_s0] sm:$0xff]  ;;  %v21_v9 = vld [vmem:[%s621_s0 + $0x38] sm:$0xff]  ;;  %v100_v13 = vld [vmem:[%s620_s1 + $0x210] sm:$0xff] }
  0x1a   :  { %192 = vmatpush.msra.mxu2 %v70_v46  ;;  %135 = vmatpush.msra.mxu0 %v37_v48  ;;  %v22_v10 = vld [vmem:[%s621_s0 + $0x40] sm:$0xff]  ;;  %v101_v12 = vld [vmem:[%s620_s1 + $0x218] sm:$0xff]  ;;  %v24_v14 = vld [vmem:[%s621_s0 + $0x50] sm:$0xff] }
  0x1b   :  { %221 = vmatpush.msra.mxu3 %v86_v47  ;;  %164 = vmatpush.msra.mxu1 %v53_v49  ;;  %v102_v11 = vld [vmem:[%s620_s1 + $0x220] sm:$0xff]  ;;  %v25_v15 = vld [vmem:[%s621_s0 + $0x58] sm:$0xff]  ;;  %v27_v17 = vld [vmem:[%s621_s0 + $0x68] sm:$0xff] }
  0x1c   :  { %193 = vmatpush.msra.mxu2 %v69_v50  ;;  %136 = vmatpush.msra.mxu0 %v36_v52  ;;  %v26_v16 = vld [vmem:[%s621_s0 + $0x60] sm:$0xff]  ;;  %v99_v18 = vld [vmem:[%s620_s1 + $0x208] sm:$0xff]  ;;  %v29_v20 = vld [vmem:[%s621_s0 + $0x78] sm:$0xff] }
  0x1d   :  { %222 = vmatpush.msra.mxu3 %v85_v51  ;;  %165 = vmatpush.msra.mxu1 %v52_v53  ;;  %v98_v19 = vld [vmem:[%s620_s1 + $0x200] sm:$0xff]  ;;  %v31_v22 = vld [vmem:[%s621_s0 + $0x88] sm:$0xff]  ;;  %v32_v23 = vld [vmem:[%s621_s0 + $0x90] sm:$0xff] }
  0x1e   :  { %194 = vmatpush.msra.mxu2 %v68_v54  ;;  %137 = vmatpush.msra.mxu0 %v35_v56  ;;  %v30_v21 = vld [vmem:[%s621_s0 + $0x80] sm:$0xff]  ;;  %v23_v25 = vld [vmem:[%s621_s0 + $0x48] sm:$0xff]  ;;  %v28_v26 = vld [vmem:[%s621_s0 + $0x70] sm:$0xff] }
  0x1f   :  { %223 = vmatpush.msra.mxu3 %v84_v55  ;;  %166 = vmatpush.msra.mxu1 %v51_v57  ;;  %v18_v24 = vld [vmem:[%s621_s0 + $0x20] sm:$0xff]  ;;  %v33_v27 = vld [vmem:[%s621_s0 + $0x98] sm:$0xff] }
  0x20   :  { %195 = vmatpush.msra.mxu2 %v67_v58  ;;  %138 = vmatpush.msra.mxu0 %v34_v60  ;;  %v308_v34 = vld [vmem:[%s622_s2] ss:$0 sm:$0xff] }
  0x21   :  { %224 = vmatpush.msra.mxu3 %v83_v59  ;;  %167 = vmatpush.msra.mxu1 %v50_v61 }
  0x22   :  { %196 = vmatpush.msra.mxu2 %v66_v62  ;;  %139 = vmatmul.f32.vlgmr.msra.gmra.mxu0 %v14_v0 }
  0x23   :  { %225 = vmatpush.msra.mxu3 %v82_v63  ;;  %168 = vmatmul.f32.vlgmr.msra.gmra.mxu1 %v15_v1 }
  0x24   :  { %197 = vmatmul.f32.vlgmr.msra.gmra.mxu2 %v16_v2  ;;  %226 = vmatmul.f32.vlgmr.msra.gmra.mxu3 %v17_v3 }
  0x25   :  { %285 = vmatpush.msrb.mxu2 %v105_v4  ;;  %286 = vmatpush.msrb.mxu3 %v105_v4 }
  0x26   :  { %247 = vmatpush.msrb.mxu0 %v105_v4  ;;  %284 = vmatpush.msrb.mxu1 %v105_v4 }
  0x27   :  { %288 = vmatpush.msrb.mxu2 %v104_v5  ;;  %289 = vmatpush.msrb.mxu3 %v104_v5 }
  0x28   :  { %248 = vmatpush.msrb.mxu0 %v104_v5  ;;  %287 = vmatpush.msrb.mxu1 %v104_v5 }
  0x29   :  { %291 = vmatpush.msrb.mxu2 %v103_v6  ;;  %292 = vmatpush.msrb.mxu3 %v103_v6 }
  0x2a   :  { %249 = vmatpush.msrb.mxu0 %v103_v6  ;;  %290 = vmatpush.msrb.mxu1 %v103_v6 }
  0x2b   :  { %142 = vmatmul.f32.gmra.mxu0 %v19_v7  ;;  %171 = vmatmul.f32.gmra.mxu1 %v20_v8 }
  0x2c   :  { %200 = vmatmul.f32.gmra.mxu2 %v21_v9  ;;  %229 = vmatmul.f32.gmra.mxu3 %v22_v10 }
  0x2d   :  { %294 = vmatpush.msrb.mxu2 %v102_v11  ;;  %295 = vmatpush.msrb.mxu3 %v102_v11 }
  0x2e   :  { %250 = vmatpush.msrb.mxu0 %v102_v11  ;;  %293 = vmatpush.msrb.mxu1 %v102_v11 }
  0x2f   :  { %297 = vmatpush.msrb.mxu2 %v101_v12  ;;  %298 = vmatpush.msrb.mxu3 %v101_v12 }
  0x30   :  { %251 = vmatpush.msrb.mxu0 %v101_v12  ;;  %296 = vmatpush.msrb.mxu1 %v101_v12 }
  0x31   :  { %300 = vmatpush.msrb.mxu2 %v100_v13  ;;  %301 = vmatpush.msrb.mxu3 %v100_v13 }
  0x32   :  { %252 = vmatpush.msrb.mxu0 %v100_v13  ;;  %299 = vmatpush.msrb.mxu1 %v100_v13 }
  0x33   :  { %145 = vmatmul.f32.gmra.mxu0 %v24_v14  ;;  %174 = vmatmul.f32.gmra.mxu1 %v25_v15 }
  0x34   :  { %203 = vmatmul.f32.gmra.mxu2 %v26_v16  ;;  %232 = vmatmul.f32.gmra.mxu3 %v27_v17 }
  0x35   :  { %303 = vmatpush.msrb.mxu2 %v99_v18  ;;  %304 = vmatpush.msrb.mxu3 %v99_v18 }
  0x36   :  { %253 = vmatpush.msrb.mxu0 %v99_v18  ;;  %302 = vmatpush.msrb.mxu1 %v99_v18 }
  0x37   :  { %306 = vmatpush.msrb.mxu2 %v98_v19  ;;  %307 = vmatpush.msrb.mxu3 %v98_v19 }
  0x38   :  { %254 = vmatpush.msrb.mxu0 %v98_v19  ;;  %305 = vmatpush.msrb.mxu1 %v98_v19 }
  0x3b   :  { %148 = vmatmul.f32.gmra.mxu0 %v29_v20  ;;  %177 = vmatmul.f32.gmra.mxu1 %v30_v21 }
  0x3c   :  { %206 = vmatmul.f32.gmra.mxu2 %v31_v22  ;;  %235 = vmatmul.f32.gmra.mxu3 %v32_v23 }
  0x43   :  { %280 = vmatmul.msk.f32.vlgmr.msrb.gmra.mxu0 %vm110_vm0, %v18_v24  ;;  %281 = vmatmul.msk.f32.vlgmr.msrb.gmra.mxu1 %vm110_vm0, %v23_v25 }
  0x44   :  { %282 = vmatmul.msk.f32.vlgmr.msrb.gmra.mxu2 %vm110_vm0, %v28_v26  ;;  %283 = vmatmul.msk.f32.vlgmr.msrb.gmra.mxu3 %vm110_vm0, %v33_v27 }
  0x9f   :  { %v140_v28 = vpop.f32.mrf.mxu0 }
  0xa0   :  { %v169_v29 = vpop.f32.mrf.mxu1  ;;  %v141_v39 = vadd.f32 %v308_v34, %v140_v28 }
  0xa2   :  { %v170_v41 = vadd.f32 %v169_v29, %v141_v39 }
  0xa7   :  { %v198_v30 = vpop.f32.mrf.mxu2  ;;  %v227_v31 = vpop.f32.mrf.mxu3 }
  0xa8   :  { %v143_v32 = vpop.f32.mrf.mxu0  ;;  %v172_v33 = vpop.f32.mrf.mxu1  ;;  %v199_v49 = vadd.f32 %v198_v30, %v170_v41 }
  0xa9   :  { %v144_v40 = vadd.f32 %v308_v34, %v143_v32 }
  0xaa   :  { %v228_v53 = vadd.f32 %v227_v31, %v199_v49 }
  0xab   :  { %v173_v42 = vadd.f32 %v172_v33, %v144_v40 }
  0xaf   :  { %v201_v35 = vpop.f32.mrf.mxu2  ;;  %v230_v36 = vpop.f32.mrf.mxu3 }
  0xb0   :  { %v146_v37 = vpop.f32.mrf.mxu0  ;;  %v175_v38 = vpop.f32.mrf.mxu1  ;;  %v202_v50 = vadd.f32 %v201_v35, %v173_v42 }
  0xb1   :  { %v147_v47 = vadd.f32 %v308_v34, %v146_v37 }
  0xb2   :  { %v231_v54 = vadd.f32 %v230_v36, %v202_v50 }
  0xb3   :  { %v176_v51 = vadd.f32 %v175_v38, %v147_v47 }
  0xb7   :  { %v204_v43 = vpop.f32.mrf.mxu2  ;;  %v233_v44 = vpop.f32.mrf.mxu3 }
  0xb8   :  { %v149_v45 = vpop.f32.mrf.mxu0  ;;  %v178_v46 = vpop.f32.mrf.mxu1  ;;  %v205_v61 = vadd.f32 %v204_v43, %v176_v51 }
  0xb9   :  { %v150_v48 = vadd.f32 %v308_v34, %v149_v45 }
  0xba   :  { %v234_v1 = vadd.f32 %v233_v44, %v205_v61 }
  0xbb   :  { %v179_v52 = vadd.f32 %v178_v46, %v150_v48 }
  0xbf   :  { %v207_v55 = vpop.f32.mrf.mxu2  ;;  %v236_v56 = vpop.f32.mrf.mxu3 }
  0xc0   :  { %v256_v57 = vpop.f32.mrf.mxu0  ;;  %v259_v58 = vpop.f32.mrf.mxu1  ;;  %v208_v62 = vadd.f32 %v207_v55, %v179_v52 }
  0xc1   :  { %v257_v59 = vadd.f32 %v256_v57, %v228_v53  ;;  %v260_v60 = vadd.f32 %v259_v58, %v231_v54 }
  0xc2   :  { %v237_v2 = vadd.f32 %v236_v56, %v208_v62 }
  0xc3   :  { %v268_v63 = vmax.f32 %v257_v59, 0.0  ;;  %v269_v0 = vmax.f32 %v260_v60, 0.0 }
  0xc5   :  { %272 = vst [vmem:[%s623_s3] sm:$0xff] %v268_v63 }
  0xc6   :  { %273 = vst [vmem:[%s623_s3 + $0x8] sm:$0xff] %v269_v0 }
  0xc7   :  { %v262_v3 = vpop.f32.mrf.mxu2  ;;  %v265_v4 = vpop.f32.mrf.mxu3 }
  0xc8   :  { %v263_v5 = vadd.f32 %v262_v3, %v234_v1  ;;  %v266_v6 = vadd.f32 %v265_v4, %v237_v2 }
  0xca   :  { %v270_v7 = vmax.f32 %v263_v5, 0.0  ;;  %v271_v8 = vmax.f32 %v266_v6, 0.0 }
  0xcc   :  { %274 = vst [vmem:[%s623_s3 + $0x10] sm:$0xff] %v270_v7 }
  0xcd   :  { %275 = vst [vmem:[%s623_s3 + $0x18] sm:$0xff] %v271_v8 }

// kernel: _unetback_features.13
= control target key start
LH: loop header
LB: loop body
LE: loop exit
PB: predicated region body
PF: predicated region fallthrough
CT: control target
= control target key end

     0   :  { %s1095_s1 = inlined_call_operand.vmem [shape: f32[1152,128], index: 1, kind: input, shape index: {}]   ;;  %s1096_s0 = inlined_call_operand.vmem [shape: f32[32,1152], index: 0, kind: input, shape index: {}]   ;;  %s1097_s2 = inlined_call_operand.vmem [shape: f32[1,128], index: 2, kind: input, shape index: {}]   ;;  %s1098_s3 = inlined_call_operand.vmem [shape: f32[32,128], index: 3, kind: output, shape index: {}]  }
   0x1   :  { %v65_v0 = vld [vmem:[%s1095_s1 + $0x78] sm:$0xff]  ;;  %v64_v4 = vld [vmem:[%s1095_s1 + $0x70] sm:$0xff]  ;;  %v63_v8 = vld [vmem:[%s1095_s1 + $0x68] sm:$0xff] }
   0x2   :  { %v81_v1 = vld [vmem:[%s1095_s1 + $0xf8] sm:$0xff]  ;;  %198 = vmatpush.msra.mxu0 %v65_v0  ;;  %v80_v5 = vld [vmem:[%s1095_s1 + $0xf0] sm:$0xff]  ;;  %v79_v9 = vld [vmem:[%s1095_s1 + $0xe8] sm:$0xff] }
   0x3   :  { %v97_v2 = vld [vmem:[%s1095_s1 + $0x178] sm:$0xff]  ;;  %227 = vmatpush.msra.mxu1 %v81_v1  ;;  %v96_v6 = vld [vmem:[%s1095_s1 + $0x170] sm:$0xff]  ;;  %v95_v10 = vld [vmem:[%s1095_s1 + $0x168] sm:$0xff] }
   0x4   :  { %v113_v3 = vld [vmem:[%s1095_s1 + $0x1f8] sm:$0xff]  ;;  %256 = vmatpush.msra.mxu2 %v97_v2  ;;  %v112_v7 = vld [vmem:[%s1095_s1 + $0x1f0] sm:$0xff]  ;;  %199 = vmatpush.msra.mxu0 %v64_v4  ;;  %v111_v11 = vld [vmem:[%s1095_s1 + $0x1e8] sm:$0xff] }
   0x5   :  { %285 = vmatpush.msra.mxu3 %v113_v3  ;;  %228 = vmatpush.msra.mxu1 %v80_v5  ;;  %v62_v12 = vld [vmem:[%s1095_s1 + $0x60] sm:$0xff]  ;;  %v61_v16 = vld [vmem:[%s1095_s1 + $0x58] sm:$0xff]  ;;  %v60_v20 = vld [vmem:[%s1095_s1 + $0x50] sm:$0xff] }
   0x6   :  { %257 = vmatpush.msra.mxu2 %v96_v6  ;;  %v78_v13 = vld [vmem:[%s1095_s1 + $0xe0] sm:$0xff]  ;;  %200 = vmatpush.msra.mxu0 %v63_v8  ;;  %v77_v17 = vld [vmem:[%s1095_s1 + $0xd8] sm:$0xff]  ;;  %v76_v21 = vld [vmem:[%s1095_s1 + $0xd0] sm:$0xff] }
   0x7   :  { %286 = vmatpush.msra.mxu3 %v112_v7  ;;  %229 = vmatpush.msra.mxu1 %v79_v9  ;;  %v94_v14 = vld [vmem:[%s1095_s1 + $0x160] sm:$0xff]  ;;  %v93_v18 = vld [vmem:[%s1095_s1 + $0x158] sm:$0xff]  ;;  %v92_v22 = vld [vmem:[%s1095_s1 + $0x150] sm:$0xff] }
   0x8   :  { %v110_v15 = vld [vmem:[%s1095_s1 + $0x1e0] sm:$0xff]  ;;  %258 = vmatpush.msra.mxu2 %v95_v10  ;;  %201 = vmatpush.msra.mxu0 %v62_v12  ;;  %v109_v19 = vld [vmem:[%s1095_s1 + $0x1d8] sm:$0xff]  ;;  %v108_v23 = vld [vmem:[%s1095_s1 + $0x1d0] sm:$0xff] }
   0x9   :  { %287 = vmatpush.msra.mxu3 %v111_v11  ;;  %230 = vmatpush.msra.mxu1 %v78_v13  ;;  %v59_v24 = vld [vmem:[%s1095_s1 + $0x48] sm:$0xff]  ;;  %v58_v28 = vld [vmem:[%s1095_s1 + $0x40] sm:$0xff]  ;;  %v57_v32 = vld [vmem:[%s1095_s1 + $0x38] sm:$0xff] }
   0xa   :  { %259 = vmatpush.msra.mxu2 %v94_v14  ;;  %202 = vmatpush.msra.mxu0 %v61_v16  ;;  %v75_v25 = vld [vmem:[%s1095_s1 + $0xc8] sm:$0xff]  ;;  %v74_v29 = vld [vmem:[%s1095_s1 + $0xc0] sm:$0xff]  ;;  %v73_v33 = vld [vmem:[%s1095_s1 + $0xb8] sm:$0xff] }
   0xb   :  { %288 = vmatpush.msra.mxu3 %v110_v15  ;;  %231 = vmatpush.msra.mxu1 %v77_v17  ;;  %v91_v26 = vld [vmem:[%s1095_s1 + $0x148] sm:$0xff]  ;;  %v90_v30 = vld [vmem:[%s1095_s1 + $0x140] sm:$0xff]  ;;  %v89_v34 = vld [vmem:[%s1095_s1 + $0x138] sm:$0xff] }
   0xc   :  { %260 = vmatpush.msra.mxu2 %v93_v18  ;;  %203 = vmatpush.msra.mxu0 %v60_v20  ;;  %v107_v27 = vld [vmem:[%s1095_s1 + $0x1c8] sm:$0xff]  ;;  %v106_v31 = vld [vmem:[%s1095_s1 + $0x1c0] sm:$0xff]  ;;  %v105_v35 = vld [vmem:[%s1095_s1 + $0x1b8] sm:$0xff] }
   0xd   :  { %289 = vmatpush.msra.mxu3 %v109_v19  ;;  %232 = vmatpush.msra.mxu1 %v76_v21  ;;  %v56_v36 = vld [vmem:[%s1095_s1 + $0x30] sm:$0xff]  ;;  %v55_v40 = vld [vmem:[%s1095_s1 + $0x28] sm:$0xff]  ;;  %v54_v44 = vld [vmem:[%s1095_s1 + $0x20] sm:$0xff] }
   0xe   :  { %261 = vmatpush.msra.mxu2 %v92_v22  ;;  %204 = vmatpush.msra.mxu0 %v59_v24  ;;  %v72_v37 = vld [vmem:[%s1095_s1 + $0xb0] sm:$0xff]  ;;  %v71_v41 = vld [vmem:[%s1095_s1 + $0xa8] sm:$0xff]  ;;  %v70_v45 = vld [vmem:[%s1095_s1 + $0xa0] sm:$0xff] }
   0xf   :  { %290 = vmatpush.msra.mxu3 %v108_v23  ;;  %233 = vmatpush.msra.mxu1 %v75_v25  ;;  %v88_v38 = vld [vmem:[%s1095_s1 + $0x130] sm:$0xff]  ;;  %v87_v42 = vld [vmem:[%s1095_s1 + $0x128] sm:$0xff]  ;;  %v86_v46 = vld [vmem:[%s1095_s1 + $0x120] sm:$0xff] }
  0x10   :  { %262 = vmatpush.msra.mxu2 %v91_v26  ;;  %205 = vmatpush.msra.mxu0 %v58_v28  ;;  %v104_v39 = vld [vmem:[%s1095_s1 + $0x1b0] sm:$0xff]  ;;  %v103_v43 = vld [vmem:[%s1095_s1 + $0x1a8] sm:$0xff]  ;;  %v102_v47 = vld [vmem:[%s1095_s1 + $0x1a0] sm:$0xff] }
  0x11   :  { %291 = vmatpush.msra.mxu3 %v107_v27  ;;  %234 = vmatpush.msra.mxu1 %v74_v29  ;;  %v53_v48 = vld [vmem:[%s1095_s1 + $0x18] sm:$0xff]  ;;  %v52_v52 = vld [vmem:[%s1095_s1 + $0x10] sm:$0xff]  ;;  %v51_v56 = vld [vmem:[%s1095_s1 + $0x8] sm:$0xff] }
  0x12   :  { %263 = vmatpush.msra.mxu2 %v90_v30  ;;  %206 = vmatpush.msra.mxu0 %v57_v32  ;;  %v69_v49 = vld [vmem:[%s1095_s1 + $0x98] sm:$0xff]  ;;  %v68_v53 = vld [vmem:[%s1095_s1 + $0x90] sm:$0xff]  ;;  %v67_v57 = vld [vmem:[%s1095_s1 + $0x88] sm:$0xff] }
  0x13   :  { %292 = vmatpush.msra.mxu3 %v106_v31  ;;  %235 = vmatpush.msra.mxu1 %v73_v33  ;;  %v85_v50 = vld [vmem:[%s1095_s1 + $0x118] sm:$0xff]  ;;  %v84_v54 = vld [vmem:[%s1095_s1 + $0x110] sm:$0xff]  ;;  %v83_v58 = vld [vmem:[%s1095_s1 + $0x108] sm:$0xff] }
  0x14   :  { %264 = vmatpush.msra.mxu2 %v89_v34  ;;  %207 = vmatpush.msra.mxu0 %v56_v36  ;;  %v101_v51 = vld [vmem:[%s1095_s1 + $0x198] sm:$0xff]  ;;  %v100_v55 = vld [vmem:[%s1095_s1 + $0x190] sm:$0xff]  ;;  %v99_v59 = vld [vmem:[%s1095_s1 + $0x188] sm:$0xff] }
  0x15   :  { %293 = vmatpush.msra.mxu3 %v105_v35  ;;  %236 = vmatpush.msra.mxu1 %v72_v37  ;;  %v50_v60 = vld [vmem:[%s1095_s1] sm:$0xff]  ;;  %v15_v1 = vld [vmem:[%s1096_s0 + $0x8] sm:$0xff]  ;;  %v16_v2 = vld [vmem:[%s1096_s0 + $0x10] sm:$0xff] }
  0x16   :  { %265 = vmatpush.msra.mxu2 %v88_v38  ;;  %208 = vmatpush.msra.mxu0 %v55_v40  ;;  %v66_v61 = vld [vmem:[%s1095_s1 + $0x80] sm:$0xff]  ;;  %v17_v3 = vld [vmem:[%s1096_s0 + $0x18] sm:$0xff]  ;;  %v160_v8 = vld [vmem:[%s1095_s1 + $0x370] sm:$0xff] }
  0x17   :  { %294 = vmatpush.msra.mxu3 %v104_v39  ;;  %237 = vmatpush.msra.mxu1 %v71_v41  ;;  %v82_v62 = vld [vmem:[%s1095_s1 + $0x100] sm:$0xff]  ;;  %v161_v4 = vld [vmem:[%s1095_s1 + $0x378] sm:$0xff]  ;;  %v176_v9 = vld [vmem:[%s1095_s1 + $0x3f0] sm:$0xff] }
  0x18   :  { %266 = vmatpush.msra.mxu2 %v87_v42  ;;  %209 = vmatpush.msra.mxu0 %v54_v44  ;;  %v98_v63 = vld [vmem:[%s1095_s1 + $0x180] sm:$0xff]  ;;  %v177_v5 = vld [vmem:[%s1095_s1 + $0x3f8] sm:$0xff]  ;;  %v128_v10 = vld [vmem:[%s1095_s1 + $0x270] sm:$0xff] }
  0x19   :  { %295 = vmatpush.msra.mxu3 %v103_v43  ;;  %238 = vmatpush.msra.mxu1 %v70_v45  ;;  %v14_v0 = vld [vmem:[%s1096_s0] sm:$0xff]  ;;  %v129_v6 = vld [vmem:[%s1095_s1 + $0x278] sm:$0xff]  ;;  %v144_v11 = vld [vmem:[%s1095_s1 + $0x2f0] sm:$0xff] }
  0x1a   :  { %267 = vmatpush.msra.mxu2 %v86_v46  ;;  %210 = vmatpush.msra.mxu0 %v53_v48  ;;  %v145_v7 = vld [vmem:[%s1095_s1 + $0x2f8] sm:$0xff]  ;;  %v159_v12 = vld [vmem:[%s1095_s1 + $0x368] sm:$0xff]  ;;  %v158_v16 = vld [vmem:[%s1095_s1 + $0x360] sm:$0xff] }
  0x1b   :  { %296 = vmatpush.msra.mxu3 %v102_v47  ;;  %239 = vmatpush.msra.mxu1 %v69_v49  ;;  %v175_v13 = vld [vmem:[%s1095_s1 + $0x3e8] sm:$0xff]  ;;  %v174_v17 = vld [vmem:[%s1095_s1 + $0x3e0] sm:$0xff]  ;;  %v24_v21 = vld [vmem:[%s1096_s0 + $0x50] sm:$0xff] }
  0x1c   :  { %268 = vmatpush.msra.mxu2 %v85_v50  ;;  %211 = vmatpush.msra.mxu0 %v52_v52  ;;  %v127_v14 = vld [vmem:[%s1095_s1 + $0x268] sm:$0xff]  ;;  %v126_v18 = vld [vmem:[%s1095_s1 + $0x260] sm:$0xff]  ;;  %v25_v22 = vld [vmem:[%s1096_s0 + $0x58] sm:$0xff] }
  0x1d   :  { %297 = vmatpush.msra.mxu3 %v101_v51  ;;  %240 = vmatpush.msra.mxu1 %v68_v53  ;;  %v143_v15 = vld [vmem:[%s1095_s1 + $0x2e8] sm:$0xff]  ;;  %v142_v19 = vld [vmem:[%s1095_s1 + $0x2e0] sm:$0xff]  ;;  %v157_v24 = vld [vmem:[%s1095_s1 + $0x358] sm:$0xff] }
  0x1e   :  { %269 = vmatpush.msra.mxu2 %v84_v54  ;;  %212 = vmatpush.msra.mxu0 %v51_v56  ;;  %v23_v20 = vld [vmem:[%s1096_s0 + $0x48] sm:$0xff]  ;;  %v26_v23 = vld [vmem:[%s1096_s0 + $0x60] sm:$0xff]  ;;  %v173_v25 = vld [vmem:[%s1095_s1 + $0x3d8] sm:$0xff] }
  0x1f   :  { %298 = vmatpush.msra.mxu3 %v100_v55  ;;  %241 = vmatpush.msra.mxu1 %v67_v57  ;;  %v125_v26 = vld [vmem:[%s1095_s1 + $0x258] sm:$0xff]  ;;  %v156_v28 = vld [vmem:[%s1095_s1 + $0x350] sm:$0xff]  ;;  %v155_v32 = vld [vmem:[%s1095_s1 + $0x348] sm:$0xff] }
  0x20   :  { %270 = vmatpush.msra.mxu2 %v83_v58  ;;  %213 = vmatpush.msra.mxu0 %v50_v60  ;;  %v141_v27 = vld [vmem:[%s1095_s1 + $0x2d8] sm:$0xff]  ;;  %v172_v29 = vld [vmem:[%s1095_s1 + $0x3d0] sm:$0xff]  ;;  %v171_v33 = vld [vmem:[%s1095_s1 + $0x3c8] sm:$0xff] }
  0x21   :  { %299 = vmatpush.msra.mxu3 %v99_v59  ;;  %242 = vmatpush.msra.mxu1 %v66_v61  ;;  %v124_v30 = vld [vmem:[%s1095_s1 + $0x250] sm:$0xff]  ;;  %v123_v34 = vld [vmem:[%s1095_s1 + $0x248] sm:$0xff]  ;;  %v154_v36 = vld [vmem:[%s1095_s1 + $0x340] sm:$0xff] }
  0x22   :  { %271 = vmatpush.msra.mxu2 %v82_v62  ;;  %214 = vmatmul.f32.vlgmr.msra.gmra.mxu0 %v14_v0  ;;  %v140_v31 = vld [vmem:[%s1095_s1 + $0x2d0] sm:$0xff]  ;;  %v139_v35 = vld [vmem:[%s1095_s1 + $0x2c8] sm:$0xff]  ;;  %v170_v37 = vld [vmem:[%s1095_s1 + $0x3c0] sm:$0xff] }
  0x23   :  { %300 = vmatpush.msra.mxu3 %v98_v63  ;;  %243 = vmatmul.f32.vlgmr.msra.gmra.mxu1 %v15_v1  ;;  %v122_v38 = vld [vmem:[%s1095_s1 + $0x240] sm:$0xff]  ;;  %v32_v40 = vld [vmem:[%s1096_s0 + $0x90] sm:$0xff]  ;;  %v33_v41 = vld [vmem:[%s1096_s0 + $0x98] sm:$0xff] }
  0x24   :  { %272 = vmatmul.f32.vlgmr.msra.gmra.mxu2 %v16_v2  ;;  %301 = vmatmul.f32.vlgmr.msra.gmra.mxu3 %v17_v3  ;;  %v138_v39 = vld [vmem:[%s1095_s1 + $0x2c0] sm:$0xff]  ;;  %v35_v43 = vld [vmem:[%s1096_s0 + $0xa8] sm:$0xff]  ;;  %v153_v44 = vld [vmem:[%s1095_s1 + $0x338] sm:$0xff] }
  0x25   :  { %372 = vmatpush.msrb.mxu2 %v161_v4  ;;  %401 = vmatpush.msrb.mxu3 %v177_v5  ;;  %v34_v42 = vld [vmem:[%s1096_s0 + $0xa0] sm:$0xff]  ;;  %v169_v45 = vld [vmem:[%s1095_s1 + $0x3b8] sm:$0xff]  ;;  %v152_v48 = vld [vmem:[%s1095_s1 + $0x330] sm:$0xff] }
  0x26   :  { %314 = vmatpush.msrb.mxu0 %v129_v6  ;;  %343 = vmatpush.msrb.mxu1 %v145_v7  ;;  %v121_v46 = vld [vmem:[%s1095_s1 + $0x238] sm:$0xff]  ;;  %v168_v49 = vld [vmem:[%s1095_s1 + $0x3b0] sm:$0xff]  ;;  %v151_v52 = vld [vmem:[%s1095_s1 + $0x328] sm:$0xff] }
  0x27   :  { %373 = vmatpush.msrb.mxu2 %v160_v8  ;;  %402 = vmatpush.msrb.mxu3 %v176_v9  ;;  %v137_v47 = vld [vmem:[%s1095_s1 + $0x2b8] sm:$0xff]  ;;  %v120_v50 = vld [vmem:[%s1095_s1 + $0x230] sm:$0xff]  ;;  %v167_v53 = vld [vmem:[%s1095_s1 + $0x3a8] sm:$0xff] }
  0x28   :  { %315 = vmatpush.msrb.mxu0 %v128_v10  ;;  %344 = vmatpush.msrb.mxu1 %v144_v11  ;;  %v136_v51 = vld [vmem:[%s1095_s1 + $0x2b0] sm:$0xff]  ;;  %v119_v54 = vld [vmem:[%s1095_s1 + $0x228] sm:$0xff]  ;;  %v150_v56 = vld [vmem:[%s1095_s1 + $0x320] sm:$0xff] }
  0x29   :  { %374 = vmatpush.msrb.mxu2 %v159_v12  ;;  %403 = vmatpush.msrb.mxu3 %v175_v13  ;;  %v135_v55 = vld [vmem:[%s1095_s1 + $0x2a8] sm:$0xff]  ;;  %v166_v57 = vld [vmem:[%s1095_s1 + $0x3a0] sm:$0xff]  ;;  %v41_v60 = vld [vmem:[%s1096_s0 + $0xd8] sm:$0xff] }
  0x2a   :  { %316 = vmatpush.msrb.mxu0 %v127_v14  ;;  %345 = vmatpush.msrb.mxu1 %v143_v15  ;;  %v118_v58 = vld [vmem:[%s1095_s1 + $0x220] sm:$0xff]  ;;  %v43_v62 = vld [vmem:[%s1096_s0 + $0xe8] sm:$0xff]  ;;  %v44_v63 = vld [vmem:[%s1096_s0 + $0xf0] sm:$0xff] }
  0x2b   :  { %375 = vmatpush.msrb.mxu2 %v158_v16  ;;  %404 = vmatpush.msrb.mxu3 %v174_v17  ;;  %v134_v59 = vld [vmem:[%s1095_s1 + $0x2a0] sm:$0xff]  ;;  %v149_v0 = vld [vmem:[%s1095_s1 + $0x318] sm:$0xff]  ;;  %v148_v4 = vld [vmem:[%s1095_s1 + $0x310] sm:$0xff] }
  0x2c   :  { %317 = vmatpush.msrb.mxu0 %v126_v18  ;;  %346 = vmatpush.msrb.mxu1 %v142_v19  ;;  %v42_v61 = vld [vmem:[%s1096_s0 + $0xe0] sm:$0xff]  ;;  %v165_v1 = vld [vmem:[%s1095_s1 + $0x398] sm:$0xff]  ;;  %v164_v5 = vld [vmem:[%s1095_s1 + $0x390] sm:$0xff] }
  0x2d   :  { %217 = vmatmul.f32.gmra.mxu0 %v23_v20  ;;  %246 = vmatmul.f32.gmra.mxu1 %v24_v21  ;;  %v117_v2 = vld [vmem:[%s1095_s1 + $0x218] sm:$0xff]  ;;  %v116_v6 = vld [vmem:[%s1095_s1 + $0x210] sm:$0xff]  ;;  %v147_v8 = vld [vmem:[%s1095_s1 + $0x308] sm:$0xff] }
  0x2e   :  { %275 = vmatmul.f32.gmra.mxu2 %v25_v22  ;;  %304 = vmatmul.f32.gmra.mxu3 %v26_v23  ;;  %v133_v3 = vld [vmem:[%s1095_s1 + $0x298] sm:$0xff]  ;;  %v132_v7 = vld [vmem:[%s1095_s1 + $0x290] sm:$0xff]  ;;  %v163_v9 = vld [vmem:[%s1095_s1 + $0x388] sm:$0xff] }
  0x2f   :  { %376 = vmatpush.msrb.mxu2 %v157_v24  ;;  %405 = vmatpush.msrb.mxu3 %v173_v25  ;;  %v115_v10 = vld [vmem:[%s1095_s1 + $0x208] sm:$0xff]  ;;  %v146_v12 = vld [vmem:[%s1095_s1 + $0x300] sm:$0xff]  ;;  %v20_v18 = vld [vmem:[%s1096_s0 + $0x30] sm:$0xff] }
  0x30   :  { %318 = vmatpush.msrb.mxu0 %v125_v26  ;;  %347 = vmatpush.msrb.mxu1 %v141_v27  ;;  %v131_v11 = vld [vmem:[%s1095_s1 + $0x288] sm:$0xff]  ;;  %v162_v13 = vld [vmem:[%s1095_s1 + $0x380] sm:$0xff]  ;;  %v21_v19 = vld [vmem:[%s1096_s0 + $0x38] sm:$0xff] }
  0x31   :  { %377 = vmatpush.msrb.mxu2 %v156_v28  ;;  %406 = vmatpush.msrb.mxu3 %v172_v29  ;;  %v114_v14 = vld [vmem:[%s1095_s1 + $0x200] sm:$0xff]  ;;  %v19_v17 = vld [vmem:[%s1096_s0 + $0x28] sm:$0xff]  ;;  %v193_v20 = vld [vmem:[%s1095_s1 + $0x478] sm:$0xff] }
  0x32   :  { %319 = vmatpush.msrb.mxu0 %v124_v30  ;;  %348 = vmatpush.msrb.mxu1 %v140_v31  ;;  %v130_v15 = vld [vmem:[%s1095_s1 + $0x280] sm:$0xff]  ;;  %v192_v21 = vld [vmem:[%s1095_s1 + $0x470] sm:$0xff]  ;;  %v191_v22 = vld [vmem:[%s1095_s1 + $0x468] sm:$0xff] }
  0x33   :  { %378 = vmatpush.msrb.mxu2 %v155_v32  ;;  %407 = vmatpush.msrb.mxu3 %v171_v33  ;;  %v18_v16 = vld [vmem:[%s1096_s0 + $0x20] sm:$0xff]  ;;  %v27_v24 = vld [vmem:[%s1096_s0 + $0x68] sm:$0xff]  ;;  %v28_v25 = vld [vmem:[%s1096_s0 + $0x70] sm:$0xff] }
  0x34   :  { %320 = vmatpush.msrb.mxu0 %v123_v34  ;;  %349 = vmatpush.msrb.mxu1 %v139_v35  ;;  %v190_v23 = vld [vmem:[%s1095_s1 + $0x460] sm:$0xff]  ;;  %v29_v26 = vld [vmem:[%s1096_s0 + $0x78] sm:$0xff]  ;;  %v188_v29 = vld [vmem:[%s1095_s1 + $0x450] sm:$0xff] }
  0x35   :  { %379 = vmatpush.msrb.mxu2 %v154_v36  ;;  %408 = vmatpush.msrb.mxu3 %v170_v37  ;;  %v30_v27 = vld [vmem:[%s1096_s0 + $0x80] sm:$0xff]  ;;  %v189_v28 = vld [vmem:[%s1095_s1 + $0x458] sm:$0xff]  ;;  %v187_v30 = vld [vmem:[%s1095_s1 + $0x448] sm:$0xff] }
  0x36   :  { %321 = vmatpush.msrb.mxu0 %v122_v38  ;;  %350 = vmatpush.msrb.mxu1 %v138_v39  ;;  %v186_v31 = vld [vmem:[%s1095_s1 + $0x440] sm:$0xff]  ;;  %v36_v32 = vld [vmem:[%s1096_s0 + $0xb0] sm:$0xff]  ;;  %v37_v33 = vld [vmem:[%s1096_s0 + $0xb8] sm:$0xff] }
  0x37   :  { %220 = vmatmul.f32.gmra.mxu0 %v32_v40  ;;  %249 = vmatmul.f32.gmra.mxu1 %v33_v41  ;;  %v38_v34 = vld [vmem:[%s1096_s0 + $0xc0] sm:$0xff]  ;;  %v39_v35 = vld [vmem:[%s1096_s0 + $0xc8] sm:$0xff]  ;;  %v185_v36 = vld [vmem:[%s1095_s1 + $0x438] sm:$0xff] }
  0x38   :  { %278 = vmatmul.f32.gmra.mxu2 %v34_v42  ;;  %307 = vmatmul.f32.gmra.mxu3 %v35_v43  ;;  %v184_v37 = vld [vmem:[%s1095_s1 + $0x430] sm:$0xff]  ;;  %v183_v38 = vld [vmem:[%s1095_s1 + $0x428] sm:$0xff]  ;;  %v182_v39 = vld [vmem:[%s1095_s1 + $0x420] sm:$0xff] }
  0x39   :  { %380 = vmatpush.msrb.mxu2 %v153_v44  ;;  %409 = vmatpush.msrb.mxu3 %v169_v45  ;;  %v45_v40 = vld [vmem:[%s1096_s0 + $0xf8] sm:$0xff]  ;;  %v46_v41 = vld [vmem:[%s1096_s0 + $0x100] sm:$0xff]  ;;  %v47_v42 = vld [vmem:[%s1096_s0 + $0x108] sm:$0xff] }
  0x3a   :  { %322 = vmatpush.msrb.mxu0 %v121_v46  ;;  %351 = vmatpush.msrb.mxu1 %v137_v47  ;;  %v48_v43 = vld [vmem:[%s1096_s0 + $0x110] sm:$0xff]  ;;  %v181_v44 = vld [vmem:[%s1095_s1 + $0x418] sm:$0xff]  ;;  %v179_v46 = vld [vmem:[%s1095_s1 + $0x408] sm:$0xff] }
  0x3b   :  { %381 = vmatpush.msrb.mxu2 %v152_v48  ;;  %410 = vmatpush.msrb.mxu3 %v168_v49  ;;  %v180_v45 = vld [vmem:[%s1095_s1 + $0x410] sm:$0xff]  ;;  %v178_v47 = vld [vmem:[%s1095_s1 + $0x400] sm:$0xff]  ;;  %v31_v49 = vld [vmem:[%s1096_s0 + $0x88] sm:$0xff] }
  0x3c   :  { %323 = vmatpush.msrb.mxu0 %v120_v50  ;;  %352 = vmatpush.msrb.mxu1 %v136_v51  ;;  %v22_v48 = vld [vmem:[%s1096_s0 + $0x40] sm:$0xff]  ;;  %v40_v50 = vld [vmem:[%s1096_s0 + $0xd0] sm:$0xff]  ;;  %v49_v51 = vld [vmem:[%s1096_s0 + $0x118] sm:$0xff] }
  0x3d   :  { %382 = vmatpush.msrb.mxu2 %v151_v52  ;;  %411 = vmatpush.msrb.mxu3 %v167_v53 }
  0x3e   :  { %324 = vmatpush.msrb.mxu0 %v119_v54  ;;  %353 = vmatpush.msrb.mxu1 %v135_v55 }
  0x3f   :  { %383 = vmatpush.msrb.mxu2 %v150_v56  ;;  %412 = vmatpush.msrb.mxu3 %v166_v57 }
  0x40   :  { %325 = vmatpush.msrb.mxu0 %v118_v58  ;;  %354 = vmatpush.msrb.mxu1 %v134_v59 }
  0x41   :  { %223 = vmatmul.f32.gmra.mxu0 %v41_v60  ;;  %252 = vmatmul.f32.gmra.mxu1 %v42_v61 }
  0x42   :  { %281 = vmatmul.f32.gmra.mxu2 %v43_v62  ;;  %310 = vmatmul.f32.gmra.mxu3 %v44_v63 }
  0x43   :  { %384 = vmatpush.msrb.mxu2 %v149_v0  ;;  %413 = vmatpush.msrb.mxu3 %v165_v1 }
  0x44   :  { %326 = vmatpush.msrb.mxu0 %v117_v2  ;;  %355 = vmatpush.msrb.mxu1 %v133_v3 }
  0x45   :  { %385 = vmatpush.msrb.mxu2 %v148_v4  ;;  %414 = vmatpush.msrb.mxu3 %v164_v5 }
  0x46   :  { %327 = vmatpush.msrb.mxu0 %v116_v6  ;;  %356 = vmatpush.msrb.mxu1 %v132_v7 }
  0x47   :  { %386 = vmatpush.msrb.mxu2 %v147_v8  ;;  %415 = vmatpush.msrb.mxu3 %v163_v9 }
  0x48   :  { %328 = vmatpush.msrb.mxu0 %v115_v10  ;;  %357 = vmatpush.msrb.mxu1 %v131_v11  ;;  %v519_v10 = vld [vmem:[%s1097_s2] ss:$0 sm:$0xff] }
  0x49   :  { %387 = vmatpush.msrb.mxu2 %v146_v12  ;;  %416 = vmatpush.msrb.mxu3 %v162_v13 }
  0x4a   :  { %329 = vmatpush.msrb.mxu0 %v114_v14  ;;  %358 = vmatpush.msrb.mxu1 %v130_v15 }
  0x4b   :  { %330 = vmatmul.f32.vlgmr.msrb.gmra.mxu0 %v18_v16  ;;  %359 = vmatmul.f32.vlgmr.msrb.gmra.mxu1 %v19_v17 }
  0x4c   :  { %388 = vmatmul.f32.vlgmr.msrb.gmra.mxu2 %v20_v18  ;;  %417 = vmatmul.f32.vlgmr.msrb.gmra.mxu3 %v21_v19 }
  0x4d   :  { %472 = vmatpush.msra.mxu2 %v193_v20  ;;  %473 = vmatpush.msra.mxu3 %v193_v20 }
  0x4e   :  { %430 = vmatpush.msra.mxu0 %v193_v20  ;;  %471 = vmatpush.msra.mxu1 %v193_v20 }
  0x4f   :  { %475 = vmatpush.msra.mxu2 %v192_v21  ;;  %476 = vmatpush.msra.mxu3 %v192_v21 }
  0x50   :  { %431 = vmatpush.msra.mxu0 %v192_v21  ;;  %474 = vmatpush.msra.mxu1 %v192_v21 }
  0x51   :  { %478 = vmatpush.msra.mxu2 %v191_v22  ;;  %479 = vmatpush.msra.mxu3 %v191_v22 }
  0x52   :  { %432 = vmatpush.msra.mxu0 %v191_v22  ;;  %477 = vmatpush.msra.mxu1 %v191_v22 }
  0x53   :  { %481 = vmatpush.msra.mxu2 %v190_v23  ;;  %482 = vmatpush.msra.mxu3 %v190_v23 }
  0x54   :  { %433 = vmatpush.msra.mxu0 %v190_v23  ;;  %480 = vmatpush.msra.mxu1 %v190_v23 }
  0x55   :  { %333 = vmatmul.f32.gmra.mxu0 %v27_v24  ;;  %362 = vmatmul.f32.gmra.mxu1 %v28_v25 }
  0x56   :  { %391 = vmatmul.f32.gmra.mxu2 %v29_v26  ;;  %420 = vmatmul.f32.gmra.mxu3 %v30_v27 }
  0x57   :  { %484 = vmatpush.msra.mxu2 %v189_v28  ;;  %485 = vmatpush.msra.mxu3 %v189_v28 }
  0x58   :  { %434 = vmatpush.msra.mxu0 %v189_v28  ;;  %483 = vmatpush.msra.mxu1 %v189_v28 }
  0x59   :  { %487 = vmatpush.msra.mxu2 %v188_v29  ;;  %488 = vmatpush.msra.mxu3 %v188_v29 }
  0x5a   :  { %435 = vmatpush.msra.mxu0 %v188_v29  ;;  %486 = vmatpush.msra.mxu1 %v188_v29 }
  0x5b   :  { %490 = vmatpush.msra.mxu2 %v187_v30  ;;  %491 = vmatpush.msra.mxu3 %v187_v30 }
  0x5c   :  { %436 = vmatpush.msra.mxu0 %v187_v30  ;;  %489 = vmatpush.msra.mxu1 %v187_v30 }
  0x5d   :  { %493 = vmatpush.msra.mxu2 %v186_v31  ;;  %494 = vmatpush.msra.mxu3 %v186_v31 }
  0x5e   :  { %437 = vmatpush.msra.mxu0 %v186_v31  ;;  %492 = vmatpush.msra.mxu1 %v186_v31 }
  0x5f   :  { %336 = vmatmul.f32.gmra.mxu0 %v36_v32  ;;  %365 = vmatmul.f32.gmra.mxu1 %v37_v33 }
  0x60   :  { %394 = vmatmul.f32.gmra.mxu2 %v38_v34  ;;  %423 = vmatmul.f32.gmra.mxu3 %v39_v35 }
  0x61   :  { %496 = vmatpush.msra.mxu2 %v185_v36  ;;  %497 = vmatpush.msra.mxu3 %v185_v36 }
  0x62   :  { %438 = vmatpush.msra.mxu0 %v185_v36  ;;  %495 = vmatpush.msra.mxu1 %v185_v36 }
  0x63   :  { %499 = vmatpush.msra.mxu2 %v184_v37  ;;  %500 = vmatpush.msra.mxu3 %v184_v37 }
  0x64   :  { %439 = vmatpush.msra.mxu0 %v184_v37  ;;  %498 = vmatpush.msra.mxu1 %v184_v37 }
  0x65   :  { %502 = vmatpush.msra.mxu2 %v183_v38  ;;  %503 = vmatpush.msra.mxu3 %v183_v38 }
  0x66   :  { %440 = vmatpush.msra.mxu0 %v183_v38  ;;  %501 = vmatpush.msra.mxu1 %v183_v38 }
  0x67   :  { %505 = vmatpush.msra.mxu2 %v182_v39  ;;  %506 = vmatpush.msra.mxu3 %v182_v39 }
  0x68   :  { %441 = vmatpush.msra.mxu0 %v182_v39  ;;  %504 = vmatpush.msra.mxu1 %v182_v39 }
  0x69   :  { %339 = vmatmul.f32.gmra.mxu0 %v45_v40  ;;  %368 = vmatmul.f32.gmra.mxu1 %v46_v41 }
  0x6a   :  { %397 = vmatmul.f32.gmra.mxu2 %v47_v42  ;;  %426 = vmatmul.f32.gmra.mxu3 %v48_v43 }
  0x6b   :  { %508 = vmatpush.msra.mxu2 %v181_v44  ;;  %509 = vmatpush.msra.mxu3 %v181_v44 }
  0x6c   :  { %442 = vmatpush.msra.mxu0 %v181_v44  ;;  %507 = vmatpush.msra.mxu1 %v181_v44 }
  0x6d   :  { %511 = vmatpush.msra.mxu2 %v180_v45  ;;  %512 = vmatpush.msra.mxu3 %v180_v45 }
  0x6e   :  { %443 = vmatpush.msra.mxu0 %v180_v45  ;;  %510 = vmatpush.msra.mxu1 %v180_v45 }
  0x6f   :  { %514 = vmatpush.msra.mxu2 %v179_v46  ;;  %515 = vmatpush.msra.mxu3 %v179_v46 }
  0x70   :  { %444 = vmatpush.msra.mxu0 %v179_v46  ;;  %513 = vmatpush.msra.mxu1 %v179_v46 }
  0x71   :  { %517 = vmatpush.msra.mxu2 %v178_v47  ;;  %518 = vmatpush.msra.mxu3 %v178_v47 }
  0x72   :  { %445 = vmatpush.msra.mxu0 %v178_v47  ;;  %516 = vmatpush.msra.mxu1 %v178_v47 }
  0x73   :  { %446 = vmatmul.f32.vlgmr.msra.gmra.mxu0 %v22_v48  ;;  %449 = vmatmul.f32.vlgmr.msra.gmra.mxu1 %v31_v49 }
  0x74   :  { %452 = vmatmul.f32.vlgmr.msra.gmra.mxu2 %v40_v50  ;;  %455 = vmatmul.f32.vlgmr.msra.gmra.mxu3 %v49_v51 }
  0x9f   :  { %v215_v52 = vpop.f32.mrf.mxu0 }
  0xa0   :  { %v244_v53 = vpop.f32.mrf.mxu1  ;;  %v216_v11 = vadd.f32 %v519_v10, %v215_v52 }
  0xa2   :  { %v245_v15 = vadd.f32 %v244_v53, %v216_v11 }
  0xa7   :  { %v273_v54 = vpop.f32.mrf.mxu2  ;;  %v302_v55 = vpop.f32.mrf.mxu3 }
  0xa8   :  { %v274_v21 = vadd.f32 %v273_v54, %v245_v15 }
  0xaa   :  { %v218_v56 = vpop.f32.mrf.mxu0  ;;  %v247_v57 = vpop.f32.mrf.mxu1  ;;  %v303_v25 = vadd.f32 %v302_v55, %v274_v21 }
  0xab   :  { %v219_v12 = vadd.f32 %v519_v10, %v218_v56 }
  0xad   :  { %v248_v16 = vadd.f32 %v247_v57, %v219_v12 }
  0xb1   :  { %v276_v58 = vpop.f32.mrf.mxu2  ;;  %v305_v59 = vpop.f32.mrf.mxu3 }
  0xb2   :  { %v277_v22 = vadd.f32 %v276_v58, %v248_v16 }
  0xb4   :  { %v221_v60 = vpop.f32.mrf.mxu0  ;;  %v250_v61 = vpop.f32.mrf.mxu1  ;;  %v306_v26 = vadd.f32 %v305_v59, %v277_v22 }
  0xb5   :  { %v222_v19 = vadd.f32 %v519_v10, %v221_v60 }
  0xb7   :  { %v251_v23 = vadd.f32 %v250_v61, %v222_v19 }
  0xbb   :  { %v279_v62 = vpop.f32.mrf.mxu2  ;;  %v308_v63 = vpop.f32.mrf.mxu3 }
  0xbc   :  { %v280_v31 = vadd.f32 %v279_v62, %v251_v23 }
  0xbe   :  { %v224_v0 = vpop.f32.mrf.mxu0  ;;  %v253_v1 = vpop.f32.mrf.mxu1  ;;  %v309_v37 = vadd.f32 %v308_v63, %v280_v31 }
  0xbf   :  { %v225_v20 = vadd.f32 %v519_v10, %v224_v0 }
  0xc1   :  { %v254_v24 = vadd.f32 %v253_v1, %v225_v20 }
  0xc5   :  { %v282_v2 = vpop.f32.mrf.mxu2  ;;  %v311_v3 = vpop.f32.mrf.mxu3 }
  0xc6   :  { %v283_v32 = vadd.f32 %v282_v2, %v254_v24 }
  0xc8   :  { %v331_v4 = vpop.f32.mrf.mxu0  ;;  %v360_v5 = vpop.f32.mrf.mxu1  ;;  %v312_v38 = vadd.f32 %v311_v3, %v283_v32 }
  0xc9   :  { %v332_v29 = vadd.f32 %v331_v4, %v303_v25 }
  0xcb   :  { %v361_v35 = vadd.f32 %v360_v5, %v332_v29 }
  0xcf   :  { %v389_v6 = vpop.f32.mrf.mxu2  ;;  %v418_v7 = vpop.f32.mrf.mxu3 }
  0xd0   :  { %v390_v39 = vadd.f32 %v389_v6, %v361_v35 }
  0xd2   :  { %v334_v8 = vpop.f32.mrf.mxu0  ;;  %v363_v9 = vpop.f32.mrf.mxu1  ;;  %v419_v45 = vadd.f32 %v418_v7, %v390_v39 }
  0xd3   :  { %v335_v30 = vadd.f32 %v334_v8, %v306_v26 }
  0xd5   :  { %v364_v36 = vadd.f32 %v363_v9, %v335_v30 }
  0xd9   :  { %v392_v13 = vpop.f32.mrf.mxu2  ;;  %v421_v14 = vpop.f32.mrf.mxu3 }
  0xda   :  { %v393_v40 = vadd.f32 %v392_v13, %v364_v36 }
  0xdc   :  { %v337_v17 = vpop.f32.mrf.mxu0  ;;  %v366_v18 = vpop.f32.mrf.mxu1  ;;  %v422_v46 = vadd.f32 %v421_v14, %v393_v40 }
  0xdd   :  { %v338_v41 = vadd.f32 %v337_v17, %v309_v37 }
  0xdf   :  { %v367_v47 = vadd.f32 %v366_v18, %v338_v41 }
  0xe3   :  { %v395_v27 = vpop.f32.mrf.mxu2  ;;  %v424_v28 = vpop.f32.mrf.mxu3 }
  0xe4   :  { %v396_v53 = vadd.f32 %v395_v27, %v367_v47 }
  0xe6   :  { %v340_v33 = vpop.f32.mrf.mxu0  ;;  %v369_v34 = vpop.f32.mrf.mxu1  ;;  %v425_v57 = vadd.f32 %v424_v28, %v396_v53 }
  0xe7   :  { %v341_v42 = vadd.f32 %v340_v33, %v312_v38 }
  0xe9   :  { %v370_v48 = vadd.f32 %v369_v34, %v341_v42 }
  0xed   :  { %v398_v43 = vpop.f32.mrf.mxu2  ;;  %v427_v44 = vpop.f32.mrf.mxu3 }
  0xee   :  { %v399_v54 = vadd.f32 %v398_v43, %v370_v48 }
  0xf0   :  { %v447_v49 = vpop.f32.mrf.mxu0  ;;  %v450_v50 = vpop.f32.mrf.mxu1  ;;  %v428_v58 = vadd.f32 %v427_v44, %v399_v54 }
  0xf1   :  { %v448_v51 = vadd.f32 %v447_v49, %v419_v45  ;;  %v451_v52 = vadd.f32 %v450_v50, %v422_v46 }
  0xf3   :  { %v459_v55 = vmax.f32 %v448_v51, 0.0  ;;  %v460_v56 = vmax.f32 %v451_v52, 0.0 }
  0xf5   :  { %463 = vst [vmem:[%s1098_s3] sm:$0xff] %v459_v55 }
  0xf6   :  { %464 = vst [vmem:[%s1098_s3 + $0x8] sm:$0xff] %v460_v56 }
  0xf7   :  { %v453_v59 = vpop.f32.mrf.mxu2  ;;  %v456_v60 = vpop.f32.mrf.mxu3 }
  0xf8   :  { %v454_v61 = vadd.f32 %v453_v59, %v425_v57  ;;  %v457_v62 = vadd.f32 %v456_v60, %v428_v58 }
  0xfa   :  { %v461_v63 = vmax.f32 %v454_v61, 0.0  ;;  %v462_v0 = vmax.f32 %v457_v62, 0.0 }
  0xfc   :  { %465 = vst [vmem:[%s1098_s3 + $0x10] sm:$0xff] %v461_v63 }
  0xfd   :  { %466 = vst [vmem:[%s1098_s3 + $0x18] sm:$0xff] %v462_v0 }

// kernel: _unetback_features.14
= control target key start
LH: loop header
LB: loop body
LE: loop exit
PB: predicated region body
PF: predicated region fallthrough
CT: control target
= control target key end

     0   :  { %s843_s1 = inlined_call_operand.vmem [shape: f32[1152,128], index: 1, kind: input, shape index: {}]   ;;  %s844_s2 = inlined_call_operand.vmem [shape: f32[1,128], index: 2, kind: input, shape index: {}]   ;;  %s845_s0 = inlined_call_operand.vmem [shape: f32[8,1152], index: 0, kind: input, shape index: {}]   ;;  %s846_s3 = inlined_call_operand.vmem [shape: f32[8,128], index: 3, kind: output, shape index: {}]  }
   0x1   :  { %v38_v0 = vld [vmem:[%s843_s1 + $0x78] sm:$0xff]  ;;  %v37_v1 = vld [vmem:[%s843_s1 + $0x70] sm:$0xff]  ;;  %v36_v3 = vld [vmem:[%s843_s1 + $0x68] sm:$0xff] }
   0x2   :  { %171 = vmatpush.msra.mxu0 %v38_v0  ;;  %v70_v2 = vld [vmem:[%s843_s1 + $0x178] sm:$0xff]  ;;  %v69_v4 = vld [vmem:[%s843_s1 + $0x170] sm:$0xff]  ;;  %v68_v7 = vld [vmem:[%s843_s1 + $0x168] sm:$0xff] }
   0x3   :  { %211 = vmatpush.msra.mxu2 %v70_v2  ;;  %v86_v5 = vld [vmem:[%s843_s1 + $0x1f8] sm:$0xff]  ;;  %v85_v8 = vld [vmem:[%s843_s1 + $0x1f0] sm:$0xff]  ;;  %v35_v9 = vld [vmem:[%s843_s1 + $0x60] sm:$0xff] }
   0x4   :  { %172 = vmatpush.msra.mxu0 %v37_v1  ;;  %231 = vmatpush.msra.mxu3 %v86_v5  ;;  %v54_v6 = vld [vmem:[%s843_s1 + $0xf8] sm:$0xff]  ;;  %v53_v10 = vld [vmem:[%s843_s1 + $0xf0] sm:$0xff]  ;;  %v67_v11 = vld [vmem:[%s843_s1 + $0x160] sm:$0xff] }
   0x5   :  { %212 = vmatpush.msra.mxu2 %v69_v4  ;;  %191 = vmatpush.msra.mxu1 %v54_v6  ;;  %v84_v12 = vld [vmem:[%s843_s1 + $0x1e8] sm:$0xff]  ;;  %v34_v14 = vld [vmem:[%s843_s1 + $0x58] sm:$0xff]  ;;  %v83_v15 = vld [vmem:[%s843_s1 + $0x1e0] sm:$0xff] }
   0x6   :  { %173 = vmatpush.msra.mxu0 %v36_v3  ;;  %232 = vmatpush.msra.mxu3 %v85_v8  ;;  %v52_v13 = vld [vmem:[%s843_s1 + $0xe8] sm:$0xff]  ;;  %v66_v16 = vld [vmem:[%s843_s1 + $0x158] sm:$0xff]  ;;  %v51_v17 = vld [vmem:[%s843_s1 + $0xe0] sm:$0xff] }
   0x7   :  { %213 = vmatpush.msra.mxu2 %v68_v7  ;;  %192 = vmatpush.msra.mxu1 %v53_v10  ;;  %v33_v18 = vld [vmem:[%s843_s1 + $0x50] sm:$0xff]  ;;  %v82_v19 = vld [vmem:[%s843_s1 + $0x1d8] sm:$0xff]  ;;  %v32_v22 = vld [vmem:[%s843_s1 + $0x48] sm:$0xff] }
   0x8   :  { %174 = vmatpush.msra.mxu0 %v35_v9  ;;  %233 = vmatpush.msra.mxu3 %v84_v12  ;;  %v65_v20 = vld [vmem:[%s843_s1 + $0x150] sm:$0xff]  ;;  %v50_v21 = vld [vmem:[%s843_s1 + $0xd8] sm:$0xff]  ;;  %v64_v24 = vld [vmem:[%s843_s1 + $0x148] sm:$0xff] }
   0x9   :  { %214 = vmatpush.msra.mxu2 %v67_v11  ;;  %193 = vmatpush.msra.mxu1 %v52_v13  ;;  %v81_v23 = vld [vmem:[%s843_s1 + $0x1d0] sm:$0xff]  ;;  %v31_v26 = vld [vmem:[%s843_s1 + $0x40] sm:$0xff]  ;;  %v80_v27 = vld [vmem:[%s843_s1 + $0x1c8] sm:$0xff] }
   0xa   :  { %175 = vmatpush.msra.mxu0 %v34_v14  ;;  %234 = vmatpush.msra.mxu3 %v83_v15  ;;  %v49_v25 = vld [vmem:[%s843_s1 + $0xd0] sm:$0xff]  ;;  %v63_v28 = vld [vmem:[%s843_s1 + $0x140] sm:$0xff]  ;;  %v48_v29 = vld [vmem:[%s843_s1 + $0xc8] sm:$0xff] }
   0xb   :  { %215 = vmatpush.msra.mxu2 %v66_v16  ;;  %194 = vmatpush.msra.mxu1 %v51_v17  ;;  %v30_v30 = vld [vmem:[%s843_s1 + $0x38] sm:$0xff]  ;;  %v79_v31 = vld [vmem:[%s843_s1 + $0x1c0] sm:$0xff]  ;;  %v29_v34 = vld [vmem:[%s843_s1 + $0x30] sm:$0xff] }
   0xc   :  { %176 = vmatpush.msra.mxu0 %v33_v18  ;;  %235 = vmatpush.msra.mxu3 %v82_v19  ;;  %v62_v32 = vld [vmem:[%s843_s1 + $0x138] sm:$0xff]  ;;  %v47_v33 = vld [vmem:[%s843_s1 + $0xc0] sm:$0xff]  ;;  %v61_v36 = vld [vmem:[%s843_s1 + $0x130] sm:$0xff] }
   0xd   :  { %216 = vmatpush.msra.mxu2 %v65_v20  ;;  %195 = vmatpush.msra.mxu1 %v50_v21  ;;  %v78_v35 = vld [vmem:[%s843_s1 + $0x1b8] sm:$0xff]  ;;  %v28_v38 = vld [vmem:[%s843_s1 + $0x28] sm:$0xff]  ;;  %v77_v39 = vld [vmem:[%s843_s1 + $0x1b0] sm:$0xff] }
   0xe   :  { %177 = vmatpush.msra.mxu0 %v32_v22  ;;  %236 = vmatpush.msra.mxu3 %v81_v23  ;;  %v46_v37 = vld [vmem:[%s843_s1 + $0xb8] sm:$0xff]  ;;  %v60_v40 = vld [vmem:[%s843_s1 + $0x128] sm:$0xff]  ;;  %v45_v41 = vld [vmem:[%s843_s1 + $0xb0] sm:$0xff] }
   0xf   :  { %217 = vmatpush.msra.mxu2 %v64_v24  ;;  %196 = vmatpush.msra.mxu1 %v49_v25  ;;  %v27_v42 = vld [vmem:[%s843_s1 + $0x20] sm:$0xff]  ;;  %v76_v43 = vld [vmem:[%s843_s1 + $0x1a8] sm:$0xff]  ;;  %v26_v46 = vld [vmem:[%s843_s1 + $0x18] sm:$0xff] }
  0x10   :  { %178 = vmatpush.msra.mxu0 %v31_v26  ;;  %237 = vmatpush.msra.mxu3 %v80_v27  ;;  %v59_v44 = vld [vmem:[%s843_s1 + $0x120] sm:$0xff]  ;;  %v44_v45 = vld [vmem:[%s843_s1 + $0xa8] sm:$0xff]  ;;  %v58_v48 = vld [vmem:[%s843_s1 + $0x118] sm:$0xff] }
  0x11   :  { %218 = vmatpush.msra.mxu2 %v63_v28  ;;  %197 = vmatpush.msra.mxu1 %v48_v29  ;;  %v75_v47 = vld [vmem:[%s843_s1 + $0x1a0] sm:$0xff]  ;;  %v25_v50 = vld [vmem:[%s843_s1 + $0x10] sm:$0xff]  ;;  %v74_v51 = vld [vmem:[%s843_s1 + $0x198] sm:$0xff] }
  0x12   :  { %179 = vmatpush.msra.mxu0 %v30_v30  ;;  %238 = vmatpush.msra.mxu3 %v79_v31  ;;  %v43_v49 = vld [vmem:[%s843_s1 + $0xa0] sm:$0xff]  ;;  %v57_v52 = vld [vmem:[%s843_s1 + $0x110] sm:$0xff]  ;;  %v42_v53 = vld [vmem:[%s843_s1 + $0x98] sm:$0xff] }
  0x13   :  { %219 = vmatpush.msra.mxu2 %v62_v32  ;;  %198 = vmatpush.msra.mxu1 %v47_v33  ;;  %v24_v54 = vld [vmem:[%s843_s1 + $0x8] sm:$0xff]  ;;  %v73_v55 = vld [vmem:[%s843_s1 + $0x190] sm:$0xff]  ;;  %v23_v58 = vld [vmem:[%s843_s1] sm:$0xff] }
  0x14   :  { %180 = vmatpush.msra.mxu0 %v29_v34  ;;  %239 = vmatpush.msra.mxu3 %v78_v35  ;;  %v56_v56 = vld [vmem:[%s843_s1 + $0x108] sm:$0xff]  ;;  %v41_v57 = vld [vmem:[%s843_s1 + $0x90] sm:$0xff]  ;;  %v102_v60 = vld [vmem:[%s843_s1 + $0x278] sm:$0xff] }
  0x15   :  { %220 = vmatpush.msra.mxu2 %v61_v36  ;;  %199 = vmatpush.msra.mxu1 %v46_v37  ;;  %v72_v59 = vld [vmem:[%s843_s1 + $0x188] sm:$0xff]  ;;  %v55_v61 = vld [vmem:[%s843_s1 + $0x100] sm:$0xff]  ;;  %v134_v62 = vld [vmem:[%s843_s1 + $0x378] sm:$0xff] }
  0x16   :  { %181 = vmatpush.msra.mxu0 %v28_v38  ;;  %240 = vmatpush.msra.mxu3 %v77_v39  ;;  %v40_v63 = vld [vmem:[%s843_s1 + $0x88] sm:$0xff]  ;;  %v101_v0 = vld [vmem:[%s843_s1 + $0x270] sm:$0xff]  ;;  %v71_v1 = vld [vmem:[%s843_s1 + $0x180] sm:$0xff] }
  0x17   :  { %221 = vmatpush.msra.mxu2 %v60_v40  ;;  %200 = vmatpush.msra.mxu1 %v45_v41  ;;  %v133_v2 = vld [vmem:[%s843_s1 + $0x370] sm:$0xff]  ;;  %v150_v3 = vld [vmem:[%s843_s1 + $0x3f8] sm:$0xff]  ;;  %v100_v4 = vld [vmem:[%s843_s1 + $0x268] sm:$0xff] }
  0x18   :  { %182 = vmatpush.msra.mxu0 %v27_v42  ;;  %241 = vmatpush.msra.mxu3 %v76_v43  ;;  %v39_v5 = vld [vmem:[%s843_s1 + $0x80] sm:$0xff]  ;;  %v118_v6 = vld [vmem:[%s843_s1 + $0x2f8] sm:$0xff]  ;;  %v132_v7 = vld [vmem:[%s843_s1 + $0x368] sm:$0xff] }
  0x19   :  { %222 = vmatpush.msra.mxu2 %v59_v44  ;;  %201 = vmatpush.msra.mxu1 %v44_v45  ;;  %v99_v8 = vld [vmem:[%s843_s1 + $0x260] sm:$0xff]  ;;  %v149_v9 = vld [vmem:[%s843_s1 + $0x3f0] sm:$0xff]  ;;  %v98_v12 = vld [vmem:[%s843_s1 + $0x258] sm:$0xff] }
  0x1a   :  { %183 = vmatpush.msra.mxu0 %v26_v46  ;;  %242 = vmatpush.msra.mxu3 %v75_v47  ;;  %v117_v10 = vld [vmem:[%s843_s1 + $0x2f0] sm:$0xff]  ;;  %v131_v11 = vld [vmem:[%s843_s1 + $0x360] sm:$0xff]  ;;  %v148_v13 = vld [vmem:[%s843_s1 + $0x3e8] sm:$0xff] }
  0x1b   :  { %223 = vmatpush.msra.mxu2 %v58_v48  ;;  %202 = vmatpush.msra.mxu1 %v43_v49  ;;  %v116_v14 = vld [vmem:[%s843_s1 + $0x2e8] sm:$0xff]  ;;  %v130_v15 = vld [vmem:[%s843_s1 + $0x358] sm:$0xff]  ;;  %v97_v16 = vld [vmem:[%s843_s1 + $0x250] sm:$0xff] }
  0x1c   :  { %184 = vmatpush.msra.mxu0 %v25_v50  ;;  %243 = vmatpush.msra.mxu3 %v74_v51  ;;  %v147_v17 = vld [vmem:[%s843_s1 + $0x3e0] sm:$0xff]  ;;  %v129_v19 = vld [vmem:[%s843_s1 + $0x350] sm:$0xff]  ;;  %v96_v20 = vld [vmem:[%s843_s1 + $0x248] sm:$0xff] }
  0x1d   :  { %224 = vmatpush.msra.mxu2 %v57_v52  ;;  %203 = vmatpush.msra.mxu1 %v42_v53  ;;  %v115_v18 = vld [vmem:[%s843_s1 + $0x2e0] sm:$0xff]  ;;  %v146_v21 = vld [vmem:[%s843_s1 + $0x3d8] sm:$0xff]  ;;  %v128_v23 = vld [vmem:[%s843_s1 + $0x348] sm:$0xff] }
  0x1e   :  { %185 = vmatpush.msra.mxu0 %v24_v54  ;;  %244 = vmatpush.msra.mxu3 %v73_v55  ;;  %v114_v22 = vld [vmem:[%s843_s1 + $0x2d8] sm:$0xff]  ;;  %v95_v24 = vld [vmem:[%s843_s1 + $0x240] sm:$0xff]  ;;  %v145_v25 = vld [vmem:[%s843_s1 + $0x3d0] sm:$0xff] }
  0x1f   :  { %225 = vmatpush.msra.mxu2 %v56_v56  ;;  %204 = vmatpush.msra.mxu1 %v41_v57  ;;  %v113_v26 = vld [vmem:[%s843_s1 + $0x2d0] sm:$0xff]  ;;  %v127_v27 = vld [vmem:[%s843_s1 + $0x340] sm:$0xff]  ;;  %v94_v28 = vld [vmem:[%s843_s1 + $0x238] sm:$0xff] }
  0x20   :  { %186 = vmatpush.msra.mxu0 %v23_v58  ;;  %245 = vmatpush.msra.mxu3 %v72_v59  ;;  %v144_v29 = vld [vmem:[%s843_s1 + $0x3c8] sm:$0xff]  ;;  %v126_v31 = vld [vmem:[%s843_s1 + $0x338] sm:$0xff]  ;;  %v93_v32 = vld [vmem:[%s843_s1 + $0x230] sm:$0xff] }
  0x21   :  { %226 = vmatpush.msra.mxu2 %v55_v61  ;;  %205 = vmatpush.msra.mxu1 %v40_v63  ;;  %v112_v30 = vld [vmem:[%s843_s1 + $0x2c8] sm:$0xff]  ;;  %v143_v33 = vld [vmem:[%s843_s1 + $0x3c0] sm:$0xff]  ;;  %v125_v35 = vld [vmem:[%s843_s1 + $0x330] sm:$0xff] }
  0x22   :  { %251 = vmatpush.msrb.mxu0 %v102_v60  ;;  %246 = vmatpush.msra.mxu3 %v71_v1  ;;  %v111_v34 = vld [vmem:[%s843_s1 + $0x2c0] sm:$0xff]  ;;  %v92_v36 = vld [vmem:[%s843_s1 + $0x228] sm:$0xff]  ;;  %v142_v37 = vld [vmem:[%s843_s1 + $0x3b8] sm:$0xff] }
  0x23   :  { %291 = vmatpush.msrb.mxu2 %v134_v62  ;;  %206 = vmatpush.msra.mxu1 %v39_v5  ;;  %v110_v38 = vld [vmem:[%s843_s1 + $0x2b8] sm:$0xff]  ;;  %v124_v39 = vld [vmem:[%s843_s1 + $0x328] sm:$0xff]  ;;  %v91_v40 = vld [vmem:[%s843_s1 + $0x220] sm:$0xff] }
  0x24   :  { %252 = vmatpush.msrb.mxu0 %v101_v0  ;;  %311 = vmatpush.msrb.mxu3 %v150_v3  ;;  %v141_v41 = vld [vmem:[%s843_s1 + $0x3b0] sm:$0xff]  ;;  %v123_v43 = vld [vmem:[%s843_s1 + $0x320] sm:$0xff]  ;;  %v90_v44 = vld [vmem:[%s843_s1 + $0x218] sm:$0xff] }
  0x25   :  { %292 = vmatpush.msrb.mxu2 %v133_v2  ;;  %271 = vmatpush.msrb.mxu1 %v118_v6  ;;  %v109_v42 = vld [vmem:[%s843_s1 + $0x2b0] sm:$0xff]  ;;  %v140_v45 = vld [vmem:[%s843_s1 + $0x3a8] sm:$0xff]  ;;  %v122_v49 = vld [vmem:[%s843_s1 + $0x318] sm:$0xff] }
  0x26   :  { %253 = vmatpush.msrb.mxu0 %v100_v4  ;;  %312 = vmatpush.msrb.mxu3 %v149_v9  ;;  %v16_v46 = vld [vmem:[%s845_s0 + $0x10] sm:$0xff]  ;;  %v108_v47 = vld [vmem:[%s843_s1 + $0x2a8] sm:$0xff]  ;;  %v139_v50 = vld [vmem:[%s843_s1 + $0x3a0] sm:$0xff] }
  0x27   :  { %293 = vmatpush.msrb.mxu2 %v132_v7  ;;  %272 = vmatpush.msrb.mxu1 %v117_v10  ;;  %v89_v48 = vld [vmem:[%s843_s1 + $0x210] sm:$0xff]  ;;  %v14_v51 = vld [vmem:[%s845_s0] sm:$0xff]  ;;  %v88_v52 = vld [vmem:[%s843_s1 + $0x208] sm:$0xff] }
  0x28   :  { %254 = vmatpush.msrb.mxu0 %v99_v8  ;;  %313 = vmatpush.msrb.mxu3 %v148_v13  ;;  %v17_v53 = vld [vmem:[%s845_s0 + $0x18] sm:$0xff]  ;;  %v107_v54 = vld [vmem:[%s843_s1 + $0x2a0] sm:$0xff]  ;;  %v121_v55 = vld [vmem:[%s843_s1 + $0x310] sm:$0xff] }
  0x29   :  { %294 = vmatpush.msrb.mxu2 %v131_v11  ;;  %273 = vmatpush.msrb.mxu1 %v116_v14  ;;  %v87_v56 = vld [vmem:[%s843_s1 + $0x200] sm:$0xff]  ;;  %v138_v57 = vld [vmem:[%s843_s1 + $0x398] sm:$0xff]  ;;  %v15_v59 = vld [vmem:[%s845_s0 + $0x8] sm:$0xff] }
  0x2a   :  { %255 = vmatpush.msrb.mxu0 %v98_v12  ;;  %314 = vmatpush.msrb.mxu3 %v147_v17  ;;  %v166_v58 = vld [vmem:[%s843_s1 + $0x478] sm:$0xff]  ;;  %v120_v61 = vld [vmem:[%s843_s1 + $0x308] sm:$0xff]  ;;  %v165_v62 = vld [vmem:[%s843_s1 + $0x470] sm:$0xff] }
  0x2b   :  { %295 = vmatpush.msrb.mxu2 %v130_v15  ;;  %274 = vmatpush.msrb.mxu1 %v115_v18  ;;  %v106_v60 = vld [vmem:[%s843_s1 + $0x298] sm:$0xff]  ;;  %v137_v63 = vld [vmem:[%s843_s1 + $0x390] sm:$0xff]  ;;  %v119_v1 = vld [vmem:[%s843_s1 + $0x300] sm:$0xff] }
  0x2c   :  { %256 = vmatpush.msrb.mxu0 %v97_v16  ;;  %315 = vmatpush.msrb.mxu3 %v146_v21  ;;  %v105_v0 = vld [vmem:[%s843_s1 + $0x290] sm:$0xff]  ;;  %v164_v2 = vld [vmem:[%s843_s1 + $0x468] sm:$0xff]  ;;  %v163_v6 = vld [vmem:[%s843_s1 + $0x460] sm:$0xff] }
  0x2d   :  { %296 = vmatpush.msrb.mxu2 %v129_v19  ;;  %275 = vmatpush.msrb.mxu1 %v114_v22  ;;  %v136_v3 = vld [vmem:[%s843_s1 + $0x388] sm:$0xff]  ;;  %v20_v4 = vld [vmem:[%s845_s0 + $0x30] sm:$0xff]  ;;  %v135_v7 = vld [vmem:[%s843_s1 + $0x380] sm:$0xff] }
  0x2e   :  { %257 = vmatpush.msrb.mxu0 %v96_v20  ;;  %316 = vmatpush.msrb.mxu3 %v145_v25  ;;  %v104_v5 = vld [vmem:[%s843_s1 + $0x288] sm:$0xff]  ;;  %v18_v8 = vld [vmem:[%s845_s0 + $0x20] sm:$0xff]  ;;  %v21_v9 = vld [vmem:[%s845_s0 + $0x38] sm:$0xff] }
  0x2f   :  { %297 = vmatpush.msrb.mxu2 %v128_v23  ;;  %276 = vmatpush.msrb.mxu1 %v113_v26  ;;  %v162_v10 = vld [vmem:[%s843_s1 + $0x458] sm:$0xff]  ;;  %v103_v11 = vld [vmem:[%s843_s1 + $0x280] sm:$0xff]  ;;  %v19_v12 = vld [vmem:[%s845_s0 + $0x28] sm:$0xff] }
  0x30   :  { %258 = vmatpush.msrb.mxu0 %v95_v24  ;;  %317 = vmatpush.msrb.mxu3 %v144_v29  ;;  %v161_v13 = vld [vmem:[%s843_s1 + $0x450] sm:$0xff]  ;;  %v160_v14 = vld [vmem:[%s843_s1 + $0x448] sm:$0xff]  ;;  %v159_v15 = vld [vmem:[%s843_s1 + $0x440] sm:$0xff] }
  0x31   :  { %298 = vmatpush.msrb.mxu2 %v127_v27  ;;  %277 = vmatpush.msrb.mxu1 %v112_v30  ;;  %v158_v16 = vld [vmem:[%s843_s1 + $0x438] sm:$0xff]  ;;  %v157_v17 = vld [vmem:[%s843_s1 + $0x430] sm:$0xff]  ;;  %v156_v18 = vld [vmem:[%s843_s1 + $0x428] sm:$0xff] }
  0x32   :  { %259 = vmatpush.msrb.mxu0 %v94_v28  ;;  %318 = vmatpush.msrb.mxu3 %v143_v33  ;;  %v155_v19 = vld [vmem:[%s843_s1 + $0x420] sm:$0xff]  ;;  %v154_v20 = vld [vmem:[%s843_s1 + $0x418] sm:$0xff]  ;;  %v153_v21 = vld [vmem:[%s843_s1 + $0x410] sm:$0xff] }
  0x33   :  { %299 = vmatpush.msrb.mxu2 %v126_v31  ;;  %278 = vmatpush.msrb.mxu1 %v111_v34  ;;  %v152_v22 = vld [vmem:[%s843_s1 + $0x408] sm:$0xff]  ;;  %v151_v23 = vld [vmem:[%s843_s1 + $0x400] sm:$0xff] }
  0x34   :  { %260 = vmatpush.msrb.mxu0 %v93_v32  ;;  %319 = vmatpush.msrb.mxu3 %v142_v37  ;;  %v22_v24 = vld [vmem:[%s845_s0 + $0x40] sm:$0xff] }
  0x35   :  { %300 = vmatpush.msrb.mxu2 %v125_v35  ;;  %279 = vmatpush.msrb.mxu1 %v110_v38  ;;  %v357_v25 = vld [vmem:[%s844_s2] ss:$0 sm:$0xff] }
  0x36   :  { %261 = vmatpush.msrb.mxu0 %v92_v36  ;;  %320 = vmatpush.msrb.mxu3 %v141_v41 }
  0x37   :  { %301 = vmatpush.msrb.mxu2 %v124_v39  ;;  %280 = vmatpush.msrb.mxu1 %v109_v42 }
  0x38   :  { %262 = vmatpush.msrb.mxu0 %v91_v40  ;;  %321 = vmatpush.msrb.mxu3 %v140_v45 }
  0x39   :  { %302 = vmatpush.msrb.mxu2 %v123_v43  ;;  %281 = vmatpush.msrb.mxu1 %v108_v47 }
  0x3a   :  { %263 = vmatpush.msrb.mxu0 %v90_v44  ;;  %227 = vmatmul.f32.vlgmr.msra.gmra.mxu2 %v16_v46 }
  0x3b   :  { %303 = vmatpush.msrb.mxu2 %v122_v49  ;;  %322 = vmatpush.msrb.mxu3 %v139_v50 }
  0x3c   :  { %264 = vmatpush.msrb.mxu0 %v89_v48  ;;  %247 = vmatmul.f32.vlgmr.msra.gmra.mxu3 %v17_v53 }
  0x3d   :  { %187 = vmatmul.f32.vlgmr.msra.gmra.mxu0 %v14_v51  ;;  %282 = vmatpush.msrb.mxu1 %v107_v54 }
  0x3e   :  { %265 = vmatpush.msrb.mxu0 %v88_v52  ;;  %304 = vmatpush.msrb.mxu2 %v121_v55 }
  0x3f   :  { %323 = vmatpush.msrb.mxu3 %v138_v57  ;;  %207 = vmatmul.f32.vlgmr.msra.gmra.mxu1 %v15_v59 }
  0x40   :  { %266 = vmatpush.msrb.mxu0 %v87_v56  ;;  %283 = vmatpush.msrb.mxu1 %v106_v60 }
  0x41   :  { %305 = vmatpush.msrb.mxu2 %v120_v61  ;;  %324 = vmatpush.msrb.mxu3 %v137_v63 }
  0x42   :  { %331 = vmatpush.msra.mxu0 %v166_v58  ;;  %284 = vmatpush.msrb.mxu1 %v105_v0 }
  0x43   :  { %306 = vmatpush.msrb.mxu2 %v119_v1  ;;  %325 = vmatpush.msrb.mxu3 %v136_v3 }
  0x44   :  { %332 = vmatpush.msra.mxu0 %v165_v62  ;;  %307 = vmatmul.f32.vlgmr.msrb.gmra.mxu2 %v20_v4 }
  0x45   :  { %285 = vmatpush.msrb.mxu1 %v104_v5  ;;  %326 = vmatpush.msrb.mxu3 %v135_v7 }
  0x46   :  { %333 = vmatpush.msra.mxu0 %v164_v2  ;;  %327 = vmatmul.f32.vlgmr.msrb.gmra.mxu3 %v21_v9 }
  0x47   :  { %267 = vmatmul.f32.vlgmr.msrb.gmra.mxu0 %v18_v8  ;;  %286 = vmatpush.msrb.mxu1 %v103_v11 }
  0x48   :  { %334 = vmatpush.msra.mxu0 %v163_v6  ;;  %287 = vmatmul.f32.vlgmr.msrb.gmra.mxu1 %v19_v12 }
  0x4a   :  { %335 = vmatpush.msra.mxu0 %v162_v10 }
  0x4c   :  { %336 = vmatpush.msra.mxu0 %v161_v13 }
  0x4e   :  { %337 = vmatpush.msra.mxu0 %v160_v14 }
  0x50   :  { %338 = vmatpush.msra.mxu0 %v159_v15 }
  0x52   :  { %339 = vmatpush.msra.mxu0 %v158_v16 }
  0x54   :  { %340 = vmatpush.msra.mxu0 %v157_v17 }
  0x56   :  { %341 = vmatpush.msra.mxu0 %v156_v18 }
  0x58   :  { %342 = vmatpush.msra.mxu0 %v155_v19 }
  0x5a   :  { %343 = vmatpush.msra.mxu0 %v154_v20 }
  0x5c   :  { %344 = vmatpush.msra.mxu0 %v153_v21 }
  0x5e   :  { %345 = vmatpush.msra.mxu0 %v152_v22 }
  0x60   :  { %346 = vmatpush.msra.mxu0 %v151_v23 }
  0x61   :  { %347 = vmatmul.f32.vlgmr.msra.gmra.mxu0 %v22_v24 }
  0xba   :  { %v188_v26 = vpop.f32.mrf.mxu0 }
  0xbb   :  { %v189_v27 = vadd.f32 %v357_v25, %v188_v26 }
  0xbc   :  { %v208_v28 = vpop.f32.mrf.mxu1 }
  0xbd   :  { %v209_v29 = vadd.f32 %v208_v28, %v189_v27  ;;  %v228_v30 = vpop.f32.mrf.mxu2 }
  0xbf   :  { %v229_v31 = vadd.f32 %v228_v30, %v209_v29  ;;  %v248_v32 = vpop.f32.mrf.mxu3 }
  0xc1   :  { %v249_v33 = vadd.f32 %v248_v32, %v229_v31 }
  0xc4   :  { %v268_v34 = vpop.f32.mrf.mxu0 }
  0xc5   :  { %v269_v35 = vadd.f32 %v268_v34, %v249_v33  ;;  %v288_v36 = vpop.f32.mrf.mxu1 }
  0xc7   :  { %v289_v37 = vadd.f32 %v288_v36, %v269_v35  ;;  %v308_v38 = vpop.f32.mrf.mxu2 }
  0xc9   :  { %v309_v39 = vadd.f32 %v308_v38, %v289_v37  ;;  %v328_v40 = vpop.f32.mrf.mxu3 }
  0xcb   :  { %v329_v41 = vadd.f32 %v328_v40, %v309_v39 }
  0xde   :  { %v348_v42 = vpop.f32.mrf.mxu0 }
  0xdf   :  { %v349_v43 = vadd.f32 %v348_v42, %v329_v41 }
  0xe1   :  { %v351_v44 = vmax.f32 %v349_v43, 0.0 }
  0xe3   :  { %352 = vst [vmem:[%s846_s3] sm:$0xff] %v351_v44 }

// kernel: _unetback_features.15
= control target key start
LH: loop header
LB: loop body
LE: loop exit
PB: predicated region body
PF: predicated region fallthrough
CT: control target
= control target key end

     0   :  { %s884_s0 = inlined_call_operand.vmem [shape: f32[8,1152], index: 0, kind: input, shape index: {}]   ;;  %s885_s1 = inlined_call_operand.vmem [shape: f32[1152,128], index: 1, kind: input, shape index: {}]   ;;  %s886_s2 = inlined_call_operand.vmem [shape: f32[1,128], index: 2, kind: input, shape index: {}]   ;;  %s887_s3 = inlined_call_operand.hbm [shape: f32[8,128], index: 3, kind: output, shape index: {}]  }
   0x1   :  { %v39_v0 = vld [vmem:[%s885_s1 + $0x78] sm:$0xff]  ;;  %v38_v1 = vld [vmem:[%s885_s1 + $0x70] sm:$0xff]  ;;  %v37_v3 = vld [vmem:[%s885_s1 + $0x68] sm:$0xff] }
   0x2   :  { %172 = vmatpush.msra.mxu0 %v39_v0  ;;  %v71_v2 = vld [vmem:[%s885_s1 + $0x178] sm:$0xff]  ;;  %v70_v4 = vld [vmem:[%s885_s1 + $0x170] sm:$0xff]  ;;  %v69_v7 = vld [vmem:[%s885_s1 + $0x168] sm:$0xff] }
   0x3   :  { %212 = vmatpush.msra.mxu2 %v71_v2  ;;  %v87_v5 = vld [vmem:[%s885_s1 + $0x1f8] sm:$0xff]  ;;  %v86_v8 = vld [vmem:[%s885_s1 + $0x1f0] sm:$0xff]  ;;  %v36_v9 = vld [vmem:[%s885_s1 + $0x60] sm:$0xff] }
   0x4   :  { %173 = vmatpush.msra.mxu0 %v38_v1  ;;  %232 = vmatpush.msra.mxu3 %v87_v5  ;;  %v55_v6 = vld [vmem:[%s885_s1 + $0xf8] sm:$0xff]  ;;  %v54_v10 = vld [vmem:[%s885_s1 + $0xf0] sm:$0xff]  ;;  %v68_v11 = vld [vmem:[%s885_s1 + $0x160] sm:$0xff] }
   0x5   :  { %213 = vmatpush.msra.mxu2 %v70_v4  ;;  %192 = vmatpush.msra.mxu1 %v55_v6  ;;  %v85_v12 = vld [vmem:[%s885_s1 + $0x1e8] sm:$0xff]  ;;  %v35_v14 = vld [vmem:[%s885_s1 + $0x58] sm:$0xff]  ;;  %v84_v15 = vld [vmem:[%s885_s1 + $0x1e0] sm:$0xff] }
   0x6   :  { %174 = vmatpush.msra.mxu0 %v37_v3  ;;  %233 = vmatpush.msra.mxu3 %v86_v8  ;;  %v53_v13 = vld [vmem:[%s885_s1 + $0xe8] sm:$0xff]  ;;  %v67_v16 = vld [vmem:[%s885_s1 + $0x158] sm:$0xff]  ;;  %v52_v17 = vld [vmem:[%s885_s1 + $0xe0] sm:$0xff] }
   0x7   :  { %214 = vmatpush.msra.mxu2 %v69_v7  ;;  %193 = vmatpush.msra.mxu1 %v54_v10  ;;  %v34_v18 = vld [vmem:[%s885_s1 + $0x50] sm:$0xff]  ;;  %v83_v19 = vld [vmem:[%s885_s1 + $0x1d8] sm:$0xff]  ;;  %v33_v22 = vld [vmem:[%s885_s1 + $0x48] sm:$0xff] }
   0x8   :  { %175 = vmatpush.msra.mxu0 %v36_v9  ;;  %234 = vmatpush.msra.mxu3 %v85_v12  ;;  %v66_v20 = vld [vmem:[%s885_s1 + $0x150] sm:$0xff]  ;;  %v51_v21 = vld [vmem:[%s885_s1 + $0xd8] sm:$0xff]  ;;  %v65_v24 = vld [vmem:[%s885_s1 + $0x148] sm:$0xff] }
   0x9   :  { %215 = vmatpush.msra.mxu2 %v68_v11  ;;  %194 = vmatpush.msra.mxu1 %v53_v13  ;;  %v82_v23 = vld [vmem:[%s885_s1 + $0x1d0] sm:$0xff]  ;;  %v32_v26 = vld [vmem:[%s885_s1 + $0x40] sm:$0xff]  ;;  %v81_v27 = vld [vmem:[%s885_s1 + $0x1c8] sm:$0xff] }
   0xa   :  { %176 = vmatpush.msra.mxu0 %v35_v14  ;;  %235 = vmatpush.msra.mxu3 %v84_v15  ;;  %v50_v25 = vld [vmem:[%s885_s1 + $0xd0] sm:$0xff]  ;;  %v64_v28 = vld [vmem:[%s885_s1 + $0x140] sm:$0xff]  ;;  %v49_v29 = vld [vmem:[%s885_s1 + $0xc8] sm:$0xff] }
   0xb   :  { %216 = vmatpush.msra.mxu2 %v67_v16  ;;  %195 = vmatpush.msra.mxu1 %v52_v17  ;;  %v31_v30 = vld [vmem:[%s885_s1 + $0x38] sm:$0xff]  ;;  %v80_v31 = vld [vmem:[%s885_s1 + $0x1c0] sm:$0xff]  ;;  %v30_v34 = vld [vmem:[%s885_s1 + $0x30] sm:$0xff] }
   0xc   :  { %177 = vmatpush.msra.mxu0 %v34_v18  ;;  %236 = vmatpush.msra.mxu3 %v83_v19  ;;  %v63_v32 = vld [vmem:[%s885_s1 + $0x138] sm:$0xff]  ;;  %v48_v33 = vld [vmem:[%s885_s1 + $0xc0] sm:$0xff]  ;;  %v62_v36 = vld [vmem:[%s885_s1 + $0x130] sm:$0xff] }
   0xd   :  { %217 = vmatpush.msra.mxu2 %v66_v20  ;;  %196 = vmatpush.msra.mxu1 %v51_v21  ;;  %v79_v35 = vld [vmem:[%s885_s1 + $0x1b8] sm:$0xff]  ;;  %v29_v38 = vld [vmem:[%s885_s1 + $0x28] sm:$0xff]  ;;  %v78_v39 = vld [vmem:[%s885_s1 + $0x1b0] sm:$0xff] }
   0xe   :  { %178 = vmatpush.msra.mxu0 %v33_v22  ;;  %237 = vmatpush.msra.mxu3 %v82_v23  ;;  %v47_v37 = vld [vmem:[%s885_s1 + $0xb8] sm:$0xff]  ;;  %v61_v40 = vld [vmem:[%s885_s1 + $0x128] sm:$0xff]  ;;  %v46_v41 = vld [vmem:[%s885_s1 + $0xb0] sm:$0xff] }
   0xf   :  { %218 = vmatpush.msra.mxu2 %v65_v24  ;;  %197 = vmatpush.msra.mxu1 %v50_v25  ;;  %v28_v42 = vld [vmem:[%s885_s1 + $0x20] sm:$0xff]  ;;  %v77_v43 = vld [vmem:[%s885_s1 + $0x1a8] sm:$0xff]  ;;  %v27_v46 = vld [vmem:[%s885_s1 + $0x18] sm:$0xff] }
  0x10   :  { %179 = vmatpush.msra.mxu0 %v32_v26  ;;  %238 = vmatpush.msra.mxu3 %v81_v27  ;;  %v60_v44 = vld [vmem:[%s885_s1 + $0x120] sm:$0xff]  ;;  %v45_v45 = vld [vmem:[%s885_s1 + $0xa8] sm:$0xff]  ;;  %v59_v48 = vld [vmem:[%s885_s1 + $0x118] sm:$0xff] }
  0x11   :  { %219 = vmatpush.msra.mxu2 %v64_v28  ;;  %198 = vmatpush.msra.mxu1 %v49_v29  ;;  %v76_v47 = vld [vmem:[%s885_s1 + $0x1a0] sm:$0xff]  ;;  %v26_v50 = vld [vmem:[%s885_s1 + $0x10] sm:$0xff]  ;;  %v75_v51 = vld [vmem:[%s885_s1 + $0x198] sm:$0xff] }
  0x12   :  { %180 = vmatpush.msra.mxu0 %v31_v30  ;;  %239 = vmatpush.msra.mxu3 %v80_v31  ;;  %v44_v49 = vld [vmem:[%s885_s1 + $0xa0] sm:$0xff]  ;;  %v58_v52 = vld [vmem:[%s885_s1 + $0x110] sm:$0xff]  ;;  %v43_v53 = vld [vmem:[%s885_s1 + $0x98] sm:$0xff] }
  0x13   :  { %220 = vmatpush.msra.mxu2 %v63_v32  ;;  %199 = vmatpush.msra.mxu1 %v48_v33  ;;  %v25_v54 = vld [vmem:[%s885_s1 + $0x8] sm:$0xff]  ;;  %v74_v55 = vld [vmem:[%s885_s1 + $0x190] sm:$0xff]  ;;  %v24_v58 = vld [vmem:[%s885_s1] sm:$0xff] }
  0x14   :  { %181 = vmatpush.msra.mxu0 %v30_v34  ;;  %240 = vmatpush.msra.mxu3 %v79_v35  ;;  %v57_v56 = vld [vmem:[%s885_s1 + $0x108] sm:$0xff]  ;;  %v42_v57 = vld [vmem:[%s885_s1 + $0x90] sm:$0xff]  ;;  %v103_v60 = vld [vmem:[%s885_s1 + $0x278] sm:$0xff] }
  0x15   :  { %221 = vmatpush.msra.mxu2 %v62_v36  ;;  %200 = vmatpush.msra.mxu1 %v47_v37  ;;  %v73_v59 = vld [vmem:[%s885_s1 + $0x188] sm:$0xff]  ;;  %v56_v61 = vld [vmem:[%s885_s1 + $0x100] sm:$0xff]  ;;  %v135_v62 = vld [vmem:[%s885_s1 + $0x378] sm:$0xff] }
  0x16   :  { %182 = vmatpush.msra.mxu0 %v29_v38  ;;  %241 = vmatpush.msra.mxu3 %v78_v39  ;;  %v41_v63 = vld [vmem:[%s885_s1 + $0x88] sm:$0xff]  ;;  %v102_v0 = vld [vmem:[%s885_s1 + $0x270] sm:$0xff]  ;;  %v72_v1 = vld [vmem:[%s885_s1 + $0x180] sm:$0xff] }
  0x17   :  { %222 = vmatpush.msra.mxu2 %v61_v40  ;;  %201 = vmatpush.msra.mxu1 %v46_v41  ;;  %v134_v2 = vld [vmem:[%s885_s1 + $0x370] sm:$0xff]  ;;  %v151_v3 = vld [vmem:[%s885_s1 + $0x3f8] sm:$0xff]  ;;  %v101_v4 = vld [vmem:[%s885_s1 + $0x268] sm:$0xff] }
  0x18   :  { %183 = vmatpush.msra.mxu0 %v28_v42  ;;  %242 = vmatpush.msra.mxu3 %v77_v43  ;;  %v40_v5 = vld [vmem:[%s885_s1 + $0x80] sm:$0xff]  ;;  %v119_v6 = vld [vmem:[%s885_s1 + $0x2f8] sm:$0xff]  ;;  %v133_v7 = vld [vmem:[%s885_s1 + $0x368] sm:$0xff] }
  0x19   :  { %223 = vmatpush.msra.mxu2 %v60_v44  ;;  %202 = vmatpush.msra.mxu1 %v45_v45  ;;  %v100_v8 = vld [vmem:[%s885_s1 + $0x260] sm:$0xff]  ;;  %v150_v9 = vld [vmem:[%s885_s1 + $0x3f0] sm:$0xff]  ;;  %v99_v12 = vld [vmem:[%s885_s1 + $0x258] sm:$0xff] }
  0x1a   :  { %184 = vmatpush.msra.mxu0 %v27_v46  ;;  %243 = vmatpush.msra.mxu3 %v76_v47  ;;  %v118_v10 = vld [vmem:[%s885_s1 + $0x2f0] sm:$0xff]  ;;  %v132_v11 = vld [vmem:[%s885_s1 + $0x360] sm:$0xff]  ;;  %v149_v13 = vld [vmem:[%s885_s1 + $0x3e8] sm:$0xff] }
  0x1b   :  { %224 = vmatpush.msra.mxu2 %v59_v48  ;;  %203 = vmatpush.msra.mxu1 %v44_v49  ;;  %v117_v14 = vld [vmem:[%s885_s1 + $0x2e8] sm:$0xff]  ;;  %v131_v15 = vld [vmem:[%s885_s1 + $0x358] sm:$0xff]  ;;  %v98_v16 = vld [vmem:[%s885_s1 + $0x250] sm:$0xff] }
  0x1c   :  { %185 = vmatpush.msra.mxu0 %v26_v50  ;;  %244 = vmatpush.msra.mxu3 %v75_v51  ;;  %v148_v17 = vld [vmem:[%s885_s1 + $0x3e0] sm:$0xff]  ;;  %v130_v19 = vld [vmem:[%s885_s1 + $0x350] sm:$0xff]  ;;  %v97_v20 = vld [vmem:[%s885_s1 + $0x248] sm:$0xff] }
  0x1d   :  { %225 = vmatpush.msra.mxu2 %v58_v52  ;;  %204 = vmatpush.msra.mxu1 %v43_v53  ;;  %v116_v18 = vld [vmem:[%s885_s1 + $0x2e0] sm:$0xff]  ;;  %v147_v21 = vld [vmem:[%s885_s1 + $0x3d8] sm:$0xff]  ;;  %v129_v23 = vld [vmem:[%s885_s1 + $0x348] sm:$0xff] }
  0x1e   :  { %186 = vmatpush.msra.mxu0 %v25_v54  ;;  %245 = vmatpush.msra.mxu3 %v74_v55  ;;  %v115_v22 = vld [vmem:[%s885_s1 + $0x2d8] sm:$0xff]  ;;  %v96_v24 = vld [vmem:[%s885_s1 + $0x240] sm:$0xff]  ;;  %v146_v25 = vld [vmem:[%s885_s1 + $0x3d0] sm:$0xff] }
  0x1f   :  { %226 = vmatpush.msra.mxu2 %v57_v56  ;;  %205 = vmatpush.msra.mxu1 %v42_v57  ;;  %v114_v26 = vld [vmem:[%s885_s1 + $0x2d0] sm:$0xff]  ;;  %v128_v27 = vld [vmem:[%s885_s1 + $0x340] sm:$0xff]  ;;  %v95_v28 = vld [vmem:[%s885_s1 + $0x238] sm:$0xff] }
  0x20   :  { %187 = vmatpush.msra.mxu0 %v24_v58  ;;  %246 = vmatpush.msra.mxu3 %v73_v59  ;;  %v145_v29 = vld [vmem:[%s885_s1 + $0x3c8] sm:$0xff]  ;;  %v127_v31 = vld [vmem:[%s885_s1 + $0x338] sm:$0xff]  ;;  %v94_v32 = vld [vmem:[%s885_s1 + $0x230] sm:$0xff] }
  0x21   :  { %227 = vmatpush.msra.mxu2 %v56_v61  ;;  %206 = vmatpush.msra.mxu1 %v41_v63  ;;  %v113_v30 = vld [vmem:[%s885_s1 + $0x2c8] sm:$0xff]  ;;  %v144_v33 = vld [vmem:[%s885_s1 + $0x3c0] sm:$0xff]  ;;  %v126_v35 = vld [vmem:[%s885_s1 + $0x330] sm:$0xff] }
  0x22   :  { %252 = vmatpush.msrb.mxu0 %v103_v60  ;;  %247 = vmatpush.msra.mxu3 %v72_v1  ;;  %v112_v34 = vld [vmem:[%s885_s1 + $0x2c0] sm:$0xff]  ;;  %v93_v36 = vld [vmem:[%s885_s1 + $0x228] sm:$0xff]  ;;  %v143_v37 = vld [vmem:[%s885_s1 + $0x3b8] sm:$0xff] }
  0x23   :  { %292 = vmatpush.msrb.mxu2 %v135_v62  ;;  %207 = vmatpush.msra.mxu1 %v40_v5 }
  0x24   :  { %253 = vmatpush.msrb.mxu0 %v102_v0  ;;  %312 = vmatpush.msrb.mxu3 %v151_v3 }
  0x25   :  { %293 = vmatpush.msrb.mxu2 %v134_v2  ;;  %272 = vmatpush.msrb.mxu1 %v119_v6 }
  0x26   :  { %254 = vmatpush.msrb.mxu0 %v101_v4  ;;  %313 = vmatpush.msrb.mxu3 %v150_v9 }
  0x27   :  { %294 = vmatpush.msrb.mxu2 %v133_v7  ;;  %273 = vmatpush.msrb.mxu1 %v118_v10 }
  0x28   :  { %255 = vmatpush.msrb.mxu0 %v100_v8  ;;  %314 = vmatpush.msrb.mxu3 %v149_v13 }
  0x29   :  { %295 = vmatpush.msrb.mxu2 %v132_v11  ;;  %274 = vmatpush.msrb.mxu1 %v117_v14 }
  0x2a   :  { %256 = vmatpush.msrb.mxu0 %v99_v12  ;;  %315 = vmatpush.msrb.mxu3 %v148_v17 }
  0x2b   :  { %296 = vmatpush.msrb.mxu2 %v131_v15  ;;  %275 = vmatpush.msrb.mxu1 %v116_v18 }
  0x2c   :  { %257 = vmatpush.msrb.mxu0 %v98_v16  ;;  %316 = vmatpush.msrb.mxu3 %v147_v21 }
  0x2d   :  { %297 = vmatpush.msrb.mxu2 %v130_v19  ;;  %276 = vmatpush.msrb.mxu1 %v115_v22 }
  0x2e   :  { %258 = vmatpush.msrb.mxu0 %v97_v20  ;;  %317 = vmatpush.msrb.mxu3 %v146_v25 }
  0x2f   :  { %298 = vmatpush.msrb.mxu2 %v129_v23  ;;  %277 = vmatpush.msrb.mxu1 %v114_v26 }
  0x30   :  { %259 = vmatpush.msrb.mxu0 %v96_v24  ;;  %318 = vmatpush.msrb.mxu3 %v145_v29 }
  0x31   :  { %299 = vmatpush.msrb.mxu2 %v128_v27  ;;  %278 = vmatpush.msrb.mxu1 %v113_v30 }
  0x32   :  { %260 = vmatpush.msrb.mxu0 %v95_v28 }
  0x33   :  { %300 = vmatpush.msrb.mxu2 %v127_v31 }
  0x34   :  { %8 = vsyncpa [#allocation3], 0  ;;  %261 = vmatpush.msrb.mxu0 %v94_v32  ;;  %319 = vmatpush.msrb.mxu3 %v144_v33  ;;  %v111_v38 = vld [vmem:[%s885_s1 + $0x2b8] sm:$0xff]  ;;  %v125_v39 = vld [vmem:[%s885_s1 + $0x328] sm:$0xff]  ;;  %s361_s24 = sshll.u32 %s887_s3, 4  ;;  %s362_s24 = int_to_ptr.hbm [resolvable:$true] %s361_s24 }
  0x35   :  { %v92_v40 = vld [vmem:[%s885_s1 + $0x220] sm:$0xff]  ;;  %279 = vmatpush.msrb.mxu1 %v112_v34  ;;  %301 = vmatpush.msrb.mxu2 %v126_v35  ;;  %v142_v41 = vld [vmem:[%s885_s1 + $0x3b0] sm:$0xff]  ;;  %v91_v44 = vld [vmem:[%s885_s1 + $0x218] sm:$0xff] }
  0x36   :  { %262 = vmatpush.msrb.mxu0 %v93_v36  ;;  %320 = vmatpush.msrb.mxu3 %v143_v37  ;;  %v110_v42 = vld [vmem:[%s885_s1 + $0x2b0] sm:$0xff]  ;;  %v124_v43 = vld [vmem:[%s885_s1 + $0x320] sm:$0xff]  ;;  %v141_v45 = vld [vmem:[%s885_s1 + $0x3a8] sm:$0xff] }
  0x37   :  { %280 = vmatpush.msrb.mxu1 %v111_v38  ;;  %302 = vmatpush.msrb.mxu2 %v125_v39  ;;  %v17_v46 = vld [vmem:[%s884_s0 + $0x10] sm:$0xff]  ;;  %v109_v47 = vld [vmem:[%s885_s1 + $0x2a8] sm:$0xff]  ;;  %v123_v49 = vld [vmem:[%s885_s1 + $0x318] sm:$0xff] }
  0x38   :  { %263 = vmatpush.msrb.mxu0 %v92_v40  ;;  %321 = vmatpush.msrb.mxu3 %v142_v41  ;;  %v90_v48 = vld [vmem:[%s885_s1 + $0x210] sm:$0xff]  ;;  %v140_v50 = vld [vmem:[%s885_s1 + $0x3a0] sm:$0xff]  ;;  %v89_v52 = vld [vmem:[%s885_s1 + $0x208] sm:$0xff] }
  0x39   :  { %281 = vmatpush.msrb.mxu1 %v110_v42  ;;  %303 = vmatpush.msrb.mxu2 %v124_v43  ;;  %v15_v51 = vld [vmem:[%s884_s0] sm:$0xff]  ;;  %v18_v53 = vld [vmem:[%s884_s0 + $0x18] sm:$0xff]  ;;  %v122_v55 = vld [vmem:[%s885_s1 + $0x310] sm:$0xff] }
  0x3a   :  { %264 = vmatpush.msrb.mxu0 %v91_v44  ;;  %322 = vmatpush.msrb.mxu3 %v141_v45  ;;  %v108_v54 = vld [vmem:[%s885_s1 + $0x2a0] sm:$0xff]  ;;  %v139_v57 = vld [vmem:[%s885_s1 + $0x398] sm:$0xff]  ;;  %v16_v59 = vld [vmem:[%s884_s0 + $0x8] sm:$0xff] }
  0x3b   :  { %228 = vmatmul.f32.vlgmr.msra.gmra.mxu2 %v17_v46  ;;  %282 = vmatpush.msrb.mxu1 %v109_v47  ;;  %v88_v56 = vld [vmem:[%s885_s1 + $0x200] sm:$0xff]  ;;  %v167_v58 = vld [vmem:[%s885_s1 + $0x478] sm:$0xff]  ;;  %v121_v61 = vld [vmem:[%s885_s1 + $0x308] sm:$0xff] }
  0x3c   :  { %265 = vmatpush.msrb.mxu0 %v90_v48  ;;  %304 = vmatpush.msrb.mxu2 %v123_v49  ;;  %v107_v60 = vld [vmem:[%s885_s1 + $0x298] sm:$0xff]  ;;  %v166_v62 = vld [vmem:[%s885_s1 + $0x470] sm:$0xff]  ;;  %v120_v1 = vld [vmem:[%s885_s1 + $0x300] sm:$0xff] }
  0x3d   :  { %323 = vmatpush.msrb.mxu3 %v140_v50  ;;  %188 = vmatmul.f32.vlgmr.msra.gmra.mxu0 %v15_v51  ;;  %v138_v63 = vld [vmem:[%s885_s1 + $0x390] sm:$0xff]  ;;  %v165_v2 = vld [vmem:[%s885_s1 + $0x468] sm:$0xff]  ;;  %v164_v6 = vld [vmem:[%s885_s1 + $0x460] sm:$0xff] }
  0x3e   :  { %266 = vmatpush.msrb.mxu0 %v89_v52  ;;  %248 = vmatmul.f32.vlgmr.msra.gmra.mxu3 %v18_v53  ;;  %v106_v0 = vld [vmem:[%s885_s1 + $0x290] sm:$0xff]  ;;  %v137_v3 = vld [vmem:[%s885_s1 + $0x388] sm:$0xff]  ;;  %v136_v7 = vld [vmem:[%s885_s1 + $0x380] sm:$0xff] }
  0x3f   :  { %283 = vmatpush.msrb.mxu1 %v108_v54  ;;  %305 = vmatpush.msrb.mxu2 %v122_v55  ;;  %v21_v4 = vld [vmem:[%s884_s0 + $0x30] sm:$0xff]  ;;  %v105_v5 = vld [vmem:[%s885_s1 + $0x288] sm:$0xff]  ;;  %v19_v8 = vld [vmem:[%s884_s0 + $0x20] sm:$0xff] }
  0x40   :  { %267 = vmatpush.msrb.mxu0 %v88_v56  ;;  %324 = vmatpush.msrb.mxu3 %v139_v57  ;;  %v22_v9 = vld [vmem:[%s884_s0 + $0x38] sm:$0xff]  ;;  %v104_v11 = vld [vmem:[%s885_s1 + $0x280] sm:$0xff]  ;;  %v20_v12 = vld [vmem:[%s884_s0 + $0x28] sm:$0xff] }
  0x41   :  { %208 = vmatmul.f32.vlgmr.msra.gmra.mxu1 %v16_v59  ;;  %306 = vmatpush.msrb.mxu2 %v121_v61  ;;  %v163_v10 = vld [vmem:[%s885_s1 + $0x458] sm:$0xff]  ;;  %v162_v13 = vld [vmem:[%s885_s1 + $0x450] sm:$0xff]  ;;  %v161_v14 = vld [vmem:[%s885_s1 + $0x448] sm:$0xff] }
  0x42   :  { %332 = vmatpush.msra.mxu0 %v167_v58  ;;  %284 = vmatpush.msrb.mxu1 %v107_v60  ;;  %v160_v15 = vld [vmem:[%s885_s1 + $0x440] sm:$0xff]  ;;  %v159_v16 = vld [vmem:[%s885_s1 + $0x438] sm:$0xff]  ;;  %v158_v17 = vld [vmem:[%s885_s1 + $0x430] sm:$0xff] }
  0x43   :  { %325 = vmatpush.msrb.mxu3 %v138_v63  ;;  %307 = vmatpush.msrb.mxu2 %v120_v1  ;;  %v157_v18 = vld [vmem:[%s885_s1 + $0x428] sm:$0xff]  ;;  %v156_v19 = vld [vmem:[%s885_s1 + $0x420] sm:$0xff]  ;;  %v155_v20 = vld [vmem:[%s885_s1 + $0x418] sm:$0xff] }
  0x44   :  { %333 = vmatpush.msra.mxu0 %v166_v62  ;;  %285 = vmatpush.msrb.mxu1 %v106_v0  ;;  %v154_v21 = vld [vmem:[%s885_s1 + $0x410] sm:$0xff]  ;;  %v153_v22 = vld [vmem:[%s885_s1 + $0x408] sm:$0xff]  ;;  %v152_v23 = vld [vmem:[%s885_s1 + $0x400] sm:$0xff] }
  0x45   :  { %326 = vmatpush.msrb.mxu3 %v137_v3  ;;  %308 = vmatmul.f32.vlgmr.msrb.gmra.mxu2 %v21_v4  ;;  %v23_v24 = vld [vmem:[%s884_s0 + $0x40] sm:$0xff]  ;;  %s398_s0 = smov [#allocation2]  }
  0x46   :  { %334 = vmatpush.msra.mxu0 %v165_v2  ;;  %286 = vmatpush.msrb.mxu1 %v105_v5  ;;  %v371_v25 = vld [vmem:[%s886_s2] ss:$0 sm:$0xff]  ;;  %s359_s1 = sshll.u32 %s398_s0, 4  ;;  %s360_s1 = int_to_ptr.vmem [resolvable:$true] %s359_s1 }
  0x47   :  { %327 = vmatpush.msrb.mxu3 %v136_v7  ;;  %268 = vmatmul.f32.vlgmr.msrb.gmra.mxu0 %v19_v8 }
  0x48   :  { %335 = vmatpush.msra.mxu0 %v164_v6  ;;  %328 = vmatmul.f32.vlgmr.msrb.gmra.mxu3 %v22_v9 }
  0x49   :  { %287 = vmatpush.msrb.mxu1 %v104_v11 }
  0x4a   :  { %336 = vmatpush.msra.mxu0 %v163_v10  ;;  %288 = vmatmul.f32.vlgmr.msrb.gmra.mxu1 %v20_v12 }
  0x4c   :  { %337 = vmatpush.msra.mxu0 %v162_v13 }
  0x4e   :  { %338 = vmatpush.msra.mxu0 %v161_v14 }
  0x50   :  { %339 = vmatpush.msra.mxu0 %v160_v15 }
  0x52   :  { %340 = vmatpush.msra.mxu0 %v159_v16 }
  0x54   :  { %341 = vmatpush.msra.mxu0 %v158_v17 }
  0x56   :  { %342 = vmatpush.msra.mxu0 %v157_v18 }
  0x58   :  { %343 = vmatpush.msra.mxu0 %v156_v19 }
  0x5a   :  { %344 = vmatpush.msra.mxu0 %v155_v20 }
  0x5c   :  { %345 = vmatpush.msra.mxu0 %v154_v21 }
  0x5e   :  { %346 = vmatpush.msra.mxu0 %v153_v22 }
  0x60   :  { %347 = vmatpush.msra.mxu0 %v152_v23 }
  0x61   :  { %348 = vmatmul.f32.vlgmr.msra.gmra.mxu0 %v23_v24 }
  0xba   :  { %v189_v26 = vpop.f32.mrf.mxu0 }
  0xbb   :  { %v190_v27 = vadd.f32 %v371_v25, %v189_v26 }
  0xbe   :  { %v209_v28 = vpop.f32.mrf.mxu1  ;;  %v229_v30 = vpop.f32.mrf.mxu2 }
  0xbf   :  { %v210_v29 = vadd.f32 %v209_v28, %v190_v27 }
  0xc1   :  { %v230_v31 = vadd.f32 %v229_v30, %v210_v29  ;;  %v249_v32 = vpop.f32.mrf.mxu3 }
  0xc3   :  { %v250_v33 = vadd.f32 %v249_v32, %v230_v31 }
  0xc4   :  { %v269_v34 = vpop.f32.mrf.mxu0 }
  0xc5   :  { %v270_v35 = vadd.f32 %v269_v34, %v250_v33 }
  0xc7   :  { %v289_v36 = vpop.f32.mrf.mxu1 }
  0xc8   :  { %v290_v37 = vadd.f32 %v289_v36, %v270_v35  ;;  %v309_v38 = vpop.f32.mrf.mxu2 }
  0xca   :  { %v310_v39 = vadd.f32 %v309_v38, %v290_v37 }
  0xcb   :  { %v329_v40 = vpop.f32.mrf.mxu3 }
  0xcc   :  { %v330_v41 = vadd.f32 %v329_v40, %v310_v39 }
  0xde   :  { %v349_v42 = vpop.f32.mrf.mxu0 }
  0xdf   :  { %v350_v43 = vadd.f32 %v349_v42, %v330_v41 }
  0xe1   :  { %v352_v44 = vmax.f32 %v350_v43, 0.0 }
  0xe3   :  { %353 = vst [vmem:[#allocation2] sm:$0xff] %v352_v44 }
  0xe4   :  { %364 = dma.vmem_to_hbm [thread:$0]  %s360_s1, 128, %s362_s24, [#allocation3]  }
  0xe5   :  { %396 = dma.done.wait [#allocation3], 128  }
  0xe6   :  { %397 = vsyncadd [#allocation3], 4294967168 }
  0xe7   :  { %369 = vsyncpa [#allocation3], 1 }

</bundles_post_ra>
